<compile_context>
chip_gen: v5e
topology: v5e:2x2
jax: 0.10.0
libtpu: 0.0.40
codegen_flags: <defaults>
</compile_context>

<pallas_src>
import functools

import jax
import jax.numpy as jnp
from jax.experimental import pallas as pl
from jax.experimental.pallas import tpu as pltpu


def _round_up(n, m):
    return ((n + m - 1) // m) * m


def _chip_defaults():
    """Generation-aware (default_batch_tile, vmem_limit_bytes, min_grid_tiles)."""
    MiB = 1 << 20
    kind = ""
    vmem_cap = None
    try:
        kind = jax.devices()[0].device_kind.lower()
    except Exception:
        pass
    try:
        vmem_cap = int(pltpu.get_tpu_info().vmem_capacity_bytes)
    except Exception:
        pass

    if not kind and vmem_cap is None:
        # Unknown hardware: conservative settings that lower everywhere.
        return 256, 48 * MiB, 1

    is_v5 = "v5" in kind
    is_v7 = ("v7" in kind) or ("7x" in kind) or (
        vmem_cap is not None and vmem_cap <= 64 * MiB)
    if vmem_cap is None:
        vmem_cap = 64 * MiB if is_v7 else 128 * MiB

    # Leave headroom for compiler-internal scratch.
    vmem_limit = min(100 * MiB, int(vmem_cap * 0.85))

    if is_v5:
        tb = 128          # 128x128 MXU: TB=128 already fills the M dimension.
    else:
        tb = 256          # v6e / v7x: 256-wide MXU.
    min_tiles = 2 if is_v7 else 1   # keep both v7x TensorCores busy (megacore).
    return tb, vmem_limit, min_tiles


def _ntm_kernel(x_ref, noise_ref, wh_ref, whd_ref, bhd_ref, tn_ref, out_ref, *,
                topic_size):
    T = topic_size
    T_pad = noise_ref.shape[-1]

    # hidden = LeakyReLU(x @ W_hid)   (bias=False, slope 0.01)
    # x and W_hid are bf16, f32 MXU accumulation.
    h1 = jnp.dot(x_ref[...], wh_ref[...], preferred_element_type=jnp.float32)
    h1 = jnp.where(h1 > 0, h1, 0.01 * h1)                       # (TB, H) f32

    # Fused, lane-padded mu|log_sigma heads: one bf16 (H, 2*T_pad) matmul with
    # f32 accumulation + f32 bias.  Padded head lanes carry exact zeros.
    heads = jnp.dot(h1.astype(jnp.bfloat16), whd_ref[...],
                    preferred_element_type=jnp.float32) + bhd_ref[...]
    mu = heads[:, :T_pad]            # lane-128 aligned slices -> no relayout
    log_sigma = heads[:, T_pad:]

    # KL divergence to standard normal; padded lanes contribute exactly 0
    # because mu=log_sigma=0 there (1 - 0 + 0 - exp(0) = 0).
    s = jnp.exp(log_sigma)                                       # (TB, T_pad)
    kld = -0.5 * jnp.sum(1.0 - mu * mu + 2.0 * log_sigma - s * s,
                         axis=-1, keepdims=True)                 # (TB, 1)

    # Reparameterized sample (noise is zero in padded lanes -> h2 there is 0).
    h2 = noise_ref[...] * s + mu                                 # (TB, T_pad)

    # z = softmax(h2) over the real T topics only (mask padded lanes).
    if T < T_pad:
        lane_t = jax.lax.broadcasted_iota(jnp.int32, h2.shape, 1)
        logits = jnp.where(lane_t < T, h2, -1e30)
    else:
        logits = h2
    zmax = jnp.max(logits, axis=-1, keepdims=True)
    ez = jnp.exp(logits - zmax)
    z = ez * pl.reciprocal(jnp.sum(ez, axis=-1, keepdims=True), approx=True)

    # mixture = z @ softmax(W_topic); topic softmax precomputed in the wrapper,
    # padded topic rows are zero so padded z lanes cannot leak in.
    mixture = jnp.dot(z.astype(jnp.bfloat16), tn_ref[...],
                      preferred_element_type=jnp.float32)        # (TB, V)
    # TODO(synk): at small H+T this (TB, V) log saturates the EUP; compute it in
    # bf16 on v6e/v7x (bf16 EUP path) or exploit x-sparsity if the format allows.
    log_prob = jnp.log(mixture + 1e-30)   # eps guards log(0) -> 0*(-inf)=NaN when x==0
    # Re-read x (bf16) here instead of keeping a (TB, V) value live across both
    # big matmuls -> shorter live ranges, less VMEM ld/st slot pressure.
    rec = -jnp.sum(log_prob * x_ref[...].astype(jnp.float32),
                   axis=-1, keepdims=True)                       # (TB, 1)

    # Single lane-dense output slab:
    #   lanes [0, T) = h2, lane T = rec, lane T+1 = kld, lanes >= T+2 = minus_elbo.
    out_w = out_ref.shape[-1]
    if out_w > T_pad:
        h_full = jnp.concatenate(
            [h2, jnp.zeros((h2.shape[0], out_w - T_pad), h2.dtype)], axis=-1)
    else:
        h_full = h2
    lanes = jax.lax.broadcasted_iota(jnp.int32, out_ref.shape, 1)
    out_ref[...] = jnp.where(lanes < T, h_full,
                             jnp.where(lanes == T, rec,
                                       jnp.where(lanes == T + 1, kld, rec + kld)))


def revised_ntm_forward(x, params, noise, *, batch_tile=None):
    """RevisedNTM forward. Returns a dict like the PyTorch module."""
    B, V = x.shape
    H = params["W_hid"].shape[1]
    T = params["W_mu"].shape[1]
    T_pad = _round_up(T, 128)
    # rec/kld/minus_elbo live in the h slab's padding lanes (T, T+1, T+2);
    # only widen by 128 lanes if T is flush with the lane boundary.
    OUT_W = T_pad if T_pad >= T + 3 else T_pad + 128

    # ---- weight-only prep, hoisted out of the per-tile kernel path ----
    x_bf16 = x.astype(jnp.bfloat16)            # x is the dominant HBM stream
    noise_f32 = noise.astype(jnp.float32)
    topic_norm = jax.nn.softmax(params["W_topic"].astype(jnp.float32), axis=-1)
    topic_norm_bf16 = jnp.pad(
        topic_norm, ((0, T_pad - T), (0, 0))).astype(jnp.bfloat16)         # (T_pad, V)
    w_hid_bf16 = params["W_hid"].astype(jnp.bfloat16)                      # (V, H)
    w_mu_p = jnp.pad(params["W_mu"].astype(jnp.float32), ((0, 0), (0, T_pad - T)))
    w_ls_p = jnp.pad(params["W_ls"].astype(jnp.float32), ((0, 0), (0, T_pad - T)))
    w_heads_bf16 = jnp.concatenate([w_mu_p, w_ls_p], axis=1).astype(jnp.bfloat16)  # (H, 2*T_pad)
    b_mu_p = jnp.pad(params["b_mu"].astype(jnp.float32), ((0, 0), (0, T_pad - T)))
    b_ls_p = jnp.pad(params["b_ls"].astype(jnp.float32), ((0, 0), (0, T_pad - T)))
    b_heads = jnp.concatenate([b_mu_p, b_ls_p], axis=1)                    # (1, 2*T_pad) f32

    # ---- generation-aware batch tiling & VMEM limit ----
    default_tb, vmem_limit, min_tiles = _chip_defaults()
    TB = batch_tile if batch_tile is not None else default_tb
    TB = min(TB, _round_up(B, 8))
    if min_tiles > 1:
        # v7x megacore: keep >= 2 grid tiles (one per TensorCore) when B allows.
        TB = min(TB, max(8, _round_up(pl.cdiv(B, min_tiles), 8)))
    TB = max(8, _round_up(TB, 8))
    B_pad = _round_up(B, TB)
    x_bf16 = jnp.pad(x_bf16, ((0, B_pad - B), (0, 0)))
    noise_f32 = jnp.pad(noise_f32, ((0, B_pad - B), (0, T_pad - T)))
    grid = (B_pad // TB,)

    def _in_specs(single_buffer):
        def w_spec(shape):
            if single_buffer:
                # Resident weights: block index never changes -> single buffer
                # halves their VMEM footprint.
                return pl.BlockSpec(shape, lambda i: (0, 0),
                                    pipeline_mode=pl.Buffered(1))
            return pl.BlockSpec(shape, lambda i: (0, 0))
        return [
            pl.BlockSpec((TB, V), lambda i: (i, 0)),        # x          (bf16, batch-tiled)
            pl.BlockSpec((TB, T_pad), lambda i: (i, 0)),    # noise      (f32, batch-tiled)
            w_spec((V, H)),                                 # W_hid      (bf16, resident)
            w_spec((H, 2 * T_pad)),                         # W_heads    (bf16, resident)
            w_spec((1, 2 * T_pad)),                         # b_heads    (f32, resident)
            w_spec((T_pad, V)),                             # topic_norm (bf16, resident)
        ]

    cost = pl.CostEstimate(
        flops=2 * B_pad * (V * H + H * 2 * T_pad + T_pad * V),
        transcendentals=B_pad * (2 * T_pad + V),
        bytes_accessed=(B_pad * V * 2 + B_pad * T_pad * 4
                        + V * H * 2 + H * 2 * T_pad * 2 + 2 * T_pad * 4
                        + T_pad * V * 2 + B_pad * OUT_W * 4),
    )

    kernel = functools.partial(_ntm_kernel, topic_size=T)
    cp = pltpu.CompilerParams(
        dimension_semantics=("parallel",),      # megacore sharding on v7x
        vmem_limit_bytes=int(vmem_limit),
    )

    def _run(single_buffer):
        return pl.pallas_call(
            kernel,
            out_shape=jax.ShapeDtypeStruct((B_pad, OUT_W), jnp.float32),
            grid=grid,
            in_specs=_in_specs(single_buffer),
            out_specs=pl.BlockSpec((TB, OUT_W), lambda i: (i, 0)),
            compiler_params=cp,
            cost_estimate=cost,
        )(x_bf16, noise_f32, w_hid_bf16, w_heads_bf16, b_heads, topic_norm_bf16)

    try:
        out = _run(True)
    except Exception:
        # pl.Buffered(1) single-buffering not supported by this jax/libtpu:
        # fall back to default double-buffered resident weights (same semantics).
        out = _run(False)

    h = out[:B, :T]
    rec_loss = out[:B, T]
    kld = out[:B, T + 1]
    minus_elbo = out[:B, T + 2]
    return {
        "ntm_loss": minus_elbo,
        "minus_elbo": minus_elbo,
        "rec_loss": rec_loss,
        "kld": kld,
        "h": h,
    }


# ---------------------------------------------------------------------------
# Parameter init mirroring the PyTorch module (xavier_normal weights,
# standard-normal biases).  Weights stored (in, out) for the kernel.
# ---------------------------------------------------------------------------
def _xavier_normal(key, fan_in, fan_out, shape):
    std = jnp.sqrt(2.0 / (fan_in + fan_out))
    return std * jax.random.normal(key, shape, dtype=jnp.float32)


def init_params(key, hidden_size, topic_size, vocab_size):
    k = jax.random.split(key, 6)
    W_hid = _xavier_normal(k[0], vocab_size, hidden_size, (vocab_size, hidden_size))
    W_mu = _xavier_normal(k[1], hidden_size, topic_size, (hidden_size, topic_size))
    W_ls = _xavier_normal(k[2], hidden_size, topic_size, (hidden_size, topic_size))
    b_mu = jax.random.normal(k[3], (1, topic_size), dtype=jnp.float32)
    b_ls = jax.random.normal(k[4], (1, topic_size), dtype=jnp.float32)
    W_topic = _xavier_normal(k[5], vocab_size, topic_size, (topic_size, vocab_size))
    return {"W_hid": W_hid, "W_mu": W_mu, "b_mu": b_mu,
            "W_ls": W_ls, "b_ls": b_ls, "W_topic": W_topic}


# Pure-JAX reference with the same numerics choices (bf16 operands on all three
# matmuls, f32 accumulation, log eps) for a tolerance check.
def _reference_forward(x, params, noise):
    xf = x.astype(jnp.float32)
    h1 = jnp.dot(xf.astype(jnp.bfloat16), params["W_hid"].astype(jnp.bfloat16),
                 preferred_element_type=jnp.float32)
    h1 = jnp.where(h1 > 0, h1, 0.01 * h1)
    h1b = h1.astype(jnp.bfloat16)
    mu = jnp.dot(h1b, params["W_mu"].astype(jnp.bfloat16),
                 preferred_element_type=jnp.float32) + params["b_mu"]
    log_sigma = jnp.dot(h1b, params["W_ls"].astype(jnp.bfloat16),
                        preferred_element_type=jnp.float32) + params["b_ls"]
    kld = -0.5 * jnp.sum(1.0 - mu ** 2 + 2.0 * log_sigma - jnp.exp(2.0 * log_sigma),
                         axis=-1)
    h2 = noise * jnp.exp(log_sigma) + mu
    z = jax.nn.softmax(h2, axis=-1)
    topic_norm = jax.nn.softmax(params["W_topic"].astype(jnp.float32), axis=-1)
    mixture = jnp.dot(z.astype(jnp.bfloat16), topic_norm.astype(jnp.bfloat16),
                      preferred_element_type=jnp.float32)
    rec = -jnp.sum(jnp.log(mixture + 1e-30) * xf, axis=-1)
    minus_elbo = rec + kld
    return {"ntm_loss": minus_elbo, "minus_elbo": minus_elbo,
            "rec_loss": rec, "kld": kld, "h": h2}


def _max_rel_err(a, b):
    denom = jnp.maximum(jnp.max(jnp.abs(b)), 1e-6)
    return float(jnp.max(jnp.abs(a - b)) / denom)


if __name__ == "__main__":
    # Small but pipeline-exercising shapes: batch padding + >=2 tiles on most chips.
    B, V, H, T = 384, 512, 128, 64

    key = jax.random.PRNGKey(0)
    k_param, k_x, k_noise = jax.random.split(key, 3)

    params = init_params(k_param, hidden_size=H, topic_size=T, vocab_size=V)

    # Bag-of-words style non-negative input.
    x = jax.random.uniform(k_x, (B, V), dtype=jnp.float32, minval=0.0, maxval=3.0)
    # Reparameterization noise (PyTorch torch.zeros_like(mu).normal_()), sampled
    # deterministically outside the kernel and passed in.
    noise = jax.random.normal(k_noise, (B, T), dtype=jnp.float32)

    out = revised_ntm_forward(x, params, noise)
    out = jax.block_until_ready(out)

    assert out["minus_elbo"].shape == (B,)
    assert out["rec_loss"].shape == (B,)
    assert out["kld"].shape == (B,)
    assert out["h"].shape == (B, T)
    assert bool(jnp.all(jnp.isfinite(out["minus_elbo"])))
    assert bool(jnp.all(jnp.isfinite(out["h"])))

    ref = _reference_forward(x, params, noise)
    for name in ("minus_elbo", "rec_loss", "kld", "h"):
        err = _max_rel_err(out[name], ref[name])
        assert err < 5e-2, f"{name} mismatch vs reference: max rel err {err}"

    print("KERNEL_OK")
</pallas_src>

<mosaic_0001>
module attributes {stable_mosaic.version = 11 : i64} {
  func.func @_ntm_kernel(%arg0: i32, %arg1: memref<256x512xbf16, #tpu.memory_space<vmem>>, %arg2: memref<256x128xf32, #tpu.memory_space<vmem>>, %arg3: memref<512x128xbf16, #tpu.memory_space<vmem>>, %arg4: memref<128x256xbf16, #tpu.memory_space<vmem>>, %arg5: memref<1x256xf32, #tpu.memory_space<vmem>>, %arg6: memref<128x512xbf16, #tpu.memory_space<vmem>>, %arg7: memref<256x128xf32, #tpu.memory_space<vmem>>) attributes {dimension_semantics = [#tpu.dimension_semantics<parallel>], iteration_bounds = array<i64: 2>, scalar_prefetch = 0 : i64, scratch_operands = 0 : i64, tpu.core_type = #tpu.core_type<tc>, window_params = [{transform_indices = @transform_0, window_bounds = array<i64: 256, 512>}, {transform_indices = @transform_1, window_bounds = array<i64: 256, 128>}, {pipeline_mode = #tpu.pipeline_mode<synchronous>, transform_indices = @transform_2, window_bounds = array<i64: 512, 128>}, {pipeline_mode = #tpu.pipeline_mode<synchronous>, transform_indices = @transform_3, window_bounds = array<i64: 128, 256>}, {pipeline_mode = #tpu.pipeline_mode<synchronous>, transform_indices = @transform_4, window_bounds = array<i64: 1, 256>}, {pipeline_mode = #tpu.pipeline_mode<synchronous>, transform_indices = @transform_5, window_bounds = array<i64: 128, 512>}, {transform_indices = @transform_6, window_bounds = array<i64: 256, 128>}]} {
    %c0 = arith.constant 0 : index
    %c0_0 = arith.constant 0 : index
    %0 = vector.load %arg1[%c0, %c0_0] : memref<256x512xbf16, #tpu.memory_space<vmem>>, vector<256x512xbf16>
    %c0_1 = arith.constant 0 : index
    %c0_2 = arith.constant 0 : index
    %1 = vector.load %arg3[%c0_1, %c0_2] : memref<512x128xbf16, #tpu.memory_space<vmem>>, vector<512x128xbf16>
    %cst = arith.constant dense<0.000000e+00> : vector<256x128xf32>
    %2 = tpu.matmul %0, %1, %cst {dimension_numbers = #tpu.dot_dimension_numbers<[1], [0], [0], [1], [0, 0, 1, 1], [], []>} : vector<256x512xbf16>, vector<512x128xbf16>, vector<256x128xf32> -> vector<256x128xf32>
    %cst_3 = arith.constant 0.000000e+00 : f32
    %3 = vector.broadcast %cst_3 : f32 to vector<256x128xf32>
    %4 = arith.cmpf ogt, %2, %3 : vector<256x128xf32>
    %cst_4 = arith.constant 0.00999999977 : f32
    %5 = vector.broadcast %cst_4 : f32 to vector<256x128xf32>
    %6 = arith.mulf %5, %2 : vector<256x128xf32>
    %7 = arith.select %4, %2, %6 : vector<256x128xi1>, vector<256x128xf32>
    %8 = arith.truncf %7 : vector<256x128xf32> to vector<256x128xbf16>
    %c0_5 = arith.constant 0 : index
    %c0_6 = arith.constant 0 : index
    %9 = vector.load %arg4[%c0_5, %c0_6] : memref<128x256xbf16, #tpu.memory_space<vmem>>, vector<128x256xbf16>
    %cst_7 = arith.constant dense<0.000000e+00> : vector<256x256xf32>
    %10 = tpu.matmul %8, %9, %cst_7 {dimension_numbers = #tpu.dot_dimension_numbers<[1], [0], [0], [1], [0, 0, 1, 1], [], []>} : vector<256x128xbf16>, vector<128x256xbf16>, vector<256x256xf32> -> vector<256x256xf32>
    %c0_8 = arith.constant 0 : index
    %c0_9 = arith.constant 0 : index
    %11 = vector.load %arg5[%c0_8, %c0_9] : memref<1x256xf32, #tpu.memory_space<vmem>>, vector<1x256xf32>
    %12 = vector.broadcast %11 : vector<1x256xf32> to vector<256x256xf32>
    %13 = arith.addf %10, %12 : vector<256x256xf32>
    %14 = vector.extract_strided_slice %13 {offsets = [0, 0], sizes = [256, 128], strides = [1, 1]} : vector<256x256xf32> to vector<256x128xf32>
    %15 = vector.extract_strided_slice %13 {offsets = [0, 128], sizes = [256, 128], strides = [1, 1]} : vector<256x256xf32> to vector<256x128xf32>
    %16 = math.exp %15 : vector<256x128xf32>
    %17 = arith.mulf %14, %14 : vector<256x128xf32>
    %cst_10 = arith.constant 1.000000e+00 : f32
    %18 = vector.broadcast %cst_10 : f32 to vector<256x128xf32>
    %19 = arith.subf %18, %17 : vector<256x128xf32>
    %cst_11 = arith.constant 2.000000e+00 : f32
    %20 = vector.broadcast %cst_11 : f32 to vector<256x128xf32>
    %21 = arith.mulf %20, %15 : vector<256x128xf32>
    %22 = arith.addf %19, %21 : vector<256x128xf32>
    %23 = arith.mulf %16, %16 : vector<256x128xf32>
    %24 = arith.subf %22, %23 : vector<256x128xf32>
    %cst_12 = arith.constant dense<0.000000e+00> : vector<256xf32>
    %25 = vector.multi_reduction <add>, %24, %cst_12 [1] : vector<256x128xf32> to vector<256xf32>
    %26 = vector.shape_cast %25 : vector<256xf32> to vector<256x1xf32>
    %cst_13 = arith.constant -5.000000e-01 : f32
    %27 = vector.broadcast %cst_13 : f32 to vector<256x1xf32>
    %28 = arith.mulf %27, %26 : vector<256x1xf32>
    %c0_14 = arith.constant 0 : index
    %c0_15 = arith.constant 0 : index
    %29 = vector.load %arg2[%c0_14, %c0_15] : memref<256x128xf32, #tpu.memory_space<vmem>>, vector<256x128xf32>
    %30 = arith.mulf %29, %16 : vector<256x128xf32>
    %31 = arith.addf %30, %14 : vector<256x128xf32>
    %32 = tpu.iota {dimensions = array<i32: 1>} : vector<256x128xi32>
    %c64_i32 = arith.constant 64 : i32
    %33 = vector.broadcast %c64_i32 : i32 to vector<256x128xi32>
    %34 = arith.cmpi slt, %32, %33 : vector<256x128xi32>
    %cst_16 = arith.constant -1.000000e+30 : f32
    %35 = vector.broadcast %cst_16 : f32 to vector<256x128xf32>
    %36 = arith.select %34, %31, %35 : vector<256x128xi1>, vector<256x128xf32>
    %cst_17 = arith.constant dense<0xFF800000> : vector<256xf32>
    %37 = vector.multi_reduction <maximumf>, %36, %cst_17 [1] : vector<256x128xf32> to vector<256xf32>
    %38 = vector.shape_cast %37 : vector<256xf32> to vector<256x1xf32>
    %39 = vector.broadcast %38 : vector<256x1xf32> to vector<256x128xf32>
    %40 = arith.subf %36, %39 : vector<256x128xf32>
    %41 = math.exp %40 : vector<256x128xf32>
    %cst_18 = arith.constant dense<0.000000e+00> : vector<256xf32>
    %42 = vector.multi_reduction <add>, %41, %cst_18 [1] : vector<256x128xf32> to vector<256xf32>
    %43 = vector.shape_cast %42 : vector<256xf32> to vector<256x1xf32>
    %44 = tpu.reciprocal %43 {approx = true} : vector<256x1xf32> -> vector<256x1xf32>
    %45 = vector.broadcast %44 : vector<256x1xf32> to vector<256x128xf32>
    %46 = arith.mulf %41, %45 : vector<256x128xf32>
    %47 = arith.truncf %46 : vector<256x128xf32> to vector<256x128xbf16>
    %c0_19 = arith.constant 0 : index
    %c0_20 = arith.constant 0 : index
    %48 = vector.load %arg6[%c0_19, %c0_20] : memref<128x512xbf16, #tpu.memory_space<vmem>>, vector<128x512xbf16>
    %cst_21 = arith.constant dense<0.000000e+00> : vector<256x512xf32>
    %49 = tpu.matmul %47, %48, %cst_21 {dimension_numbers = #tpu.dot_dimension_numbers<[1], [0], [0], [1], [0, 0, 1, 1], [], []>} : vector<256x128xbf16>, vector<128x512xbf16>, vector<256x512xf32> -> vector<256x512xf32>
    %cst_22 = arith.constant 1.000000e-30 : f32
    %50 = vector.broadcast %cst_22 : f32 to vector<256x512xf32>
    %51 = arith.addf %49, %50 : vector<256x512xf32>
    %52 = math.log %51 : vector<256x512xf32>
    %c0_23 = arith.constant 0 : index
    %c0_24 = arith.constant 0 : index
    %53 = vector.load %arg1[%c0_23, %c0_24] : memref<256x512xbf16, #tpu.memory_space<vmem>>, vector<256x512xbf16>
    %54 = arith.extf %53 : vector<256x512xbf16> to vector<256x512xf32>
    %55 = arith.mulf %52, %54 : vector<256x512xf32>
    %cst_25 = arith.constant dense<0.000000e+00> : vector<256xf32>
    %56 = vector.multi_reduction <add>, %55, %cst_25 [1] : vector<256x512xf32> to vector<256xf32>
    %57 = vector.shape_cast %56 : vector<256xf32> to vector<256x1xf32>
    %cst_26 = arith.constant 0.000000e+00 : f32
    %58 = vector.broadcast %cst_26 : f32 to vector<256x1xf32>
    %59 = arith.subf %58, %57 : vector<256x1xf32>
    %60 = tpu.iota {dimensions = array<i32: 1>} : vector<256x128xi32>
    %c64_i32_27 = arith.constant 64 : i32
    %61 = vector.broadcast %c64_i32_27 : i32 to vector<256x128xi32>
    %62 = arith.cmpi slt, %60, %61 : vector<256x128xi32>
    %c64_i32_28 = arith.constant 64 : i32
    %63 = vector.broadcast %c64_i32_28 : i32 to vector<256x128xi32>
    %64 = arith.cmpi eq, %60, %63 : vector<256x128xi32>
    %c65_i32 = arith.constant 65 : i32
    %65 = vector.broadcast %c65_i32 : i32 to vector<256x128xi32>
    %66 = arith.cmpi eq, %60, %65 : vector<256x128xi32>
    %67 = arith.addf %59, %28 : vector<256x1xf32>
    %68 = vector.shape_cast %28 : vector<256x1xf32> to vector<256x1xf32>
    %69 = vector.broadcast %68 : vector<256x1xf32> to vector<256x128xf32>
    %70 = vector.shape_cast %67 : vector<256x1xf32> to vector<256x1xf32>
    %71 = vector.broadcast %70 : vector<256x1xf32> to vector<256x128xf32>
    %72 = arith.select %66, %69, %71 : vector<256x128xi1>, vector<256x128xf32>
    %73 = vector.shape_cast %59 : vector<256x1xf32> to vector<256x1xf32>
    %74 = vector.broadcast %73 : vector<256x1xf32> to vector<256x128xf32>
    %75 = arith.select %64, %74, %72 : vector<256x128xi1>, vector<256x128xf32>
    %76 = arith.select %62, %31, %75 : vector<256x128xi1>, vector<256x128xf32>
    %c0_29 = arith.constant 0 : index
    %c0_30 = arith.constant 0 : index
    %77 = vector.load %arg7[%c0_29, %c0_30] : memref<256x128xf32, #tpu.memory_space<vmem>>, vector<256x128xf32>
    tpu.vector_store %arg7[%c0_29, %c0_30], %76 {strides = array<i32>} : memref<256x128xf32, #tpu.memory_space<vmem>>, vector<256x128xf32>,
    return
  }
  func.func @transform_0(%arg0: i32) -> (i32, i32) {
    %c0_i32 = arith.constant 0 : i32
    %c0_i32_0 = arith.constant 0 : i32
    return %arg0, %c0_i32 : i32, i32
  }
  func.func @transform_1(%arg0: i32) -> (i32, i32) {
    %c0_i32 = arith.constant 0 : i32
    %c0_i32_0 = arith.constant 0 : i32
    return %arg0, %c0_i32 : i32, i32
  }
  func.func @transform_2(%arg0: i32) -> (i32, i32) {
    %c0_i32 = arith.constant 0 : i32
    %c0_i32_0 = arith.constant 0 : i32
    %c0_i32_1 = arith.constant 0 : i32
    return %c0_i32, %c0_i32_0 : i32, i32
  }
  func.func @transform_3(%arg0: i32) -> (i32, i32) {
    %c0_i32 = arith.constant 0 : i32
    %c0_i32_0 = arith.constant 0 : i32
    %c0_i32_1 = arith.constant 0 : i32
    return %c0_i32, %c0_i32_0 : i32, i32
  }
  func.func @transform_4(%arg0: i32) -> (i32, i32) {
    %c0_i32 = arith.constant 0 : i32
    %c0_i32_0 = arith.constant 0 : i32
    %c0_i32_1 = arith.constant 0 : i32
    return %c0_i32, %c0_i32_0 : i32, i32
  }
  func.func @transform_5(%arg0: i32) -> (i32, i32) {
    %c0_i32 = arith.constant 0 : i32
    %c0_i32_0 = arith.constant 0 : i32
    %c0_i32_1 = arith.constant 0 : i32
    return %c0_i32, %c0_i32_0 : i32, i32
  }
  func.func @transform_6(%arg0: i32) -> (i32, i32) {
    %c0_i32 = arith.constant 0 : i32
    %c0_i32_0 = arith.constant 0 : i32
    return %arg0, %c0_i32 : i32, i32
  }
}

module attributes {stable_mosaic.version = 11 : i64} {
  func.func @_ntm_kernel(%arg0: i32, %arg1: memref<256x512xbf16, #tpu.memory_space<vmem>>, %arg2: memref<256x128xf32, #tpu.memory_space<vmem>>, %arg3: memref<512x128xbf16, #tpu.memory_space<vmem>>, %arg4: memref<128x256xbf16, #tpu.memory_space<vmem>>, %arg5: memref<1x256xf32, #tpu.memory_space<vmem>>, %arg6: memref<128x512xbf16, #tpu.memory_space<vmem>>, %arg7: memref<256x128xf32, #tpu.memory_space<vmem>>) attributes {dimension_semantics = [#tpu.dimension_semantics<parallel>], iteration_bounds = array<i64: 2>, scalar_prefetch = 0 : i64, scratch_operands = 0 : i64, tpu.core_type = #tpu.core_type<tc>, window_params = [{transform_indices = @transform_0, window_bounds = array<i64: 256, 512>}, {transform_indices = @transform_1, window_bounds = array<i64: 256, 128>}, {pipeline_mode = #tpu.pipeline_mode<synchronous>, transform_indices = @transform_2, window_bounds = array<i64: 512, 128>}, {pipeline_mode = #tpu.pipeline_mode<synchronous>, transform_indices = @transform_3, window_bounds = array<i64: 128, 256>}, {pipeline_mode = #tpu.pipeline_mode<synchronous>, transform_indices = @transform_4, window_bounds = array<i64: 1, 256>}, {pipeline_mode = #tpu.pipeline_mode<synchronous>, transform_indices = @transform_5, window_bounds = array<i64: 128, 512>}, {transform_indices = @transform_6, window_bounds = array<i64: 256, 128>}]} {
    %c0 = arith.constant 0 : index
    %c0_0 = arith.constant 0 : index
    %0 = vector.load %arg1[%c0, %c0_0] : memref<256x512xbf16, #tpu.memory_space<vmem>>, vector<256x512xbf16>
    %c0_1 = arith.constant 0 : index
    %c0_2 = arith.constant 0 : index
    %1 = vector.load %arg3[%c0_1, %c0_2] : memref<512x128xbf16, #tpu.memory_space<vmem>>, vector<512x128xbf16>
    %cst = arith.constant dense<0.000000e+00> : vector<256x128xf32>
    %2 = tpu.matmul %0, %1, %cst {dimension_numbers = #tpu.dot_dimension_numbers<[1], [0], [0], [1], [0, 0, 1, 1], [], []>} : vector<256x512xbf16>, vector<512x128xbf16>, vector<256x128xf32> -> vector<256x128xf32>
    %cst_3 = arith.constant 0.000000e+00 : f32
    %3 = vector.broadcast %cst_3 : f32 to vector<256x128xf32>
    %4 = arith.cmpf ogt, %2, %3 : vector<256x128xf32>
    %cst_4 = arith.constant 0.00999999977 : f32
    %5 = vector.broadcast %cst_4 : f32 to vector<256x128xf32>
    %6 = arith.mulf %5, %2 : vector<256x128xf32>
    %7 = arith.select %4, %2, %6 : vector<256x128xi1>, vector<256x128xf32>
    %8 = arith.truncf %7 : vector<256x128xf32> to vector<256x128xbf16>
    %c0_5 = arith.constant 0 : index
    %c0_6 = arith.constant 0 : index
    %9 = vector.load %arg4[%c0_5, %c0_6] : memref<128x256xbf16, #tpu.memory_space<vmem>>, vector<128x256xbf16>
    %cst_7 = arith.constant dense<0.000000e+00> : vector<256x256xf32>
    %10 = tpu.matmul %8, %9, %cst_7 {dimension_numbers = #tpu.dot_dimension_numbers<[1], [0], [0], [1], [0, 0, 1, 1], [], []>} : vector<256x128xbf16>, vector<128x256xbf16>, vector<256x256xf32> -> vector<256x256xf32>
    %c0_8 = arith.constant 0 : index
    %c0_9 = arith.constant 0 : index
    %11 = vector.load %arg5[%c0_8, %c0_9] : memref<1x256xf32, #tpu.memory_space<vmem>>, vector<1x256xf32>
    %12 = vector.broadcast %11 : vector<1x256xf32> to vector<256x256xf32>
    %13 = arith.addf %10, %12 : vector<256x256xf32>
    %14 = vector.extract_strided_slice %13 {offsets = [0, 0], sizes = [256, 128], strides = [1, 1]} : vector<256x256xf32> to vector<256x128xf32>
    %15 = vector.extract_strided_slice %13 {offsets = [0, 128], sizes = [256, 128], strides = [1, 1]} : vector<256x256xf32> to vector<256x128xf32>
    %16 = math.exp %15 : vector<256x128xf32>
    %17 = arith.mulf %14, %14 : vector<256x128xf32>
    %cst_10 = arith.constant 1.000000e+00 : f32
    %18 = vector.broadcast %cst_10 : f32 to vector<256x128xf32>
    %19 = arith.subf %18, %17 : vector<256x128xf32>
    %cst_11 = arith.constant 2.000000e+00 : f32
    %20 = vector.broadcast %cst_11 : f32 to vector<256x128xf32>
    %21 = arith.mulf %20, %15 : vector<256x128xf32>
    %22 = arith.addf %19, %21 : vector<256x128xf32>
    %23 = arith.mulf %16, %16 : vector<256x128xf32>
    %24 = arith.subf %22, %23 : vector<256x128xf32>
    %cst_12 = arith.constant dense<0.000000e+00> : vector<256xf32>
    %25 = vector.multi_reduction <add>, %24, %cst_12 [1] : vector<256x128xf32> to vector<256xf32>
    %26 = vector.shape_cast %25 : vector<256xf32> to vector<256x1xf32>
    %cst_13 = arith.constant -5.000000e-01 : f32
    %27 = vector.broadcast %cst_13 : f32 to vector<256x1xf32>
    %28 = arith.mulf %27, %26 : vector<256x1xf32>
    %c0_14 = arith.constant 0 : index
    %c0_15 = arith.constant 0 : index
    %29 = vector.load %arg2[%c0_14, %c0_15] : memref<256x128xf32, #tpu.memory_space<vmem>>, vector<256x128xf32>
    %30 = arith.mulf %29, %16 : vector<256x128xf32>
    %31 = arith.addf %30, %14 : vector<256x128xf32>
    %32 = tpu.iota {dimensions = array<i32: 1>} : vector<256x128xi32>
    %c64_i32 = arith.constant 64 : i32
    %33 = vector.broadcast %c64_i32 : i32 to vector<256x128xi32>
    %34 = arith.cmpi slt, %32, %33 : vector<256x128xi32>
    %cst_16 = arith.constant -1.000000e+30 : f32
    %35 = vector.broadcast %cst_16 : f32 to vector<256x128xf32>
    %36 = arith.select %34, %31, %35 : vector<256x128xi1>, vector<256x128xf32>
    %cst_17 = arith.constant dense<0xFF800000> : vector<256xf32>
    %37 = vector.multi_reduction <maximumf>, %36, %cst_17 [1] : vector<256x128xf32> to vector<256xf32>
    %38 = vector.shape_cast %37 : vector<256xf32> to vector<256x1xf32>
    %39 = vector.broadcast %38 : vector<256x1xf32> to vector<256x128xf32>
    %40 = arith.subf %36, %39 : vector<256x128xf32>
    %41 = math.exp %40 : vector<256x128xf32>
    %cst_18 = arith.constant dense<0.000000e+00> : vector<256xf32>
    %42 = vector.multi_reduction <add>, %41, %cst_18 [1] : vector<256x128xf32> to vector<256xf32>
    %43 = vector.shape_cast %42 : vector<256xf32> to vector<256x1xf32>
    %44 = tpu.reciprocal %43 {approx = true} : vector<256x1xf32> -> vector<256x1xf32>
    %45 = vector.broadcast %44 : vector<256x1xf32> to vector<256x128xf32>
    %46 = arith.mulf %41, %45 : vector<256x128xf32>
    %47 = arith.truncf %46 : vector<256x128xf32> to vector<256x128xbf16>
    %c0_19 = arith.constant 0 : index
    %c0_20 = arith.constant 0 : index
    %48 = vector.load %arg6[%c0_19, %c0_20] : memref<128x512xbf16, #tpu.memory_space<vmem>>, vector<128x512xbf16>
    %cst_21 = arith.constant dense<0.000000e+00> : vector<256x512xf32>
    %49 = tpu.matmul %47, %48, %cst_21 {dimension_numbers = #tpu.dot_dimension_numbers<[1], [0], [0], [1], [0, 0, 1, 1], [], []>} : vector<256x128xbf16>, vector<128x512xbf16>, vector<256x512xf32> -> vector<256x512xf32>
    %cst_22 = arith.constant 1.000000e-30 : f32
    %50 = vector.broadcast %cst_22 : f32 to vector<256x512xf32>
    %51 = arith.addf %49, %50 : vector<256x512xf32>
    %52 = math.log %51 : vector<256x512xf32>
    %c0_23 = arith.constant 0 : index
    %c0_24 = arith.constant 0 : index
    %53 = vector.load %arg1[%c0_23, %c0_24] : memref<256x512xbf16, #tpu.memory_space<vmem>>, vector<256x512xbf16>
    %54 = arith.extf %53 : vector<256x512xbf16> to vector<256x512xf32>
    %55 = arith.mulf %52, %54 : vector<256x512xf32>
    %cst_25 = arith.constant dense<0.000000e+00> : vector<256xf32>
    %56 = vector.multi_reduction <add>, %55, %cst_25 [1] : vector<256x512xf32> to vector<256xf32>
    %57 = vector.shape_cast %56 : vector<256xf32> to vector<256x1xf32>
    %cst_26 = arith.constant 0.000000e+00 : f32
    %58 = vector.broadcast %cst_26 : f32 to vector<256x1xf32>
    %59 = arith.subf %58, %57 : vector<256x1xf32>
    %60 = tpu.iota {dimensions = array<i32: 1>} : vector<256x128xi32>
    %c64_i32_27 = arith.constant 64 : i32
    %61 = vector.broadcast %c64_i32_27 : i32 to vector<256x128xi32>
    %62 = arith.cmpi slt, %60, %61 : vector<256x128xi32>
    %c64_i32_28 = arith.constant 64 : i32
    %63 = vector.broadcast %c64_i32_28 : i32 to vector<256x128xi32>
    %64 = arith.cmpi eq, %60, %63 : vector<256x128xi32>
    %c65_i32 = arith.constant 65 : i32
    %65 = vector.broadcast %c65_i32 : i32 to vector<256x128xi32>
    %66 = arith.cmpi eq, %60, %65 : vector<256x128xi32>
    %67 = arith.addf %59, %28 : vector<256x1xf32>
    %68 = vector.shape_cast %28 : vector<256x1xf32> to vector<256x1xf32>
    %69 = vector.broadcast %68 : vector<256x1xf32> to vector<256x128xf32>
    %70 = vector.shape_cast %67 : vector<256x1xf32> to vector<256x1xf32>
    %71 = vector.broadcast %70 : vector<256x1xf32> to vector<256x128xf32>
    %72 = arith.select %66, %69, %71 : vector<256x128xi1>, vector<256x128xf32>
    %73 = vector.shape_cast %59 : vector<256x1xf32> to vector<256x1xf32>
    %74 = vector.broadcast %73 : vector<256x1xf32> to vector<256x128xf32>
    %75 = arith.select %64, %74, %72 : vector<256x128xi1>, vector<256x128xf32>
    %76 = arith.select %62, %31, %75 : vector<256x128xi1>, vector<256x128xf32>
    %c0_29 = arith.constant 0 : index
    %c0_30 = arith.constant 0 : index
    %77 = vector.load %arg7[%c0_29, %c0_30] : memref<256x128xf32, #tpu.memory_space<vmem>>, vector<256x128xf32>
    tpu.vector_store %arg7[%c0_29, %c0_30], %76 {strides = array<i32>} : memref<256x128xf32, #tpu.memory_space<vmem>>, vector<256x128xf32>,
    return
  }
  func.func @transform_0(%arg0: i32) -> (i32, i32) {
    %c0_i32 = arith.constant 0 : i32
    %c0_i32_0 = arith.constant 0 : i32
    return %arg0, %c0_i32 : i32, i32
  }
  func.func @transform_1(%arg0: i32) -> (i32, i32) {
    %c0_i32 = arith.constant 0 : i32
    %c0_i32_0 = arith.constant 0 : i32
    return %arg0, %c0_i32 : i32, i32
  }
  func.func @transform_2(%arg0: i32) -> (i32, i32) {
    %c0_i32 = arith.constant 0 : i32
    %c0_i32_0 = arith.constant 0 : i32
    %c0_i32_1 = arith.constant 0 : i32
    return %c0_i32, %c0_i32_0 : i32, i32
  }
  func.func @transform_3(%arg0: i32) -> (i32, i32) {
    %c0_i32 = arith.constant 0 : i32
    %c0_i32_0 = arith.constant 0 : i32
    %c0_i32_1 = arith.constant 0 : i32
    return %c0_i32, %c0_i32_0 : i32, i32
  }
  func.func @transform_4(%arg0: i32) -> (i32, i32) {
    %c0_i32 = arith.constant 0 : i32
    %c0_i32_0 = arith.constant 0 : i32
    %c0_i32_1 = arith.constant 0 : i32
    return %c0_i32, %c0_i32_0 : i32, i32
  }
  func.func @transform_5(%arg0: i32) -> (i32, i32) {
    %c0_i32 = arith.constant 0 : i32
    %c0_i32_0 = arith.constant 0 : i32
    %c0_i32_1 = arith.constant 0 : i32
    return %c0_i32, %c0_i32_0 : i32, i32
  }
  func.func @transform_6(%arg0: i32) -> (i32, i32) {
    %c0_i32 = arith.constant 0 : i32
    %c0_i32_0 = arith.constant 0 : i32
    return %arg0, %c0_i32 : i32, i32
  }
}

</mosaic_0001>

<bundles_post_ra>
// kernel: tpu_custom_call.1
= control target key start
LH: loop header
LB: loop body
LE: loop exit
PB: predicated region body
PF: predicated region fallthrough
CT: control target
= control target key end

     0   :  { %s7881_s0 = inlined_call_operand.hbm [shape: bf16[512,512], index: 0, kind: input, shape index: {}]   ;;  %s7882_s1 = inlined_call_operand.hbm [shape: f32[512,128], index: 1, kind: input, shape index: {}]   ;;  %s7883_s2 = inlined_call_operand.hbm [shape: bf16[512,128], index: 2, kind: input, shape index: {}]   ;;  %s7884_s3 = inlined_call_operand.hbm [shape: bf16[128,256], index: 3, kind: input, shape index: {}]   ;;  %s7885_s4 = inlined_call_operand.vmem [shape: f32[1,256], index: 4, kind: input, shape index: {}]   ;;  %s7886_s5 = inlined_call_operand.hbm [shape: bf16[128,512], index: 5, kind: input, shape index: {}]   ;;  %s7887_s6 = inlined_call_operand.hbm [shape: f32[512,128], index: 6, kind: output, shape index: {}]  }
   0x1   :  { %7991 = sst [smem:[#allocation118_spill]] %s7883_s2 }
   0x2   :  { %7992 = sst [smem:[#allocation119_spill]] %s7884_s3 }
   0x3   :  { %7993 = sst [smem:[#allocation120_spill]] %s7886_s5 }
   0x4   :  { %11 = vsyncpa [#allocation3], 0 }
   0x5   :  { %13 = vsyncpa [#allocation3 + $0x1], 0 }
   0x6   :  { %14 = vsyncpa [#allocation6], 0 }
   0x7   :  { %16 = vsyncpa [#allocation6 + $0x1], 0 }
   0x8   :  { %17 = vsyncpa [#allocation9], 0 }
   0x9   :  { %18 = vsyncpa [#allocation4], 0 }
   0xa   :  { %20 = vsyncpa [#allocation4 + $0x1], 0  ;;  %s5675_s21 = smov 0   ;;  %s5677_s22 = smov 0  }
   0xb   :  { %s5679_s23 = smov 0   ;;  %s5681_s24 = smov 0  }
   0xc LB: > { %7994 = sst [smem:[#allocation17_spill]] %s5623_s23  ;;  %s5696_s25 = sadd.s32 4294967295, %s5627_s24   ;;  %s5627_s24 = sphi %s5681_s24, %s8254_s24   ;;  %s5623_s23 = sphi %s5679_s23, %s8251_s23   ;;  %s5619_s22 = sphi %s5677_s22, %s8253_s22   ;;  %s5615_s21 = sphi %s5675_s21, %s8252_s21  }
   0xd   : > { %s4096_s26 = sadd.s32 4294967294, %s5627_s24   ;;  %p46_p0 = scmp.ne.s32.totalorder %s5619_s22, %s5615_s21 }
   0xe   : > { %p47_p1 = scmp.eq.s32.totalorder %s5696_s25, 0  ;;  %p180_p2 = scmp.eq.s32.totalorder %s5696_s25, 1 }
   0xf   : > { %p186_p3 = scmp.eq.s32.totalorder %s4096_s26, 1  ;;  %p4097_p5 = scmp.ge.s32.totalorder %s5627_s24, 1 }
  0x10   : > { %p5705_p4 = por %p47_p1, %p46_p0  ;;  %p193_p7 = scmp.lt.s32.totalorder %s5627_s24, 3 }
  0x11   : > { %p5710_p6 = por %p186_p3, %p46_p0  ;;  %s7997_s2 = sld [smem:[#allocation118_spill]] }
  0x12   : > { %p5718_p8 = pnand %p4097_p5, %p193_p7  ;;  %s5629_s9 = smov [#allocation7]  }
  0x13   : > { %s206_s10 = sshll.u32 %s5629_s9, 4  ;;  %s8000_s3 = sld [smem:[#allocation119_spill]]  ;;  %s207_s10 = int_to_ptr.vmem [resolvable:$true] %s206_s10 }
  0x14   : > { %p4879_p9 = pneg %p5718_p8  ;;  %s5630_s15 = smov 64  }
  0x15   : > { %s5631_s16 = smov 4   ;;  %s5632_s17 = smov [#allocation8]  }
  0x16   : > { %p5726_p10 = pnand %p4879_p9, %p47_p1  ;;  %s220_s18 = sshll.u32 %s5632_s17, 4  ;;  %s221_s18 = int_to_ptr.vmem [resolvable:$true] %s220_s18 }
  0x17   : > { %s204_s7 = sshll.u32 %s7997_s2, 4  ;;  %s7888_s19 = smov 128   ;;  %s205_s7 = int_to_ptr.hbm [resolvable:$true] %s204_s7 }
  0x18   : > { %4882 = dma.hbm_to_vmem [thread:$0]  (!%p5726_p10), %s205_s7, 4096, %s207_s10, [#allocation6], %s5630_s15, %s5630_s15, %s5631_s16  }
  0x19   : > { %s218_s14 = sshll.u32 %s8000_s3, 4  ;;  %s7889_s20 = smov 8   ;;  %s219_s14 = int_to_ptr.hbm [resolvable:$true] %s218_s14 }
  0x1a   : > { %4885 = dma.hbm_to_vmem [thread:$0]  (!%p5726_p10), %s219_s14, 2048, %s221_s18, [#allocation9], %s7888_s19, %s7888_s19, %s7889_s20  }
  0x1b   : > { %s8001_s5 = sld [smem:[#allocation120_spill]]  ;;  %s5635_s7 = smov [#allocation10]  }
  0x1c   : > { %s237_s9 = sshll.u32 %s5635_s7, 4  ;;  %s7890_s10 = smov 256   ;;  %s238_s9 = int_to_ptr.vmem [resolvable:$true] %s237_s9 }
  0x1d   : > { %s7891_s12 = smov 16   ;;  %s5750_s13 = sadd.s32 1, %s5627_s24  }
  0x1e   : > { %s30_s14 = ssub.s32 %s5627_s24, %s5750_s13  ;;  %s33_s15 = sadd.s32 1, %s5623_s23 }
  0x1f   : > { %p31_p12 = scmp.eq.s32.totalorder %s30_s14, 0  ;;  %p40_p13 = scmp.ne.s32.totalorder %s5623_s23, %s5619_s22 }
  0x20   : > { %p41_p0 = scmp.eq.s32.totalorder %s5627_s24, 0  ;;  %p4903_p3 = scmp.lt.s32.totalorder %s5627_s24, 2 }
  0x21   : > { %s235_s30 = sshll.u32 %s8001_s5, 4  ;;  %p5764_p7 = por %p180_p2, %p40_p13  ;;  %s236_s30 = int_to_ptr.hbm [resolvable:$true] %s235_s30 }
  0x22   : > { %4888 = dma.hbm_to_vmem [thread:$0]  (!%p5726_p10), %s236_s30, 4096, %s238_s9, [#allocation9], %s7890_s10, %s7890_s10, %s7891_s12  }
  0x23   : > { %s5760_s16 = scalar_select %p31_p12, %s5623_s23, %s33_s15  }
  0x24   : > { %p42_p5 = por %p41_p0, %p40_p13  ;;  %s5769_s17 = sand.u32 1, %s5623_s23  }
  0x25   : > { %8002 = sst [smem:[#allocation18_spill]] %s5760_s16  ;;  %s4698_s18 = sshll.u32 %s5627_s24, 9 }
  0x26   : > { %s4102_s26 = sshll.u32 %s5769_s17, 9  ;;  %s261_s7 = scalar_lea.hbm %s7881_s0, %s4698_s18 }
  0x27   : > { %s262_s9 = sshll.u32 %s261_s7, 4  ;;  %s255_s14 = scalar_lea.vmem [#allocation2], %s4102_s26  ;;  %s263_s9 = int_to_ptr.hbm [resolvable:$true] %s262_s9 }
  0x28   : > { %s264_s15 = sshll.u32 %s255_s14, 4  ;;  %p5778_p2 = pnand %p4903_p3, %p42_p5  ;;  %s265_s15 = int_to_ptr.vmem [resolvable:$true] %s264_s15 }
  0x29   : > { %s274_s20 = sand.u32 1, %s5627_s24   ;;  %s4106_s10 = sshll.u32 %s5769_s17, 8 }
  0x2a   : > { %s252_s12 = scalar_lea.sflag [#allocation3], %s5769_s17  ;;  %s5489_s2 = sshra.s32 %s263_s9, 4  ;;  %s5490_s2 = int_to_ptr.hbm [resolvable:$true] %s5489_s2 }
  0x2b   : > { %s5491_s3 = scalar_lea.hbm %s5490_s2, 512  ;;  %p5493_p10 = pneg %p5778_p2 }
  0x2c   : > { %p5492_p9 = scmp.ne.s32.totalorder %s5490_s2, %s5491_s3  ;;  %s5496_s29 = scalar_lea.hbm %s7881_s0, 1024 }
  0x2d   : > { %p5497_p0 = scmp.lt.s32.totalorder %s5490_s2, %s7881_s0  ;;  %p5498_p3 = scmp.lt.s32.totalorder %s5496_s29, %s5491_s3 }
  0x2e   : > { %p5494_p12 = pnand %p5493_p10, %p5492_p9 }
  0x2f   : > { %p5499_p5 = por %p5498_p3, %p5497_p0 }
  0x30   : > { %p5495_p13 = pneg %p5494_p12 }
  0x32   : > { %p5500_p11 = pnand %p5499_p5, %p5495_p13 }
  0x34   : > { %5503 = shalt.err (!%p5500_p11)
}
  0x35   : > { %s8005_s17 = smov 16   ;;  %s8006_s14 = smov 256  }
  0x36   : > { %4892 = dma.hbm_to_vmem [thread:$0]  (!%p5778_p2), %s263_s9, 8192, %s265_s15, %s252_s12, %s8006_s14, %s8006_s14, %s8005_s17  }
  0x37   : > { %s4699_s5 = sshll.u32 %s5627_s24, 8  ;;  %s278_s16 = scalar_lea.vmem [#allocation5], %s4106_s10 }
  0x38   : > { %s286_s18 = sshll.u32 %s278_s16, 4  ;;  %s283_s30 = scalar_lea.hbm %s7882_s1, %s4699_s5  ;;  %s287_s18 = int_to_ptr.vmem [resolvable:$true] %s286_s18 }
  0x39   : > { %s284_s2 = sshll.u32 %s283_s30, 4  ;;  %s275_s3 = scalar_lea.sflag [#allocation6], %s274_s20  ;;  %s285_s2 = int_to_ptr.hbm [resolvable:$true] %s284_s2 }
  0x3a   : > { %s5519_s29 = sshra.s32 %s285_s2, 4  ;;  %s5526_s10 = scalar_lea.hbm %s7882_s1, 512  ;;  %s5520_s29 = int_to_ptr.hbm [resolvable:$true] %s5519_s29 }
  0x3b   : > { %s5521_s7 = scalar_lea.hbm %s5520_s29, 256  ;;  %p5527_p13 = scmp.lt.s32.totalorder %s5520_s29, %s7882_s1 }
  0x3c   : > { %p5522_p11 = scmp.ne.s32.totalorder %s5520_s29, %s5521_s7  ;;  %p5528_p0 = scmp.lt.s32.totalorder %s5526_s10, %s5521_s7 }
  0x3e   : > { %p5524_p9 = pnand %p5522_p11, %p5493_p10  ;;  %p5529_p3 = por %p5528_p0, %p5527_p13 }
  0x40   : > { %p5525_p12 = pneg %p5524_p9 }
  0x42   : > { %p5530_p5 = pnand %p5529_p3, %p5525_p12 }
  0x44   : > { %5533 = shalt.err (!%p5530_p5)
}
  0x45   : > { %s8007_s5 = smov 8   ;;  %s8008_s23 = smov 128  }
  0x46   : > { %4895 = dma.hbm_to_vmem [thread:$0]  (!%p5778_p2), %s285_s2, 4096, %s287_s18, %s275_s3, %s8008_s23, %s8008_s23, %s8007_s5  }
  0x47   : > { %298 = sbr.rel (%p5718_p8) target bundleno = 1519 (0x5ef), region = 44 }
  0x4c   : > { %s5822_s20 = sand.u32 1, %s5619_s22  }
  0x4d   : > { %s4110_s17 = sshll.u32 %s5822_s20, 9  ;;  %s301_s14 = scalar_lea.sflag [#allocation3], %s5822_s20 }
  0x4e   : > { %s5826_s26 = scalar_lea.vmem [#allocation2], %s4110_s17 }
  0x4f   : > { %5594 = dma.done.wait (%p5705_p4), %s301_s14, 8192  }
  0x50   : > { %5596 = vsyncadd (%p5705_p4), %s301_s14, 4294959104  ;;  %s310_s8 = sand.u32 1, %s5696_s25   ;;  %s4111_s19 = sshll.u32 %s5822_s20, 8 }
  0x51   : > { %s311_s18 = scalar_lea.sflag [#allocation6], %s310_s8  ;;  %s5836_s30 = scalar_lea.vmem [#allocation5], %s4111_s19 }
  0x52   : > { %5598 = dma.done.wait (%p5705_p4), %s311_s18, 4096  }
  0x53   : > { %5600 = vsyncadd (%p5705_p4), %s311_s18, 4294963200 }
  0x54   : > { %5602 = dma.done.wait (%p47_p1), [#allocation6], 4096  }
  0x55   : > { %5604 = vsyncadd (%p47_p1), [#allocation6], 4294963200 }
  0x56   : > { %5606 = dma.done.wait (%p47_p1), [#allocation9], 6144  }
  0x57   : > { %5608 = vsyncadd (%p47_p1), [#allocation9], 4294961152  ;;  %v4771_v0 = vld [vmem:[#allocation7 + $0x38] sm:$0xff]  ;;  %v4770_v2 = vld [vmem:[#allocation7 + $0x30] sm:$0xff]  ;;  %s7551_s3 = scalar_lea.vmem [#allocation11], %s4111_s19  ;;  %s4844_s29 = sshll.u32 %s5696_s25, 8 }
  0x58   : > { %v4779_v1 = vld [vmem:[#allocation7 + $0x78] sm:$0xff]  ;;  %4845 = vmatpush.bf16.msra.mxu2 %v4771_v0  ;;  %v4778_v3 = vld [vmem:[#allocation7 + $0x70] sm:$0xff]  ;;  %1007 = vmatpush.bf16.msra.mxu0 %v4771_v0  ;;  %v4769_v4 = vld [vmem:[#allocation7 + $0x28] sm:$0xff]  ;;  %s3968_s9 = scalar_lea.hbm %s7887_s6, %s4844_s29  ;;  %s3969_s25 = sshll.u32 %s7551_s3, 4  ;;  %s3970_s25 = int_to_ptr.vmem [resolvable:$true] %s3969_s25 }
  0x59   : > { %4853 = vmatpush.bf16.msra.mxu3 %v4779_v1  ;;  %1096 = vmatpush.bf16.msra.mxu1 %v4779_v1  ;;  %v4777_v5 = vld [vmem:[#allocation7 + $0x68] sm:$0xff]  ;;  %v4768_v6 = vld [vmem:[#allocation7 + $0x20] sm:$0xff]  ;;  %v4767_v8 = vld [vmem:[#allocation7 + $0x18] sm:$0xff]  ;;  %s3971_s10 = sshll.u32 %s3968_s9, 4  ;;  %s3957_s16 = scalar_lea.sflag [#allocation4], %s5822_s20  ;;  %s3972_s10 = int_to_ptr.hbm [resolvable:$true] %s3971_s10 }
  0x5a   : > { %v4776_v7 = vld [vmem:[#allocation7 + $0x60] sm:$0xff]  ;;  %v4775_v9 = vld [vmem:[#allocation7 + $0x58] sm:$0xff]  ;;  %v4766_v10 = vld [vmem:[#allocation7 + $0x10] sm:$0xff]  ;;  %s5563_s15 = sshra.s32 %s3972_s10, 4  ;;  %s5569_s14 = scalar_lea.hbm %s7887_s6, 512  ;;  %s5564_s15 = int_to_ptr.hbm [resolvable:$true] %s5563_s15 }
  0x5b   : > { %v4774_v11 = vld [vmem:[#allocation7 + $0x50] sm:$0xff]  ;;  %v4765_v12 = vld [vmem:[#allocation7 + $0x8] sm:$0xff]  ;;  %v4764_v14 = vld [vmem:[#allocation7] sm:$0xff]  ;;  %s5565_s5 = scalar_lea.hbm %s5564_s15, 256  ;;  %p5570_p2 = scmp.lt.s32.totalorder %s5564_s15, %s7887_s6 }
  0x5c   : > { %4846 = vmatpush.bf16.msra.mxu2 %v4770_v2  ;;  %1008 = vmatpush.bf16.msra.mxu0 %v4770_v2  ;;  %v4773_v13 = vld [vmem:[#allocation7 + $0x48] sm:$0xff]  ;;  %v4772_v15 = vld [vmem:[#allocation7 + $0x40] sm:$0xff]  ;;  %v4734_v17 = vld [vmem:[%s5826_s26 + $0x10c] sm:$0xf0]  ;;  %p5566_p1 = scmp.ne.s32.totalorder %s5564_s15, %s5565_s5  ;;  %p5571_p10 = scmp.lt.s32.totalorder %s5569_s14, %s5565_s5 }
  0x5d   : > { %4854 = vmatpush.bf16.msra.mxu3 %v4778_v3  ;;  %1097 = vmatpush.bf16.msra.mxu1 %v4778_v3  ;;  %v4246_v16 = vld [vmem:[%s5826_s26 + $0x100] sm:$0xf]  ;;  %v4732_v18 = vld [vmem:[%s5826_s26 + $0x104] sm:$0xf]  ;;  %v4248_v19 = vld [vmem:[%s5826_s26 + $0x110] sm:$0xf0] }
  0x5e   : > { %v4787_v20 = vld [vmem:[#allocation7 + $0xb8] sm:$0xff]  ;;  %v4247_v22 = vor.u32 %v4734_v17, %v4246_v16  ;;  %v4251_v23 = vor.u32 %v4732_v18, %v4248_v19  ;;  %v4786_v24 = vld [vmem:[#allocation7 + $0xb0] sm:$0xff]  ;;  %v4785_v26 = vld [vmem:[#allocation7 + $0xa8] sm:$0xff]  ;;  %p5567_p4 = pnand %p5566_p1, %p5764_p7  ;;  %p5572_p11 = por %p5571_p10, %p5570_p2 }
  0x5f   : > { %v4795_v21 = vld [vmem:[#allocation7 + $0xf8] sm:$0xff]  ;;  %v4794_v25 = vld [vmem:[#allocation7 + $0xf0] sm:$0xff]  ;;  %v4793_v27 = vld [vmem:[#allocation7 + $0xe8] sm:$0xff] }
  0x60   : > { %4847 = vmatpush.bf16.msra.mxu2 %v4769_v4  ;;  %1009 = vmatpush.bf16.msra.mxu0 %v4769_v4  ;;  %v4262_v28 = vld [vmem:[%s5826_s26 + $0x120] sm:$0xf]  ;;  %v4738_v29 = vld [vmem:[%s5826_s26 + $0x12c] sm:$0xf0]  ;;  %v4736_v30 = vld [vmem:[%s5826_s26 + $0x124] sm:$0xf]  ;;  %p5568_p8 = pneg %p5567_p4 }
  0x61   : > { %4855 = vmatpush.bf16.msra.mxu3 %v4777_v5  ;;  %1098 = vmatpush.bf16.msra.mxu1 %v4777_v5  ;;  %v4264_v31 = vld [vmem:[%s5826_s26 + $0x130] sm:$0xf0]  ;;  %v4263_v32 = vor.u32 %v4738_v29, %v4262_v28  ;;  %v4784_v34 = vld [vmem:[#allocation7 + $0xa0] sm:$0xff]  ;;  %v4742_v37 = vld [vmem:[%s5826_s26 + $0x14c] sm:$0xf0] }
  0x62   : > { %v4267_v33 = vor.u32 %v4736_v30, %v4264_v31  ;;  %v4792_v35 = vld [vmem:[#allocation7 + $0xe0] sm:$0xff]  ;;  %v4280_v39 = vld [vmem:[%s5826_s26 + $0x150] sm:$0xf0]  ;;  %v4783_v42 = vld [vmem:[#allocation7 + $0x98] sm:$0xff]  ;;  %p5573_p9 = pnand %p5572_p11, %p5568_p8 }
  0x63   : > { %v4278_v36 = vld [vmem:[%s5826_s26 + $0x140] sm:$0xf]  ;;  %v4740_v38 = vld [vmem:[%s5826_s26 + $0x144] sm:$0xf]  ;;  %v4791_v43 = vld [vmem:[#allocation7 + $0xd8] sm:$0xff] }
  0x64   : > { %4848 = vmatpush.bf16.msra.mxu2 %v4768_v6  ;;  %1010 = vmatpush.bf16.msra.mxu0 %v4768_v6  ;;  %v4279_v40 = vor.u32 %v4742_v37, %v4278_v36  ;;  %v4283_v41 = vor.u32 %v4740_v38, %v4280_v39  ;;  %v4294_v44 = vld [vmem:[%s5826_s26 + $0x160] sm:$0xf]  ;;  %v4746_v45 = vld [vmem:[%s5826_s26 + $0x16c] sm:$0xf0]  ;;  %v4744_v46 = vld [vmem:[%s5826_s26 + $0x164] sm:$0xf] }
  0x65   : > { %4856 = vmatpush.bf16.msra.mxu3 %v4776_v7  ;;  %1099 = vmatpush.bf16.msra.mxu1 %v4776_v7  ;;  %v4296_v47 = vld [vmem:[%s5826_s26 + $0x170] sm:$0xf0]  ;;  %v4295_v48 = vor.u32 %v4746_v45, %v4294_v44  ;;  %v4310_v52 = vld [vmem:[%s5826_s26 + $0x180] sm:$0xf]  ;;  %v4750_v53 = vld [vmem:[%s5826_s26 + $0x18c] sm:$0xf0] }
  0x66   : > { %v4299_v49 = vor.u32 %v4744_v46, %v4296_v47  ;;  %v4782_v50 = vld [vmem:[#allocation7 + $0x90] sm:$0xff]  ;;  %v4748_v54 = vld [vmem:[%s5826_s26 + $0x184] sm:$0xf]  ;;  %v4311_v56 = vor.u32 %v4750_v53, %v4310_v52  ;;  %v4781_v58 = vld [vmem:[#allocation7 + $0x88] sm:$0xff] }
  0x67   : > { %v4790_v51 = vld [vmem:[#allocation7 + $0xd0] sm:$0xff]  ;;  %v4789_v59 = vld [vmem:[#allocation7 + $0xc8] sm:$0xff]  ;;  %v4326_v60 = vld [vmem:[%s5826_s26 + $0x1a0] sm:$0xf] }
  0x68   : > { %4849 = vmatpush.bf16.msra.mxu2 %v4767_v8  ;;  %1011 = vmatpush.bf16.msra.mxu0 %v4767_v8  ;;  %v4312_v55 = vld [vmem:[%s5826_s26 + $0x190] sm:$0xf0]  ;;  %v4754_v61 = vld [vmem:[%s5826_s26 + $0x1ac] sm:$0xf0]  ;;  %v4752_v62 = vld [vmem:[%s5826_s26 + $0x1a4] sm:$0xf] }
  0x69   : > { %4857 = vmatpush.bf16.msra.mxu3 %v4775_v9  ;;  %1100 = vmatpush.bf16.msra.mxu1 %v4775_v9  ;;  %v4315_v57 = vor.u32 %v4748_v54, %v4312_v55  ;;  %v4328_v63 = vld [vmem:[%s5826_s26 + $0x1b0] sm:$0xf0]  ;;  %v4327_v0 = vor.u32 %v4754_v61, %v4326_v60  ;;  %v4780_v2 = vld [vmem:[#allocation7 + $0x80] sm:$0xff]  ;;  %v4702_v5 = vld [vmem:[%s5826_s26 + $0xc] sm:$0xf0] }
  0x6a   : > { %v4331_v1 = vor.u32 %v4752_v62, %v4328_v63  ;;  %v4788_v3 = vld [vmem:[#allocation7 + $0xc0] sm:$0xff]  ;;  %v4120_v7 = vld [vmem:[%s5826_s26 + $0x10] sm:$0xf0]  ;;  %v4762_v17 = vld [vmem:[%s5826_s26 + $0x1ec] sm:$0xf0] }
  0x6b   : > { %v4118_v4 = vld [vmem:[%s5826_s26] sm:$0xf]  ;;  %v4700_v6 = vld [vmem:[%s5826_s26 + $0x4] sm:$0xf]  ;;  %v4360_v19 = vld [vmem:[%s5826_s26 + $0x1f0] sm:$0xf0] }
  0x6c   : > { %4850 = vmatpush.bf16.msra.mxu2 %v4766_v10  ;;  %1012 = vmatpush.bf16.msra.mxu0 %v4766_v10  ;;  %v4119_v8 = vor.u32 %v4702_v5, %v4118_v4  ;;  %v4123_v9 = vor.u32 %v4700_v6, %v4120_v7  ;;  %v4342_v10 = vld [vmem:[%s5826_s26 + $0x1c0] sm:$0xf]  ;;  %v4760_v18 = vld [vmem:[%s5826_s26 + $0x1e4] sm:$0xf]  ;;  %v4810_v28 = vld [vmem:[#allocation8 + $0x74] sm:$0xf] }
  0x6d   : > { %4858 = vmatpush.bf16.msra.mxu3 %v4774_v11  ;;  %1101 = vmatpush.bf16.msra.mxu1 %v4774_v11  ;;  %v4758_v11 = vld [vmem:[%s5826_s26 + $0x1cc] sm:$0xf0]  ;;  %v4358_v16 = vld [vmem:[%s5826_s26 + $0x1e0] sm:$0xf]  ;;  %v4560_v29 = vld [vmem:[#allocation8 + $0x78] sm:$0xf0] }
  0x6e   : > { %v4563_v30 = vor.u32 %v4810_v28, %v4560_v29  ;;  %v4126_v31 = vld [vmem:[%s5826_s26 + $0x8] sm:$0xf]  ;;  %v4558_v37 = vld [vmem:[#allocation8 + $0x70] sm:$0xf]  ;;  %v4811_v38 = vld [vmem:[#allocation8 + $0x74] sm:$0xf0] }
  0x6f   : > { %v4559_v39 = vor.u32 %v4811_v38, %v4558_v37  ;;  %v4152_v44 = vld [vmem:[%s5826_s26 + $0x50] sm:$0xf0]  ;;  %v4142_v52 = vld [vmem:[%s5826_s26 + $0x28] sm:$0xf]  ;;  %v4707_v53 = vld [vmem:[%s5826_s26 + $0x34] sm:$0xf0] }
  0x70   : > { %4851 = vmatpush.bf16.msra.mxu2 %v4765_v12  ;;  %1013 = vmatpush.bf16.msra.mxu0 %v4765_v12  ;;  %v4756_v12 = vld [vmem:[%s5826_s26 + $0x1c4] sm:$0xf]  ;;  %v4705_v54 = vld [vmem:[%s5826_s26 + $0x2c] sm:$0xf]  ;;  %v4144_v55 = vld [vmem:[%s5826_s26 + $0x38] sm:$0xf0] }
  0x71   : > { %4859 = vmatpush.bf16.msra.mxu3 %v4773_v13  ;;  %1102 = vmatpush.bf16.msra.mxu1 %v4773_v13  ;;  %v4344_v13 = vld [vmem:[%s5826_s26 + $0x1d0] sm:$0xf0]  ;;  %v4147_v60 = vor.u32 %v4705_v54, %v4144_v55  ;;  %v4550_v61 = vld [vmem:[#allocation8 + $0x60] sm:$0xf]  ;;  %v4809_v62 = vld [vmem:[#allocation8 + $0x64] sm:$0xf0] }
  0x72   : > { %v4551_v63 = vor.u32 %v4809_v62, %v4550_v61  ;;  %v4168_v4 = vld [vmem:[%s5826_s26 + $0x70] sm:$0xf0]  ;;  %v4715_v37 = vld [vmem:[%s5826_s26 + $0x74] sm:$0xf0]  ;;  %v4713_v38 = vld [vmem:[%s5826_s26 + $0x6c] sm:$0xf] }
  0x73   : > { %v4184_v28 = vld [vmem:[%s5826_s26 + $0x90] sm:$0xf0]  ;;  %v4190_v62 = vld [vmem:[%s5826_s26 + $0x88] sm:$0xf] }
  0x74   : > { %4852 = vmatpush.bf16.msra.mxu2 %v4764_v14  ;;  %1014 = vmatpush.bf16.msra.mxu0 %v4764_v14  ;;  %v4343_v14 = vor.u32 %v4758_v11, %v4342_v10  ;;  %v4544_v10 = vld [vmem:[#allocation8 + $0x58] sm:$0xf0] }
  0x75   : > { %4860 = vmatpush.bf16.msra.mxu3 %v4772_v15  ;;  %1103 = vmatpush.bf16.msra.mxu1 %v4772_v15  ;;  %v4347_v15 = vor.u32 %v4756_v12, %v4344_v13  ;;  %v4158_v12 = vld [vmem:[%s5826_s26 + $0x48] sm:$0xf]  ;;  %v4711_v13 = vld [vmem:[%s5826_s26 + $0x54] sm:$0xf0] }
  0x77   : > { %1055 = vmatmul.bf16.vlgmr.msra.gmra.mxu2 %v4247_v22  ;;  %1015 = vmatmul.bf16.vlgmr.msra.gmra.mxu0 %v4119_v8  ;;  %v4704_v22 = vld [vmem:[%s5826_s26 + $0x24] sm:$0xf] }
  0x78   : > { %1185 = vmatpush.bf16.msrb.mxu2 %v4787_v20  ;;  %1144 = vmatmul.bf16.vlgmr.msra.gmra.mxu3 %v4251_v23  ;;  %v4134_v20 = vld [vmem:[%s5826_s26 + $0x20] sm:$0xf] }
  0x79   : > { %1274 = vmatpush.bf16.msrb.mxu3 %v4795_v21  ;;  %1104 = vmatmul.bf16.vlgmr.msra.gmra.mxu1 %v4123_v9  ;;  %v4706_v21 = vld [vmem:[%s5826_s26 + $0x2c] sm:$0xf0]  ;;  %v4806_v9 = vld [vmem:[#allocation8 + $0x54] sm:$0xf] }
  0x7a   : > { %v4135_v23 = vor.u32 %v4706_v21, %v4134_v20  ;;  %1666 = vmatpush.bf16.msrb.mxu1 %v4563_v30  ;;  %1577 = vmatpush.bf16.msrb.mxu0 %v4559_v39  ;;  %v4547_v11 = vor.u32 %v4806_v9, %v4544_v10  ;;  %v4542_v21 = vld [vmem:[#allocation8 + $0x50] sm:$0xf]  ;;  %v4176_v39 = vld [vmem:[%s5826_s26 + $0x78] sm:$0xf0]  ;;  %v4803_v9 = vld [vmem:[#allocation8 + $0x34] sm:$0xf0] }
  0x7c   : > { %1186 = vmatpush.bf16.msrb.mxu2 %v4786_v24  ;;  %v4136_v24 = vld [vmem:[%s5826_s26 + $0x30] sm:$0xf0] }
  0x7d   : > { %1275 = vmatpush.bf16.msrb.mxu3 %v4794_v25  ;;  %v4139_v25 = vor.u32 %v4704_v22, %v4136_v24  ;;  %v4807_v22 = vld [vmem:[#allocation8 + $0x54] sm:$0xf0]  ;;  %v4182_v24 = vld [vmem:[%s5826_s26 + $0x80] sm:$0xf] }
  0x7e   : > { %1578 = vmatpush.bf16.msrb.mxu0 %v4551_v63  ;;  %v4719_v63 = vld [vmem:[%s5826_s26 + $0x94] sm:$0xf0] }
  0x80   : > { %1187 = vmatpush.bf16.msrb.mxu2 %v4785_v26  ;;  %v4359_v26 = vor.u32 %v4762_v17, %v4358_v16 }
  0x81   : > { %1276 = vmatpush.bf16.msrb.mxu3 %v4793_v27  ;;  %v4363_v27 = vor.u32 %v4760_v18, %v4360_v19  ;;  %v4159_v19 = vor.u32 %v4711_v13, %v4158_v12  ;;  %v4726_v12 = vld [vmem:[%s5826_s26 + $0xcc] sm:$0xf0]  ;;  %v4724_v13 = vld [vmem:[%s5826_s26 + $0xc4] sm:$0xf] }
  0x84   : > { %1188 = vmatpush.bf16.msrb.mxu2 %v4784_v34  ;;  %v4128_v34 = vld [vmem:[%s5826_s26 + $0x18] sm:$0xf0] }
  0x85   : > { %1277 = vmatpush.bf16.msrb.mxu3 %v4792_v35 }
  0x87   : > { %1060 = vmatmul.bf16.gmra.mxu2 %v4263_v32  ;;  %1020 = vmatmul.bf16.gmra.mxu0 %v4135_v23  ;;  %v4703_v32 = vld [vmem:[%s5826_s26 + $0x14] sm:$0xf0]  ;;  %v4543_v23 = vor.u32 %v4807_v22, %v4542_v21  ;;  %v4800_v21 = vld [vmem:[#allocation8 + $0x24] sm:$0xf]  ;;  %v4520_v22 = vld [vmem:[#allocation8 + $0x28] sm:$0xf0] }
  0x88   : > { %1149 = vmatmul.bf16.gmra.mxu3 %v4267_v33  ;;  %1189 = vmatpush.bf16.msrb.mxu2 %v4783_v42  ;;  %v4701_v33 = vld [vmem:[%s5826_s26 + $0xc] sm:$0xf]  ;;  %v4127_v35 = vor.u32 %v4703_v32, %v4126_v31  ;;  %v4708_v42 = vld [vmem:[%s5826_s26 + $0x44] sm:$0xf] }
  0x89   : > { %1278 = vmatpush.bf16.msrb.mxu3 %v4791_v43  ;;  %1109 = vmatmul.bf16.gmra.mxu1 %v4139_v25  ;;  %v4131_v36 = vor.u32 %v4701_v33, %v4128_v34  ;;  %v4155_v47 = vor.u32 %v4708_v42, %v4152_v44  ;;  %v4718_v25 = vld [vmem:[%s5826_s26 + $0x8c] sm:$0xf0]  ;;  %v4804_v33 = vld [vmem:[#allocation8 + $0x44] sm:$0xf]  ;;  %v4536_v34 = vld [vmem:[#allocation8 + $0x48] sm:$0xf0]  ;;  %v4179_v44 = vor.u32 %v4713_v38, %v4176_v39 }
  0x8a   : > { %1579 = vmatpush.bf16.msrb.mxu0 %v4543_v23  ;;  %v4523_v23 = vor.u32 %v4800_v21, %v4520_v22  ;;  %v4730_v38 = vld [vmem:[%s5826_s26 + $0xec] sm:$0xf0]  ;;  %v4728_v39 = vld [vmem:[%s5826_s26 + $0xe4] sm:$0xf] }
  0x8c   : > { %1190 = vmatpush.bf16.msrb.mxu2 %v4782_v50  ;;  %v4552_v50 = vld [vmem:[#allocation8 + $0x68] sm:$0xf0] }
  0x8d   : > { %1279 = vmatpush.bf16.msrb.mxu3 %v4790_v51 }
  0x90   : > { %1191 = vmatpush.bf16.msrb.mxu2 %v4781_v58 }
  0x91   : > { %1280 = vmatpush.bf16.msrb.mxu3 %v4789_v59  ;;  %v4143_v59 = vor.u32 %v4707_v53, %v4142_v52  ;;  %v4200_v53 = vld [vmem:[%s5826_s26 + $0xb0] sm:$0xf0] }
  0x94   : > { %1192 = vmatpush.bf16.msrb.mxu2 %v4780_v2  ;;  %v4712_v2 = vld [vmem:[%s5826_s26 + $0x64] sm:$0xf] }
  0x95   : > { %1281 = vmatpush.bf16.msrb.mxu3 %v4788_v3  ;;  %v4171_v7 = vor.u32 %v4712_v2, %v4168_v4 }
  0x97   : > { %1065 = vmatmul.bf16.gmra.mxu2 %v4279_v40  ;;  %v4150_v40 = vld [vmem:[%s5826_s26 + $0x40] sm:$0xf] }
  0x98   : > { %1154 = vmatmul.bf16.gmra.mxu3 %v4283_v41  ;;  %v4710_v41 = vld [vmem:[%s5826_s26 + $0x4c] sm:$0xf0] }
  0x99   : > { %v4151_v43 = vor.u32 %v4710_v41, %v4150_v40  ;;  %1114 = vmatmul.bf16.gmra.mxu1 %v4155_v47 }
  0x9b   : > { %1025 = vmatmul.bf16.gmra.mxu0 %v4151_v43 }
  0xa7   : > { %1070 = vmatmul.bf16.gmra.mxu2 %v4295_v48 }
  0xa8   : > { %1159 = vmatmul.bf16.gmra.mxu3 %v4299_v49  ;;  %v4808_v49 = vld [vmem:[#allocation8 + $0x64] sm:$0xf] }
  0xa9   : > { %v4555_v51 = vor.u32 %v4808_v49, %v4552_v50  ;;  %1119 = vmatmul.bf16.gmra.mxu1 %v4171_v7  ;;  %v4198_v49 = vld [vmem:[%s5826_s26 + $0xa0] sm:$0xf]  ;;  %v4722_v50 = vld [vmem:[%s5826_s26 + $0xac] sm:$0xf0] }
  0xaa   : > { %v4199_v52 = vor.u32 %v4722_v50, %v4198_v49  ;;  %v4526_v7 = vld [vmem:[#allocation8 + $0x30] sm:$0xf]  ;;  %v4512_v49 = vld [vmem:[#allocation8 + $0x18] sm:$0xf0] }
  0xab   : > { %1667 = vmatpush.bf16.msrb.mxu1 %v4555_v51  ;;  %v4720_v51 = vld [vmem:[%s5826_s26 + $0xa4] sm:$0xf]  ;;  %v4527_v10 = vor.u32 %v4803_v9, %v4526_v7  ;;  %v4238_v7 = vld [vmem:[%s5826_s26 + $0xe8] sm:$0xf] }
  0xac   : > { %v4796_v9 = vld [vmem:[#allocation8 + $0x4] sm:$0xf] }
  0xaf   : > { %1668 = vmatpush.bf16.msrb.mxu1 %v4547_v11  ;;  %v4214_v11 = vld [vmem:[%s5826_s26 + $0xc0] sm:$0xf] }
  0xb7   : > { %1075 = vmatmul.bf16.gmra.mxu2 %v4311_v56 }
  0xb8   : > { %1164 = vmatmul.bf16.gmra.mxu3 %v4315_v57 }
  0xc7   : > { %1080 = vmatmul.bf16.gmra.mxu2 %v4327_v0  ;;  %v4166_v0 = vld [vmem:[%s5826_s26 + $0x60] sm:$0xf] }
  0xc8   : > { %1169 = vmatmul.bf16.gmra.mxu3 %v4331_v1  ;;  %v4714_v1 = vld [vmem:[%s5826_s26 + $0x6c] sm:$0xf0] }
  0xc9   : > { %v4167_v3 = vor.u32 %v4714_v1, %v4166_v0  ;;  %v4717_v0 = vld [vmem:[%s5826_s26 + $0x8c] sm:$0xf]  ;;  %v4192_v1 = vld [vmem:[%s5826_s26 + $0x98] sm:$0xf0] }
  0xcb   : > { %1030 = vmatmul.bf16.gmra.mxu0 %v4167_v3 }
  0xd7   : > { %1085 = vmatmul.bf16.gmra.mxu2 %v4343_v14  ;;  %v4709_v14 = vld [vmem:[%s5826_s26 + $0x4c] sm:$0xf] }
  0xd8   : > { %1174 = vmatmul.bf16.gmra.mxu3 %v4347_v15  ;;  %v4160_v15 = vld [vmem:[%s5826_s26 + $0x58] sm:$0xf0] }
  0xd9   : > { %v4163_v20 = vor.u32 %v4709_v14, %v4160_v15  ;;  %v4215_v14 = vor.u32 %v4726_v12, %v4214_v11  ;;  %v4216_v15 = vld [vmem:[%s5826_s26 + $0xd0] sm:$0xf0]  ;;  %v4731_v11 = vld [vmem:[%s5826_s26 + $0xf4] sm:$0xf0]  ;;  %v4729_v12 = vld [vmem:[%s5826_s26 + $0xec] sm:$0xf] }
  0xda   : > { %v4239_v22 = vor.u32 %v4731_v11, %v4238_v7 }
  0xe7   : > { %1090 = vmatmul.bf16.gmra.mxu2 %v4359_v26  ;;  %v4716_v26 = vld [vmem:[%s5826_s26 + $0x84] sm:$0xf] }
  0xe8   : > { %1179 = vmatmul.bf16.gmra.mxu3 %v4363_v27  ;;  %v4183_v27 = vor.u32 %v4718_v25, %v4182_v24  ;;  %v4187_v31 = vor.u32 %v4716_v26, %v4184_v28  ;;  %v4206_v24 = vld [vmem:[%s5826_s26 + $0xa8] sm:$0xf]  ;;  %v4723_v25 = vld [vmem:[%s5826_s26 + $0xb4] sm:$0xf0]  ;;  %v4721_v26 = vld [vmem:[%s5826_s26 + $0xac] sm:$0xf] }
  0xea   : > { %1035 = vmatmul.bf16.gmra.mxu0 %v4183_v27  ;;  %1124 = vmatmul.bf16.gmra.mxu1 %v4187_v31  ;;  %v4208_v27 = vld [vmem:[%s5826_s26 + $0xb8] sm:$0xf0]  ;;  %v4207_v31 = vor.u32 %v4723_v25, %v4206_v24  ;;  %v4502_v24 = vld [vmem:[#allocation8] sm:$0xf]  ;;  %v4797_v25 = vld [vmem:[#allocation8 + $0x4] sm:$0xf0] }
  0xf7   : > { %1193 = vmatmul.bf16.vlgmr.msrb.gmra.mxu2 %v4127_v35  ;;  %v4539_v35 = vor.u32 %v4804_v33, %v4536_v34  ;;  %v4211_v33 = vor.u32 %v4721_v26, %v4208_v27  ;;  %v4518_v34 = vld [vmem:[#allocation8 + $0x20] sm:$0xf]  ;;  %v4503_v26 = vor.u32 %v4797_v25, %v4502_v24  ;;  %v4741_v24 = vld [vmem:[%s5826_s26 + $0x14c] sm:$0xf]  ;;  %v4288_v25 = vld [vmem:[%s5826_s26 + $0x158] sm:$0xf0] }
  0xf8   : > { %1282 = vmatmul.bf16.vlgmr.msrb.gmra.mxu3 %v4131_v36  ;;  %v4174_v36 = vld [vmem:[%s5826_s26 + $0x68] sm:$0xf] }
  0xf9   : > { %1669 = vmatpush.bf16.msrb.mxu1 %v4539_v35  ;;  %v4175_v43 = vor.u32 %v4715_v37, %v4174_v36  ;;  %v4801_v35 = vld [vmem:[#allocation8 + $0x24] sm:$0xf0]  ;;  %v4230_v37 = vld [vmem:[%s5826_s26 + $0xe0] sm:$0xf] }
  0xfa   : > { %v1056_v45 = vpop.f32.mrf.mxu2  ;;  %1040 = vmatmul.bf16.gmra.mxu0 %v4199_v52  ;;  %v4519_v36 = vor.u32 %v4801_v35, %v4518_v34  ;;  %v4727_v52 = vld [vmem:[%s5826_s26 + $0xd4] sm:$0xf0]  ;;  %v4254_v34 = vld [vmem:[%s5826_s26 + $0x108] sm:$0xf] }
  0xfb   : > { %v1145_v46 = vpop.f32.mrf.mxu3  ;;  %v4735_v35 = vld [vmem:[%s5826_s26 + $0x114] sm:$0xf0] }
  0xfc   : > { %v5898_v48 = vadd.f32 %v1145_v46, %v1056_v45  ;;  %v4534_v45 = vld [vmem:[#allocation8 + $0x40] sm:$0xf]  ;;  %v4805_v46 = vld [vmem:[#allocation8 + $0x44] sm:$0xf0] }
  0xfd   : > { %v4535_v47 = vor.u32 %v4805_v46, %v4534_v45 }
  0xff   : > { %1580 = vmatpush.bf16.msrb.mxu0 %v4535_v47  ;;  %v4798_v47 = vld [vmem:[#allocation8 + $0x14] sm:$0xf] }
 0x100   : > { %v4515_v50 = vor.u32 %v4798_v47, %v4512_v49 }
 0x102   : > { %v1058_v56 = vpop.f32.mrf.mxu2 }
 0x103   : > { %v1147_v57 = vpop.f32.mrf.mxu3  ;;  %1581 = vmatpush.bf16.msrb.mxu0 %v4527_v10  ;;  %v4504_v10 = vld [vmem:[#allocation8 + $0x8] sm:$0xf0] }
 0x104   : > { %v5904_v58 = vadd.f32 %v1147_v57, %v1058_v56  ;;  %v4203_v56 = vor.u32 %v4720_v51, %v4200_v53  ;;  %v4222_v51 = vld [vmem:[%s5826_s26 + $0xc8] sm:$0xf]  ;;  %v4725_v53 = vld [vmem:[%s5826_s26 + $0xcc] sm:$0xf] }
 0x106   : > { %1129 = vmatmul.bf16.gmra.mxu1 %v4203_v56 }
 0x107   : > { %1198 = vmatmul.bf16.gmra.mxu2 %v4143_v59  ;;  %v4802_v59 = vld [vmem:[#allocation8 + $0x34] sm:$0xf]  ;;  %1582 = vmatpush.bf16.msrb.mxu0 %v4519_v36  ;;  %v4733_v36 = vld [vmem:[%s5826_s26 + $0x10c] sm:$0xf] }
 0x108   : > { %1287 = vmatmul.bf16.gmra.mxu3 %v4147_v60  ;;  %v4528_v60 = vld [vmem:[#allocation8 + $0x38] sm:$0xf0] }
 0x109   : > { %v4531_v61 = vor.u32 %v4802_v59, %v4528_v60  ;;  %v4223_v60 = vor.u32 %v4727_v52, %v4222_v51 }
 0x10a   : > { %v1061_v5 = vpop.f32.mrf.mxu2  ;;  %1045 = vmatmul.bf16.gmra.mxu0 %v4215_v14  ;;  %v4507_v14 = vor.u32 %v4796_v9, %v4504_v10 }
 0x10b   : > { %v1150_v6 = vpop.f32.mrf.mxu3  ;;  %1670 = vmatpush.bf16.msrb.mxu1 %v4531_v61 }
 0x10c   : > { %v5910_v8 = vadd.f32 %v1150_v6, %v1061_v5  ;;  %v4191_v5 = vor.u32 %v4719_v63, %v4190_v62  ;;  %v4195_v6 = vor.u32 %v4717_v0, %v4192_v1  ;;  %v1016_v62 = vpop.f32.mrf.mxu0  ;;  %v1105_v63 = vpop.f32.mrf.mxu1  ;;  %v4510_v0 = vld [vmem:[#allocation8 + $0x10] sm:$0xf]  ;;  %v4799_v1 = vld [vmem:[#allocation8 + $0x14] sm:$0xf0] }
 0x10d   : > { %v1106_v47 = vadd.f32 %v1105_v63, %v1016_v62 }
 0x10f   : > { %1671 = vmatpush.bf16.msrb.mxu1 %v4523_v23 }
 0x112   : > { %v1063_v16 = vpop.f32.mrf.mxu2 }
 0x113   : > { %v1152_v17 = vpop.f32.mrf.mxu3  ;;  %1672 = vmatpush.bf16.msrb.mxu1 %v4515_v50 }
 0x114   : > { %v5916_v18 = vadd.f32 %v1152_v17, %v1063_v16 }
 0x117   : > { %1203 = vmatmul.bf16.gmra.mxu2 %v4159_v19  ;;  %v4219_v19 = vor.u32 %v4724_v13, %v4216_v15  ;;  %v4240_v13 = vld [vmem:[%s5826_s26 + $0xf8] sm:$0xf0]  ;;  %v1018_v15 = vpop.f32.mrf.mxu0  ;;  %1673 = vmatpush.bf16.msrb.mxu1 %v4507_v14 }
 0x118   : > { %1292 = vmatmul.bf16.gmra.mxu3 %v4163_v20  ;;  %v4243_v23 = vor.u32 %v4729_v12, %v4240_v13 }
 0x119   : > { %1134 = vmatmul.bf16.gmra.mxu1 %v4219_v19 }
 0x11a   : > { %v1066_v29 = vpop.f32.mrf.mxu2 }
 0x11b   : > { %v1155_v30 = vpop.f32.mrf.mxu3 }
 0x11c   : > { %v5922_v32 = vadd.f32 %v1155_v30, %v1066_v29 }
 0x122   : > { %v1068_v40 = vpop.f32.mrf.mxu2 }
 0x123   : > { %v1157_v41 = vpop.f32.mrf.mxu3 }
 0x124   : > { %v5928_v42 = vadd.f32 %v1157_v41, %v1068_v40  ;;  %v4231_v40 = vor.u32 %v4730_v38, %v4230_v37  ;;  %v4232_v41 = vld [vmem:[%s5826_s26 + $0xf0] sm:$0xf0]  ;;  %v4256_v37 = vld [vmem:[%s5826_s26 + $0x118] sm:$0xf0] }
 0x125   : > { %v4235_v45 = vor.u32 %v4728_v39, %v4232_v41  ;;  %v4255_v41 = vor.u32 %v4735_v35, %v4254_v34 }
 0x126   : > { %1050 = vmatmul.bf16.gmra.mxu0 %v4231_v40 }
 0x127   : > { %1208 = vmatmul.bf16.gmra.mxu2 %v4175_v43 }
 0x128   : > { %1297 = vmatmul.bf16.gmra.mxu3 %v4179_v44 }
 0x129   : > { %1139 = vmatmul.bf16.gmra.mxu1 %v4235_v45 }
 0x12a   : > { %v1071_v54 = vpop.f32.mrf.mxu2 }
 0x12b   : > { %v1160_v55 = vpop.f32.mrf.mxu3 }
 0x12c   : > { %v5934_v57 = vadd.f32 %v1160_v55, %v1071_v54  ;;  %v4224_v54 = vld [vmem:[%s5826_s26 + $0xd8] sm:$0xf0] }
 0x12d   : > { %v4227_v61 = vor.u32 %v4725_v53, %v4224_v54  ;;  %v4270_v54 = vld [vmem:[%s5826_s26 + $0x128] sm:$0xf] }
 0x132   : > { %v1073_v2 = vpop.f32.mrf.mxu2 }
 0x133   : > { %v1162_v3 = vpop.f32.mrf.mxu3 }
 0x134   : > { %v5940_v4 = vadd.f32 %v1162_v3, %v1073_v2  ;;  %v4511_v2 = vor.u32 %v4799_v1, %v4510_v0 }
 0x136   : > { %1583 = vmatpush.bf16.msrb.mxu0 %v4511_v2 }
 0x137   : > { %1213 = vmatmul.bf16.gmra.mxu2 %v4191_v5 }
 0x138   : > { %1302 = vmatmul.bf16.gmra.mxu3 %v4195_v6 }
 0x13a   : > { %v1076_v16 = vpop.f32.mrf.mxu2  ;;  %1584 = vmatpush.bf16.msrb.mxu0 %v4503_v26 }
 0x13b   : > { %v1165_v17 = vpop.f32.mrf.mxu3 }
 0x13c   : > { %v5946_v20 = vadd.f32 %v1165_v17, %v1076_v16  ;;  %v1107_v16 = vpop.f32.mrf.mxu1 }
 0x142   : > { %v1078_v28 = vpop.f32.mrf.mxu2 }
 0x143   : > { %v1167_v29 = vpop.f32.mrf.mxu3 }
 0x144   : > { %v5952_v30 = vadd.f32 %v1167_v29, %v1078_v28 }
 0x147   : > { %1218 = vmatmul.bf16.gmra.mxu2 %v4207_v31  ;;  %v1021_v31 = vpop.f32.mrf.mxu0 }
 0x148   : > { %1307 = vmatmul.bf16.gmra.mxu3 %v4211_v33  ;;  %v1110_v33 = vpop.f32.mrf.mxu1 }
 0x149   : > { %v1111_v12 = vadd.f32 %v1110_v33, %v1021_v31  ;;  %v4291_v33 = vor.u32 %v4741_v24, %v4288_v25  ;;  %v4318_v24 = vld [vmem:[%s5826_s26 + $0x188] sm:$0xf] }
 0x14a   : > { %v1081_v43 = vpop.f32.mrf.mxu2 }
 0x14b   : > { %v1170_v44 = vpop.f32.mrf.mxu3 }
 0x14c   : > { %v5958_v46 = vadd.f32 %v1170_v44, %v1081_v43  ;;  %v4259_v43 = vor.u32 %v4733_v36, %v4256_v37 }
 0x14f   : > { %v1023_v44 = vpop.f32.mrf.mxu0 }
 0x150   : > { %v1112_v45 = vpop.f32.mrf.mxu1 }
 0x151   : > { %v1113_v26 = vadd.f32 %v1112_v45, %v1023_v44 }
 0x152   : > { %v1083_v55 = vpop.f32.mrf.mxu2 }
 0x153   : > { %v1172_v56 = vpop.f32.mrf.mxu3 }
 0x154   : > { %v5964_v59 = vadd.f32 %v1172_v56, %v1083_v55  ;;  %v4739_v55 = vld [vmem:[%s5826_s26 + $0x134] sm:$0xf0]  ;;  %v4737_v56 = vld [vmem:[%s5826_s26 + $0x12c] sm:$0xf] }
 0x157   : > { %1223 = vmatmul.bf16.gmra.mxu2 %v4223_v60  ;;  %v1026_v52 = vpop.f32.mrf.mxu0  ;;  %v4272_v60 = vld [vmem:[%s5826_s26 + $0x138] sm:$0xf0] }
 0x158   : > { %1312 = vmatmul.bf16.gmra.mxu3 %v4227_v61  ;;  %v1115_v53 = vpop.f32.mrf.mxu1  ;;  %v1108_v61 = vadd.f32 %v1107_v16, %v1018_v15  ;;  %v4275_v7 = vor.u32 %v4737_v56, %v4272_v60 }
 0x15a   : > { %v1086_v3 = vpop.f32.mrf.mxu2 }
 0x15b   : > { %v1175_v5 = vpop.f32.mrf.mxu3 }
 0x15c   : > { %v5966_v6 = vadd.f32 %v1175_v5, %v1086_v3  ;;  %v4271_v5 = vor.u32 %v4739_v55, %v4270_v54 }
 0x15f   : > { %v1028_v63 = vpop.f32.mrf.mxu0 }
 0x160   : > { %v1117_v11 = vpop.f32.mrf.mxu1 }
 0x161   : > { %v1118_v60 = vadd.f32 %v1117_v11, %v1028_v63 }
 0x162   : > { %v1088_v17 = vpop.f32.mrf.mxu2 }
 0x163   : > { %v1177_v19 = vpop.f32.mrf.mxu3 }
 0x164   : > { %v5972_v21 = vadd.f32 %v1177_v19, %v1088_v17 }
 0x167   : > { %1228 = vmatmul.bf16.gmra.mxu2 %v4239_v22  ;;  %v4286_v22 = vld [vmem:[%s5826_s26 + $0x148] sm:$0xf] }
 0x168   : > { %1317 = vmatmul.bf16.gmra.mxu3 %v4243_v23  ;;  %v4743_v23 = vld [vmem:[%s5826_s26 + $0x154] sm:$0xf0]  ;;  %v1120_v34 = vpop.f32.mrf.mxu1 }
 0x169   : > { %v4287_v31 = vor.u32 %v4743_v23, %v4286_v22 }
 0x16a   : > { %v1091_v27 = vpop.f32.mrf.mxu2 }
 0x16b   : > { %v1180_v28 = vpop.f32.mrf.mxu3 }
 0x16c   : > { %v5974_v29 = vadd.f32 %v1180_v28, %v1091_v27  ;;  %v1031_v28 = vpop.f32.mrf.mxu0 }
 0x170   : > { %v1122_v55 = vpop.f32.mrf.mxu1 }
 0x172   : > { %v1093_v38 = vpop.f32.mrf.mxu2 }
 0x173   : > { %v1182_v39 = vpop.f32.mrf.mxu3 }
 0x174   : > { %v5980_v40 = vadd.f32 %v1182_v39, %v1093_v38  ;;  %v1033_v54 = vpop.f32.mrf.mxu0 }
 0x175   : > { %v1123_v23 = vadd.f32 %v1122_v55, %v1033_v54 }
 0x177   : > { %1233 = vmatmul.bf16.gmra.mxu2 %v4255_v41 }
 0x178   : > { %1322 = vmatmul.bf16.gmra.mxu3 %v4259_v43  ;;  %v1116_v43 = vadd.f32 %v1115_v53, %v1026_v52  ;;  %v4745_v52 = vld [vmem:[%s5826_s26 + $0x16c] sm:$0xf]  ;;  %v4304_v53 = vld [vmem:[%s5826_s26 + $0x178] sm:$0xf0] }
 0x17a   : > { %v1194_v49 = vpop.f32.mrf.mxu2 }
 0x17b   : > { %v1283_v50 = vpop.f32.mrf.mxu3  ;;  %v1195_v51 = vadd.f32 %v1194_v49, %v1106_v47 }
 0x17d   : > { %v1284_v0 = vadd.f32 %v1283_v50, %v1195_v51 }
 0x17f   : > { %v1395_v9 = vmul.f32 0.01, %v1284_v0  ;;  %vm1363_vm0 = vcmp.gt.f32.partialorder %v1284_v0, 0.0 }
 0x181   : > { %v1427_v13 = vsel %vm1363_vm0, %v1284_v0, %v1395_v9  ;;  %v4747_v0 = vld [vmem:[%s5826_s26 + $0x174] sm:$0xf0]  ;;  %v4307_v9 = vor.u32 %v4745_v52, %v4304_v53  ;;  %v4753_v52 = vld [vmem:[%s5826_s26 + $0x1ac] sm:$0xf]  ;;  %v4336_v53 = vld [vmem:[%s5826_s26 + $0x1b8] sm:$0xf0] }
 0x182   : > { %v1196_v1 = vpop.f32.mrf.mxu2 }
 0x183   : > { %v1285_v2 = vpop.f32.mrf.mxu3  ;;  %v1197_v3 = vadd.f32 %v1196_v1, %v1108_v61  ;;  %v4302_v61 = vld [vmem:[%s5826_s26 + $0x168] sm:$0xf] }
 0x185   : > { %v1286_v10 = vadd.f32 %v1285_v2, %v1197_v3 }
 0x187   : > { %vm1364_vm1 = vcmp.gt.f32.partialorder %v1286_v10, 0.0  ;;  %v1396_v62 = vmul.f32 0.01, %v1286_v10  ;;  %1238 = vmatmul.bf16.gmra.mxu2 %v4271_v5 }
 0x188   : > { %1327 = vmatmul.bf16.gmra.mxu3 %v4275_v7  ;;  %v4303_v7 = vor.u32 %v4747_v0, %v4302_v61  ;;  %v4334_v61 = vld [vmem:[%s5826_s26 + $0x1a8] sm:$0xf]  ;;  %v4755_v0 = vld [vmem:[%s5826_s26 + $0x1b4] sm:$0xf0] }
 0x189   : > { %v1428_v14 = vsel %vm1364_vm1, %v1286_v10, %v1396_v62  ;;  %v1036_v62 = vpop.f32.mrf.mxu0 }
 0x18a   : > { %v1199_v15 = vpop.f32.mrf.mxu2  ;;  %v1459_v17 = vpack.c.bf16 %v1428_v14, %v1427_v13  ;;  %v1121_v14 = vadd.f32 %v1120_v34, %v1031_v28  ;;  %v4749_v28 = vld [vmem:[%s5826_s26 + $0x18c] sm:$0xf]  ;;  %v4320_v34 = vld [vmem:[%s5826_s26 + $0x198] sm:$0xf0] }
 0x18b   : > { %v1288_v16 = vpop.f32.mrf.mxu3  ;;  %v1200_v19 = vadd.f32 %v1199_v15, %v1111_v12  ;;  %v1125_v12 = vpop.f32.mrf.mxu1 }
 0x18c   : > { %1585 = vmatmul.bf16.vlgmr.msrb.gmra.mxu0 %v1459_v17  ;;  %1674 = vmatmul.bf16.vlgmr.msrb.gmra.mxu1 %v1459_v17 }
 0x18d   : > { %v1289_v27 = vadd.f32 %v1288_v16, %v1200_v19 }
 0x18f   : > { %v1397_v38 = vmul.f32 0.01, %v1289_v27  ;;  %vm1365_vm2 = vcmp.gt.f32.partialorder %v1289_v27, 0.0 }
 0x191   : > { %v1429_v44 = vsel %vm1365_vm2, %v1289_v27, %v1397_v38  ;;  %v1038_v25 = vpop.f32.mrf.mxu0  ;;  %v4751_v27 = vld [vmem:[%s5826_s26 + $0x194] sm:$0xf0]  ;;  %v4323_v38 = vor.u32 %v4749_v28, %v4320_v34  ;;  %v4757_v28 = vld [vmem:[%s5826_s26 + $0x1cc] sm:$0xf]  ;;  %v4352_v34 = vld [vmem:[%s5826_s26 + $0x1d8] sm:$0xf0] }
 0x192   : > { %v1201_v35 = vpop.f32.mrf.mxu2 }
 0x193   : > { %v1290_v36 = vpop.f32.mrf.mxu3  ;;  %v1202_v37 = vadd.f32 %v1201_v35, %v1113_v26  ;;  %v1127_v26 = vpop.f32.mrf.mxu1 }
 0x195   : > { %v1291_v39 = vadd.f32 %v1290_v36, %v1202_v37 }
 0x197   : > { %v1398_v41 = vmul.f32 0.01, %v1291_v39  ;;  %1243 = vmatmul.bf16.gmra.mxu2 %v4287_v31  ;;  %vm1366_vm3 = vcmp.gt.f32.partialorder %v1291_v39, 0.0 }
 0x198   : > { %1332 = vmatmul.bf16.gmra.mxu3 %v4291_v33  ;;  %v4319_v33 = vor.u32 %v4751_v27, %v4318_v24  ;;  %v4759_v27 = vld [vmem:[%s5826_s26 + $0x1d4] sm:$0xf0] }
 0x199   : > { %v1430_v45 = vsel %vm1366_vm3, %v1291_v39, %v1398_v41 }
 0x19a   : > { %v1204_v47 = vpop.f32.mrf.mxu2  ;;  %v1460_v50 = vpack.c.bf16 %v1430_v45, %v1429_v44 }
 0x19b   : > { %v1293_v49 = vpop.f32.mrf.mxu3  ;;  %v1205_v51 = vadd.f32 %v1204_v47, %v1116_v43  ;;  %v1126_v43 = vadd.f32 %v1125_v12, %v1036_v62  ;;  %v1041_v47 = vpop.f32.mrf.mxu0 }
 0x19c   : > { %1590 = vmatmul.bf16.gmra.mxu0 %v1460_v50  ;;  %1679 = vmatmul.bf16.gmra.mxu1 %v1460_v50 }
 0x19d   : > { %v1294_v56 = vadd.f32 %v1293_v49, %v1205_v51  ;;  %v1130_v49 = vpop.f32.mrf.mxu1 }
 0x19f   : > { %v1399_v3 = vmul.f32 0.01, %v1294_v56  ;;  %vm1367_vm4 = vcmp.gt.f32.partialorder %v1294_v56, 0.0 }
 0x1a1   : > { %v1431_v63 = vsel %vm1367_vm4, %v1294_v56, %v1399_v3 }
 0x1a2   : > { %v1206_v1 = vpop.f32.mrf.mxu2 }
 0x1a3   : > { %v1295_v2 = vpop.f32.mrf.mxu3  ;;  %v1207_v5 = vadd.f32 %v1206_v1, %v1118_v60  ;;  %v1128_v60 = vadd.f32 %v1127_v26, %v1038_v25  ;;  %v4350_v26 = vld [vmem:[%s5826_s26 + $0x1c8] sm:$0xf] }
 0x1a5   : > { %v1296_v10 = vadd.f32 %v1295_v2, %v1207_v5  ;;  %v1132_v62 = vpop.f32.mrf.mxu1 }
 0x1a7   : > { %v1400_v13 = vmul.f32 0.01, %v1296_v10  ;;  %1248 = vmatmul.bf16.gmra.mxu2 %v4303_v7  ;;  %vm1368_vm5 = vcmp.gt.f32.partialorder %v1296_v10, 0.0  ;;  %v4335_v7 = vor.u32 %v4755_v0, %v4334_v61  ;;  %v4366_v61 = vld [vmem:[%s5826_s26 + $0x1e8] sm:$0xf] }
 0x1a8   : > { %1337 = vmatmul.bf16.gmra.mxu3 %v4307_v9  ;;  %v4339_v9 = vor.u32 %v4753_v52, %v4336_v53  ;;  %v4763_v0 = vld [vmem:[%s5826_s26 + $0x1f4] sm:$0xf0]  ;;  %v4761_v52 = vld [vmem:[%s5826_s26 + $0x1ec] sm:$0xf]  ;;  %v4368_v53 = vld [vmem:[%s5826_s26 + $0x1f8] sm:$0xf0] }
 0x1a9   : > { %v1432_v11 = vsel %vm1368_vm5, %v1296_v10, %v1400_v13  ;;  %v1043_v10 = vpop.f32.mrf.mxu0 }
 0x1aa   : > { %v1209_v15 = vpop.f32.mrf.mxu2  ;;  %v1461_v17 = vpack.c.bf16 %v1432_v11, %v1431_v63  ;;  %v1133_v25 = vadd.f32 %v1132_v62, %v1043_v10  ;;  %v4367_v10 = vor.u32 %v4763_v0, %v4366_v61  ;;  %v4371_v62 = vor.u32 %v4761_v52, %v4368_v53 }
 0x1ab   : > { %v1298_v16 = vpop.f32.mrf.mxu3  ;;  %v1210_v19 = vadd.f32 %v1209_v15, %v1121_v14  ;;  %v1131_v14 = vadd.f32 %v1130_v49, %v1041_v47 }
 0x1ac   : > { %1595 = vmatmul.bf16.gmra.mxu0 %v1461_v17  ;;  %1684 = vmatmul.bf16.gmra.mxu1 %v1461_v17 }
 0x1ad   : > { %v1299_v22 = vadd.f32 %v1298_v16, %v1210_v19 }
 0x1af   : > { %v1401_v37 = vmul.f32 0.01, %v1299_v22  ;;  %vm1369_vm6 = vcmp.gt.f32.partialorder %v1299_v22, 0.0 }
 0x1b1   : > { %v1433_v44 = vsel %vm1369_vm6, %v1299_v22, %v1401_v37  ;;  %v1046_v22 = vpop.f32.mrf.mxu0 }
 0x1b2   : > { %v1211_v35 = vpop.f32.mrf.mxu2 }
 0x1b3   : > { %v1300_v36 = vpop.f32.mrf.mxu3  ;;  %v1212_v31 = vadd.f32 %v1211_v35, %v1123_v23  ;;  %v1135_v23 = vpop.f32.mrf.mxu1 }
 0x1b5   : > { %v1301_v39 = vadd.f32 %v1300_v36, %v1212_v31 }
 0x1b7   : > { %v1402_v41 = vmul.f32 0.01, %v1301_v39  ;;  %1253 = vmatmul.bf16.gmra.mxu2 %v4319_v33  ;;  %vm1370_vm7 = vcmp.gt.f32.partialorder %v1301_v39, 0.0  ;;  %v4351_v33 = vor.u32 %v4759_v27, %v4350_v26 }
 0x1b8   : > { %1342 = vmatmul.bf16.gmra.mxu3 %v4323_v38  ;;  %v4355_v38 = vor.u32 %v4757_v28, %v4352_v34 }
 0x1b9   : > { %v1434_v45 = vsel %vm1370_vm7, %v1301_v39, %v1402_v41 }
 0x1ba   : > { %v1214_v50 = vpop.f32.mrf.mxu2  ;;  %v1462_v54 = vpack.c.bf16 %v1434_v45, %v1433_v44  ;;  %v1048_v45 = vpop.f32.mrf.mxu0 }
 0x1bb   : > { %v1303_v51 = vpop.f32.mrf.mxu3  ;;  %v1215_v55 = vadd.f32 %v1214_v50, %v1126_v43  ;;  %v1136_v43 = vadd.f32 %v1135_v23, %v1046_v22  ;;  %v1137_v47 = vpop.f32.mrf.mxu1 }
 0x1bc   : > { %1600 = vmatmul.bf16.gmra.mxu0 %v1462_v54  ;;  %1689 = vmatmul.bf16.gmra.mxu1 %v1462_v54 }
 0x1bd   : > { %v1304_v56 = vadd.f32 %v1303_v51, %v1215_v55 }
 0x1bf   : > { %v1403_v3 = vmul.f32 0.01, %v1304_v56  ;;  %vm1371_vm8 = vcmp.gt.f32.partialorder %v1304_v56, 0.0 }
 0x1c1   : > { %v1435_v63 = vsel %vm1371_vm8, %v1304_v56, %v1403_v3 }
 0x1c2   : > { %v1216_v1 = vpop.f32.mrf.mxu2 }
 0x1c3   : > { %v1305_v2 = vpop.f32.mrf.mxu3  ;;  %v1217_v5 = vadd.f32 %v1216_v1, %v1128_v60  ;;  %v1138_v60 = vadd.f32 %v1137_v47, %v1048_v45  ;;  %v1051_v1 = vpop.f32.mrf.mxu0 }
 0x1c5   : > { %v1306_v12 = vadd.f32 %v1305_v2, %v1217_v5  ;;  %v1140_v2 = vpop.f32.mrf.mxu1 }
 0x1c7   : > { %vm1372_vm9 = vcmp.gt.f32.partialorder %v1306_v12, 0.0  ;;  %v1404_v13 = vmul.f32 0.01, %v1306_v12  ;;  %1258 = vmatmul.bf16.gmra.mxu2 %v4335_v7 }
 0x1c8   : > { %1347 = vmatmul.bf16.gmra.mxu3 %v4339_v9 }
 0x1c9   : > { %v1436_v11 = vsel %vm1372_vm9, %v1306_v12, %v1404_v13 }
 0x1ca   : > { %v1219_v15 = vpop.f32.mrf.mxu2  ;;  %v1463_v17 = vpack.c.bf16 %v1436_v11, %v1435_v63 }
 0x1cb   : > { %v1308_v16 = vpop.f32.mrf.mxu3  ;;  %v1220_v19 = vadd.f32 %v1219_v15, %v1131_v14  ;;  %v1141_v14 = vadd.f32 %v1140_v2, %v1051_v1  ;;  %v1053_v22 = vpop.f32.mrf.mxu0 }
 0x1cc   : > { %1605 = vmatmul.bf16.gmra.mxu0 %v1463_v17  ;;  %1694 = vmatmul.bf16.gmra.mxu1 %v1463_v17 }
 0x1cd   : > { %v1309_v24 = vadd.f32 %v1308_v16, %v1220_v19  ;;  %v1142_v23 = vpop.f32.mrf.mxu1 }
 0x1cf   : > { %v1405_v37 = vmul.f32 0.01, %v1309_v24  ;;  %vm1373_vm10 = vcmp.gt.f32.partialorder %v1309_v24, 0.0 }
 0x1d1   : > { %v1437_v44 = vsel %vm1373_vm10, %v1309_v24, %v1405_v37 }
 0x1d2   : > { %v1221_v35 = vpop.f32.mrf.mxu2 }
 0x1d3   : > { %v1310_v36 = vpop.f32.mrf.mxu3  ;;  %v1222_v31 = vadd.f32 %v1221_v35, %v1133_v25  ;;  %v1143_v25 = vadd.f32 %v1142_v23, %v1053_v22  ;;  %v2107_v22 = vld [vmem:[%s5836_s30] sm:$0xff] }
 0x1d5   : > { %v1311_v39 = vadd.f32 %v1310_v36, %v1222_v31 }
 0x1d7   : > { %vm1374_vm11 = vcmp.gt.f32.partialorder %v1311_v39, 0.0  ;;  %v1406_v41 = vmul.f32 0.01, %v1311_v39  ;;  %1263 = vmatmul.bf16.gmra.mxu2 %v4351_v33 }
 0x1d8   : > { %1352 = vmatmul.bf16.gmra.mxu3 %v4355_v38 }
 0x1d9   : > { %v1438_v49 = vsel %vm1374_vm11, %v1311_v39, %v1406_v41 }
 0x1da   : > { %v1224_v50 = vpop.f32.mrf.mxu2  ;;  %v1464_v54 = vpack.c.bf16 %v1438_v49, %v1437_v44  ;;  %v1491_v49 = vld [vmem:[%s7885_s4] sm:$0x3] }
 0x1db   : > { %v1313_v51 = vpop.f32.mrf.mxu3  ;;  %v1225_v55 = vadd.f32 %v1224_v50, %v1136_v43 }
 0x1dc   : > { %1610 = vmatmul.bf16.gmra.mxu0 %v1464_v54  ;;  %1699 = vmatmul.bf16.gmra.mxu1 %v1464_v54  ;;  %v6015_v54 = vperm.slane %v1491_v49, 0 }
 0x1dd   : > { %v1314_v56 = vadd.f32 %v1313_v51, %v1225_v55  ;;  %v6017_v55 = vperm.slane %v1491_v49, 1 }
 0x1df   : > { %v1407_v7 = vmul.f32 0.01, %v1314_v56  ;;  %vm1375_vm12 = vcmp.gt.f32.partialorder %v1314_v56, 0.0 }
 0x1e1   : > { %v1439_v63 = vsel %vm1375_vm12, %v1314_v56, %v1407_v7  ;;  %v2203_v7 = vlaneseq }
 0x1e2   : > { %v1226_v3 = vpop.f32.mrf.mxu2 }
 0x1e3   : > { %v1315_v5 = vpop.f32.mrf.mxu3  ;;  %v1227_v9 = vadd.f32 %v1226_v3, %v1138_v60 }
 0x1e5   : > { %v1316_v12 = vadd.f32 %v1315_v5, %v1227_v9 }
 0x1e7   : > { %vm1376_vm13 = vcmp.gt.f32.partialorder %v1316_v12, 0.0  ;;  %v1408_v13 = vmul.f32 0.01, %v1316_v12  ;;  %1268 = vmatmul.bf16.gmra.mxu2 %v4367_v10 }
 0x1e8   : > { %1357 = vmatmul.bf16.gmra.mxu3 %v4371_v62 }
 0x1e9   : > { %v1440_v11 = vsel %vm1376_vm13, %v1316_v12, %v1408_v13  ;;  %v6022_v12 = vand.u32 127, %v2203_v7 }
 0x1ea   : > { %v1229_v15 = vpop.f32.mrf.mxu2  ;;  %v1465_v17 = vpack.c.bf16 %v1440_v11, %v1439_v63 }
 0x1eb   : > { %v1318_v16 = vpop.f32.mrf.mxu3  ;;  %v1230_v19 = vadd.f32 %v1229_v15, %v1141_v14  ;;  %8009 = vst [vmem:[#allocation19_spill] sm:$0xff] %v6022_v12  ;;  %vm2205_vm2 = vcmp.lt.s32.totalorder %v6022_v12, 64 }
 0x1ec   : > { %1615 = vmatmul.bf16.gmra.mxu0 %v1465_v17  ;;  %1704 = vmatmul.bf16.gmra.mxu1 %v1465_v17 }
 0x1ed   : > { %v1319_v24 = vadd.f32 %v1318_v16, %v1230_v19 }
 0x1ef   : > { %v1409_v28 = vmul.f32 0.01, %v1319_v24  ;;  %vm1377_vm14 = vcmp.gt.f32.partialorder %v1319_v24, 0.0 }
 0x1f1   : > { %v1441_v37 = vsel %vm1377_vm14, %v1319_v24, %v1409_v28 }
 0x1f2   : > { %v1231_v26 = vpop.f32.mrf.mxu2 }
 0x1f3   : > { %v1320_v27 = vpop.f32.mrf.mxu3  ;;  %v1232_v34 = vadd.f32 %v1231_v26, %v1143_v25 }
 0x1f5   : > { %v1321_v35 = vadd.f32 %v1320_v27, %v1232_v34 }
 0x1f7   : > { %vm1378_vm15 = vcmp.gt.f32.partialorder %v1321_v35, 0.0  ;;  %v1410_v36 = vmul.f32 0.01, %v1321_v35 }
 0x1f9   : > { %v1442_v31 = vsel %vm1378_vm15, %v1321_v35, %v1410_v36 }
 0x1fa   : > { %v1234_v33 = vpop.f32.mrf.mxu2  ;;  %v1466_v39 = vpack.c.bf16 %v1442_v31, %v1441_v37 }
 0x1fb   : > { %v1323_v38 = vpop.f32.mrf.mxu3  ;;  %v1235_v41 = vadd.f32 %v1234_v33, %v5898_v48 }
 0x1fc   : > { %1620 = vmatmul.bf16.gmra.mxu0 %v1466_v39  ;;  %1709 = vmatmul.bf16.gmra.mxu1 %v1466_v39 }
 0x1fd   : > { %v1324_v43 = vadd.f32 %v1323_v38, %v1235_v41 }
 0x1ff   : > { %v1411_v50 = vmul.f32 0.01, %v1324_v43  ;;  %vm1379_vm0 = vcmp.gt.f32.partialorder %v1324_v43, 0.0 }
 0x201   : > { %v1443_v61 = vsel %vm1379_vm0, %v1324_v43, %v1411_v50 }
 0x202   : > { %v1236_v44 = vpop.f32.mrf.mxu2 }
 0x203   : > { %v1325_v45 = vpop.f32.mrf.mxu3  ;;  %v1237_v47 = vadd.f32 %v1236_v44, %v5904_v58 }
 0x205   : > { %v1326_v51 = vadd.f32 %v1325_v45, %v1237_v47 }
 0x207   : > { %vm1380_vm1 = vcmp.gt.f32.partialorder %v1326_v51, 0.0  ;;  %v1412_v56 = vmul.f32 0.01, %v1326_v51 }
 0x209   : > { %v1586_v60 = vpop.f32.mrf.mxu0  ;;  %v1675_v48 = vpop.f32.mrf.mxu1  ;;  %v1444_v0 = vsel %vm1380_vm1, %v1326_v51, %v1412_v56  ;;  %v2108_v56 = vld [vmem:[%s5836_s30 + $0x8] sm:$0xff] }
 0x20a   : > { %v1587_v52 = vadd.f32 %v1586_v60, %v6015_v54  ;;  %v1676_v58 = vadd.f32 %v1675_v48, %v6017_v55  ;;  %v1239_v53 = vpop.f32.mrf.mxu2  ;;  %v1467_v2 = vpack.c.bf16 %v1444_v0, %v1443_v61 }
 0x20b   : > { %v1328_v1 = vpop.f32.mrf.mxu3  ;;  %v1240_v9 = vadd.f32 %v1239_v53, %v5910_v8 }
 0x20c   : > { %v1819_v3 = vmul.f32 %v1587_v52, %v1587_v52  ;;  %v1755_v5 = vmul.f32 1.442695, %v1676_v58  ;;  %1625 = vmatmul.bf16.gmra.mxu0 %v1467_v2  ;;  %1714 = vmatmul.bf16.gmra.mxu1 %v1467_v2  ;;  %v1883_v62 = vmul.f32 2.0, %v1676_v58 }
 0x20d   : > { %v1329_v14 = vadd.f32 %v1328_v1, %v1240_v9 }
 0x20e   : > { %v1851_v10 = vsub.f32 1.0, %v1819_v3  ;;  %4951 = vpow2.f32 %v1755_v5 }
 0x20f   : > { %v1413_v26 = vmul.f32 0.01, %v1329_v14  ;;  %vm1381_vm3 = vcmp.gt.f32.partialorder %v1329_v14, 0.0 }
 0x210   : > { %v6024_v13 = vadd.f32 %v1883_v62, %v1851_v10 }
 0x211   : > { %v1588_v63 = vpop.f32.mrf.mxu0  ;;  %v1677_v11 = vpop.f32.mrf.mxu1  ;;  %v1445_v43 = vsel %vm1381_vm3, %v1329_v14, %v1413_v26 }
 0x212   : > { %8010 = vst [vmem:[#allocation20_spill] sm:$0xff] %v6024_v13  ;;  %v1589_v15 = vadd.f32 %v1588_v63, %v6015_v54  ;;  %v1678_v16 = vadd.f32 %v1677_v11, %v6017_v55  ;;  %v1241_v17 = vpop.f32.mrf.mxu2  ;;  %v4624_v13 = vld [vmem:[#allocation10 + $0x78] sm:$0xf0] }
 0x213   : > { %v1330_v19 = vpop.f32.mrf.mxu3  ;;  %v1242_v23 = vadd.f32 %v1241_v17, %v5916_v18 }
 0x214   : > { %v4952_v8 = vpop.eup %4951  ;;  %v1820_v24 = vmul.f32 %v1589_v15, %v1589_v15  ;;  %v1757_v25 = vmul.f32 1.442695, %v1678_v16  ;;  %v1884_v36 = vmul.f32 2.0, %v1678_v16 }
 0x215   : > { %v1331_v27 = vadd.f32 %v1330_v19, %v1242_v23  ;;  %v2139_v28 = vmul.f32 %v4952_v8, %v2107_v22  ;;  %v6031_v34 = vmul.f32 %v4952_v8, %v4952_v8 }
 0x216   : > { %v1852_v35 = vsub.f32 1.0, %v1820_v24  ;;  %4953 = vpow2.f32 %v1757_v25 }
 0x217   : > { %8011 = vst [vmem:[#allocation21_spill] sm:$0xff] %v6031_v34  ;;  %vm1382_vm4 = vcmp.gt.f32.partialorder %v1331_v27, 0.0  ;;  %v1414_v37 = vmul.f32 0.01, %v1331_v27  ;;  %v6033_v31 = vadd.f32 %v2139_v28, %v1587_v52  ;;  %v4616_v34 = vld [vmem:[#allocation10 + $0x70] sm:$0xf0] }
 0x218   : > { %v6037_v33 = vadd.f32 %v1884_v36, %v1852_v35 }
 0x219   : > { %8012 = vst [vmem:[#allocation22_spill] sm:$0xff] %v6033_v31  ;;  %v1591_v38 = vpop.f32.mrf.mxu0  ;;  %v1680_v39 = vpop.f32.mrf.mxu1  ;;  %v6042_v41 = vsel %vm2205_vm2, %v6033_v31, -1e+30  ;;  %v1446_v44 = vsel %vm1382_vm4, %v1331_v27, %v1414_v37 }
 0x21a   : > { %8013 = vst [vmem:[#allocation23_spill] sm:$0xff] %v6037_v33  ;;  %v1592_v45 = vadd.f32 %v1591_v38, %v6015_v54  ;;  %v1681_v47 = vadd.f32 %v1680_v39, %v6017_v55  ;;  %v1244_v49 = vpop.f32.mrf.mxu2  ;;  %2238 = vmax.xlane.f32.xlu0 %v6042_v41  ;;  %v1468_v51 = vpack.c.bf16 %v1446_v44, %v1445_v43  ;;  %v4824_v33 = vld [vmem:[#allocation10 + $0x64] sm:$0xf] }
 0x21b   : > { %v1333_v50 = vpop.f32.mrf.mxu3  ;;  %v1245_v0 = vadd.f32 %v1244_v49, %v5922_v32 }
 0x21c   : > { %v4954_v60 = vpop.eup %4953  ;;  %v1821_v48 = vmul.f32 %v1592_v45, %v1592_v45  ;;  %v1759_v61 = vmul.f32 1.442695, %v1681_v47  ;;  %1630 = vmatmul.bf16.gmra.mxu0 %v1468_v51  ;;  %1719 = vmatmul.bf16.gmra.mxu1 %v1468_v51  ;;  %v1885_v1 = vmul.f32 2.0, %v1681_v47 }
 0x21d   : > { %v2140_v52 = vmul.f32 %v4954_v60, %v2108_v56  ;;  %v6049_v58 = vmul.f32 %v4954_v60, %v4954_v60  ;;  %v1334_v7 = vadd.f32 %v1333_v50, %v1245_v0  ;;  %v2110_v56 = vld [vmem:[%s5836_s30 + $0x18] sm:$0xff] }
 0x21e   : > { %v1853_v53 = vsub.f32 1.0, %v1821_v48  ;;  %4955 = vpow2.f32 %v1759_v61 }
 0x21f   : > { %8014 = vst [vmem:[#allocation24_spill] sm:$0xff] %v6049_v58  ;;  %v6051_v2 = vadd.f32 %v2140_v52, %v1589_v15  ;;  %v2109_v15 = vld [vmem:[%s5836_s30 + $0x10] sm:$0xff]  ;;  %v1415_v23 = vmul.f32 0.01, %v1334_v7  ;;  %vm1383_vm5 = vcmp.gt.f32.partialorder %v1334_v7, 0.0 }
 0x220   : > { %v6055_v5 = vadd.f32 %v1885_v1, %v1853_v53 }
 0x221   : > { %8015 = vst [vmem:[#allocation25_spill] sm:$0xff] %v6051_v2  ;;  %v1593_v9 = vpop.f32.mrf.mxu0  ;;  %v1682_v10 = vpop.f32.mrf.mxu1  ;;  %v6060_v32 = vsel %vm2205_vm2, %v6051_v2, -1e+30  ;;  %v1447_v43 = vsel %vm1383_vm5, %v1334_v7, %v1415_v23 }
 0x222   : > { %8016 = vst [vmem:[#allocation26_spill] sm:$0xff] %v6055_v5  ;;  %v1594_v62 = vadd.f32 %v1593_v9, %v6015_v54  ;;  %v1683_v14 = vadd.f32 %v1682_v10, %v6017_v55  ;;  %v1246_v63 = vpop.f32.mrf.mxu2  ;;  %2240 = vmax.xlane.f32.xlu0 %v6060_v32  ;;  %v4664_v5 = vld [vmem:[#allocation10 + $0xd0] sm:$0xf0] }
 0x223   : > { %v1335_v11 = vpop.f32.mrf.mxu3  ;;  %v1247_v16 = vadd.f32 %v1246_v63, %v5928_v42 }
 0x224   : > { %v4956_v17 = vpop.eup %4955  ;;  %v1822_v19 = vmul.f32 %v1594_v62, %v1594_v62  ;;  %v1761_v22 = vmul.f32 1.442695, %v1683_v14  ;;  %v1886_v27 = vmul.f32 2.0, %v1683_v14 }
 0x225   : > { %v1336_v8 = vadd.f32 %v1335_v11, %v1247_v16  ;;  %v2141_v24 = vmul.f32 %v4956_v17, %v2109_v15  ;;  %v6067_v25 = vmul.f32 %v4956_v17, %v4956_v17 }
 0x226   : > { %v1854_v26 = vsub.f32 1.0, %v1822_v19  ;;  %4957 = vpow2.f32 %v1761_v22  ;;  %v2111_v22 = vld [vmem:[%s5836_s30 + $0x20] sm:$0xff] }
 0x227   : > { %8017 = vst [vmem:[#allocation27_spill] sm:$0xff] %v6067_v25  ;;  %vm1384_vm6 = vcmp.gt.f32.partialorder %v1336_v8, 0.0  ;;  %v1416_v28 = vmul.f32 0.01, %v1336_v8  ;;  %v6069_v35 = vadd.f32 %v2141_v24, %v1592_v45 }
 0x228   : > { %v6073_v36 = vadd.f32 %v1886_v27, %v1854_v26 }
 0x229   : > { %8018 = vst [vmem:[#allocation28_spill] sm:$0xff] %v6069_v35  ;;  %v1596_v37 = vpop.f32.mrf.mxu0  ;;  %v1685_v38 = vpop.f32.mrf.mxu1  ;;  %v6078_v39 = vsel %vm2205_vm2, %v6069_v35, -1e+30  ;;  %v1448_v44 = vsel %vm1384_vm6, %v1336_v8, %v1416_v28 }
 0x22a   : > { %8019 = vst [vmem:[#allocation29_spill] sm:$0xff] %v6073_v36  ;;  %v1597_v47 = vadd.f32 %v1596_v37, %v6015_v54  ;;  %v1686_v49 = vadd.f32 %v1685_v38, %v6017_v55  ;;  %v1249_v45 = vpop.f32.mrf.mxu2  ;;  %2242 = vmax.xlane.f32.xlu1 %v6078_v39  ;;  %v1469_v51 = vpack.c.bf16 %v1448_v44, %v1447_v43 }
 0x22b   : > { %v1338_v50 = vpop.f32.mrf.mxu3  ;;  %v1250_v52 = vadd.f32 %v1249_v45, %v5934_v57 }
 0x22c   : > { %v4958_v60 = vpop.eup %4957  ;;  %v1823_v48 = vmul.f32 %v1597_v47, %v1597_v47  ;;  %v1763_v61 = vmul.f32 1.442695, %v1686_v49  ;;  %v1887_v0 = vmul.f32 2.0, %v1686_v49  ;;  %1635 = vmatmul.bf16.gmra.mxu0 %v1469_v51  ;;  %1724 = vmatmul.bf16.gmra.mxu1 %v1469_v51 }
 0x22d   : > { %v2142_v53 = vmul.f32 %v4958_v60, %v2110_v56  ;;  %v6085_v1 = vmul.f32 %v4958_v60, %v4958_v60  ;;  %v1339_v63 = vadd.f32 %v1338_v50, %v1250_v52 }
 0x22e   : > { %v1855_v7 = vsub.f32 1.0, %v1823_v48  ;;  %4959 = vpow2.f32 %v1763_v61 }
 0x22f   : > { %8020 = vst [vmem:[#allocation30_spill] sm:$0xff] %v6085_v1  ;;  %v6087_v9 = vadd.f32 %v2142_v53, %v1594_v62  ;;  %v1417_v27 = vmul.f32 0.01, %v1339_v63  ;;  %vm1385_vm7 = vcmp.gt.f32.partialorder %v1339_v63, 0.0 }
 0x230   : > { %v6091_v14 = vadd.f32 %v1887_v0, %v1855_v7 }
 0x231   : > { %8021 = vst [vmem:[#allocation31_spill] sm:$0xff] %v6087_v9  ;;  %v1598_v11 = vpop.f32.mrf.mxu0  ;;  %v1687_v15 = vpop.f32.mrf.mxu1  ;;  %v6096_v57 = vsel %vm2205_vm2, %v6087_v9, -1e+30  ;;  %v1449_v48 = vsel %vm1385_vm7, %v1339_v63, %v1417_v27 }
 0x232   : > { %8022 = vst [vmem:[#allocation32_spill] sm:$0xff] %v6091_v14  ;;  %v1599_v16 = vadd.f32 %v1598_v11, %v6015_v54  ;;  %v1688_v17 = vadd.f32 %v1687_v15, %v6017_v55  ;;  %v1251_v19 = vpop.f32.mrf.mxu2  ;;  %2244 = vmax.xlane.f32.xlu1 %v6096_v57  ;;  %v2112_v11 = vld [vmem:[%s5836_s30 + $0x28] sm:$0xff]  ;;  %v4656_v14 = vld [vmem:[#allocation10 + $0xb8] sm:$0xf0] }
 0x233   : > { %v1340_v62 = vpop.f32.mrf.mxu3  ;;  %v1252_v23 = vadd.f32 %v1251_v19, %v5940_v4 }
 0x234   : > { %v4960_v8 = vpop.eup %4959  ;;  %v1824_v24 = vmul.f32 %v1599_v16, %v1599_v16  ;;  %v1765_v26 = vmul.f32 1.442695, %v1688_v17  ;;  %v1888_v44 = vmul.f32 2.0, %v1688_v17 }
 0x235   : > { %v1341_v28 = vadd.f32 %v1340_v62, %v1252_v23  ;;  %v2143_v37 = vmul.f32 %v4960_v8, %v2111_v22  ;;  %v6103_v38 = vmul.f32 %v4960_v8, %v4960_v8 }
 0x236   : > { %v1856_v43 = vsub.f32 1.0, %v1824_v24  ;;  %4961 = vpow2.f32 %v1765_v26 }
 0x237   : > { %8023 = vst [vmem:[#allocation33_spill] sm:$0xff] %v6103_v38  ;;  %vm1386_vm8 = vcmp.gt.f32.partialorder %v1341_v28, 0.0  ;;  %v1418_v49 = vmul.f32 0.01, %v1341_v28  ;;  %v6105_v45 = vadd.f32 %v2143_v37, %v1597_v47  ;;  %v4835_v38 = vld [vmem:[#allocation10 + $0xb4] sm:$0xf0] }
 0x238   : > { %v6109_v50 = vadd.f32 %v1888_v44, %v1856_v43 }
 0x239   : > { %8024 = vst [vmem:[#allocation34_spill] sm:$0xff] %v6105_v45  ;;  %v1601_v51 = vpop.f32.mrf.mxu0  ;;  %v1690_v56 = vpop.f32.mrf.mxu1  ;;  %v6114_v60 = vsel %vm2205_vm2, %v6105_v45, -1e+30  ;;  %v1450_v61 = vsel %vm1386_vm8, %v1341_v28, %v1418_v49 }
 0x23a   : > { %8025 = vst [vmem:[#allocation35_spill] sm:$0xff] %v6109_v50  ;;  %v1602_v0 = vadd.f32 %v1601_v51, %v6015_v54  ;;  %v1691_v52 = vadd.f32 %v1690_v56, %v6017_v55  ;;  %v1254_v47 = vpop.f32.mrf.mxu2  ;;  %2246 = vmax.xlane.f32.xlu2 %v6114_v60  ;;  %v1470_v7 = vpack.c.bf16 %v1450_v61, %v1449_v48  ;;  %v2113_v56 = vld [vmem:[%s5836_s30 + $0x30] sm:$0xff] }
 0x23b   : > { %v1343_v53 = vpop.f32.mrf.mxu3  ;;  %v1255_v22 = vadd.f32 %v1254_v47, %v5946_v20 }
 0x23c   : > { %v4962_v15 = vpop.eup %4961  ;;  %v1825_v17 = vmul.f32 %v1602_v0, %v1602_v0  ;;  %v1767_v19 = vmul.f32 1.442695, %v1691_v52  ;;  %v1889_v62 = vmul.f32 2.0, %v1691_v52  ;;  %1640 = vmatmul.bf16.gmra.mxu0 %v1470_v7  ;;  %1729 = vmatmul.bf16.gmra.mxu1 %v1470_v7 }
 0x23d   : > { %v2144_v63 = vmul.f32 %v4962_v15, %v2112_v11  ;;  %v6121_v23 = vmul.f32 %v4962_v15, %v4962_v15  ;;  %v1344_v28 = vadd.f32 %v1343_v53, %v1255_v22 }
 0x23e   : > { %v1857_v8 = vsub.f32 1.0, %v1825_v17  ;;  %4963 = vpow2.f32 %v1767_v19 }
 0x23f   : > { %8026 = vst [vmem:[#allocation36_spill] sm:$0xff] %v6121_v23  ;;  %v6123_v24 = vadd.f32 %v2144_v63, %v1599_v16  ;;  %v1419_v53 = vmul.f32 0.01, %v1344_v28  ;;  %vm1387_vm9 = vcmp.gt.f32.partialorder %v1344_v28, 0.0 }
 0x240   : > { %v6127_v27 = vadd.f32 %v1889_v62, %v1857_v8 }
 0x241   : > { %8027 = vst [vmem:[#allocation37_spill] sm:$0xff] %v6123_v24  ;;  %v1603_v37 = vpop.f32.mrf.mxu0  ;;  %v1692_v43 = vpop.f32.mrf.mxu1  ;;  %v6132_v20 = vsel %vm2205_vm2, %v6123_v24, -1e+30 }
 0x242   : > { %8028 = vst [vmem:[#allocation38_spill] sm:$0xff] %v6127_v27  ;;  %v1604_v44 = vadd.f32 %v1603_v37, %v6015_v54  ;;  %v1693_v49 = vadd.f32 %v1692_v43, %v6017_v55  ;;  %v1256_v51 = vpop.f32.mrf.mxu2  ;;  %2248 = vmax.xlane.f32.xlu2 %v6132_v20  ;;  %v4648_v27 = vld [vmem:[#allocation10 + $0xb0] sm:$0xf0] }
 0x243   : > { %v1345_v16 = vpop.f32.mrf.mxu3  ;;  %v1257_v48 = vadd.f32 %v1256_v51, %v5952_v30  ;;  %v1451_v51 = vsel %vm1387_vm9, %v1344_v28, %v1419_v53 }
 0x244   : > { %v4964_v61 = vpop.eup %4963  ;;  %v1826_v52 = vmul.f32 %v1604_v44, %v1604_v44  ;;  %v1769_v47 = vmul.f32 1.442695, %v1693_v49  ;;  %v1890_v19 = vmul.f32 2.0, %v1693_v49 }
 0x245   : > { %v1346_v7 = vadd.f32 %v1345_v16, %v1257_v48  ;;  %v2145_v11 = vmul.f32 %v4964_v61, %v2113_v56  ;;  %v6139_v15 = vmul.f32 %v4964_v61, %v4964_v61 }
 0x246   : > { %v1858_v17 = vsub.f32 1.0, %v1826_v52  ;;  %4965 = vpow2.f32 %v1769_v47  ;;  %v2114_v52 = vld [vmem:[%s5836_s30 + $0x38] sm:$0xff] }
 0x247   : > { %8029 = vst [vmem:[#allocation39_spill] sm:$0xff] %v6139_v15  ;;  %vm1388_vm10 = vcmp.gt.f32.partialorder %v1346_v7, 0.0  ;;  %v1420_v62 = vmul.f32 0.01, %v1346_v7  ;;  %v6141_v22 = vadd.f32 %v2145_v11, %v1602_v0  ;;  %v4839_v15 = vld [vmem:[#allocation10 + $0xd4] sm:$0xf0] }
 0x248   : > { %v6145_v63 = vadd.f32 %v1890_v19, %v1858_v17 }
 0x249   : > { %8030 = vst [vmem:[#allocation40_spill] sm:$0xff] %v6141_v22  ;;  %v1606_v8 = vpop.f32.mrf.mxu0  ;;  %v1695_v37 = vpop.f32.mrf.mxu1  ;;  %v6150_v43 = vsel %vm2205_vm2, %v6141_v22, -1e+30  ;;  %v1452_v16 = vsel %vm1388_vm10, %v1346_v7, %v1420_v62 }
 0x24a   : > { %8031 = vst [vmem:[#allocation41_spill] sm:$0xff] %v6145_v63  ;;  %v1607_v49 = vadd.f32 %v1606_v8, %v6015_v54  ;;  %v1696_v56 = vadd.f32 %v1695_v37, %v6017_v55  ;;  %v1259_v0 = vpop.f32.mrf.mxu2  ;;  %2250 = vmax.xlane.f32.xlu0 %v6150_v43  ;;  %v1471_v61 = vpack.c.bf16 %v1452_v16, %v1451_v51 }
 0x24b   : > { %v1348_v48 = vpop.f32.mrf.mxu3  ;;  %v1260_v26 = vadd.f32 %v1259_v0, %v5958_v46 }
 0x24c   : > { %v4966_v47 = vpop.eup %4965  ;;  %v1827_v11 = vmul.f32 %v1607_v49, %v1607_v49  ;;  %v1771_v17 = vmul.f32 1.442695, %v1696_v56  ;;  %v1891_v19 = vmul.f32 2.0, %v1696_v56  ;;  %1645 = vmatmul.bf16.gmra.mxu0 %v1471_v61  ;;  %1734 = vmatmul.bf16.gmra.mxu1 %v1471_v61 }
 0x24d   : > { %v2146_v28 = vmul.f32 %v4966_v47, %v2114_v52  ;;  %v6157_v53 = vmul.f32 %v4966_v47, %v4966_v47  ;;  %v1349_v51 = vadd.f32 %v1348_v48, %v1260_v26  ;;  %v2115_v47 = vld [vmem:[%s5836_s30 + $0x40] sm:$0xff] }
 0x24e   : > { %v1859_v7 = vsub.f32 1.0, %v1827_v11  ;;  %4967 = vpow2.f32 %v1771_v17 }
 0x24f   : > { %8032 = vst [vmem:[#allocation42_spill] sm:$0xff] %v6157_v53  ;;  %v6159_v62 = vadd.f32 %v2146_v28, %v1604_v44  ;;  %vm1389_vm11 = vcmp.gt.f32.partialorder %v1349_v51, 0.0  ;;  %v4680_v53 = vld [vmem:[#allocation10 + $0xf0] sm:$0xf0] }
 0x250   : > { %v6163_v37 = vadd.f32 %v1891_v19, %v1859_v7  ;;  %v1421_v19 = vmul.f32 0.01, %v1349_v51 }
 0x251   : > { %8033 = vst [vmem:[#allocation43_spill] sm:$0xff] %v6159_v62  ;;  %v1608_v16 = vpop.f32.mrf.mxu0  ;;  %v1697_v56 = vpop.f32.mrf.mxu1  ;;  %v6168_v46 = vsel %vm2205_vm2, %v6159_v62, -1e+30 }
 0x252   : > { %8034 = vst [vmem:[#allocation44_spill] sm:$0xff] %v6163_v37  ;;  %v6171_v0 = vadd.f32 %v1608_v16, %v6015_v54  ;;  %v1698_v61 = vadd.f32 %v1697_v56, %v6017_v55  ;;  %v1261_v44 = vpop.f32.mrf.mxu2  ;;  %2252 = vmax.xlane.f32.xlu1 %v6168_v46 }
 0x253   : > { %v1350_v52 = vpop.f32.mrf.mxu3  ;;  %v1262_v11 = vadd.f32 %v1261_v44, %v5964_v59 }
 0x254   : > { %v4968_v26 = vpop.eup %4967  ;;  %v1828_v48 = vmul.f32 %v6171_v0, %v6171_v0  ;;  %v1773_v17 = vmul.f32 1.442695, %v1698_v61  ;;  %v1892_v56 = vmul.f32 2.0, %v1698_v61 }
 0x255   : > { %v1351_v28 = vadd.f32 %v1350_v52, %v1262_v11  ;;  %v2147_v7 = vmul.f32 %v4968_v26, %v2115_v47  ;;  %v6179_v8 = vmul.f32 %v4968_v26, %v4968_v26  ;;  %v1453_v47 = vsel %vm1389_vm11, %v1349_v51, %v1421_v19 }
 0x256   : > { %v1860_v16 = vsub.f32 1.0, %v1828_v48  ;;  %4969 = vpow2.f32 %v1773_v17 }
 0x257   : > { %8035 = vst [vmem:[#allocation45_spill] sm:$0xff] %v6179_v8  ;;  %vm1390_vm12 = vcmp.gt.f32.partialorder %v1351_v28, 0.0  ;;  %v1422_v42 = vmul.f32 0.01, %v1351_v28  ;;  %v6181_v30 = vadd.f32 %v2147_v7, %v1607_v49 }
 0x258   : > { %v6185_v44 = vadd.f32 %v1892_v56, %v1860_v16 }
 0x259   : > { %8036 = vst [vmem:[#allocation46_spill] sm:$0xff] %v6181_v30  ;;  %v1611_v4 = vpop.f32.mrf.mxu0  ;;  %v1700_v10 = vpop.f32.mrf.mxu1  ;;  %v6190_v52 = vsel %vm2205_vm2, %v6181_v30, -1e+30  ;;  %v1454_v11 = vsel %vm1390_vm12, %v1351_v28, %v1422_v42 }
 0x25a   : > { %8037 = vst [vmem:[#allocation47_spill] sm:$0xff] %v6185_v44  ;;  %v6193_v61 = vadd.f32 %v1611_v4, %v6015_v54  ;;  %v1701_v49 = vadd.f32 %v1700_v10, %v6017_v55  ;;  %v1264_v26 = vpop.f32.mrf.mxu2  ;;  %2254 = vmax.xlane.f32.xlu1 %v6190_v52  ;;  %v1472_v17 = vpack.c.bf16 %v1454_v11, %v1453_v47  ;;  %v4840_v44 = vld [vmem:[#allocation10 + $0xe4] sm:$0xf] }
 0x25b   : > { %v1353_v48 = vpop.f32.mrf.mxu3  ;;  %v1265_v42 = vadd.f32 %v1264_v26, %v5966_v6 }
 0x25c   : > { %v6197_v7 = vpop.eup %4969  ;;  %v1829_v16 = vmul.f32 %v6193_v61, %v6193_v61  ;;  %v1775_v56 = vmul.f32 1.442695, %v1701_v49  ;;  %v1893_v59 = vmul.f32 2.0, %v1701_v49  ;;  %1650 = vmatmul.bf16.gmra.mxu0 %v1472_v17  ;;  %1739 = vmatmul.bf16.gmra.mxu1 %v1472_v17 }
 0x25d   : > { %v6204_v4 = vmul.f32 %v6197_v7, %v6197_v7  ;;  %v1354_v28 = vadd.f32 %v1353_v48, %v1265_v42 }
 0x25e   : > { %v1861_v10 = vsub.f32 1.0, %v1829_v16  ;;  %4971 = vpow2.f32 %v1775_v56 }
 0x25f   : > { %8038 = vst [vmem:[#allocation48_spill] sm:$0xff] %v6204_v4  ;;  %vm1391_vm13 = vcmp.gt.f32.partialorder %v1354_v28, 0.0 }
 0x260   : > { %v6208_v19 = vadd.f32 %v1893_v59, %v1861_v10  ;;  %v1423_v59 = vmul.f32 0.01, %v1354_v28 }
 0x261   : > { %v1613_v47 = vpop.f32.mrf.mxu0  ;;  %v1702_v11 = vpop.f32.mrf.mxu1 }
 0x262   : > { %8039 = vst [vmem:[#allocation49_spill] sm:$0xff] %v6208_v19  ;;  %v6211_v49 = vadd.f32 %v1613_v47, %v6015_v54  ;;  %v1703_v17 = vadd.f32 %v1702_v11, %v6017_v55  ;;  %v1266_v6 = vpop.f32.mrf.mxu2  ;;  %v1455_v30 = vsel %vm1391_vm13, %v1354_v28, %v1423_v59 }
 0x263   : > { %v1355_v26 = vpop.f32.mrf.mxu3  ;;  %v1267_v3 = vadd.f32 %v1266_v6, %v5972_v21 }
 0x264   : > { %v6215_v18 = vpop.eup %4971  ;;  %v1830_v16 = vmul.f32 %v6211_v49, %v6211_v49  ;;  %v1777_v56 = vmul.f32 1.442695, %v1703_v17  ;;  %v1894_v47 = vmul.f32 2.0, %v1703_v17 }
 0x265   : > { %v1356_v10 = vadd.f32 %v1355_v26, %v1267_v3  ;;  %v6221_v48 = vmul.f32 %v6215_v18, %v6215_v18 }
 0x266   : > { %v1862_v42 = vsub.f32 1.0, %v1830_v16  ;;  %4973 = vpow2.f32 %v1777_v56 }
 0x267   : > { %8040 = vst [vmem:[#allocation50_spill] sm:$0xff] %v6221_v48  ;;  %vm1392_vm14 = vcmp.gt.f32.partialorder %v1356_v10, 0.0  ;;  %v1424_v11 = vmul.f32 0.01, %v1356_v10 }
 0x268   : > { %v6225_v6 = vadd.f32 %v1894_v47, %v1862_v42 }
 0x269   : > { %v1616_v51 = vpop.f32.mrf.mxu0  ;;  %v1705_v22 = vpop.f32.mrf.mxu1  ;;  %v1456_v62 = vsel %vm1392_vm14, %v1356_v10, %v1424_v11 }
 0x26a   : > { %8041 = vst [vmem:[#allocation51_spill] sm:$0xff] %v6225_v6  ;;  %v6228_v3 = vadd.f32 %v1616_v51, %v6015_v54  ;;  %v1706_v26 = vadd.f32 %v1705_v22, %v6017_v55  ;;  %v1269_v9 = vpop.f32.mrf.mxu2  ;;  %v1473_v56 = vpack.c.bf16 %v1456_v62, %v1455_v30 }
 0x26b   : > { %v1358_v16 = vpop.f32.mrf.mxu3  ;;  %v1270_v28 = vadd.f32 %v1269_v9, %v5974_v29 }
 0x26c   : > { %v6231_v17 = vpop.eup %4973  ;;  %v1831_v24 = vmul.f32 %v6228_v3, %v6228_v3  ;;  %v1779_v21 = vmul.f32 1.442695, %v1706_v26  ;;  %v1895_v42 = vmul.f32 2.0, %v1706_v26  ;;  %1655 = vmatmul.bf16.gmra.mxu0 %v1473_v56  ;;  %1744 = vmatmul.bf16.gmra.mxu1 %v1473_v56 }
 0x26d   : > { %v6238_v51 = vmul.f32 %v6231_v17, %v6231_v17  ;;  %v1359_v62 = vadd.f32 %v1358_v16, %v1270_v28 }
 0x26e   : > { %v1863_v59 = vsub.f32 1.0, %v1831_v24  ;;  %4975 = vpow2.f32 %v1779_v21 }
 0x26f   : > { %8042 = vst [vmem:[#allocation52_spill] sm:$0xff] %v6238_v51  ;;  %vm1393_vm15 = vcmp.gt.f32.partialorder %v1359_v62, 0.0 }
 0x270   : > { %v6242_v30 = vadd.f32 %v1895_v42, %v1863_v59  ;;  %v1425_v42 = vmul.f32 0.01, %v1359_v62 }
 0x271   : > { %v1618_v10 = vpop.f32.mrf.mxu0  ;;  %v1707_v47 = vpop.f32.mrf.mxu1 }
 0x272   : > { %8043 = vst [vmem:[#allocation53_spill] sm:$0xff] %v6242_v30  ;;  %v6245_v11 = vadd.f32 %v1618_v10, %v6015_v54  ;;  %v1708_v26 = vadd.f32 %v1707_v47, %v6017_v55  ;;  %v1271_v29 = vpop.f32.mrf.mxu2  ;;  %v1457_v35 = vsel %vm1393_vm15, %v1359_v62, %v1425_v42 }
 0x273   : > { %v1360_v9 = vpop.f32.mrf.mxu3  ;;  %v1272_v56 = vadd.f32 %v1271_v29, %v5980_v40 }
 0x274   : > { %v6249_v45 = vpop.eup %4975  ;;  %v1832_v24 = vmul.f32 %v6245_v11, %v6245_v11  ;;  %v1781_v21 = vmul.f32 1.442695, %v1708_v26  ;;  %v1896_v10 = vmul.f32 2.0, %v1708_v26 }
 0x275   : > { %v1361_v59 = vadd.f32 %v1360_v9, %v1272_v56  ;;  %v6255_v16 = vmul.f32 %v6249_v45, %v6249_v45 }
 0x276   : > { %v1864_v28 = vsub.f32 1.0, %v1832_v24  ;;  %4977 = vpow2.f32 %v1781_v21 }
 0x277   : > { %8044 = vst [vmem:[#allocation54_spill] sm:$0xff] %v6255_v16  ;;  %vm1394_vm0 = vcmp.gt.f32.partialorder %v1361_v59, 0.0  ;;  %v1426_v47 = vmul.f32 0.01, %v1361_v59 }
 0x278   : > { %v6259_v29 = vadd.f32 %v1896_v10, %v1864_v28 }
 0x279   : > { %v1621_v22 = vpop.f32.mrf.mxu0  ;;  %v1710_v31 = vpop.f32.mrf.mxu1  ;;  %v1458_v2 = vsel %vm1394_vm0, %v1361_v59, %v1426_v47 }
 0x27a   : > { %8045 = vst [vmem:[#allocation55_spill] sm:$0xff] %v6259_v29  ;;  %v6262_v9 = vadd.f32 %v1621_v22, %v6015_v54  ;;  %v1711_v56 = vadd.f32 %v1710_v31, %v6017_v55  ;;  %v1474_v51 = vpack.c.bf16 %v1458_v2, %v1457_v35 }
 0x27c   : > { %v6265_v24 = vpop.eup %4977  ;;  %v1833_v26 = vmul.f32 %v6262_v9, %v6262_v9  ;;  %v1783_v21 = vmul.f32 1.442695, %v1711_v56  ;;  %v1897_v6 = vmul.f32 2.0, %v1711_v56  ;;  %1660 = vmatmul.bf16.gmra.mxu0 %v1474_v51  ;;  %1749 = vmatmul.bf16.gmra.mxu1 %v1474_v51 }
 0x27d   : > { %v6271_v28 = vmul.f32 %v6265_v24, %v6265_v24 }
 0x27e   : > { %v1865_v62 = vsub.f32 1.0, %v1833_v26  ;;  %4979 = vpow2.f32 %v1783_v21 }
 0x27f   : > { %8046 = vst [vmem:[#allocation56_spill] sm:$0xff] %v6271_v28 }
 0x280   : > { %v6275_v31 = vadd.f32 %v1897_v6, %v1865_v62 }
 0x281   : > { %v1623_v2 = vpop.f32.mrf.mxu0  ;;  %v1712_v35 = vpop.f32.mrf.mxu1 }
 0x282   : > { %8047 = vst [vmem:[#allocation57_spill] sm:$0xff] %v6275_v31  ;;  %v6278_v42 = vadd.f32 %v1623_v2, %v6015_v54  ;;  %v1713_v59 = vadd.f32 %v1712_v35, %v6017_v55 }
 0x284   : > { %v6281_v10 = vpop.eup %4979  ;;  %v1834_v51 = vmul.f32 %v6278_v42, %v6278_v42  ;;  %v1785_v47 = vmul.f32 1.442695, %v1713_v59  ;;  %v1898_v6 = vmul.f32 2.0, %v1713_v59 }
 0x285   : > { %v6287_v56 = vmul.f32 %v6281_v10, %v6281_v10 }
 0x286   : > { %v1866_v26 = vsub.f32 1.0, %v1834_v51  ;;  %4981 = vpow2.f32 %v1785_v47 }
 0x287   : > { %8048 = vst [vmem:[#allocation58_spill] sm:$0xff] %v6287_v56 }
 0x288   : > { %v6291_v62 = vadd.f32 %v1898_v6, %v1866_v26 }
 0x289   : > { %v1626_v2 = vpop.f32.mrf.mxu0  ;;  %v1715_v35 = vpop.f32.mrf.mxu1 }
 0x28a   : > { %8049 = vst [vmem:[#allocation59_spill] sm:$0xff] %v6291_v62  ;;  %v6294_v22 = vadd.f32 %v1626_v2, %v6015_v54  ;;  %v1716_v40 = vadd.f32 %v1715_v35, %v6017_v55 }
 0x28c   : > { %v6297_v28 = vpop.eup %4981  ;;  %v1835_v29 = vmul.f32 %v6294_v22, %v6294_v22  ;;  %v1787_v51 = vmul.f32 1.442695, %v1716_v40  ;;  %v1899_v6 = vmul.f32 2.0, %v1716_v40 }
 0x28d   : > { %v2239_v47 = vpop.xlane.xlu0 %2238  ;;  %v6303_v59 = vmul.f32 %v6297_v28, %v6297_v28 }
 0x28e   : > { %v1867_v26 = vsub.f32 1.0, %v1835_v29  ;;  %4983 = vpow2.f32 %v1787_v51  ;;  %v2302_v2 = vsub.f32 %v6042_v41, %v2239_v47  ;;  %v2116_v47 = vld [vmem:[%s5836_s30 + $0x48] sm:$0xff] }
 0x28f   : > { %8050 = vst [vmem:[#allocation60_spill] sm:$0xff] %v6303_v59  ;;  %v2148_v59 = vmul.f32 %v6197_v7, %v2116_v47 }
 0x290   : > { %v2334_v21 = vmul.f32 1.442695, %v2302_v2  ;;  %v6308_v56 = vadd.f32 %v1899_v6, %v1867_v26 }
 0x291   : > { %v1628_v31 = vpop.f32.mrf.mxu0  ;;  %v1717_v8 = vpop.f32.mrf.mxu1  ;;  %v6341_v7 = vadd.f32 %v2148_v59, %v6171_v0 }
 0x292   : > { %8051 = vst [vmem:[#allocation61_spill] sm:$0xff] %v6308_v56  ;;  %4985 = vpow2.f32 %v2334_v21  ;;  %v6311_v37 = vadd.f32 %v1628_v31, %v6015_v54  ;;  %v1718_v16 = vadd.f32 %v1717_v8, %v6017_v55 }
 0x293   : > { %8054 = vst [vmem:[#allocation64_spill] sm:$0xff] %v6341_v7  ;;  %v6356_v0 = vsel %vm2205_vm2, %v6341_v7, -1e+30 }
 0x294   : > { %v6314_v29 = vpop.eup %4983  ;;  %v1836_v40 = vmul.f32 %v6311_v37, %v6311_v37  ;;  %v1789_v41 = vmul.f32 1.442695, %v1718_v16  ;;  %v1900_v21 = vmul.f32 2.0, %v1718_v16 }
 0x295   : > { %v2241_v51 = vpop.xlane.xlu0 %2240  ;;  %v6321_v26 = vmul.f32 %v6314_v29, %v6314_v29 }
 0x296   : > { %v1868_v6 = vsub.f32 1.0, %v1836_v40  ;;  %4987 = vpow2.f32 %v1789_v41  ;;  %v2303_v31 = vsub.f32 %v6060_v32, %v2241_v51 }
 0x297   : > { %8052 = vst [vmem:[#allocation62_spill] sm:$0xff] %v6321_v26 }
 0x298   : > { %v6326_v2 = vpop.eup %4985  ;;  %v2336_v35 = vmul.f32 1.442695, %v2303_v31  ;;  %v6329_v62 = vadd.f32 %v1900_v21, %v1868_v6  ;;  %v2117_v6 = vld [vmem:[%s5836_s30 + $0x50] sm:$0xff] }
 0x299   : > { %v1631_v30 = vpop.f32.mrf.mxu0  ;;  %v1720_v48 = vpop.f32.mrf.mxu1  ;;  %2398 = vadd.xlane.f32.xlu2 %v6326_v2  ;;  %v2149_v59 = vmul.f32 %v6215_v18, %v2117_v6 }
 0x29a   : > { %8053 = vst [vmem:[#allocation63_spill] sm:$0xff] %v6329_v62  ;;  %4989 = vpow2.f32 %v2336_v35  ;;  %v6333_v16 = vadd.f32 %v1631_v30, %v6015_v54  ;;  %v1721_v32 = vadd.f32 %v1720_v48, %v6017_v55 }
 0x29b   : > { %v6372_v6 = vadd.f32 %v2149_v59, %v6193_v61 }
 0x29c   : > { %v6336_v40 = vpop.eup %4987  ;;  %v1837_v41 = vmul.f32 %v6333_v16, %v6333_v16  ;;  %v1791_v51 = vmul.f32 1.442695, %v1721_v32  ;;  %v1901_v30 = vmul.f32 2.0, %v1721_v32 }
 0x29d   : > { %v2243_v47 = vpop.xlane.xlu1 %2242  ;;  %v6346_v21 = vmul.f32 %v6336_v40, %v6336_v40  ;;  %8057 = vst [vmem:[#allocation67_spill] sm:$0xff] %v6372_v6  ;;  %v6387_v61 = vsel %vm2205_vm2, %v6372_v6, -1e+30 }
 0x29e   : > { %v1869_v35 = vsub.f32 1.0, %v1837_v41  ;;  %4991 = vpow2.f32 %v1791_v51  ;;  %v2304_v48 = vsub.f32 %v6078_v39, %v2243_v47 }
 0x29f   : > { %8055 = vst [vmem:[#allocation65_spill] sm:$0xff] %v6346_v21 }
 0x2a0   : > { %v6351_v8 = vpop.eup %4989  ;;  %v2338_v26 = vmul.f32 1.442695, %v2304_v48  ;;  %v6359_v56 = vadd.f32 %v1901_v30, %v1869_v35  ;;  %v2118_v30 = vld [vmem:[%s5836_s30 + $0x58] sm:$0xff] }
 0x2a1   : > { %v1633_v41 = vpop.f32.mrf.mxu0  ;;  %v1722_v32 = vpop.f32.mrf.mxu1  ;;  %2256 = vmax.xlane.f32.xlu2 %v6356_v0  ;;  %2400 = vadd.xlane.f32.xlu0 %v6351_v8  ;;  %v2150_v59 = vmul.f32 %v6231_v17, %v2118_v30 }
 0x2a2   : > { %8056 = vst [vmem:[#allocation66_spill] sm:$0xff] %v6359_v56  ;;  %4993 = vpow2.f32 %v2338_v26  ;;  %v6364_v39 = vadd.f32 %v1633_v41, %v6015_v54  ;;  %v1723_v51 = vadd.f32 %v1722_v32, %v6017_v55 }
 0x2a3   : > { %v6403_v30 = vadd.f32 %v2150_v59, %v6211_v49 }
 0x2a4   : > { %v6367_v47 = vpop.eup %4991  ;;  %v1838_v48 = vmul.f32 %v6364_v39, %v6364_v39  ;;  %v1793_v18 = vmul.f32 1.442695, %v1723_v51  ;;  %v1902_v41 = vmul.f32 2.0, %v1723_v51 }
 0x2a5   : > { %v2245_v35 = vpop.xlane.xlu1 %2244  ;;  %v6377_v31 = vmul.f32 %v6367_v47, %v6367_v47  ;;  %8060 = vst [vmem:[#allocation70_spill] sm:$0xff] %v6403_v30  ;;  %v6418_v49 = vsel %vm2205_vm2, %v6403_v30, -1e+30 }
 0x2a6   : > { %v1870_v26 = vsub.f32 1.0, %v1838_v48  ;;  %4995 = vpow2.f32 %v1793_v18  ;;  %v2305_v32 = vsub.f32 %v6096_v57, %v2245_v35 }
 0x2a7   : > { %8058 = vst [vmem:[#allocation68_spill] sm:$0xff] %v6377_v31 }
 0x2a8   : > { %v6382_v21 = vpop.eup %4993  ;;  %v2340_v62 = vmul.f32 1.442695, %v2305_v32  ;;  %v6390_v19 = vadd.f32 %v1902_v41, %v1870_v26  ;;  %v2119_v41 = vld [vmem:[%s5836_s30 + $0x60] sm:$0xff] }
 0x2a9   : > { %v1636_v48 = vpop.f32.mrf.mxu0  ;;  %v1725_v51 = vpop.f32.mrf.mxu1  ;;  %2258 = vmax.xlane.f32.xlu2 %v6387_v61  ;;  %2402 = vadd.xlane.f32.xlu0 %v6382_v21  ;;  %v2151_v59 = vmul.f32 %v6249_v45, %v2119_v41 }
 0x2aa   : > { %8059 = vst [vmem:[#allocation69_spill] sm:$0xff] %v6390_v19  ;;  %4997 = vpow2.f32 %v2340_v62  ;;  %v6395_v57 = vadd.f32 %v1636_v48, %v6015_v54  ;;  %v1726_v18 = vadd.f32 %v1725_v51, %v6017_v55 }
 0x2ab   : > { %v6434_v41 = vadd.f32 %v2151_v59, %v6228_v3 }
 0x2ac   : > { %v6398_v35 = vpop.eup %4995  ;;  %v1839_v32 = vmul.f32 %v6395_v57, %v6395_v57  ;;  %v1795_v17 = vmul.f32 1.442695, %v1726_v18  ;;  %v1903_v48 = vmul.f32 2.0, %v1726_v18 }
 0x2ad   : > { %v2247_v26 = vpop.xlane.xlu2 %2246  ;;  %v6408_v7 = vmul.f32 %v6398_v35, %v6398_v35  ;;  %8063 = vst [vmem:[#allocation73_spill] sm:$0xff] %v6434_v41  ;;  %v6449_v3 = vsel %vm2205_vm2, %v6434_v41, -1e+30  ;;  %v4678_v41 = vld [vmem:[#allocation10 + $0xe0] sm:$0xf] }
 0x2ae   : > { %v1871_v62 = vsub.f32 1.0, %v1839_v32  ;;  %4999 = vpow2.f32 %v1795_v17  ;;  %v2306_v51 = vsub.f32 %v6114_v60, %v2247_v26 }
 0x2af   : > { %8061 = vst [vmem:[#allocation71_spill] sm:$0xff] %v6408_v7 }
 0x2b0   : > { %v6413_v31 = vpop.eup %4997  ;;  %v2342_v56 = vmul.f32 1.442695, %v2306_v51  ;;  %v6421_v23 = vadd.f32 %v1903_v48, %v1871_v62  ;;  %v2120_v48 = vld [vmem:[%s5836_s30 + $0x68] sm:$0xff] }
 0x2b1   : > { %v1638_v32 = vpop.f32.mrf.mxu0  ;;  %v1727_v18 = vpop.f32.mrf.mxu1  ;;  %2404 = vadd.xlane.f32.xlu1 %v6413_v31  ;;  %2260 = vmax.xlane.f32.xlu0 %v6418_v49  ;;  %v2152_v59 = vmul.f32 %v6265_v24, %v2120_v48 }
 0x2b2   : > { %8062 = vst [vmem:[#allocation72_spill] sm:$0xff] %v6421_v23  ;;  %5001 = vpow2.f32 %v2342_v56  ;;  %v6426_v60 = vadd.f32 %v1638_v32, %v6015_v54  ;;  %v1728_v17 = vadd.f32 %v1727_v18, %v6017_v55 }
 0x2b3   : > { %v6465_v48 = vadd.f32 %v2152_v59, %v6245_v11  ;;  %v4841_v11 = vld [vmem:[#allocation10 + $0xec] sm:$0xf] }
 0x2b4   : > { %v6429_v26 = vpop.eup %4999  ;;  %v1840_v51 = vmul.f32 %v6426_v60, %v6426_v60  ;;  %v1797_v45 = vmul.f32 1.442695, %v1728_v17  ;;  %v1904_v32 = vmul.f32 2.0, %v1728_v17 }
 0x2b5   : > { %v2249_v62 = vpop.xlane.xlu2 %2248  ;;  %v6439_v6 = vmul.f32 %v6429_v26, %v6429_v26  ;;  %8066 = vst [vmem:[#allocation76_spill] sm:$0xff] %v6465_v48 }
 0x2b6   : > { %v1872_v56 = vsub.f32 1.0, %v1840_v51  ;;  %5003 = vpow2.f32 %v1797_v45  ;;  %v2307_v18 = vsub.f32 %v6132_v20, %v2249_v62 }
 0x2b7   : > { %8064 = vst [vmem:[#allocation74_spill] sm:$0xff] %v6439_v6  ;;  %v4842_v6 = vld [vmem:[#allocation10 + $0xec] sm:$0xf0] }
 0x2b8   : > { %v6444_v7 = vpop.eup %5001  ;;  %v2344_v19 = vmul.f32 1.442695, %v2307_v18  ;;  %v6452_v50 = vadd.f32 %v1904_v32, %v1872_v56  ;;  %v2121_v56 = vld [vmem:[%s5836_s30 + $0x70] sm:$0xff]  ;;  %v4679_v4 = vor.u32 %v4842_v6, %v4678_v41 }
 0x2b9   : > { %v1641_v51 = vpop.f32.mrf.mxu0  ;;  %v1730_v17 = vpop.f32.mrf.mxu1  ;;  %2406 = vadd.xlane.f32.xlu1 %v6444_v7  ;;  %2262 = vmax.xlane.f32.xlu0 %v6449_v3  ;;  %v2153_v23 = vmul.f32 %v6281_v10, %v2121_v56 }
 0x2ba   : > { %8065 = vst [vmem:[#allocation75_spill] sm:$0xff] %v6452_v50  ;;  %5005 = vpow2.f32 %v2344_v19  ;;  %v6457_v20 = vadd.f32 %v1641_v51, %v6015_v54  ;;  %v1731_v45 = vadd.f32 %v1730_v17, %v6017_v55  ;;  %2734 = vmatpush.bf16.msra.mxu2 %v4679_v4 }
 0x2bb   : > { %v6492_v56 = vadd.f32 %v2153_v23, %v6262_v9  ;;  %v4843_v23 = vld [vmem:[#allocation10 + $0xf4] sm:$0xf0] }
 0x2bc   : > { %v6460_v62 = vpop.eup %5003  ;;  %v1841_v18 = vmul.f32 %v6457_v20, %v6457_v20  ;;  %v1799_v24 = vmul.f32 1.442695, %v1731_v45  ;;  %v1905_v51 = vmul.f32 2.0, %v1731_v45  ;;  %v4683_v45 = vor.u32 %v4840_v44, %v4680_v53 }
 0x2bd   : > { %v2251_v32 = vpop.xlane.xlu0 %2250  ;;  %v6470_v30 = vmul.f32 %v6460_v62, %v6460_v62  ;;  %8069 = vst [vmem:[#allocation79_spill] sm:$0xff] %v6492_v56  ;;  %v6507_v9 = vsel %vm2205_vm2, %v6492_v56, -1e+30 }
 0x2be   : > { %v1873_v19 = vsub.f32 1.0, %v1841_v18  ;;  %5007 = vpow2.f32 %v1799_v24  ;;  %v2308_v17 = vsub.f32 %v6150_v43, %v2251_v32  ;;  %v6481_v18 = vsel %vm2205_vm2, %v6465_v48, -1e+30  ;;  %2823 = vmatpush.bf16.msra.mxu3 %v4683_v45  ;;  %v4686_v45 = vld [vmem:[#allocation10 + $0xe8] sm:$0xf] }
 0x2bf   : > { %8067 = vst [vmem:[#allocation77_spill] sm:$0xff] %v6470_v30  ;;  %v4688_v48 = vld [vmem:[#allocation10 + $0xf8] sm:$0xf0] }
 0x2c0   : > { %v6476_v59 = vpop.eup %5005  ;;  %v2346_v63 = vmul.f32 1.442695, %v2308_v17  ;;  %v6483_v43 = vadd.f32 %v1905_v51, %v1873_v19  ;;  %v2122_v51 = vld [vmem:[%s5836_s30 + $0x78] sm:$0xff] }
 0x2c1   : > { %v1643_v24 = vpop.f32.mrf.mxu0  ;;  %v1732_v10 = vpop.f32.mrf.mxu1  ;;  %2264 = vmax.xlane.f32.xlu1 %v6481_v18  ;;  %2408 = vadd.xlane.f32.xlu2 %v6476_v59 }
 0x2c2   : > { %8068 = vst [vmem:[#allocation78_spill] sm:$0xff] %v6483_v43  ;;  %5009 = vpow2.f32 %v2346_v63  ;;  %v6488_v6 = vadd.f32 %v1643_v24, %v6015_v54  ;;  %v1733_v41 = vadd.f32 %v1732_v10, %v6017_v55  ;;  %v4687_v10 = vor.u32 %v4843_v23, %v4686_v45  ;;  %v4836_v43 = vld [vmem:[#allocation10 + $0xc4] sm:$0xf] }
 0x2c4   : > { %v6494_v53 = vpop.eup %5007  ;;  %v1842_v44 = vmul.f32 %v6488_v6, %v6488_v6  ;;  %v1801_v32 = vmul.f32 1.442695, %v1733_v41  ;;  %v1906_v24 = vmul.f32 2.0, %v1733_v41  ;;  %v2154_v41 = vmul.f32 %v6297_v28, %v2122_v51  ;;  %2912 = vmatpush.bf16.msra.mxu0 %v4687_v10 }
 0x2c5   : > { %v2253_v19 = vpop.xlane.xlu1 %2252  ;;  %v6501_v63 = vmul.f32 %v6494_v53, %v6494_v53 }
 0x2c6   : > { %v1874_v17 = vsub.f32 1.0, %v1842_v44  ;;  %5011 = vpow2.f32 %v1801_v32  ;;  %v2309_v4 = vsub.f32 %v6168_v46, %v2253_v19  ;;  %v4691_v32 = vor.u32 %v4841_v11, %v4688_v48 }
 0x2c7   : > { %8070 = vst [vmem:[#allocation80_spill] sm:$0xff] %v6501_v63  ;;  %v6527_v11 = vadd.f32 %v2154_v41, %v6278_v42 }
 0x2c8   : > { %v6511_v50 = vpop.eup %5009  ;;  %v2348_v44 = vmul.f32 1.442695, %v2309_v4  ;;  %v6514_v46 = vadd.f32 %v1906_v24, %v1874_v17  ;;  %3001 = vmatpush.bf16.msra.mxu1 %v4691_v32  ;;  %v2123_v17 = vld [vmem:[%s5836_s30 + $0x80] sm:$0xff] }
 0x2c9   : > { %v1646_v19 = vpop.f32.mrf.mxu0  ;;  %v1735_v25 = vpop.f32.mrf.mxu1  ;;  %2266 = vmax.xlane.f32.xlu1 %v6507_v9  ;;  %2410 = vadd.xlane.f32.xlu2 %v6511_v50  ;;  %8072 = vst [vmem:[#allocation82_spill] sm:$0xff] %v6527_v11  ;;  %v6542_v42 = vsel %vm2205_vm2, %v6527_v11, -1e+30  ;;  %v2155_v41 = vmul.f32 %v6314_v29, %v2123_v17 }
 0x2ca   : > { %8071 = vst [vmem:[#allocation81_spill] sm:$0xff] %v6514_v46  ;;  %5013 = vpow2.f32 %v2348_v44  ;;  %v6519_v45 = vadd.f32 %v1646_v19, %v6015_v54  ;;  %v1736_v23 = vadd.f32 %v1735_v25, %v6017_v55 }
 0x2cb   : > { %v6558_v17 = vadd.f32 %v2155_v41, %v6294_v22 }
 0x2cc   : > { %v6522_v4 = vpop.eup %5011  ;;  %v1843_v28 = vmul.f32 %v6519_v45, %v6519_v45  ;;  %v1803_v48 = vmul.f32 1.442695, %v1736_v23  ;;  %v1907_v25 = vmul.f32 2.0, %v1736_v23 }
 0x2cd   : > { %v2255_v51 = vpop.xlane.xlu1 %2254  ;;  %v6532_v24 = vmul.f32 %v6522_v4, %v6522_v4  ;;  %8075 = vst [vmem:[#allocation85_spill] sm:$0xff] %v6558_v17  ;;  %v6572_v11 = vsel %vm2205_vm2, %v6558_v17, -1e+30 }
 0x2ce   : > { %v1875_v44 = vsub.f32 1.0, %v1843_v28  ;;  %5015 = vpow2.f32 %v1803_v48  ;;  %v2310_v10 = vsub.f32 %v6190_v52, %v2255_v51 }
 0x2cf   : > { %8073 = vst [vmem:[#allocation83_spill] sm:$0xff] %v6532_v24 }
 0x2d0   : > { %v6537_v19 = vpop.eup %5013  ;;  %v2350_v30 = vmul.f32 1.442695, %v2310_v10  ;;  %v6545_v56 = vadd.f32 %v1907_v25, %v1875_v44  ;;  %v2124_v44 = vld [vmem:[%s5836_s30 + $0x88] sm:$0xff] }
 0x2d1   : > { %v1648_v28 = vpop.f32.mrf.mxu0  ;;  %v1737_v23 = vpop.f32.mrf.mxu1  ;;  %2412 = vadd.xlane.f32.xlu0 %v6537_v19  ;;  %2268 = vmax.xlane.f32.xlu2 %v6542_v42  ;;  %v2156_v22 = vmul.f32 %v6336_v40, %v2124_v44 }
 0x2d2   : > { %8074 = vst [vmem:[#allocation84_spill] sm:$0xff] %v6545_v56  ;;  %5017 = vpow2.f32 %v2350_v30  ;;  %v6550_v52 = vadd.f32 %v1648_v28, %v6015_v54  ;;  %v1738_v48 = vadd.f32 %v1737_v23, %v6017_v55  ;;  %v4838_v56 = vld [vmem:[#allocation10 + $0xcc] sm:$0xf0] }
 0x2d3   : > { %v6589_v44 = vadd.f32 %v2156_v22, %v6311_v37 }
 0x2d4   : > { %v6553_v51 = vpop.eup %5015  ;;  %v1844_v10 = vmul.f32 %v6550_v52, %v6550_v52  ;;  %v1805_v29 = vmul.f32 1.442695, %v1738_v48  ;;  %v1908_v28 = vmul.f32 2.0, %v1738_v48 }
 0x2d5   : > { %v6563_v25 = vmul.f32 %v6553_v51, %v6553_v51  ;;  %8079 = vst [vmem:[#allocation89_spill] sm:$0xff] %v6589_v44  ;;  %v6601_v37 = vsel %vm2205_vm2, %v6589_v44, -1e+30  ;;  %v4837_v44 = vld [vmem:[#allocation10 + $0xcc] sm:$0xf] }
 0x2d6   : > { %v1876_v30 = vsub.f32 1.0, %v1844_v10  ;;  %5019 = vpow2.f32 %v1805_v29  ;;  %v2125_v29 = vld [vmem:[%s5836_s30 + $0x90] sm:$0xff] }
 0x2d7   : > { %8076 = vst [vmem:[#allocation86_spill] sm:$0xff] %v6563_v25 }
 0x2d8   : > { %v6567_v32 = vpop.eup %5017  ;;  %v6575_v41 = vadd.f32 %v1908_v28, %v1876_v30  ;;  %v2157_v30 = vmul.f32 %v6367_v47, %v2125_v29  ;;  %v4667_v47 = vor.u32 %v4836_v43, %v4664_v5  ;;  %v4672_v43 = vld [vmem:[#allocation10 + $0xd8] sm:$0xf0] }
 0x2d9   : > { %8077 = vst [vmem:[#allocation87_spill] sm:$0xff] %v6567_v32  ;;  %v1651_v24 = vpop.f32.mrf.mxu0  ;;  %v1740_v46 = vpop.f32.mrf.mxu1  ;;  %2414 = vadd.xlane.f32.xlu0 %v6567_v32  ;;  %2270 = vmax.xlane.f32.xlu2 %v6572_v11  ;;  %v4592_v32 = vld [vmem:[#allocation10 + $0x38] sm:$0xf0] }
 0x2da   : > { %8078 = vst [vmem:[#allocation88_spill] sm:$0xff] %v6575_v41  ;;  %v6580_v48 = vadd.f32 %v1651_v24, %v6015_v54  ;;  %v1741_v10 = vadd.f32 %v1740_v46, %v6017_v55  ;;  %v4662_v46 = vld [vmem:[#allocation10 + $0xc0] sm:$0xf]  ;;  %2824 = vmatpush.bf16.msra.mxu3 %v4667_v47  ;;  %v4832_v41 = vld [vmem:[#allocation10 + $0xa4] sm:$0xf] }
 0x2db   : > { %v4663_v63 = vor.u32 %v4838_v56, %v4662_v46  ;;  %v4670_v46 = vld [vmem:[#allocation10 + $0xc8] sm:$0xf] }
 0x2dc   : > { %v6584_v23 = vpop.eup %5019  ;;  %v1845_v17 = vmul.f32 %v6580_v48, %v6580_v48  ;;  %v1807_v40 = vmul.f32 1.442695, %v1741_v10  ;;  %v1909_v25 = vmul.f32 2.0, %v1741_v10  ;;  %v6607_v10 = vadd.f32 %v2157_v30, %v6333_v16 }
 0x2dd   : > { %v6594_v28 = vmul.f32 %v6584_v23, %v6584_v23  ;;  %2735 = vmatpush.bf16.msra.mxu2 %v4663_v63  ;;  %v4671_v5 = vor.u32 %v4839_v15, %v4670_v46  ;;  %v4675_v16 = vor.u32 %v4837_v44, %v4672_v43  ;;  %v4654_v44 = vld [vmem:[#allocation10 + $0xa8] sm:$0xf] }
 0x2de   : > { %v1877_v24 = vsub.f32 1.0, %v1845_v17  ;;  %5021 = vpow2.f32 %v1807_v40  ;;  %8082 = vst [vmem:[#allocation92_spill] sm:$0xff] %v6607_v10  ;;  %v6620_v63 = vsel %vm2205_vm2, %v6607_v10, -1e+30  ;;  %v4651_v10 = vor.u32 %v4832_v41, %v4648_v27  ;;  %v4830_v27 = vld [vmem:[#allocation10 + $0x8c] sm:$0xf0] }
 0x2df   : > { %8080 = vst [vmem:[#allocation90_spill] sm:$0xff] %v6594_v28  ;;  %2913 = vmatpush.bf16.msra.mxu0 %v4671_v5  ;;  %3002 = vmatpush.bf16.msra.mxu1 %v4675_v16  ;;  %v4833_v5 = vld [vmem:[#allocation10 + $0xac] sm:$0xf]  ;;  %v4828_v41 = vld [vmem:[#allocation10 + $0x84] sm:$0xf] }
 0x2e0   : > { %v6603_v22 = vadd.f32 %v1909_v25, %v1877_v24  ;;  %2825 = vmatpush.bf16.msra.mxu3 %v4651_v10  ;;  %v4638_v43 = vld [vmem:[#allocation10 + $0x88] sm:$0xf]  ;;  %v4640_v10 = vld [vmem:[#allocation10 + $0x98] sm:$0xf0] }
 0x2e1   : > { %v1653_v29 = vpop.f32.mrf.mxu0  ;;  %v1742_v17 = vpop.f32.mrf.mxu1  ;;  %2272 = vmax.xlane.f32.xlu0 %v6601_v37 }
 0x2e2   : > { %8081 = vst [vmem:[#allocation91_spill] sm:$0xff] %v6603_v22  ;;  %v6610_v56 = vadd.f32 %v1653_v29, %v6015_v54  ;;  %v1743_v40 = vadd.f32 %v1742_v17, %v6017_v55  ;;  %v4646_v29 = vld [vmem:[#allocation10 + $0xa0] sm:$0xf]  ;;  %v4834_v17 = vld [vmem:[#allocation10 + $0xac] sm:$0xf0] }
 0x2e3   : > { %v4647_v46 = vor.u32 %v4834_v17, %v4646_v29  ;;  %v4630_v17 = vld [vmem:[#allocation10 + $0x80] sm:$0xf] }
 0x2e4   : > { %v6613_v25 = vpop.eup %5021  ;;  %v1846_v24 = vmul.f32 %v6610_v56, %v6610_v56  ;;  %v1809_v28 = vmul.f32 1.442695, %v1743_v40  ;;  %v1910_v15 = vmul.f32 2.0, %v1743_v40  ;;  %v4659_v40 = vor.u32 %v4833_v5, %v4656_v14 }
 0x2e5   : > { %v6624_v30 = vmul.f32 %v6613_v25, %v6613_v25  ;;  %2736 = vmatpush.bf16.msra.mxu2 %v4647_v46  ;;  %v4829_v46 = vld [vmem:[#allocation10 + $0x8c] sm:$0xf] }
 0x2e6   : > { %v1878_v47 = vsub.f32 1.0, %v1846_v24  ;;  %5023 = vpow2.f32 %v1809_v28  ;;  %v4655_v28 = vor.u32 %v4835_v38, %v4654_v44  ;;  %3003 = vmatpush.bf16.msra.mxu1 %v4659_v40  ;;  %v4643_v40 = vor.u32 %v4829_v46, %v4640_v10 }
 0x2e7   : > { %8083 = vst [vmem:[#allocation93_spill] sm:$0xff] %v6624_v30  ;;  %v4831_v30 = vld [vmem:[#allocation10 + $0x94] sm:$0xf0] }
 0x2e8   : > { %v6628_v1 = vadd.f32 %v1910_v15, %v1878_v47  ;;  %2914 = vmatpush.bf16.msra.mxu0 %v4655_v28  ;;  %v4631_v47 = vor.u32 %v4830_v27, %v4630_v17  ;;  %v4632_v15 = vld [vmem:[#allocation10 + $0x90] sm:$0xf0]  ;;  %v4639_v44 = vor.u32 %v4831_v30, %v4638_v43  ;;  %v4614_v17 = vld [vmem:[#allocation10 + $0x60] sm:$0xf]  ;;  %v4826_v27 = vld [vmem:[#allocation10 + $0x6c] sm:$0xf0]  ;;  %v4619_v43 = vor.u32 %v4824_v33, %v4616_v34 }
 0x2e9   : > { %v1656_v36 = vpop.f32.mrf.mxu0  ;;  %v1745_v24 = vpop.f32.mrf.mxu1  ;;  %2274 = vmax.xlane.f32.xlu0 %v6620_v63  ;;  %v4615_v58 = vor.u32 %v4826_v27, %v4614_v17  ;;  %v4598_v17 = vld [vmem:[#allocation10 + $0x40] sm:$0xf]  ;;  %v4822_v27 = vld [vmem:[#allocation10 + $0x4c] sm:$0xf0]  ;;  %v4600_v33 = vld [vmem:[#allocation10 + $0x50] sm:$0xf0] }
 0x2ea   : > { %8084 = vst [vmem:[#allocation94_spill] sm:$0xff] %v6628_v1  ;;  %v6632_v16 = vadd.f32 %v1656_v36, %v6015_v54  ;;  %v1746_v29 = vadd.f32 %v1745_v24, %v6017_v55  ;;  %v4635_v36 = vor.u32 %v4828_v41, %v4632_v15  ;;  %2737 = vmatpush.bf16.msra.mxu2 %v4631_v47  ;;  %v4622_v41 = vld [vmem:[#allocation10 + $0x68] sm:$0xf]  ;;  %v4827_v47 = vld [vmem:[#allocation10 + $0x74] sm:$0xf0] }
 0x2eb   : > { %3004 = vmatpush.bf16.msra.mxu1 %v4643_v40  ;;  %v4825_v15 = vld [vmem:[#allocation10 + $0x6c] sm:$0xf]  ;;  %v4820_v40 = vld [vmem:[#allocation10 + $0x44] sm:$0xf]  ;;  %v4599_v34 = vor.u32 %v4822_v27, %v4598_v17  ;;  %v4606_v30 = vld [vmem:[#allocation10 + $0x48] sm:$0xf] }
 0x2ec   : > { %v6635_v22 = vpop.eup %5023  ;;  %v1847_v14 = vmul.f32 %v6632_v16, %v6632_v16  ;;  %v1811_v38 = vmul.f32 1.442695, %v1746_v29  ;;  %v1911_v28 = vmul.f32 2.0, %v1746_v29  ;;  %2826 = vmatpush.bf16.msra.mxu3 %v4635_v36  ;;  %2915 = vmatpush.bf16.msra.mxu0 %v4639_v44  ;;  %v4623_v36 = vor.u32 %v4827_v47, %v4622_v41  ;;  %v4821_v47 = vld [vmem:[#allocation10 + $0x4c] sm:$0xf] }
 0x2ed   : > { %v6641_v5 = vmul.f32 %v6635_v22, %v6635_v22  ;;  %v4627_v46 = vor.u32 %v4825_v15, %v4624_v13  ;;  %v4603_v41 = vor.u32 %v4820_v40, %v4600_v33  ;;  %v4582_v27 = vld [vmem:[#allocation10 + $0x20] sm:$0xf]  ;;  %v4590_v40 = vld [vmem:[#allocation10 + $0x28] sm:$0xf]  ;;  %v4819_v33 = vld [vmem:[#allocation10 + $0x34] sm:$0xf0] }
 0x2ee   : > { %v1879_v24 = vsub.f32 1.0, %v1847_v14  ;;  %5025 = vpow2.f32 %v1811_v38  ;;  %2738 = vmatpush.bf16.msra.mxu2 %v4615_v58 }
 0x2ef   : > { %8085 = vst [vmem:[#allocation95_spill] sm:$0xff] %v6641_v5  ;;  %3005 = vmatpush.bf16.msra.mxu1 %v4627_v46  ;;  %v4818_v5 = vld [vmem:[#allocation10 + $0x2c] sm:$0xf0]  ;;  %v4584_v46 = vld [vmem:[#allocation10 + $0x30] sm:$0xf0] }
 0x2f0   : > { %v6645_v14 = vadd.f32 %v1911_v28, %v1879_v24  ;;  %2827 = vmatpush.bf16.msra.mxu3 %v4619_v43  ;;  %2916 = vmatpush.bf16.msra.mxu0 %v4623_v36  ;;  %v4823_v24 = vld [vmem:[#allocation10 + $0x54] sm:$0xf0]  ;;  %v4608_v43 = vld [vmem:[#allocation10 + $0x58] sm:$0xf0]  ;;  %v4583_v1 = vor.u32 %v4818_v5, %v4582_v27  ;;  %v4814_v27 = vld [vmem:[#allocation10 + $0xc] sm:$0xf0] }
 0x2f1   : > { %v1658_v29 = vpop.f32.mrf.mxu0  ;;  %v1747_v38 = vpop.f32.mrf.mxu1  ;;  %v4607_v15 = vor.u32 %v4823_v24, %v4606_v30  ;;  %v4611_v17 = vor.u32 %v4821_v47, %v4608_v43  ;;  %v4817_v24 = vld [vmem:[#allocation10 + $0x2c] sm:$0xf]  ;;  %v4566_v43 = vld [vmem:[#allocation10] sm:$0xf]  ;;  %v4574_v30 = vld [vmem:[#allocation10 + $0x8] sm:$0xf] }
 0x2f2   : > { %v6648_v44 = vadd.f32 %v1658_v29, %v6015_v54  ;;  %v1748_v10 = vadd.f32 %v1747_v38, %v6017_v55  ;;  %2739 = vmatpush.bf16.msra.mxu2 %v4599_v34  ;;  %v4595_v47 = vor.u32 %v4817_v24, %v4592_v32 }
 0x2f3   : > { %3006 = vmatpush.bf16.msra.mxu1 %v4611_v17  ;;  %v4812_v17 = vld [vmem:[#allocation10 + $0x4] sm:$0xf] }
 0x2f4   : > { %8086 = vst [vmem:[#allocation96_spill] sm:$0xff] %v6648_v44  ;;  %v6651_v28 = vpop.eup %5025  ;;  %v1848_v58 = vmul.f32 %v6648_v44, %v6648_v44  ;;  %v1813_v13 = vmul.f32 1.442695, %v1748_v10  ;;  %v1912_v36 = vmul.f32 2.0, %v1748_v10  ;;  %2828 = vmatpush.bf16.msra.mxu3 %v4603_v41  ;;  %2917 = vmatpush.bf16.msra.mxu0 %v4607_v15  ;;  %v4816_v44 = vld [vmem:[#allocation10 + $0x24] sm:$0xf]  ;;  %v4591_v41 = vor.u32 %v4819_v33, %v4590_v40 }
 0x2f5   : > { %v6657_v29 = vmul.f32 %v6651_v28, %v6651_v28  ;;  %v4587_v34 = vor.u32 %v4816_v44, %v4584_v46  ;;  %v4567_v44 = vor.u32 %v4814_v27, %v4566_v43  ;;  %v4568_v46 = vld [vmem:[#allocation10 + $0x10] sm:$0xf0]  ;;  %v4813_v33 = vld [vmem:[#allocation10 + $0xc] sm:$0xf] }
 0x2f6   : > { %v1880_v38 = vsub.f32 1.0, %v1848_v58  ;;  %5027 = vpow2.f32 %v1813_v13  ;;  %2740 = vmatpush.bf16.msra.mxu2 %v4583_v1  ;;  %v4571_v40 = vor.u32 %v4812_v17, %v4568_v46 }
 0x2f7   : > { %3007 = vmatpush.bf16.msra.mxu1 %v4595_v47 }
 0x2f8   : > { %v6661_v58 = vadd.f32 %v1912_v36, %v1880_v38  ;;  %2829 = vmatpush.bf16.msra.mxu3 %v4587_v34  ;;  %2918 = vmatpush.bf16.msra.mxu0 %v4591_v41  ;;  %v4815_v38 = vld [vmem:[#allocation10 + $0x14] sm:$0xf0]  ;;  %v4576_v34 = vld [vmem:[#allocation10 + $0x18] sm:$0xf0] }
 0x2f9   : > { %v1661_v10 = vpop.f32.mrf.mxu0  ;;  %v1750_v13 = vpop.f32.mrf.mxu1  ;;  %v4575_v24 = vor.u32 %v4815_v38, %v4574_v30  ;;  %v4579_v43 = vor.u32 %v4813_v33, %v4576_v34 }
 0x2fa   : > { %8087 = vst [vmem:[#allocation97_spill] sm:$0xff] %v6661_v58  ;;  %v6664_v5 = vadd.f32 %v1661_v10, %v6015_v54  ;;  %v1751_v15 = vadd.f32 %v1750_v13, %v6017_v55  ;;  %2741 = vmatpush.bf16.msra.mxu2 %v4567_v44 }
 0x2fb   : > { %3008 = vmatpush.bf16.msra.mxu1 %v4579_v43 }
 0x2fc   : > { %v6667_v36 = vpop.eup %5027  ;;  %v1849_v1 = vmul.f32 %v6664_v5, %v6664_v5  ;;  %v1815_v32 = vmul.f32 1.442695, %v1751_v15  ;;  %v1913_v41 = vmul.f32 2.0, %v1751_v15  ;;  %2830 = vmatpush.bf16.msra.mxu3 %v4571_v40  ;;  %2919 = vmatpush.bf16.msra.mxu0 %v4575_v24 }
 0x2fd   : > { %v6673_v10 = vmul.f32 %v6667_v36, %v6667_v36 }
 0x2fe   : > { %v1881_v13 = vsub.f32 1.0, %v1849_v1  ;;  %5029 = vpow2.f32 %v1815_v32 }
 0x2ff   : > { %8088 = vst [vmem:[#allocation98_spill] sm:$0xff] %v6673_v10 }
 0x300   : > { %v6677_v47 = vadd.f32 %v1913_v41, %v1881_v13 }
 0x301   : > { %v1663_v17 = vpop.f32.mrf.mxu0  ;;  %v1752_v44 = vpop.f32.mrf.mxu1 }
 0x302   : > { %v6680_v30 = vadd.f32 %v1663_v17, %v6015_v54  ;;  %v1753_v46 = vadd.f32 %v1752_v44, %v6017_v55 }
 0x304   : > { %v6683_v38 = vpop.eup %5029  ;;  %v1850_v15 = vmul.f32 %v6680_v30, %v6680_v30  ;;  %v1817_v1 = vmul.f32 1.442695, %v1753_v46  ;;  %v1914_v33 = vmul.f32 2.0, %v1753_v46 }
 0x305   : > { %v6689_v32 = vmul.f32 %v6683_v38, %v6683_v38 }
 0x306   : > { %v1882_v40 = vsub.f32 1.0, %v1850_v15  ;;  %5031 = vpow2.f32 %v1817_v1 }
 0x308   : > { %v6693_v54 = vadd.f32 %v1914_v33, %v1882_v40 }
 0x30c   : > { %v6695_v34 = vpop.eup %5031  ;;  %v2399_v55 = vpop.xlane.xlu2 %2398 }
 0x30d   : > { %v6699_v13 = vmul.f32 %v6695_v34, %v6695_v34  ;;  %5033 = vrcp.f32 %v2399_v55 }
 0x313   : > { %v5034_v15 = vpop.eup %5033 }
 0x314   : > { %v2257_v43 = vpop.xlane.xlu2 %2256  ;;  %v2401_v17 = vpop.xlane.xlu0 %2400  ;;  %v2494_v40 = vmul.f32 %v5034_v15, %v6326_v2 }
 0x315   : > { %v2311_v44 = vsub.f32 %v6356_v0, %v2257_v43  ;;  %5035 = vrcp.f32 %v2401_v17 }
 0x317   : > { %v2352_v46 = vmul.f32 1.442695, %v2311_v44 }
 0x319   : > { %5037 = vpow2.f32 %v2352_v46 }
 0x31b   : > { %v5036_v1 = vpop.eup %5035 }
 0x31c   : > { %v2495_v33 = vmul.f32 %v5036_v1, %v6351_v8  ;;  %v2259_v27 = vpop.xlane.xlu2 %2258  ;;  %v2403_v24 = vpop.xlane.xlu0 %2402  ;;  %v2126_v8 = vld [vmem:[%s5836_s30 + $0x98] sm:$0xff] }
 0x31d   : > { %v2312_v10 = vsub.f32 %v6387_v61, %v2259_v27 }
 0x31e   : > { %v2526_v41 = vpack.c.bf16 %v2495_v33, %v2494_v40 }
 0x31f   : > { %v6707_v55 = vpop.eup %5037  ;;  %v2354_v58 = vmul.f32 1.442695, %v2312_v10  ;;  %v2158_v10 = vmul.f32 %v6398_v35, %v2126_v8  ;;  %v2128_v8 = vld [vmem:[%s5836_s30 + $0xa8] sm:$0xff] }
 0x320   : > { %2416 = vadd.xlane.f32.xlu1 %v6707_v55  ;;  %2742 = vmatmul.bf16.vlgmr.msra.gmra.mxu2 %v2526_v41 }
 0x321   : > { %5039 = vpow2.f32 %v2354_v58  ;;  %2831 = vmatmul.bf16.vlgmr.msra.gmra.mxu3 %v2526_v41  ;;  %2920 = vmatmul.bf16.vlgmr.msra.gmra.mxu0 %v2526_v41 }
 0x322   : > { %3009 = vmatmul.bf16.vlgmr.msra.gmra.mxu1 %v2526_v41  ;;  %5041 = vrcp.f32 %v2403_v24  ;;  %v6717_v41 = vadd.f32 %v2158_v10, %v6364_v39 }
 0x324   : > { %v2405_v2 = vpop.xlane.xlu1 %2404  ;;  %v2261_v0 = vpop.xlane.xlu0 %2260  ;;  %8089 = vst [vmem:[#allocation99_spill] sm:$0xff] %v6717_v41 }
 0x325   : > { %5043 = vrcp.f32 %v2405_v2  ;;  %v2313_v43 = vsub.f32 %v6418_v49, %v2261_v0  ;;  %v2127_v49 = vld [vmem:[%s5836_s30 + $0xa0] sm:$0xff]  ;;  %v6728_v2 = vsel %vm2205_vm2, %v6717_v41, -1e+30 }
 0x326   : > { %v2159_v39 = vmul.f32 %v6429_v26, %v2127_v49 }
 0x327   : > { %v6712_v61 = vpop.eup %5039  ;;  %v2356_v27 = vmul.f32 1.442695, %v2313_v43 }
 0x328   : > { %2418 = vadd.xlane.f32.xlu1 %v6712_v61  ;;  %v5042_v17 = vpop.eup %5041 }
 0x329   : > { %5045 = vpow2.f32 %v2356_v27  ;;  %v2496_v24 = vmul.f32 %v5042_v17, %v6382_v21  ;;  %v6734_v21 = vadd.f32 %v2159_v39, %v6395_v57  ;;  %v2160_v57 = vmul.f32 %v6460_v62, %v2128_v8 }
 0x32b   : > { %v5044_v58 = vpop.eup %5043  ;;  %8090 = vst [vmem:[#allocation100_spill] sm:$0xff] %v6734_v21  ;;  %v6743_v27 = vsel %vm2205_vm2, %v6734_v21, -1e+30 }
 0x32c   : > { %v2497_v44 = vmul.f32 %v5044_v58, %v6413_v31  ;;  %v2407_v46 = vpop.xlane.xlu1 %2406  ;;  %v2263_v15 = vpop.xlane.xlu0 %2262 }
 0x32d   : > { %v2314_v1 = vsub.f32 %v6449_v3, %v2263_v15  ;;  %v6752_v15 = vadd.f32 %v2160_v57, %v6426_v60 }
 0x32e   : > { %v2527_v40 = vpack.c.bf16 %v2497_v44, %v2496_v24 }
 0x32f   : > { %v6723_v33 = vpop.eup %5045  ;;  %v2358_v35 = vmul.f32 1.442695, %v2314_v1  ;;  %8091 = vst [vmem:[#allocation101_spill] sm:$0xff] %v6752_v15  ;;  %v2129_v1 = vld [vmem:[%s5836_s30 + $0xb0] sm:$0xff] }
 0x330   : > { %2276 = vmax.xlane.f32.xlu1 %v6728_v2  ;;  %2747 = vmatmul.bf16.gmra.mxu2 %v2527_v40  ;;  %v2161_v60 = vmul.f32 %v6494_v53, %v2129_v1 }
 0x331   : > { %5047 = vpow2.f32 %v2358_v35  ;;  %2836 = vmatmul.bf16.gmra.mxu3 %v2527_v40  ;;  %2925 = vmatmul.bf16.gmra.mxu0 %v2527_v40  ;;  %v2130_v35 = vld [vmem:[%s5836_s30 + $0xb8] sm:$0xff] }
 0x332   : > { %3014 = vmatmul.bf16.gmra.mxu1 %v2527_v40  ;;  %2420 = vadd.xlane.f32.xlu2 %v6723_v33  ;;  %5049 = vrcp.f32 %v2407_v46  ;;  %v2162_v8 = vmul.f32 %v6522_v4, %v2130_v35 }
 0x334   : > { %v2265_v31 = vpop.xlane.xlu1 %2264  ;;  %v2409_v3 = vpop.xlane.xlu2 %2408 }
 0x335   : > { %v2315_v0 = vsub.f32 %v6481_v18, %v2265_v31  ;;  %5051 = vrcp.f32 %v2409_v3  ;;  %v6768_v31 = vadd.f32 %v2161_v60, %v6457_v20  ;;  %v6781_v20 = vadd.f32 %v2162_v8, %v6488_v6 }
 0x337   : > { %v6738_v26 = vpop.eup %5047  ;;  %v2360_v43 = vmul.f32 1.442695, %v2315_v0  ;;  %8092 = vst [vmem:[#allocation102_spill] sm:$0xff] %v6768_v31 }
 0x338   : > { %2278 = vmax.xlane.f32.xlu1 %v6743_v27  ;;  %v5050_v10 = vpop.eup %5049  ;;  %8093 = vst [vmem:[#allocation103_spill] sm:$0xff] %v6781_v20 }
 0x339   : > { %5053 = vpow2.f32 %v2360_v43  ;;  %v2498_v17 = vmul.f32 %v5050_v10, %v6444_v7  ;;  %v6761_v7 = vsel %vm2205_vm2, %v6752_v15, -1e+30  ;;  %v6777_v43 = vsel %vm2205_vm2, %v6768_v31, -1e+30 }
 0x33a   : > { %2422 = vadd.xlane.f32.xlu2 %v6738_v26 }
 0x33b   : > { %v5052_v18 = vpop.eup %5051 }
 0x33c   : > { %v2499_v58 = vmul.f32 %v5052_v18, %v6476_v59  ;;  %v2267_v24 = vpop.xlane.xlu1 %2266  ;;  %v2411_v44 = vpop.xlane.xlu2 %2410 }
 0x33d   : > { %v2316_v46 = vsub.f32 %v6507_v9, %v2267_v24 }
 0x33e   : > { %v2528_v49 = vpack.c.bf16 %v2499_v58, %v2498_v17  ;;  %v2131_v17 = vld [vmem:[%s5836_s30 + $0xc0] sm:$0xff] }
 0x33f   : > { %v6755_v40 = vpop.eup %5053  ;;  %v2362_v62 = vmul.f32 1.442695, %v2316_v46  ;;  %v2163_v6 = vmul.f32 %v6553_v51, %v2131_v17 }
 0x340   : > { %2424 = vadd.xlane.f32.xlu0 %v6755_v40  ;;  %2752 = vmatmul.bf16.gmra.mxu2 %v2528_v49 }
 0x341   : > { %5055 = vpow2.f32 %v2362_v62  ;;  %2841 = vmatmul.bf16.gmra.mxu3 %v2528_v49  ;;  %2930 = vmatmul.bf16.gmra.mxu0 %v2528_v49 }
 0x342   : > { %3019 = vmatmul.bf16.gmra.mxu1 %v2528_v49  ;;  %2280 = vmax.xlane.f32.xlu2 %v6761_v7  ;;  %5057 = vrcp.f32 %v2411_v44  ;;  %v6792_v49 = vsel %vm2205_vm2, %v6781_v20, -1e+30 }
 0x344   : > { %v2269_v59 = vpop.xlane.xlu2 %2268  ;;  %v2413_v9 = vpop.xlane.xlu0 %2412 }
 0x345   : > { %v2317_v39 = vsub.f32 %v6542_v42, %v2269_v59  ;;  %5059 = vrcp.f32 %v2413_v9  ;;  %v2133_v9 = vld [vmem:[%s5836_s30 + $0xd0] sm:$0xff] }
 0x346   : > { %v2165_v8 = vmul.f32 %v6613_v25, %v2133_v9 }
 0x347   : > { %v6770_v3 = vpop.eup %5055  ;;  %v2364_v0 = vmul.f32 1.442695, %v2317_v39 }
 0x348   : > { %2426 = vadd.xlane.f32.xlu0 %v6770_v3  ;;  %v5058_v53 = vpop.eup %5057 }
 0x349   : > { %5061 = vpow2.f32 %v2364_v0  ;;  %v2500_v10 = vmul.f32 %v5058_v53, %v6511_v50  ;;  %v6798_v50 = vadd.f32 %v2163_v6, %v6519_v45 }
 0x34a   : > { %2282 = vmax.xlane.f32.xlu2 %v6777_v43 }
 0x34b   : > { %v5060_v42 = vpop.eup %5059  ;;  %8094 = vst [vmem:[#allocation104_spill] sm:$0xff] %v6798_v50  ;;  %v6807_v60 = vsel %vm2205_vm2, %v6798_v50, -1e+30 }
 0x34c   : > { %v2501_v57 = vmul.f32 %v5060_v42, %v6537_v19  ;;  %v2271_v4 = vpop.xlane.xlu2 %2270  ;;  %v2415_v18 = vpop.xlane.xlu0 %2414  ;;  %v2132_v19 = vld [vmem:[%s5836_s30 + $0xc8] sm:$0xff] }
 0x34d   : > { %v2318_v58 = vsub.f32 %v6572_v11, %v2271_v4  ;;  %v2164_v59 = vmul.f32 %v6584_v23, %v2132_v19 }
 0x34e   : > { %v2529_v24 = vpack.c.bf16 %v2501_v57, %v2500_v10  ;;  %v2135_v57 = vld [vmem:[%s5836_s30 + $0xe0] sm:$0xff] }
 0x34f   : > { %v6787_v44 = vpop.eup %5061  ;;  %v2366_v46 = vmul.f32 1.442695, %v2318_v58  ;;  %v6813_v45 = vadd.f32 %v2164_v59, %v6550_v52  ;;  %v6828_v52 = vadd.f32 %v2165_v8, %v6580_v48  ;;  %v2167_v4 = vmul.f32 %v6651_v28, %v2135_v57 }
 0x350   : > { %2284 = vmax.xlane.f32.xlu0 %v6792_v49  ;;  %2428 = vadd.xlane.f32.xlu1 %v6787_v44 }
 0x351   : > { %5063 = vpow2.f32 %v2366_v46  ;;  %2757 = vmatmul.bf16.gmra.mxu2 %v2529_v24  ;;  %2846 = vmatmul.bf16.gmra.mxu3 %v2529_v24  ;;  %8095 = vst [vmem:[#allocation105_spill] sm:$0xff] %v6813_v45  ;;  %v6822_v23 = vsel %vm2205_vm2, %v6813_v45, -1e+30  ;;  %v6836_v42 = vsel %vm2205_vm2, %v6828_v52, -1e+30  ;;  %v6853_v17 = vadd.f32 %v2167_v4, %v6632_v16  ;;  %v8099_v46 = vld [vmem:[#allocation87_spill] sm:$0xff] }
 0x352   : > { %2935 = vmatmul.bf16.gmra.mxu0 %v2529_v24  ;;  %3024 = vmatmul.bf16.gmra.mxu1 %v2529_v24  ;;  %8096 = vst [vmem:[#allocation106_spill] sm:$0xff] %v6828_v52  ;;  %v367_v4 = vld [vmem:[%s5826_s26] sm:$0xff] }
 0x353   : > { %8098 = vst [vmem:[#allocation108_spill] sm:$0xff] %v6853_v17 }
 0x354   : > { %v2273_v11 = vpop.xlane.xlu0 %2272 }
 0x355   : > { %v2319_v1 = vsub.f32 %v6601_v37, %v2273_v11 }
 0x357   : > { %v6802_v62 = vpop.eup %5063  ;;  %v2368_v51 = vmul.f32 1.442695, %v2319_v1 }
 0x358   : > { %2286 = vmax.xlane.f32.xlu0 %v6807_v60  ;;  %2430 = vadd.xlane.f32.xlu1 %v6802_v62 }
 0x359   : > { %5065 = vpow2.f32 %v2368_v51 }
 0x35c   : > { %v2275_v37 = vpop.xlane.xlu0 %2274 }
 0x35d   : > { %v2320_v35 = vsub.f32 %v6620_v63, %v2275_v37  ;;  %v2134_v63 = vld [vmem:[%s5836_s30 + $0xd8] sm:$0xff] }
 0x35e   : > { %v2166_v10 = vmul.f32 %v6635_v22, %v2134_v63  ;;  %v6858_v22 = vsel %vm2205_vm2, %v6853_v17, -1e+30 }
 0x35f   : > { %v6817_v39 = vpop.eup %5065  ;;  %v2370_v0 = vmul.f32 1.442695, %v2320_v35 }
 0x360   : > { %2288 = vmax.xlane.f32.xlu1 %v6822_v23  ;;  %2432 = vadd.xlane.f32.xlu2 %v6817_v39  ;;  %v6842_v25 = vadd.f32 %v2166_v10, %v6610_v56 }
 0x361   : > { %5067 = vpow2.f32 %v2370_v0 }
 0x362   : > { %8097 = vst [vmem:[#allocation107_spill] sm:$0xff] %v6842_v25  ;;  %v6848_v48 = vsel %vm2205_vm2, %v6842_v25, -1e+30  ;;  %5069 = vrcp.f32 %v2415_v18 }
 0x367   : > { %v6831_v53 = vpop.eup %5067 }
 0x368   : > { %2290 = vmax.xlane.f32.xlu1 %v6836_v42  ;;  %2434 = vadd.xlane.f32.xlu2 %v6831_v53  ;;  %v5070_v58 = vpop.eup %5069 }
 0x369   : > { %v2502_v6 = vmul.f32 %v5070_v58, %v8099_v46  ;;  %v3346_v46 = vunpack.c.l.bf16 %v367_v4 }
 0x370   : > { %2292 = vmax.xlane.f32.xlu2 %v6848_v48 }
 0x378   : > { %2294 = vmax.xlane.f32.xlu2 %v6858_v22 }
 0x393   : > { %v2417_v56 = vpop.xlane.xlu1 %2416 }
 0x394   : > { %5071 = vrcp.f32 %v2417_v56 }
 0x39a   : > { %v5072_v24 = vpop.eup %5071 }
 0x39b   : > { %v2503_v28 = vmul.f32 %v5072_v24, %v6707_v55  ;;  %v2419_v11 = vpop.xlane.xlu1 %2418 }
 0x39c   : > { %5073 = vrcp.f32 %v2419_v11 }
 0x39d   : > { %v2530_v19 = vpack.c.bf16 %v2503_v28, %v2502_v6 }
 0x39e   : > { %v2921_v16 = vpop.f32.mrf.mxu0 }
 0x39f   : > { %v3010_v1 = vpop.f32.mrf.mxu1  ;;  %2762 = vmatmul.bf16.gmra.mxu2 %v2530_v19  ;;  %2851 = vmatmul.bf16.gmra.mxu3 %v2530_v19  ;;  %v2922_v51 = vadd.f32 1e-30, %v2921_v16 }
 0x3a0   : > { %2940 = vmatmul.bf16.gmra.mxu0 %v2530_v19  ;;  %3029 = vmatmul.bf16.gmra.mxu1 %v2530_v19  ;;  %v3011_v59 = vadd.f32 1e-30, %v3010_v1  ;;  %v3347_v19 = vunpack.c.h.bf16 %v367_v4 }
 0x3a1   : > { %5075 = vlog2.f32 %v2922_v51 }
 0x3a2   : > { %5077 = vlog2.f32 %v3011_v59  ;;  %v5074_v56 = vpop.eup %5073 }
 0x3a3   : > { %v2277_v18 = vpop.xlane.xlu1 %2276  ;;  %v2743_v37 = vpop.f32.mrf.mxu2  ;;  %v2504_v17 = vmul.f32 %v5074_v56, %v6712_v61 }
 0x3a4   : > { %v2321_v9 = vsub.f32 %v6728_v2, %v2277_v18  ;;  %v2744_v35 = vadd.f32 1e-30, %v2743_v37  ;;  %v2832_v55 = vpop.f32.mrf.mxu3  ;;  %v368_v2 = vld [vmem:[%s5826_s26 + $0x8] sm:$0xff] }
 0x3a5   : > { %v2833_v0 = vadd.f32 1e-30, %v2832_v55  ;;  %v2421_v8 = vpop.xlane.xlu2 %2420 }
 0x3a6   : > { %v2372_v63 = vmul.f32 1.442695, %v2321_v9  ;;  %5079 = vlog2.f32 %v2744_v35  ;;  %v6864_v10 = vpop.f32.mrf.mxu0  ;;  %v3348_v35 = vunpack.c.l.bf16 %v368_v2 }
 0x3a7   : > { %5081 = vlog2.f32 %v2833_v0  ;;  %v6866_v57 = vpop.f32.mrf.mxu1  ;;  %v5076_v58 = vpop.eup %5075 }
 0x3a8   : > { %5083 = vpow2.f32 %v2372_v63  ;;  %v5078_v24 = vpop.eup %5077  ;;  %v3095_v9 = vmul.f32 0.6931472, %v5076_v58 }
 0x3a9   : > { %5085 = vrcp.f32 %v2421_v8 }
 0x3aa   : > { %v3476_v50 = vmul.f32 %v3348_v35, %v3095_v9 }
 0x3ab   : > { %v2279_v6 = vpop.xlane.xlu1 %2278  ;;  %v6870_v28 = vpop.f32.mrf.mxu2 }
 0x3ac   : > { %v5080_v11 = vpop.eup %5079  ;;  %v2322_v16 = vsub.f32 %v6743_v27, %v2279_v6  ;;  %v6873_v1 = vpop.f32.mrf.mxu3  ;;  %v3349_v27 = vunpack.c.h.bf16 %v368_v2  ;;  %v3097_v6 = vmul.f32 0.6931472, %v5078_v24 }
 0x3ad   : > { %v5082_v51 = vpop.eup %5081  ;;  %v3091_v59 = vmul.f32 0.6931472, %v5080_v11  ;;  %v2423_v18 = vpop.xlane.xlu2 %2422 }
 0x3ae   : > { %v6875_v37 = vpop.eup %5083  ;;  %v3093_v55 = vmul.f32 0.6931472, %v5082_v51  ;;  %v2374_v0 = vmul.f32 1.442695, %v2322_v16  ;;  %v2926_v8 = vpop.f32.mrf.mxu0  ;;  %v2136_v51 = vld [vmem:[%s5836_s30 + $0xe8] sm:$0xff]  ;;  %v3477_v2 = vmul.f32 %v3349_v27, %v3097_v6 }
 0x3af   : > { %v5086_v63 = vpop.eup %5085  ;;  %v3474_v25 = vmul.f32 %v3346_v46, %v3091_v59  ;;  %v2927_v4 = vadd.f32 1e-30, %v2926_v8  ;;  %v3015_v52 = vpop.f32.mrf.mxu1  ;;  %2436 = vadd.xlane.f32.xlu0 %v6875_v37  ;;  %v371_v59 = vld [vmem:[%s5826_s26 + $0x20] sm:$0xff] }
 0x3b0   : > { %v3475_v11 = vmul.f32 %v3347_v19, %v3093_v55  ;;  %v2505_v45 = vmul.f32 %v5086_v63, %v6723_v33  ;;  %5087 = vpow2.f32 %v2374_v0  ;;  %v3016_v58 = vadd.f32 1e-30, %v3015_v52  ;;  %v372_v0 = vld [vmem:[%s5826_s26 + $0x28] sm:$0xff] }
 0x3b1   : > { %5089 = vrcp.f32 %v2423_v18  ;;  %v3354_v63 = vunpack.c.l.bf16 %v371_v59 }
 0x3b2   : > { %v2531_v16 = vpack.c.bf16 %v2505_v45, %v2504_v17  ;;  %v3602_v20 = vadd.f32 %v3475_v11, %v3474_v25  ;;  %5091 = vlog2.f32 %v2927_v4  ;;  %v2168_v45 = vmul.f32 %v6667_v36, %v2136_v51  ;;  %v8101_v36 = vld [vmem:[#allocation96_spill] sm:$0xff] }
 0x3b3   : > { %v2748_v31 = vpop.f32.mrf.mxu2  ;;  %v2425_v61 = vpop.xlane.xlu0 %2424  ;;  %v3355_v11 = vunpack.c.h.bf16 %v371_v59 }
 0x3b4   : > { %2767 = vmatmul.bf16.gmra.mxu2 %v2531_v16  ;;  %2856 = vmatmul.bf16.gmra.mxu3 %v2531_v16  ;;  %v2749_v56 = vadd.f32 1e-30, %v2748_v31  ;;  %v2837_v46 = vpop.f32.mrf.mxu3  ;;  %5093 = vrcp.f32 %v2425_v61  ;;  %v3603_v24 = vadd.f32 %v3602_v20, %v3476_v50  ;;  %v6894_v35 = vadd.f32 %v2168_v45, %v8101_v36 }
 0x3b5   : > { %5095 = vlog2.f32 %v3016_v58  ;;  %2945 = vmatmul.bf16.gmra.mxu0 %v2531_v16  ;;  %3034 = vmatmul.bf16.gmra.mxu1 %v2531_v16  ;;  %v2838_v33 = vadd.f32 1e-30, %v2837_v46  ;;  %v2281_v52 = vpop.xlane.xlu2 %2280  ;;  %v3356_v61 = vunpack.c.l.bf16 %v372_v0 }
 0x3b6   : > { %v6882_v25 = vpop.eup %5087  ;;  %5097 = vlog2.f32 %v2749_v56  ;;  %v2323_v17 = vsub.f32 %v6761_v7, %v2281_v52  ;;  %v6885_v31 = vpop.f32.mrf.mxu0  ;;  %v6887_v19 = vadd.f32 %v3603_v24, %v3477_v2  ;;  %8102 = vst [vmem:[#allocation96_spill] sm:$0xff] %v6894_v35  ;;  %v2137_v7 = vld [vmem:[%s5836_s30 + $0xf0] sm:$0xff]  ;;  %v6906_v2 = vsel %vm2205_vm2, %v6894_v35, -1e+30 }
 0x3b7   : > { %5099 = vlog2.f32 %v2838_v33  ;;  %v6889_v20 = vpop.f32.mrf.mxu1  ;;  %2438 = vadd.xlane.f32.xlu0 %v6882_v25  ;;  %v5090_v50 = vpop.eup %5089  ;;  %v2169_v24 = vmul.f32 %v6683_v38, %v2137_v7 }
 0x3b8   : > { %8100 = vst [vmem:[#allocation87_spill] sm:$0xff] %v6887_v19  ;;  %v2376_v18 = vmul.f32 1.442695, %v2323_v17  ;;  %v5092_v9 = vpop.eup %5091  ;;  %v2506_v33 = vmul.f32 %v5090_v50, %v6738_v26 }
 0x3b9   : > { %v3111_v52 = vmul.f32 0.6931472, %v5092_v9 }
 0x3ba   : > { %v5094_v55 = vpop.eup %5093  ;;  %5101 = vpow2.f32 %v2376_v18 }
 0x3bb   : > { %v5096_v8 = vpop.eup %5095  ;;  %v6898_v4 = vpop.f32.mrf.mxu2  ;;  %v2507_v58 = vmul.f32 %v5094_v55, %v6755_v40  ;;  %v3357_v55 = vunpack.c.h.bf16 %v372_v0  ;;  %v3484_v26 = vmul.f32 %v3356_v61, %v3111_v52 }
 0x3bc   : > { %v2427_v27 = vpop.xlane.xlu0 %2426  ;;  %v5098_v6 = vpop.eup %5097  ;;  %v3113_v15 = vmul.f32 0.6931472, %v5096_v8 }
 0x3bd   : > { %v6901_v16 = vpop.f32.mrf.mxu3  ;;  %v5100_v51 = vpop.eup %5099  ;;  %v3107_v56 = vmul.f32 0.6931472, %v5098_v6  ;;  %v2532_v41 = vpack.c.bf16 %v2507_v58, %v2506_v33  ;;  %5103 = vrcp.f32 %v2427_v27  ;;  %v2138_v27 = vld [vmem:[%s5836_s30 + $0xf8] sm:$0xff] }
 0x3be   : > { %v2283_v46 = vpop.xlane.xlu2 %2282  ;;  %v3109_v45 = vmul.f32 0.6931472, %v5100_v51  ;;  %v2931_v40 = vpop.f32.mrf.mxu0 }
 0x3bf   : > { %v2324_v17 = vsub.f32 %v6777_v43, %v2283_v46  ;;  %v3482_v59 = vmul.f32 %v3354_v63, %v3107_v56  ;;  %v2932_v18 = vadd.f32 1e-30, %v2931_v40  ;;  %v3020_v36 = vpop.f32.mrf.mxu1  ;;  %2296 = vmax.xlane.f32.xlu0 %v6906_v2  ;;  %v6916_v43 = vadd.f32 %v2169_v24, %v6664_v5  ;;  %v375_v24 = vld [vmem:[%s5826_s26 + $0x40] sm:$0xff] }
 0x3c0   : > { %v6912_v6 = vpop.eup %5101  ;;  %v3483_v35 = vmul.f32 %v3355_v11, %v3109_v45  ;;  %v3021_v38 = vadd.f32 1e-30, %v3020_v36  ;;  %v3485_v11 = vmul.f32 %v3357_v55, %v3113_v15  ;;  %v3362_v40 = vunpack.c.l.bf16 %v375_v24 }
 0x3c1   : > { %v2378_v21 = vmul.f32 1.442695, %v2324_v17  ;;  %2440 = vadd.xlane.f32.xlu1 %v6912_v6  ;;  %8103 = vst [vmem:[#allocation109_spill] sm:$0xff] %v6916_v43  ;;  %v6925_v51 = vsel %vm2205_vm2, %v6916_v43, -1e+30  ;;  %v376_v17 = vld [vmem:[%s5826_s26 + $0x48] sm:$0xff] }
 0x3c2   : > { %v3612_v50 = vadd.f32 %v3483_v35, %v3482_v59 }
 0x3c3   : > { %5105 = vpow2.f32 %v2378_v21  ;;  %v2429_v9 = vpop.xlane.xlu1 %2428  ;;  %v2753_v0 = vpop.f32.mrf.mxu2 }
 0x3c4   : > { %5107 = vlog2.f32 %v2932_v18  ;;  %2772 = vmatmul.bf16.gmra.mxu2 %v2532_v41  ;;  %2861 = vmatmul.bf16.gmra.mxu3 %v2532_v41  ;;  %v2754_v7 = vadd.f32 1e-30, %v2753_v0  ;;  %v2285_v63 = vpop.xlane.xlu0 %2284  ;;  %v3613_v58 = vadd.f32 %v3612_v50, %v3484_v26  ;;  %v5104_v15 = vpop.eup %5103 }
 0x3c5   : > { %5109 = vrcp.f32 %v2429_v9  ;;  %v2842_v8 = vpop.f32.mrf.mxu3  ;;  %2950 = vmatmul.bf16.gmra.mxu0 %v2532_v41  ;;  %3039 = vmatmul.bf16.gmra.mxu1 %v2532_v41  ;;  %v2325_v5 = vsub.f32 %v6792_v49, %v2285_v63  ;;  %v2170_v41 = vmul.f32 %v6695_v34, %v2138_v27  ;;  %v3364_v27 = vunpack.c.l.bf16 %v376_v17 }
 0x3c6   : > { %5111 = vlog2.f32 %v3021_v38  ;;  %v2843_v21 = vadd.f32 1e-30, %v2842_v8  ;;  %v6920_v35 = vpop.f32.mrf.mxu0  ;;  %v6927_v61 = vadd.f32 %v3613_v58, %v3485_v11  ;;  %v3363_v38 = vunpack.c.h.bf16 %v375_v24 }
 0x3c7   : > { %5113 = vlog2.f32 %v2754_v7  ;;  %v2380_v56 = vmul.f32 1.442695, %v2325_v5  ;;  %v6929_v46 = vpop.f32.mrf.mxu1  ;;  %2298 = vmax.xlane.f32.xlu0 %v6925_v51  ;;  %v6941_v36 = vadd.f32 %v2170_v41, %v6680_v30  ;;  %v2508_v8 = vmul.f32 %v5104_v15, %v6770_v3 }
 0x3c8   : > { %8104 = vst [vmem:[#allocation110_spill] sm:$0xff] %v6927_v61  ;;  %5115 = vlog2.f32 %v2843_v21  ;;  %v3365_v3 = vunpack.c.h.bf16 %v376_v17 }
 0x3c9   : > { %v6933_v49 = vpop.eup %5105  ;;  %5117 = vpow2.f32 %v2380_v56  ;;  %8105 = vst [vmem:[#allocation111_spill] sm:$0xff] %v6941_v36 }
 0x3ca   : > { %v5108_v33 = vpop.eup %5107  ;;  %2442 = vadd.xlane.f32.xlu1 %v6933_v49 }
 0x3cb   : > { %v5110_v52 = vpop.eup %5109  ;;  %v2431_v59 = vpop.xlane.xlu1 %2430  ;;  %v3127_v63 = vmul.f32 0.6931472, %v5108_v33 }
 0x3cc   : > { %v5112_v45 = vpop.eup %5111  ;;  %v6938_v18 = vpop.f32.mrf.mxu2  ;;  %v2509_v34 = vmul.f32 %v5110_v52, %v6787_v44  ;;  %v6953_v44 = vsel %vm2205_vm2, %v6941_v36, -1e+30 }
 0x3cd   : > { %v5114_v55 = vpop.eup %5113  ;;  %v6944_v26 = vpop.f32.mrf.mxu3  ;;  %v3129_v41 = vmul.f32 0.6931472, %v5112_v45  ;;  %v3492_v15 = vmul.f32 %v3364_v27, %v3127_v63  ;;  %v379_v27 = vld [vmem:[%s5826_s26 + $0x60] sm:$0xff] }
 0x3ce   : > { %v2287_v50 = vpop.xlane.xlu0 %2286  ;;  %v5116_v9 = vpop.eup %5115  ;;  %v3123_v0 = vmul.f32 0.6931472, %v5114_v55  ;;  %v2533_v52 = vpack.c.bf16 %v2509_v34, %v2508_v8 }
 0x3cf   : > { %v2326_v7 = vsub.f32 %v6807_v60, %v2287_v50  ;;  %v3125_v11 = vmul.f32 0.6931472, %v5116_v9  ;;  %v6948_v58 = vpop.eup %5117  ;;  %v2936_v5 = vpop.f32.mrf.mxu0  ;;  %v3493_v34 = vmul.f32 %v3365_v3, %v3129_v41  ;;  %v380_v41 = vld [vmem:[%s5826_s26 + $0x68] sm:$0xff] }
 0x3d0   : > { %v3490_v30 = vmul.f32 %v3362_v40, %v3123_v0  ;;  %v3025_v56 = vpop.f32.mrf.mxu1  ;;  %2444 = vadd.xlane.f32.xlu2 %v6948_v58  ;;  %v2937_v60 = vadd.f32 1e-30, %v2936_v5 }
 0x3d1   : > { %v2382_v21 = vmul.f32 1.442695, %v2326_v7  ;;  %v3491_v24 = vmul.f32 %v3363_v38, %v3125_v11  ;;  %v3026_v33 = vadd.f32 1e-30, %v3025_v56 }
 0x3d2   : > { %2300 = vmax.xlane.f32.xlu1 %v6953_v44 }
 0x3d3   : > { %5119 = vpow2.f32 %v2382_v21  ;;  %v3622_v40 = vadd.f32 %v3491_v24, %v3490_v30  ;;  %v2289_v55 = vpop.xlane.xlu1 %2288  ;;  %v2433_v50 = vpop.xlane.xlu2 %2432  ;;  %v3370_v24 = vunpack.c.l.bf16 %v379_v27 }
 0x3d4   : > { %5121 = vrcp.f32 %v2431_v59  ;;  %2777 = vmatmul.bf16.gmra.mxu2 %v2533_v52  ;;  %2866 = vmatmul.bf16.gmra.mxu3 %v2533_v52  ;;  %v2327_v9 = vsub.f32 %v6822_v23, %v2289_v55  ;;  %v2758_v45 = vpop.f32.mrf.mxu2  ;;  %v3371_v55 = vunpack.c.h.bf16 %v379_v27 }
 0x3d5   : > { %v2847_v38 = vpop.f32.mrf.mxu3  ;;  %5123 = vrcp.f32 %v2433_v50  ;;  %v3623_v17 = vadd.f32 %v3622_v40, %v3492_v15  ;;  %2955 = vmatmul.bf16.gmra.mxu0 %v2533_v52  ;;  %3044 = vmatmul.bf16.gmra.mxu1 %v2533_v52  ;;  %v2759_v0 = vadd.f32 1e-30, %v2758_v45 }
 0x3d6   : > { %5125 = vlog2.f32 %v2937_v60  ;;  %v2848_v7 = vadd.f32 1e-30, %v2847_v38  ;;  %v2384_v59 = vmul.f32 1.442695, %v2327_v9  ;;  %v3372_v38 = vunpack.c.l.bf16 %v380_v41 }
 0x3d7   : > { %5127 = vlog2.f32 %v3026_v33  ;;  %v6958_v8 = vadd.f32 %v3623_v17, %v3493_v34 }
 0x3d8   : > { %5129 = vlog2.f32 %v2759_v0 }
 0x3d9   : > { %8106 = vst [vmem:[#allocation112_spill] sm:$0xff] %v6958_v8  ;;  %v6960_v63 = vpop.eup %5119  ;;  %5131 = vpow2.f32 %v2384_v59 }
 0x3da   : > { %2446 = vadd.xlane.f32.xlu2 %v6960_v63  ;;  %v5122_v23 = vpop.eup %5121  ;;  %5133 = vlog2.f32 %v2848_v7 }
 0x3db   : > { %v5124_v11 = vpop.eup %5123  ;;  %v2291_v21 = vpop.xlane.xlu1 %2290  ;;  %v2510_v33 = vmul.f32 %v5122_v23, %v6802_v62 }
 0x3dc   : > { %v5126_v30 = vpop.eup %5125  ;;  %v2435_v5 = vpop.xlane.xlu2 %2434  ;;  %v2511_v52 = vmul.f32 %v5124_v11, %v6817_v39  ;;  %v2328_v3 = vsub.f32 %v6836_v42, %v2291_v21  ;;  %v3373_v42 = vunpack.c.h.bf16 %v380_v41 }
 0x3dd   : > { %v5128_v56 = vpop.eup %5127  ;;  %v3143_v45 = vmul.f32 0.6931472, %v5126_v30 }
 0x3de   : > { %v5130_v60 = vpop.eup %5129  ;;  %v2386_v50 = vmul.f32 1.442695, %v2328_v3  ;;  %v2534_v0 = vpack.c.bf16 %v2511_v52, %v2510_v33  ;;  %v3145_v39 = vmul.f32 0.6931472, %v5128_v56  ;;  %v6984_v33 = vpop.f32.mrf.mxu0 }
 0x3df   : > { %v6967_v15 = vpop.eup %5131  ;;  %v3139_v40 = vmul.f32 0.6931472, %v5130_v60  ;;  %v3500_v11 = vmul.f32 %v3372_v38, %v3143_v45 }
 0x3e0   : > { %v5134_v9 = vpop.eup %5133  ;;  %2448 = vadd.xlane.f32.xlu0 %v6967_v15  ;;  %5135 = vpow2.f32 %v2386_v50  ;;  %v3501_v21 = vmul.f32 %v3373_v42, %v3145_v39  ;;  %v6990_v50 = vpop.f32.mrf.mxu3 }
 0x3e1   : > { %v3498_v34 = vmul.f32 %v3370_v24, %v3139_v40  ;;  %v3141_v17 = vmul.f32 0.6931472, %v5134_v9  ;;  %v6986_v40 = vpop.f32.mrf.mxu1 }
 0x3e3   : > { %v3499_v7 = vmul.f32 %v3371_v55, %v3141_v17  ;;  %v6988_v55 = vpop.f32.mrf.mxu2 }
 0x3e4   : > { %v2293_v59 = vpop.xlane.xlu2 %2292  ;;  %2782 = vmatmul.bf16.gmra.mxu2 %v2534_v0  ;;  %2871 = vmatmul.bf16.gmra.mxu3 %v2534_v0 }
 0x3e5   : > { %v2329_v62 = vsub.f32 %v6848_v48, %v2293_v59  ;;  %v3632_v23 = vadd.f32 %v3499_v7, %v3498_v34  ;;  %2960 = vmatmul.bf16.gmra.mxu0 %v2534_v0  ;;  %3049 = vmatmul.bf16.gmra.mxu1 %v2534_v0 }
 0x3e6   : > { %v6972_v27 = vpop.eup %5135 }
 0x3e7   : > { %v2388_v30 = vmul.f32 1.442695, %v2329_v62  ;;  %v3633_v24 = vadd.f32 %v3632_v23, %v3500_v11  ;;  %2450 = vadd.xlane.f32.xlu1 %v6972_v27 }
 0x3e9   : > { %5137 = vpow2.f32 %v2388_v30  ;;  %v6975_v56 = vadd.f32 %v3633_v24, %v3501_v21 }
 0x3eb   : > { %8107 = vst [vmem:[#allocation113_spill] sm:$0xff] %v6975_v56 }
 0x3ec   : > { %v2295_v41 = vpop.xlane.xlu2 %2294 }
 0x3ed   : > { %v2330_v52 = vsub.f32 %v6858_v22, %v2295_v41 }
 0x3ef   : > { %v6978_v3 = vpop.eup %5137  ;;  %v2390_v60 = vmul.f32 1.442695, %v2330_v52  ;;  %v385_v52 = vld [vmem:[%s5826_s26 + $0x90] sm:$0xff] }
 0x3f0   : > { %2452 = vadd.xlane.f32.xlu2 %v6978_v3 }
 0x3f1   : > { %5139 = vpow2.f32 %v2390_v60 }
 0x3f2   : > { %5141 = vrcp.f32 %v2435_v5 }
 0x3f7   : > { %v6981_v48 = vpop.eup %5139 }
 0x3f8   : > { %8108 = vst [vmem:[#allocation114_spill] sm:$0xff] %v6981_v48  ;;  %2454 = vadd.xlane.f32.xlu0 %v6981_v48  ;;  %v5142_v0 = vpop.eup %5141 }
 0x3f9   : > { %v2512_v62 = vmul.f32 %v5142_v0, %v6831_v53 }
 0x41d   : > { %v6992_v9 = vpop.f32.mrf.mxu0  ;;  %v6994_v22 = vpop.f32.mrf.mxu1 }
 0x422   : > { %v6996_v45 = vpop.f32.mrf.mxu2  ;;  %v6998_v38 = vpop.f32.mrf.mxu3 }
 0x423   : > { %v2437_v34 = vpop.xlane.xlu0 %2436 }
 0x424   : > { %5143 = vrcp.f32 %v2437_v34  ;;  %v3382_v34 = vunpack.c.l.bf16 %v385_v52 }
 0x425   : > { %v2943_v17 = vpop.f32.mrf.mxu0  ;;  %v3032_v7 = vpop.f32.mrf.mxu1 }
 0x426   : > { %v2944_v39 = vadd.f32 1e-30, %v2943_v17  ;;  %v3033_v24 = vadd.f32 1e-30, %v3032_v7  ;;  %v386_v17 = vld [vmem:[%s5826_s26 + $0x98] sm:$0xff] }
 0x427   : > { %v3385_v43 = vunpack.c.h.bf16 %v386_v17 }
 0x428   : > { %5145 = vlog2.f32 %v2944_v39 }
 0x42a   : > { %v5144_v42 = vpop.eup %5143  ;;  %v2765_v59 = vpop.f32.mrf.mxu2 }
 0x42b   : > { %v2854_v11 = vpop.f32.mrf.mxu3  ;;  %v2513_v23 = vmul.f32 %v5144_v42, %v6875_v37  ;;  %v2766_v30 = vadd.f32 1e-30, %v2765_v59  ;;  %v2439_v21 = vpop.xlane.xlu0 %2438  ;;  %v3383_v37 = vunpack.c.h.bf16 %v385_v52 }
 0x42c   : > { %v2855_v5 = vadd.f32 1e-30, %v2854_v11 }
 0x42d   : > { %5147 = vlog2.f32 %v2766_v30  ;;  %v2535_v41 = vpack.c.bf16 %v2513_v23, %v2512_v62  ;;  %v3384_v30 = vunpack.c.l.bf16 %v386_v17 }
 0x42e   : > { %5149 = vlog2.f32 %v2855_v5  ;;  %v5146_v60 = vpop.eup %5145 }
 0x42f   : > { %2787 = vmatmul.bf16.gmra.mxu2 %v2535_v41  ;;  %2876 = vmatmul.bf16.gmra.mxu3 %v2535_v41  ;;  %5151 = vlog2.f32 %v3033_v24  ;;  %v3167_v23 = vmul.f32 0.6931472, %v5146_v60 }
 0x430   : > { %2965 = vmatmul.bf16.gmra.mxu0 %v2535_v41  ;;  %3054 = vmatmul.bf16.gmra.mxu1 %v2535_v41  ;;  %5153 = vrcp.f32 %v2439_v21 }
 0x431   : > { %v3512_v52 = vmul.f32 %v3384_v30, %v3167_v23  ;;  %v8117_v30 = vld [vmem:[#allocation24_spill] sm:$0xff] }
 0x433   : > { %v5148_v53 = vpop.eup %5147  ;;  %v2297_v0 = vpop.xlane.xlu0 %2296 }
 0x434   : > { %v5150_v42 = vpop.eup %5149  ;;  %v3163_v59 = vmul.f32 0.6931472, %v5148_v53  ;;  %v2441_v11 = vpop.xlane.xlu1 %2440  ;;  %v2331_v39 = vsub.f32 %v6906_v2, %v2297_v0 }
 0x435   : > { %v3165_v7 = vmul.f32 0.6931472, %v5150_v42  ;;  %v5152_v62 = vpop.eup %5151  ;;  %5155 = vrcp.f32 %v2441_v11 }
 0x436   : > { %v3510_v5 = vmul.f32 %v3382_v34, %v3163_v59  ;;  %v2392_v24 = vmul.f32 1.442695, %v2331_v39  ;;  %v3169_v41 = vmul.f32 0.6931472, %v5152_v62  ;;  %v5154_v48 = vpop.eup %5153 }
 0x437   : > { %v3511_v36 = vmul.f32 %v3383_v37, %v3165_v7  ;;  %v2514_v60 = vmul.f32 %v5154_v48, %v6882_v25 }
 0x438   : > { %5157 = vpow2.f32 %v2392_v24  ;;  %v3513_v21 = vmul.f32 %v3385_v43, %v3169_v41  ;;  %v8119_v24 = vld [vmem:[#allocation29_spill] sm:$0xff]  ;;  %v8120_v41 = vld [vmem:[#allocation30_spill] sm:$0xff] }
 0x439   : > { %v3647_v12 = vadd.f32 %v3511_v36, %v3510_v5 }
 0x43b   : > { %v2299_v56 = vpop.xlane.xlu0 %2298  ;;  %v3648_v2 = vadd.f32 %v3647_v12, %v3512_v52  ;;  %v5156_v0 = vpop.eup %5155  ;;  %v8121_v52 = vsub.f32 %v8119_v24, %v8120_v41  ;;  %v8137_v24 = vld [vmem:[#allocation35_spill] sm:$0xff]  ;;  %v8138_v41 = vld [vmem:[#allocation36_spill] sm:$0xff] }
 0x43c   : > { %v2332_v19 = vsub.f32 %v6925_v51, %v2299_v56  ;;  %v2515_v34 = vmul.f32 %v5156_v0, %v6912_v6  ;;  %v8113_v56 = vld [vmem:[#allocation21_spill] sm:$0xff] }
 0x43d   : > { %v2443_v53 = vpop.xlane.xlu1 %2442  ;;  %v7011_v17 = vadd.f32 %v3648_v2, %v3513_v21  ;;  %v8123_v2 = vld [vmem:[#allocation33_spill] sm:$0xff]  ;;  %v8125_v21 = vld [vmem:[#allocation38_spill] sm:$0xff] }
 0x43e   : > { %v7006_v42 = vpop.eup %5157  ;;  %v2394_v37 = vmul.f32 1.442695, %v2332_v19  ;;  %v2536_v36 = vpack.c.bf16 %v2515_v34, %v2514_v60  ;;  %v8112_v19 = vld [vmem:[#allocation20_spill] sm:$0xff]  ;;  %v8126_v60 = vld [vmem:[#allocation39_spill] sm:$0xff] }
 0x43f   : > { %8109 = vst [vmem:[#allocation115_spill] sm:$0xff] %v7006_v42  ;;  %2456 = vadd.xlane.f32.xlu1 %v7006_v42  ;;  %v8114_v48 = vsub.f32 %v8112_v19, %v8113_v56  ;;  %v8127_v34 = vsub.f32 %v8125_v21, %v8126_v60  ;;  %v8144_v21 = vld [vmem:[#allocation54_spill] sm:$0xff] }
 0x440   : > { %8110 = vst [vmem:[#allocation116_spill] sm:$0xff] %v7011_v17  ;;  %5159 = vpow2.f32 %v2394_v37  ;;  %2792 = vmatmul.bf16.gmra.mxu2 %v2536_v36  ;;  %2881 = vmatmul.bf16.gmra.mxu3 %v2536_v36  ;;  %v8128_v37 = vld [vmem:[#allocation26_spill] sm:$0xff] }
 0x441   : > { %5161 = vrcp.f32 %v2443_v53  ;;  %2970 = vmatmul.bf16.gmra.mxu0 %v2536_v36  ;;  %3059 = vmatmul.bf16.gmra.mxu1 %v2536_v36  ;;  %v8129_v36 = vld [vmem:[#allocation27_spill] sm:$0xff] }
 0x443   : > { %v2445_v12 = vpop.xlane.xlu2 %2444 }
 0x444   : > { %5163 = vrcp.f32 %v2445_v12  ;;  %v8130_v12 = vsub.f32 %v8128_v37, %v8129_v36  ;;  %v8147_v37 = vld [vmem:[#allocation45_spill] sm:$0xff] }
 0x445   : > { %v2301_v43 = vpop.xlane.xlu1 %2300 }
 0x446   : > { %v2333_v51 = vsub.f32 %v6953_v44, %v2301_v43  ;;  %v7014_v25 = vpop.eup %5159  ;;  %v8116_v44 = vld [vmem:[#allocation23_spill] sm:$0xff] }
 0x447   : > { %8111 = vst [vmem:[#allocation117_spill] sm:$0xff] %v7014_v25  ;;  %2458 = vadd.xlane.f32.xlu2 %v7014_v25  ;;  %2011 = vadd.xlane.f32.xlu1 %v8114_v48  ;;  %v5162_v59 = vpop.eup %5161  ;;  %v8118_v5 = vsub.f32 %v8116_v44, %v8117_v30  ;;  %v7042_v48 = vpop.f32.mrf.mxu0  ;;  %v8135_v44 = vld [vmem:[#allocation48_spill] sm:$0xff] }
 0x448   : > { %v2396_v6 = vmul.f32 1.442695, %v2333_v51  ;;  %v2516_v7 = vmul.f32 %v5162_v59, %v6933_v49  ;;  %v7044_v59 = vpop.f32.mrf.mxu1 }
 0x44a   : > { %5165 = vpow2.f32 %v2396_v6  ;;  %v5164_v11 = vpop.eup %5163 }
 0x44b   : > { %v2517_v39 = vmul.f32 %v5164_v11, %v6948_v58  ;;  %v8122_v58 = vld [vmem:[#allocation32_spill] sm:$0xff]  ;;  %v8131_v11 = vld [vmem:[#allocation41_spill] sm:$0xff] }
 0x44c   : > { %v8124_v0 = vsub.f32 %v8122_v58, %v8123_v2  ;;  %v8141_v58 = vld [vmem:[#allocation50_spill] sm:$0xff] }
 0x44d   : > { %v2537_v62 = vpack.c.bf16 %v2517_v39, %v2516_v7  ;;  %v2447_v53 = vpop.xlane.xlu2 %2446  ;;  %v8132_v39 = vld [vmem:[#allocation42_spill] sm:$0xff] }
 0x44e   : > { %5167 = vrcp.f32 %v2447_v53  ;;  %v8133_v7 = vsub.f32 %v8131_v11, %v8132_v39  ;;  %v7057_v53 = vpop.f32.mrf.mxu3  ;;  %v2746_v39 = vadd.f32 1e-30, %v6870_v28  ;;  %v2751_v28 = vadd.f32 1e-30, %v6898_v4 }
 0x44f   : > { %2013 = vadd.xlane.f32.xlu2 %v8118_v5  ;;  %2017 = vadd.xlane.f32.xlu1 %v8121_v52  ;;  %v8139_v52 = vsub.f32 %v8137_v24, %v8138_v41  ;;  %v8149_v24 = vld [vmem:[#allocation55_spill] sm:$0xff]  ;;  %v8150_v41 = vld [vmem:[#allocation56_spill] sm:$0xff] }
 0x450   : > { %v7022_v23 = vpop.eup %5165  ;;  %2797 = vmatmul.bf16.gmra.mxu2 %v2537_v62  ;;  %2886 = vmatmul.bf16.gmra.mxu3 %v2537_v62 }
 0x451   : > { %8115 = vst [vmem:[#allocation20_spill] sm:$0xff] %v7022_v23  ;;  %2460 = vadd.xlane.f32.xlu0 %v7022_v23  ;;  %2975 = vmatmul.bf16.gmra.mxu0 %v2537_v62  ;;  %v8171_v23 = vld [vmem:[#allocation77_spill] sm:$0xff] }
 0x452   : > { %3064 = vmatmul.bf16.gmra.mxu1 %v2537_v62  ;;  %v8134_v62 = vld [vmem:[#allocation47_spill] sm:$0xff] }
 0x453   : > { %v2449_v49 = vpop.xlane.xlu0 %2448  ;;  %v8136_v30 = vsub.f32 %v8134_v62, %v8135_v44 }
 0x454   : > { %5169 = vrcp.f32 %v2449_v49  ;;  %v5168_v43 = vpop.eup %5167  ;;  %v8140_v49 = vld [vmem:[#allocation49_spill] sm:$0xff] }
 0x455   : > { %v2518_v19 = vmul.f32 %v5168_v43, %v6960_v63  ;;  %v8142_v2 = vsub.f32 %v8140_v49, %v8141_v58  ;;  %v7068_v43 = vpop.f32.mrf.mxu0  ;;  %v2840_v58 = vadd.f32 1e-30, %v6901_v16  ;;  %v2761_v16 = vadd.f32 1e-30, %v6988_v55 }
 0x456   : > { %v7079_v44 = vpop.f32.mrf.mxu3 }
 0x457   : > { %2019 = vadd.xlane.f32.xlu2 %v8124_v0  ;;  %2023 = vadd.xlane.f32.xlu1 %v8127_v34  ;;  %v8143_v0 = vld [vmem:[#allocation53_spill] sm:$0xff]  ;;  %v8146_v34 = vld [vmem:[#allocation44_spill] sm:$0xff] }
 0x458   : > { %v8145_v60 = vsub.f32 %v8143_v0, %v8144_v21  ;;  %v8148_v36 = vsub.f32 %v8146_v34, %v8147_v37  ;;  %v2850_v21 = vadd.f32 1e-30, %v6990_v50  ;;  %v8159_v37 = vld [vmem:[#allocation62_spill] sm:$0xff]  ;;  %v2929_v50 = vadd.f32 1e-30, %v6885_v31 }
 0x459   : > { %2015 = vadd.xlane.f32.xlu0 %v8130_v12 }
 0x45a   : > { %v5170_v51 = vpop.eup %5169  ;;  %v2451_v5 = vpop.xlane.xlu1 %2450 }
 0x45b   : > { %v2519_v6 = vmul.f32 %v5170_v51, %v6967_v15  ;;  %5171 = vrcp.f32 %v2451_v5  ;;  %v7055_v15 = vpop.f32.mrf.mxu2  ;;  %v7070_v51 = vpop.f32.mrf.mxu1  ;;  %v3013_v5 = vadd.f32 1e-30, %v6866_v57  ;;  %v2756_v57 = vadd.f32 1e-30, %v6938_v18 }
 0x45d   : > { %v2538_v56 = vpack.c.bf16 %v2519_v6, %v2518_v19  ;;  %v7095_v0 = vpop.f32.mrf.mxu0 }
 0x45f   : > { %2025 = vadd.xlane.f32.xlu2 %v8133_v7  ;;  %2029 = vadd.xlane.f32.xlu1 %v8136_v30  ;;  %v2835_v7 = vadd.f32 1e-30, %v6873_v1  ;;  %v8156_v1 = vld [vmem:[#allocation52_spill] sm:$0xff] }
 0x460   : > { %2802 = vmatmul.bf16.gmra.mxu2 %v2538_v56  ;;  %2891 = vmatmul.bf16.gmra.mxu3 %v2538_v56 }
 0x461   : > { %2021 = vadd.xlane.f32.xlu0 %v8139_v52  ;;  %2980 = vmatmul.bf16.gmra.mxu0 %v2538_v56  ;;  %v5172_v12 = vpop.eup %5171  ;;  %v8151_v52 = vsub.f32 %v8149_v24, %v8150_v41 }
 0x462   : > { %3069 = vmatmul.bf16.gmra.mxu1 %v2538_v56  ;;  %v2924_v56 = vadd.f32 1e-30, %v6864_v10  ;;  %v2520_v11 = vmul.f32 %v5172_v12, %v6972_v27  ;;  %v8155_v27 = vld [vmem:[#allocation51_spill] sm:$0xff]  ;;  %v8161_v12 = vld [vmem:[#allocation66_spill] sm:$0xff] }
 0x463   : > { %v2453_v63 = vpop.xlane.xlu2 %2452  ;;  %v7077_v62 = vpop.f32.mrf.mxu2  ;;  %v8157_v49 = vsub.f32 %v8155_v27, %v8156_v1  ;;  %v377_v27 = vld [vmem:[%s5826_s26 + $0x50] sm:$0xff] }
 0x464   : > { %5173 = vrcp.f32 %v2453_v63  ;;  %v8153_v63 = vld [vmem:[#allocation60_spill] sm:$0xff]  ;;  %v7097_v4 = vpop.f32.mrf.mxu1 }
 0x465   : > { %5175 = vlog2.f32 %v2924_v56  ;;  %v7109_v56 = vld [vmem:[%s5826_s26 + $0x18] sm:$0xff] }
 0x466   : > { %5177 = vlog2.f32 %v2746_v39  ;;  %v3352_v1 = vunpack.c.l.bf16 %v7109_v56 }
 0x467   : > { %2031 = vadd.xlane.f32.xlu2 %v8142_v2  ;;  %2035 = vadd.xlane.f32.xlu1 %v8145_v60  ;;  %5179 = vlog2.f32 %v2835_v7  ;;  %v2845_v2 = vadd.f32 1e-30, %v6944_v26  ;;  %v369_v60 = vld [vmem:[%s5826_s26 + $0x10] sm:$0xff]  ;;  %v7117_v7 = vpop.f32.mrf.mxu3 }
 0x468   : > { %5181 = vlog2.f32 %v3013_v5  ;;  %v8158_v26 = vld [vmem:[#allocation61_spill] sm:$0xff]  ;;  %v8165_v5 = vld [vmem:[#allocation58_spill] sm:$0xff] }
 0x469   : > { %2027 = vadd.xlane.f32.xlu0 %v8148_v36  ;;  %5183 = vlog2.f32 %v2751_v28  ;;  %v8160_v36 = vsub.f32 %v8158_v26, %v8159_v37  ;;  %v3018_v28 = vadd.f32 1e-30, %v6889_v20  ;;  %v2939_v26 = vadd.f32 1e-30, %v6984_v33  ;;  %v8170_v20 = vld [vmem:[#allocation75_spill] sm:$0xff] }
 0x46a   : > { %v5174_v6 = vpop.eup %5173  ;;  %5185 = vlog2.f32 %v2840_v58  ;;  %v8172_v25 = vsub.f32 %v8170_v20, %v8171_v23 }
 0x46b   : > { %v2521_v19 = vmul.f32 %v5174_v6, %v6978_v3  ;;  %v8152_v3 = vld [vmem:[#allocation59_spill] sm:$0xff]  ;;  %v5176_v18 = vpop.eup %5175  ;;  %5187 = vlog2.f32 %v2756_v57  ;;  %v8162_v6 = vld [vmem:[#allocation68_spill] sm:$0xff]  ;;  %v7115_v39 = vpop.f32.mrf.mxu2 }
 0x46c   : > { %v8154_v10 = vsub.f32 %v8152_v3, %v8153_v63  ;;  %v5178_v34 = vpop.eup %5177  ;;  %5189 = vlog2.f32 %v2845_v2  ;;  %v2934_v3 = vadd.f32 1e-30, %v6920_v35  ;;  %v7124_v63 = vld [vmem:[%s5826_s26 + $0x38] sm:$0xff]  ;;  %v3351_v2 = vunpack.c.h.bf16 %v369_v60 }
 0x46d   : > { %v2539_v30 = vpack.c.bf16 %v2521_v19, %v2520_v11  ;;  %v8163_v19 = vsub.f32 %v8161_v12, %v8162_v6  ;;  %v5180_v55 = vpop.eup %5179  ;;  %v7113_v11 = vld [vmem:[%s5826_s26 + $0x30] sm:$0xff]  ;;  %5191 = vlog2.f32 %v2761_v16  ;;  %v3099_v31 = vmul.f32 0.6931472, %v5178_v34 }
 0x46e   : > { %v5182_v41 = vpop.eup %5181  ;;  %5193 = vlog2.f32 %v2850_v21  ;;  %v3101_v57 = vmul.f32 0.6931472, %v5180_v55  ;;  %v3358_v16 = vunpack.c.l.bf16 %v7113_v11  ;;  %v3359_v21 = vunpack.c.h.bf16 %v7113_v11 }
 0x46f   : > { %2037 = vadd.xlane.f32.xlu2 %v8151_v52  ;;  %2041 = vadd.xlane.f32.xlu1 %v8154_v10  ;;  %v3350_v52 = vunpack.c.l.bf16 %v369_v60  ;;  %v5184_v10 = vpop.eup %5183  ;;  %5195 = vlog2.f32 %v2929_v50  ;;  %v3023_v34 = vadd.f32 1e-30, %v6929_v46  ;;  %v3366_v12 = vunpack.c.l.bf16 %v377_v27  ;;  %v7136_v60 = vpop.f32.mrf.mxu0 }
 0x470   : > { %2807 = vmatmul.bf16.gmra.mxu2 %v2539_v30  ;;  %2896 = vmatmul.bf16.gmra.mxu3 %v2539_v30  ;;  %v5186_v58 = vpop.eup %5185  ;;  %5197 = vlog2.f32 %v2934_v3  ;;  %v2764_v6 = vadd.f32 1e-30, %v6996_v45  ;;  %v3367_v50 = vunpack.c.h.bf16 %v377_v27  ;;  %v2853_v11 = vadd.f32 1e-30, %v6998_v38  ;;  %v8167_v3 = vld [vmem:[#allocation69_spill] sm:$0xff]  ;;  %v8173_v38 = vld [vmem:[#allocation63_spill] sm:$0xff] }
 0x471   : > { %2033 = vadd.xlane.f32.xlu0 %v8157_v49  ;;  %2985 = vmatmul.bf16.gmra.mxu0 %v2539_v30  ;;  %v5188_v35 = vpop.eup %5187  ;;  %v3478_v55 = vmul.f32 %v3350_v52, %v3099_v31  ;;  %5199 = vlog2.f32 %v3018_v28  ;;  %v8168_v49 = vld [vmem:[#allocation71_spill] sm:$0xff]  ;;  %v3117_v52 = vmul.f32 0.6931472, %v5186_v58  ;;  %v8174_v27 = vld [vmem:[#allocation65_spill] sm:$0xff]  ;;  %v7157_v58 = vpop.f32.mrf.mxu3 }
 0x472   : > { %3074 = vmatmul.bf16.gmra.mxu1 %v2539_v30  ;;  %v8164_v30 = vld [vmem:[#allocation57_spill] sm:$0xff]  ;;  %v5190_v37 = vpop.eup %5189  ;;  %5201 = vlog2.f32 %v2939_v26  ;;  %v8169_v45 = vsub.f32 %v8167_v3, %v8168_v49  ;;  %v3131_v31 = vmul.f32 0.6931472, %v5188_v35  ;;  %v7160_v35 = vld [vmem:[%s5826_s26 + $0x58] sm:$0xff] }
 0x473   : > { %v8166_v24 = vsub.f32 %v8164_v30, %v8165_v5  ;;  %v5192_v33 = vpop.eup %5191  ;;  %v381_v30 = vld [vmem:[%s5826_s26 + $0x70] sm:$0xff]  ;;  %v3479_v5 = vmul.f32 %v3351_v2, %v3101_v57  ;;  %5203 = vlog2.f32 %v3023_v34  ;;  %v3133_v28 = vmul.f32 0.6931472, %v5190_v37  ;;  %v7155_v23 = vpop.f32.mrf.mxu2 }
 0x474   : > { %v5194_v46 = vpop.eup %5193  ;;  %v8175_v57 = vsub.f32 %v8173_v38, %v8174_v27  ;;  %5205 = vlog2.f32 %v2764_v6  ;;  %v3147_v26 = vmul.f32 0.6931472, %v5192_v33  ;;  %v3494_v38 = vmul.f32 %v3366_v12, %v3131_v31  ;;  %v8177_v31 = vld [vmem:[#allocation80_spill] sm:$0xff] }
 0x475   : > { %v5196_v2 = vpop.eup %5195  ;;  %v3149_v3 = vmul.f32 0.6931472, %v5194_v46  ;;  %5207 = vlog2.f32 %v2853_v11  ;;  %v3607_v37 = vadd.f32 %v3479_v5, %v3478_v55  ;;  %v3495_v33 = vmul.f32 %v3367_v50, %v3133_v28  ;;  %v383_v5 = vld [vmem:[%s5826_s26 + $0x80] sm:$0xff] }
 0x476   : > { %v5198_v34 = vpop.eup %5197  ;;  %v2942_v46 = vadd.f32 1e-30, %v6992_v9  ;;  %v3119_v27 = vmul.f32 0.6931472, %v5196_v2  ;;  %v3368_v49 = vunpack.c.l.bf16 %v7160_v35  ;;  %v2858_v9 = vadd.f32 1e-30, %v7057_v53 }
 0x477   : > { %2043 = vadd.xlane.f32.xlu2 %v8160_v36  ;;  %2047 = vadd.xlane.f32.xlu1 %v8163_v19  ;;  %v3103_v36 = vmul.f32 0.6931472, %v5176_v18  ;;  %v7138_v19 = vpop.f32.mrf.mxu1  ;;  %v3028_v18 = vadd.f32 1e-30, %v6986_v40  ;;  %v3374_v40 = vunpack.c.l.bf16 %v381_v30  ;;  %v5200_v6 = vpop.eup %5199  ;;  %v8179_v2 = vld [vmem:[#allocation84_spill] sm:$0xff]  ;;  %v8183_v53 = vld [vmem:[#allocation74_spill] sm:$0xff]  ;;  %v3627_v17 = vadd.f32 %v3495_v33, %v3494_v38 }
 0x478   : > { %v5202_v11 = vpop.eup %5201  ;;  %v3121_v50 = vmul.f32 0.6931472, %v5200_v6 }
 0x479   : > { %2039 = vadd.xlane.f32.xlu0 %v8166_v24  ;;  %v3115_v24 = vmul.f32 0.6931472, %v5184_v10  ;;  %v7152_v10 = vmul.f32 0.6931472, %v5182_v41  ;;  %5209 = vlog2.f32 %v3028_v18  ;;  %v3480_v41 = vmul.f32 %v3352_v1, %v3103_v36  ;;  %v7172_v18 = vpop.f32.mrf.mxu0 }
 0x47a   : > { %v3135_v1 = vmul.f32 0.6931472, %v5198_v34  ;;  %v3502_v36 = vmul.f32 %v3374_v40, %v3147_v26  ;;  %5211 = vlog2.f32 %v2942_v46 }
 0x47b   : > { %v3486_v20 = vmul.f32 %v3358_v16, %v3115_v24  ;;  %v3369_v16 = vunpack.c.h.bf16 %v7160_v35  ;;  %v5204_v24 = vpop.eup %5203  ;;  %v8180_v35 = vld [vmem:[#allocation86_spill] sm:$0xff]  ;;  %v3608_v40 = vadd.f32 %v3607_v37, %v3480_v41  ;;  %v3378_v41 = vunpack.c.l.bf16 %v383_v5  ;;  %v7189_v38 = vpop.f32.mrf.mxu2 }
 0x47c   : > { %v5206_v12 = vpop.eup %5205  ;;  %v8181_v34 = vsub.f32 %v8179_v2, %v8180_v35  ;;  %v3137_v61 = vmul.f32 0.6931472, %v5204_v24  ;;  %v3496_v37 = vmul.f32 %v3368_v49, %v3135_v1  ;;  %v3379_v35 = vunpack.c.h.bf16 %v383_v5  ;;  %v384_v1 = vld [vmem:[%s5826_s26 + $0x88] sm:$0xff] }
 0x47d   : > { %v5208_v26 = vpop.eup %5207  ;;  %v3155_v46 = vmul.f32 0.6931472, %v5206_v12 }
 0x47e   : > { %v3157_v2 = vmul.f32 0.6931472, %v5208_v26 }
 0x47f   : > { %2049 = vadd.xlane.f32.xlu2 %v8169_v45  ;;  %2053 = vadd.xlane.f32.xlu1 %v8172_v25  ;;  %v3375_v25 = vunpack.c.h.bf16 %v381_v30  ;;  %v3487_v45 = vmul.f32 %v3359_v21, %v3117_v52  ;;  %v7164_v30 = vld [vmem:[%s5826_s26 + $0x78] sm:$0xff]  ;;  %v2769_v21 = vadd.f32 1e-30, %v7055_v15  ;;  %v7174_v52 = vpop.f32.mrf.mxu1  ;;  %v5210_v8 = vpop.eup %5209 }
 0x480   : > { %v3376_v15 = vunpack.c.l.bf16 %v7164_v30  ;;  %v5212_v24 = vpop.eup %5211 }
 0x481   : > { %2045 = vadd.xlane.f32.xlu0 %v8175_v57  ;;  %v3031_v57 = vadd.f32 1e-30, %v6994_v22  ;;  %v3503_v55 = vmul.f32 %v3375_v25, %v3149_v3  ;;  %v8176_v22 = vld [vmem:[#allocation78_spill] sm:$0xff]  ;;  %v3151_v3 = vmul.f32 0.6931472, %v5202_v11  ;;  %v8182_v25 = vld [vmem:[#allocation72_spill] sm:$0xff]  ;;  %v3617_v42 = vadd.f32 %v3487_v45, %v3486_v20  ;;  %v7191_v20 = vpop.f32.mrf.mxu3 }
 0x482   : > { %v8178_v28 = vsub.f32 %v8176_v22, %v8177_v31  ;;  %v8184_v6 = vsub.f32 %v8182_v25, %v8183_v53  ;;  %v3377_v22 = vunpack.c.h.bf16 %v7164_v30  ;;  %v8185_v31 = vunpack.c.l.bf16 %v7124_v63  ;;  %v8195_v25 = vld [vmem:[#allocation83_spill] sm:$0xff] }
 0x483   : > { %5213 = vlog2.f32 %v3031_v57  ;;  %v3637_v11 = vadd.f32 %v3503_v55, %v3502_v36  ;;  %v3628_v45 = vadd.f32 %v3627_v17, %v3496_v37  ;;  %v3504_v33 = vmul.f32 %v3376_v15, %v3151_v3  ;;  %v8189_v15 = vld [vmem:[#allocation90_spill] sm:$0xff] }
 0x484   : > { %5215 = vlog2.f32 %v2769_v21  ;;  %v2947_v57 = vadd.f32 1e-30, %v7042_v48  ;;  %v3036_v36 = vadd.f32 1e-30, %v7044_v59  ;;  %v3497_v55 = vmul.f32 %v3369_v16, %v3137_v61  ;;  %v8188_v48 = vld [vmem:[#allocation88_spill] sm:$0xff]  ;;  %v387_v16 = vld [vmem:[%s5826_s26 + $0xa0] sm:$0xff] }
 0x485   : > { %5217 = vlog2.f32 %v2858_v9  ;;  %v8187_v21 = vunpack.c.h.bf16 %v7124_v63  ;;  %v3506_v17 = vmul.f32 %v3378_v41, %v3155_v46  ;;  %v3507_v9 = vmul.f32 %v3379_v35, %v3157_v2  ;;  %v7225_v46 = vld [vmem:[%s5826_s26 + $0xa8] sm:$0xff] }
 0x486   : > { %v8190_v26 = vsub.f32 %v8188_v48, %v8189_v15  ;;  %v2860_v63 = vadd.f32 1e-30, %v7079_v44  ;;  %v3159_v41 = vmul.f32 0.6931472, %v5212_v24  ;;  %v3380_v37 = vunpack.c.l.bf16 %v384_v1  ;;  %v7254_v15 = vld [vmem:[%s5826_s26 + $0xd8] sm:$0xff] }
 0x487   : > { %2055 = vadd.xlane.f32.xlu2 %v8178_v28  ;;  %2059 = vadd.xlane.f32.xlu1 %v8181_v34  ;;  %v3488_v28 = vmul.f32 %v8185_v31, %v3119_v27  ;;  %v3153_v34 = vmul.f32 0.6931472, %v5210_v8  ;;  %v8186_v27 = vunpack.c.h.bf16 %v7109_v56  ;;  %v3638_v8 = vadd.f32 %v3637_v11, %v3504_v33  ;;  %v8191_v56 = vld [vmem:[#allocation94_spill] sm:$0xff]  ;;  %v7220_v11 = vpop.f32.mrf.mxu0  ;;  %v7222_v44 = vpop.f32.mrf.mxu1 }
 0x488   : > { %v3489_v12 = vmul.f32 %v8187_v21, %v3121_v50  ;;  %v8194_v50 = vld [vmem:[#allocation81_spill] sm:$0xff]  ;;  %5219 = vlog2.f32 %v2947_v57  ;;  %v3038_v2 = vadd.f32 1e-30, %v7070_v51  ;;  %v3381_v35 = vunpack.c.h.bf16 %v384_v1  ;;  %v7231_v33 = vld [vmem:[%s5826_s26 + $0xb8] sm:$0xff]  ;;  %v7244_v21 = vld [vmem:[%s5826_s26 + $0xc0] sm:$0xff] }
 0x489   : > { %2051 = vadd.xlane.f32.xlu0 %v8184_v6  ;;  %v3618_v30 = vadd.f32 %v3617_v42, %v3488_v28  ;;  %v3481_v49 = vmul.f32 %v8186_v27, %v7152_v10  ;;  %v5214_v5 = vpop.eup %5213  ;;  %v2771_v42 = vadd.f32 1e-30, %v7077_v62  ;;  %v8192_v10 = vld [vmem:[#allocation95_spill] sm:$0xff]  ;;  %v8196_v53 = vsub.f32 %v8194_v50, %v8195_v25 }
 0x48a   : > { %v8193_v3 = vsub.f32 %v8191_v56, %v8192_v10  ;;  %v5216_v61 = vpop.eup %5215  ;;  %v7215_v62 = vadd.f32 %v3628_v45, %v3497_v55  ;;  %v3505_v6 = vmul.f32 %v3377_v22, %v3153_v34  ;;  %5221 = vlog2.f32 %v3036_v36  ;;  %v7238_v36 = vld [vmem:[%s5826_s26 + $0xc8] sm:$0xff] }
 0x48b   : > { %v7208_v59 = vadd.f32 %v3608_v40, %v3481_v49  ;;  %v7217_v31 = vadd.f32 %v3618_v30, %v3489_v12  ;;  %v5218_v28 = vpop.eup %5217  ;;  %v2949_v40 = vadd.f32 1e-30, %v7068_v43  ;;  %v3161_v34 = vmul.f32 0.6931472, %v5214_v5  ;;  %v7234_v30 = vld [vmem:[%s5826_s26 + $0xb0] sm:$0xff]  ;;  %v7246_v12 = vpop.f32.mrf.mxu2 }
 0x48c   : > { %v7228_v22 = vadd.f32 %v3638_v8, %v3505_v6  ;;  %v3386_v45 = vunpack.c.l.bf16 %v387_v16  ;;  %5223 = vlog2.f32 %v2771_v42  ;;  %v3642_v43 = vadd.f32 %v3507_v9, %v3506_v17  ;;  %v7248_v5 = vpop.f32.mrf.mxu3  ;;  %v8200_v6 = vld [vmem:[#allocation93_spill] sm:$0xff] }
 0x48d   : > { %v3171_v57 = vmul.f32 0.6931472, %v5216_v61  ;;  %v3173_v27 = vmul.f32 0.6931472, %v5218_v28  ;;  %v3387_v49 = vunpack.c.h.bf16 %v387_v16  ;;  %5225 = vlog2.f32 %v2860_v63 }
 0x48e   : > { %v3508_v24 = vmul.f32 %v3380_v37, %v3159_v41  ;;  %v3388_v51 = vunpack.c.l.bf16 %v7225_v46  ;;  %5227 = vlog2.f32 %v2949_v40  ;;  %v3389_v1 = vunpack.c.h.bf16 %v7225_v46  ;;  %v5220_v9 = vpop.eup %5219 }
 0x48f   : > { %2061 = vadd.xlane.f32.xlu2 %v8190_v26  ;;  %2065 = vadd.xlane.f32.xlu1 %v8193_v3  ;;  %v3392_v55 = vunpack.c.l.bf16 %v7231_v33  ;;  %5229 = vlog2.f32 %v3038_v2  ;;  %v3390_v8 = vunpack.c.l.bf16 %v7234_v30  ;;  %v3393_v17 = vunpack.c.h.bf16 %v7231_v33 }
 0x490   : > { %v3391_v42 = vunpack.c.h.bf16 %v7234_v30  ;;  %v2952_v48 = vadd.f32 1e-30, %v7095_v0  ;;  %v8197_v26 = vsub.f32 %v6645_v14, %v6657_v29  ;;  %v8198_v56 = vsub.f32 %v6677_v47, %v6689_v32  ;;  %v5222_v61 = vpop.eup %5221  ;;  %v7265_v0 = vld [vmem:[%s5826_s26 + $0xd0] sm:$0xff] }
 0x491   : > { %2057 = vadd.xlane.f32.xlu0 %v8196_v53  ;;  %v3509_v10 = vmul.f32 %v3381_v35, %v3161_v34  ;;  %v3643_v3 = vadd.f32 %v3642_v43, %v3508_v24  ;;  %v3514_v16 = vmul.f32 %v3386_v45, %v3171_v57  ;;  %v3515_v63 = vmul.f32 %v3387_v49, %v3173_v27  ;;  %v8199_v53 = vld [vmem:[#allocation91_spill] sm:$0xff]  ;;  %v7279_v43 = vpop.f32.mrf.mxu0  ;;  %v7281_v57 = vpop.f32.mrf.mxu1 }
 0x492   : > { %v3396_v50 = vunpack.c.l.bf16 %v7238_v36  ;;  %v2774_v25 = vadd.f32 1e-30, %v7115_v39  ;;  %v8201_v28 = vsub.f32 %v8199_v53, %v8200_v6  ;;  %v5224_v14 = vpop.eup %5223  ;;  %v3394_v29 = vunpack.c.l.bf16 %v7244_v21 }
 0x493   : > { %v2863_v47 = vadd.f32 1e-30, %v7117_v7  ;;  %v3395_v32 = vunpack.c.h.bf16 %v7244_v21  ;;  %v3397_v41 = vunpack.c.h.bf16 %v7238_v36  ;;  %v5226_v37 = vpop.eup %5225  ;;  %v3175_v40 = vmul.f32 0.6931472, %v5220_v9  ;;  %v7287_v9 = vld [vmem:[%s5826_s26 + $0xe8] sm:$0xff] }
 0x494   : > { %v3041_v39 = vadd.f32 1e-30, %v7097_v4  ;;  %v3400_v2 = vunpack.c.l.bf16 %v7254_v15  ;;  %v5228_v34 = vpop.eup %5227  ;;  %5231 = vlog2.f32 %v2952_v48  ;;  %v3398_v45 = vunpack.c.l.bf16 %v7265_v0 }
 0x495   : > { %v3399_v7 = vunpack.c.h.bf16 %v7265_v0  ;;  %v7283_v27 = vadd.f32 %v3643_v3, %v3509_v10  ;;  %v5230_v49 = vpop.eup %5229  ;;  %v3177_v24 = vmul.f32 0.6931472, %v5222_v61  ;;  %5233 = vlog2.f32 %v2774_v25  ;;  %v7297_v25 = vld [vmem:[%s5826_s26 + $0xf8] sm:$0xff] }
 0x496   : > { %v2776_v4 = vadd.f32 1e-30, %v7155_v23  ;;  %v3652_v48 = vadd.f32 %v3515_v63, %v3514_v16  ;;  %v3181_v53 = vmul.f32 0.6931472, %v5226_v37  ;;  %5235 = vlog2.f32 %v2863_v47  ;;  %v2872_v63 = vpop.f32.mrf.mxu3  ;;  %v8204_v47 = vld [vmem:[#allocation98_spill] sm:$0xff] }
 0x497   : > { %2067 = vadd.xlane.f32.xlu2 %v8197_v26  ;;  %2071 = vadd.xlane.f32.xlu1 %v8198_v56  ;;  %v7290_v26 = vld [vmem:[%s5826_s26 + $0xe0] sm:$0xff]  ;;  %v3179_v56 = vmul.f32 0.6931472, %v5224_v14  ;;  %v2865_v6 = vadd.f32 1e-30, %v7157_v58  ;;  %5237 = vlog2.f32 %v3041_v39  ;;  %v3404_v61 = vunpack.c.l.bf16 %v7287_v9  ;;  %v8203_v14 = vld [vmem:[#allocation97_spill] sm:$0xff] }
 0x498   : > { %v3183_v35 = vmul.f32 0.6931472, %v5228_v34  ;;  %v2779_v10 = vadd.f32 1e-30, %v7189_v38  ;;  %v3185_v3 = vmul.f32 0.6931472, %v5230_v49  ;;  %v8202_v16 = vsub.f32 %v6693_v54, %v6699_v13  ;;  %v2783_v38 = vpop.f32.mrf.mxu2 }
 0x499   : > { %2063 = vadd.xlane.f32.xlu0 %v8201_v28  ;;  %v3516_v28 = vmul.f32 %v3388_v51, %v3175_v40  ;;  %v2868_v23 = vadd.f32 1e-30, %v7191_v20  ;;  %v3405_v58 = vunpack.c.h.bf16 %v7287_v9  ;;  %5239 = vlog2.f32 %v2776_v4  ;;  %v7314_v34 = vld [vmem:[%s5826_s26 + $0xf0] sm:$0xff] }
 0x49a   : > { %v3402_v51 = vunpack.c.l.bf16 %v7290_v26  ;;  %v8205_v37 = vsub.f32 %v8203_v14, %v8204_v47  ;;  %v3517_v20 = vmul.f32 %v3389_v1, %v3177_v24  ;;  %v5232_v54 = vpop.eup %5231  ;;  %v3518_v13 = vmul.f32 %v3390_v8, %v3179_v56  ;;  %v8206_v47 = vld [vmem:[#allocation110_spill] sm:$0xff] }
 0x49b   : > { %v3653_v40 = vadd.f32 %v3652_v48, %v3516_v28  ;;  %v2954_v39 = vadd.f32 1e-30, %v7136_v60  ;;  %5241 = vlog2.f32 %v2865_v6  ;;  %v5234_v49 = vpop.eup %5233  ;;  %v3043_v4 = vadd.f32 1e-30, %v7138_v19  ;;  %v7329_v28 = vpop.f32.mrf.mxu0 }
 0x49c   : > { %5243 = vlog2.f32 %v2779_v10  ;;  %v3408_v46 = vunpack.c.l.bf16 %v7297_v25  ;;  %v5236_v1 = vpop.eup %5235  ;;  %v3520_v30 = vmul.f32 %v3392_v55, %v3183_v35  ;;  %v2957_v8 = vadd.f32 1e-30, %v7172_v18  ;;  %v7331_v55 = vpop.f32.mrf.mxu1 }
 0x49d   : > { %5245 = vlog2.f32 %v2868_v23  ;;  %v3521_v60 = vmul.f32 %v3393_v17, %v3185_v3  ;;  %v3191_v24 = vmul.f32 0.6931472, %v5232_v54  ;;  %v3406_v48 = vunpack.c.l.bf16 %v7314_v34 }
 0x49e   : > { %v2784_v19 = vadd.f32 1e-30, %v2783_v38  ;;  %v3409_v56 = vunpack.c.h.bf16 %v7297_v25  ;;  %5247 = vlog2.f32 %v2954_v39  ;;  %v2873_v6 = vadd.f32 1e-30, %v2872_v63 }
 0x49f   : > { %2073 = vadd.xlane.f32.xlu2 %v8202_v16  ;;  %3610 = vadd.xlane.f32.xlu1 %v7208_v59  ;;  %v3519_v59 = vmul.f32 %v3391_v42, %v3181_v53  ;;  %v3403_v16 = vunpack.c.h.bf16 %v7290_v26  ;;  %v5238_v42 = vpop.eup %5237  ;;  %v7327_v53 = vld [vmem:[%s5826_s26 + $0x108] sm:$0xff]  ;;  %v7333_v18 = vadd.f32 %v3653_v40, %v3517_v20  ;;  %v3187_v17 = vmul.f32 0.6931472, %v5234_v49 }
 0x4a0   : > { %v5240_v33 = vpop.eup %5239  ;;  %v3189_v10 = vmul.f32 0.6931472, %v5236_v1  ;;  %5249 = vlog2.f32 %v3043_v4  ;;  %v3046_v3 = vadd.f32 1e-30, %v7174_v52  ;;  %v3193_v38 = vmul.f32 0.6931472, %v5238_v42  ;;  %v2874_v42 = vpop.f32.mrf.mxu3 }
 0x4a1   : > { %2069 = vadd.xlane.f32.xlu0 %v8205_v37  ;;  %v3657_v35 = vadd.f32 %v3519_v59, %v3518_v13  ;;  %v5242_v23 = vpop.eup %5241  ;;  %5251 = vlog2.f32 %v2957_v8  ;;  %v2781_v14 = vadd.f32 1e-30, %v7246_v12  ;;  %v3407_v63 = vunpack.c.h.bf16 %v7314_v34  ;;  %v8207_v37 = vld [vmem:[#allocation112_spill] sm:$0xff]  ;;  %v8208_v13 = vld [vmem:[#allocation87_spill] sm:$0xff]  ;;  %v2785_v8 = vpop.f32.mrf.mxu2 }
 0x4a2   : > { %v5244_v20 = vpop.eup %5243  ;;  %v7342_v40 = vmul.f32 %v3396_v50, %v3191_v24  ;;  %v2870_v54 = vadd.f32 1e-30, %v7248_v5  ;;  %v3412_v52 = vunpack.c.l.bf16 %v7327_v53  ;;  %5253 = vlog2.f32 %v2784_v19  ;;  %v7355_v1 = vld [vmem:[%s5826_s26 + $0x100] sm:$0xff] }
 0x4a3   : > { %v5246_v12 = vpop.eup %5245  ;;  %v2959_v59 = vadd.f32 1e-30, %v7220_v11  ;;  %5255 = vlog2.f32 %v2873_v6  ;;  %v3658_v39 = vadd.f32 %v3657_v35, %v3520_v30  ;;  %v3413_v49 = vunpack.c.h.bf16 %v7327_v53 }
 0x4a4   : > { %v3522_v4 = vmul.f32 %v3394_v29, %v3187_v17  ;;  %v3523_v50 = vmul.f32 %v3395_v32, %v3189_v10  ;;  %5257 = vlog2.f32 %v3046_v3  ;;  %v3048_v5 = vadd.f32 1e-30, %v7222_v44  ;;  %v5248_v24 = vpop.eup %5247 }
 0x4a5   : > { %v3195_v19 = vmul.f32 0.6931472, %v5240_v33  ;;  %v3197_v11 = vmul.f32 0.6931472, %v5242_v23  ;;  %5259 = vlog2.f32 %v2781_v14  ;;  %v2962_v30 = vadd.f32 1e-30, %v7279_v43 }
 0x4a6   : > { %v5250_v6 = vpop.eup %5249  ;;  %v3203_v35 = vmul.f32 0.6931472, %v5244_v20  ;;  %v3205_v29 = vmul.f32 0.6931472, %v5246_v12  ;;  %5261 = vlog2.f32 %v2870_v54  ;;  %v3051_v21 = vadd.f32 1e-30, %v7281_v57 }
 0x4a7   : > { %3615 = vadd.xlane.f32.xlu2 %v8206_v47  ;;  %3625 = vadd.xlane.f32.xlu1 %v8207_v37  ;;  %v5252_v32 = vpop.eup %5251  ;;  %5263 = vlog2.f32 %v2959_v59  ;;  %v3410_v44 = vunpack.c.l.bf16 %v7355_v1  ;;  %v7364_v33 = vadd.f32 %v3658_v39, %v3521_v60  ;;  %v7368_v43 = vmul.f32 %v3397_v41, %v3193_v38  ;;  %v7371_v14 = vld [vmem:[%s5826_s26 + $0x118] sm:$0xff]  ;;  %v2455_v47 = vpop.xlane.xlu0 %2454  ;;  %v7388_v59 = vld [vmem:[%s5826_s26 + $0x110] sm:$0xff] }
 0x4a8   : > { %v5254_v3 = vpop.eup %5253  ;;  %v3199_v23 = vmul.f32 0.6931472, %v5248_v24  ;;  %5265 = vlog2.f32 %v3048_v5  ;;  %v2786_v57 = vadd.f32 1e-30, %v2785_v8  ;;  %v3662_v37 = vadd.f32 %v3523_v50, %v3522_v4 }
 0x4a9   : > { %3605 = vadd.xlane.f32.xlu0 %v8208_v13  ;;  %v5256_v20 = vpop.eup %5255  ;;  %v3526_v54 = vmul.f32 %v3398_v45, %v3195_v19  ;;  %v3527_v60 = vmul.f32 %v3399_v7, %v3197_v11  ;;  %5267 = vlog2.f32 %v2962_v30  ;;  %v2875_v36 = vadd.f32 1e-30, %v2874_v42 }
 0x4aa   : > { %v5258_v41 = vpop.eup %5257  ;;  %v3201_v38 = vmul.f32 0.6931472, %v5250_v6  ;;  %v3530_v13 = vmul.f32 %v3402_v51, %v3203_v35  ;;  %v3531_v12 = vmul.f32 %v3403_v16, %v3205_v29  ;;  %5269 = vlog2.f32 %v3051_v21 }
 0x4ab   : > { %v5260_v0 = vpop.eup %5259  ;;  %v3411_v45 = vunpack.c.h.bf16 %v7355_v1  ;;  %v2964_v7 = vadd.f32 1e-30, %v7329_v28  ;;  %5271 = vrcp.f32 %v2455_v47  ;;  %v3207_v39 = vmul.f32 0.6931472, %v5252_v32 }
 0x4ac   : > { %v3219_v4 = vmul.f32 0.6931472, %v5254_v3  ;;  %v3221_v51 = vmul.f32 0.6931472, %v5256_v20  ;;  %5273 = vlog2.f32 %v2786_v57  ;;  %v3667_v1 = vadd.f32 %v3527_v60, %v3526_v54 }
 0x4ad   : > { %v7360_v17 = vpop.f32.mrf.mxu0  ;;  %v7362_v10 = vpop.f32.mrf.mxu1  ;;  %5275 = vlog2.f32 %v2875_v36  ;;  %v3663_v28 = vadd.f32 %v3662_v37, %v7342_v40  ;;  %v3414_v42 = vunpack.c.l.bf16 %v7388_v59  ;;  %v8209_v24 = vunpack.c.h.bf16 %v7254_v15 }
 0x4ae   : > { %v3672_v11 = vadd.f32 %v3531_v12, %v3530_v13  ;;  %v3211_v6 = vmul.f32 0.6931472, %v5260_v0  ;;  %v3053_v29 = vadd.f32 1e-30, %v7331_v55  ;;  %v3532_v32 = vmul.f32 %v3404_v61, %v3207_v39 }
 0x4af   : > { %3630 = vadd.xlane.f32.xlu2 %v7215_v62  ;;  %3640 = vadd.xlane.f32.xlu1 %v7228_v22  ;;  %v3416_v62 = vunpack.c.l.bf16 %v7371_v14  ;;  %v5262_v22 = vpop.eup %5261  ;;  %v3529_v19 = vmul.f32 %v8209_v24, %v3201_v38  ;;  %v3538_v40 = vmul.f32 %v3410_v44, %v3219_v4  ;;  %v3539_v3 = vmul.f32 %v3411_v45, %v3221_v51  ;;  %v8210_v44 = vld [vmem:[#allocation113_spill] sm:$0xff]  ;;  %v8212_v51 = vld [vmem:[#allocation115_spill] sm:$0xff] }
 0x4b0   : > { %v5264_v50 = vpop.eup %5263  ;;  %v3213_v35 = vmul.f32 0.6931472, %v5262_v22  ;;  %v3209_v37 = vmul.f32 0.6931472, %v5258_v41  ;;  %v3415_v15 = vunpack.c.h.bf16 %v7388_v59  ;;  %v7403_v55 = vadd.f32 %v3663_v28, %v7368_v43  ;;  %v8211_v43 = vld [vmem:[#allocation114_spill] sm:$0xff] }
 0x4b1   : > { %3620 = vadd.xlane.f32.xlu0 %v7217_v31  ;;  %v3528_v31 = vmul.f32 %v3400_v2, %v3199_v23  ;;  %v5266_v8 = vpop.eup %5265  ;;  %v3215_v60 = vmul.f32 0.6931472, %v5264_v50  ;;  %v3673_v38 = vadd.f32 %v3672_v11, %v3532_v32  ;;  %v3534_v41 = vmul.f32 %v3406_v48, %v3211_v6 }
 0x4b2   : > { %v2788_v26 = vpop.f32.mrf.mxu2  ;;  %v2877_v16 = vpop.f32.mrf.mxu3  ;;  %v3217_v36 = vmul.f32 0.6931472, %v5266_v8  ;;  %v3682_v39 = vadd.f32 %v3539_v3, %v3538_v40  ;;  %v7429_v3 = vld [vmem:[%s5826_s26 + $0x120] sm:$0xff]  ;;  %v3417_v59 = vunpack.c.h.bf16 %v7371_v14 }
 0x4b3   : > { %v2457_v5 = vpop.xlane.xlu1 %2456  ;;  %v5268_v30 = vpop.eup %5267  ;;  %v2789_v23 = vadd.f32 1e-30, %v2788_v26  ;;  %v3668_v20 = vadd.f32 %v3667_v1, %v3528_v31  ;;  %v2878_v28 = vadd.f32 1e-30, %v2877_v16  ;;  %v405_v16 = vld [vmem:[%s5826_s26 + $0x130] sm:$0xff]  ;;  %v3418_v14 = vunpack.c.l.bf16 %v7429_v3 }
 0x4b4   : > { %5277 = vrcp.f32 %v2457_v5  ;;  %v5270_v21 = vpop.eup %5269  ;;  %v3223_v12 = vmul.f32 0.6931472, %v5268_v30 }
 0x4b5   : > { %5279 = vlog2.f32 %v2964_v7  ;;  %v2968_v2 = vpop.f32.mrf.mxu0  ;;  %v3057_v57 = vpop.f32.mrf.mxu1  ;;  %v3225_v0 = vmul.f32 0.6931472, %v5270_v21  ;;  %v3669_v6 = vadd.f32 %v3668_v20, %v3529_v19  ;;  %v8213_v20 = vld [vmem:[#allocation116_spill] sm:$0xff] }
 0x4b6   : > { %v5272_v47 = vpop.eup %5271  ;;  %v2969_v61 = vadd.f32 1e-30, %v2968_v2  ;;  %5281 = vlog2.f32 %v3053_v29  ;;  %v3058_v50 = vadd.f32 1e-30, %v3057_v57  ;;  %v3540_v8 = vmul.f32 %v3412_v52, %v3223_v12 }
 0x4b7   : > { %3645 = vadd.xlane.f32.xlu2 %v7283_v27  ;;  %3655 = vadd.xlane.f32.xlu1 %v7333_v18  ;;  %v5274_v54 = vpop.eup %5273  ;;  %v3535_v27 = vmul.f32 %v3407_v63, %v3213_v35  ;;  %v2522_v45 = vmul.f32 %v5272_v47, %v8211_v43  ;;  %5283 = vlog2.f32 %v2789_v23  ;;  %v3533_v35 = vmul.f32 %v3405_v58, %v3209_v37  ;;  %v7439_v37 = vld [vmem:[%s5826_s26 + $0x138] sm:$0xff] }
 0x4b8   : > { %v5276_v13 = vpop.eup %5275  ;;  %v3227_v34 = vmul.f32 0.6931472, %v5274_v54  ;;  %5285 = vlog2.f32 %v2969_v61  ;;  %v3536_v2 = vmul.f32 %v3408_v46, %v3215_v60  ;;  %v3683_v21 = vadd.f32 %v3682_v39, %v3540_v8 }
 0x4b9   : > { %3635 = vadd.xlane.f32.xlu0 %v8210_v44  ;;  %v3229_v63 = vmul.f32 0.6931472, %v5276_v13  ;;  %v3677_v11 = vadd.f32 %v3535_v27, %v3534_v41  ;;  %v7423_v52 = vmul.f32 %v3409_v56, %v3217_v36  ;;  %v2967_v58 = vadd.f32 1e-30, %v7360_v17 }
 0x4ba   : > { %v5278_v18 = vpop.eup %5277  ;;  %v2790_v7 = vpop.f32.mrf.mxu2  ;;  %v3542_v19 = vmul.f32 %v3414_v42, %v3227_v34  ;;  %v3674_v25 = vadd.f32 %v3673_v38, %v3533_v35  ;;  %v3541_v56 = vmul.f32 %v3413_v49, %v3225_v0  ;;  %v3056_v47 = vadd.f32 1e-30, %v7362_v10  ;;  %v7451_v34 = vld [vmem:[%s5826_s26 + $0x128] sm:$0xff] }
 0x4bb   : > { %v2879_v22 = vpop.f32.mrf.mxu3  ;;  %v5280_v4 = vpop.eup %5279  ;;  %v2523_v26 = vmul.f32 %v5278_v18, %v8212_v51  ;;  %v2791_v31 = vadd.f32 1e-30, %v2790_v7  ;;  %v3543_v9 = vmul.f32 %v3415_v15, %v3229_v63  ;;  %v3678_v42 = vadd.f32 %v3677_v11, %v3536_v2  ;;  %v407_v11 = vld [vmem:[%s5826_s26 + $0x140] sm:$0xff] }
 0x4bc   : > { %v2880_v5 = vadd.f32 1e-30, %v2879_v22  ;;  %v2459_v48 = vpop.xlane.xlu2 %2458  ;;  %v7412_v1 = vpop.xlane.xlu1 %2011  ;;  %v3231_v30 = vmul.f32 0.6931472, %v5280_v4  ;;  %v3422_v15 = vunpack.c.l.bf16 %v405_v16  ;;  %v3423_v54 = vunpack.c.h.bf16 %v405_v16 }
 0x4bd   : > { %5287 = vlog2.f32 %v2791_v31  ;;  %v2540_v24 = vpack.c.bf16 %v2523_v26, %v2522_v45  ;;  %v5282_v29 = vpop.eup %5281  ;;  %v3684_v36 = vadd.f32 %v3683_v21, %v3541_v56  ;;  %v3687_v10 = vadd.f32 %v3543_v9, %v3542_v19 }
 0x4be   : > { %5289 = vlog2.f32 %v2880_v5  ;;  %v5284_v32 = vpop.eup %5283  ;;  %v2971_v46 = vpop.f32.mrf.mxu0  ;;  %v3544_v17 = vmul.f32 %v3416_v62, %v3231_v30  ;;  %v3233_v57 = vmul.f32 0.6931472, %v5282_v29  ;;  %v3424_v41 = vunpack.c.l.bf16 %v7439_v37 }
 0x4bf   : > { %5291 = vlog2.f32 %v3058_v50  ;;  %2812 = vmatmul.bf16.gmra.mxu2 %v2540_v24  ;;  %2901 = vmatmul.bf16.gmra.mxu3 %v2540_v24  ;;  %v3060_v40 = vpop.f32.mrf.mxu1  ;;  %v5286_v23 = vpop.eup %5285  ;;  %v2972_v53 = vadd.f32 1e-30, %v2971_v46  ;;  %v3419_v22 = vunpack.c.h.bf16 %v7429_v3  ;;  %v3235_v51 = vmul.f32 0.6931472, %v5284_v32 }
 0x4c0   : > { %5293 = vlog2.f32 %v2878_v28  ;;  %2990 = vmatmul.bf16.gmra.mxu0 %v2540_v24  ;;  %3079 = vmatmul.bf16.gmra.mxu1 %v2540_v24  ;;  %v3247_v13 = vmul.f32 0.6931472, %v5286_v23  ;;  %v3061_v4 = vadd.f32 1e-30, %v3060_v40  ;;  %v3425_v5 = vunpack.c.h.bf16 %v7439_v37  ;;  %v8215_v40 = vld [vmem:[#allocation20_spill] sm:$0xff] }
 0x4c1   : > { %3660 = vadd.xlane.f32.xlu2 %v7364_v33  ;;  %3670 = vadd.xlane.f32.xlu1 %v3669_v6  ;;  %5295 = vrcp.f32 %v2459_v48  ;;  %v3545_v30 = vmul.f32 %v3417_v59, %v3233_v57  ;;  %v3679_v6 = vadd.f32 %v3678_v42, %v7423_v52  ;;  %v3688_v21 = vadd.f32 %v3687_v10, %v3544_v17  ;;  %v7466_v42 = vld [vmem:[%s5826_s26 + $0x148] sm:$0xff] }
 0x4c2   : > { %3650 = vadd.xlane.f32.xlu0 %v8213_v20  ;;  %5297 = vlog2.f32 %v2967_v58  ;;  %v3552_v28 = vmul.f32 %v3424_v41, %v3247_v13  ;;  %v3420_v9 = vunpack.c.l.bf16 %v7451_v34  ;;  %v8214_v58 = vld [vmem:[#allocation117_spill] sm:$0xff]  ;;  %v3546_v56 = vmul.f32 %v3418_v14, %v3235_v51 }
 0x4c3   : > { %v5288_v33 = vpop.eup %5287  ;;  %v2793_v12 = vpop.f32.mrf.mxu2  ;;  %v3426_v23 = vunpack.c.l.bf16 %v407_v11  ;;  %v3427_v57 = vunpack.c.h.bf16 %v407_v11  ;;  %v3689_v13 = vadd.f32 %v3688_v21, %v3545_v30 }
 0x4c4   : > { %v7442_v49 = vpop.xlane.xlu2 %2013  ;;  %v2461_v60 = vpop.xlane.xlu0 %2460  ;;  %v3243_v62 = vmul.f32 0.6931472, %v5288_v33  ;;  %v2794_v45 = vadd.f32 1e-30, %v2793_v12 }
 0x4c5   : > { %v5290_v61 = vpop.eup %5289  ;;  %v7445_v44 = vpop.xlane.xlu1 %2017  ;;  %5299 = vrcp.f32 %v2461_v60 }
 0x4c6   : > { %v5292_v38 = vpop.eup %5291  ;;  %v3245_v27 = vmul.f32 0.6931472, %v5290_v61  ;;  %v2882_v18 = vpop.f32.mrf.mxu3  ;;  %5301 = vlog2.f32 %v3056_v47  ;;  %v3550_v43 = vmul.f32 %v3422_v15, %v3243_v62  ;;  %v3428_v62 = vunpack.c.l.bf16 %v7466_v42 }
 0x4c7   : > { %v5294_v0 = vpop.eup %5293  ;;  %v2883_v7 = vadd.f32 1e-30, %v2882_v18  ;;  %5303 = vlog2.f32 %v2972_v53  ;;  %v3249_v26 = vmul.f32 0.6931472, %v5292_v38  ;;  %v2973_v50 = vpop.f32.mrf.mxu0 }
 0x4c8   : > { %v3551_v39 = vmul.f32 %v3423_v54, %v3245_v27  ;;  %5305 = vlog2.f32 %v2794_v45  ;;  %v3062_v31 = vpop.f32.mrf.mxu1  ;;  %v5296_v48 = vpop.eup %5295  ;;  %v3237_v63 = vmul.f32 0.6931472, %v5294_v0  ;;  %v2974_v29 = vadd.f32 1e-30, %v2973_v50  ;;  %v409_v45 = vld [vmem:[%s5826_s26 + $0x150] sm:$0xff] }
 0x4c9   : > { %5307 = vlog2.f32 %v2883_v7  ;;  %3675 = vadd.xlane.f32.xlu2 %v3674_v25  ;;  %3685 = vadd.xlane.f32.xlu1 %v3684_v36  ;;  %v5298_v24 = vpop.eup %5297  ;;  %v2524_v46 = vmul.f32 %v5296_v48, %v8214_v58  ;;  %v3553_v52 = vmul.f32 %v3425_v5, %v3249_v26  ;;  %v3063_v61 = vadd.f32 1e-30, %v3062_v31 }
 0x4ca   : > { %v3697_v8 = vadd.f32 %v3551_v39, %v3550_v43  ;;  %3665 = vadd.xlane.f32.xlu0 %v7403_v55  ;;  %5309 = vlog2.f32 %v3061_v4  ;;  %v3547_v59 = vmul.f32 %v3419_v22, %v3237_v63  ;;  %v3239_v60 = vmul.f32 0.6931472, %v5298_v24  ;;  %v410_v63 = vld [vmem:[%s5826_s26 + $0x158] sm:$0xff] }
 0x4cb   : > { %v5300_v35 = vpop.eup %5299  ;;  %v2795_v47 = vpop.f32.mrf.mxu2  ;;  %5311 = vlog2.f32 %v2974_v29  ;;  %v3421_v7 = vunpack.c.h.bf16 %v7451_v34  ;;  %v3429_v31 = vunpack.c.h.bf16 %v7466_v42 }
 0x4cc   : > { %v7456_v2 = vpop.xlane.xlu2 %2019  ;;  %v7458_v16 = vpop.xlane.xlu0 %2015  ;;  %v3698_v32 = vadd.f32 %v3697_v8, %v3552_v28  ;;  %v2525_v55 = vmul.f32 %v5300_v35, %v8215_v40  ;;  %v2796_v15 = vadd.f32 1e-30, %v2795_v47  ;;  %v3692_v18 = vadd.f32 %v3547_v59, %v3546_v56  ;;  %v411_v47 = vld [vmem:[%s5826_s26 + $0x160] sm:$0xff] }
 0x4cd   : > { %v5302_v19 = vpop.eup %5301  ;;  %v7463_v3 = vpop.xlane.xlu1 %2023  ;;  %v3548_v22 = vmul.f32 %v3420_v9, %v3239_v60  ;;  %v3430_v28 = vunpack.c.l.bf16 %v409_v45  ;;  %v3431_v35 = vunpack.c.h.bf16 %v409_v45 }
 0x4ce   : > { %v5304_v25 = vpop.eup %5303  ;;  %v2884_v17 = vpop.f32.mrf.mxu3  ;;  %v2541_v33 = vpack.c.bf16 %v2525_v55, %v2524_v46  ;;  %v3699_v54 = vadd.f32 %v3698_v32, %v3553_v52  ;;  %5313 = vlog2.f32 %v2796_v15  ;;  %v3241_v0 = vmul.f32 0.6931472, %v5302_v19 }
 0x4cf   : > { %v5306_v37 = vpop.eup %5305  ;;  %v2885_v20 = vadd.f32 1e-30, %v2884_v17  ;;  %v2976_v10 = vpop.f32.mrf.mxu0  ;;  %v3255_v27 = vmul.f32 0.6931472, %v5304_v25  ;;  %v3693_v11 = vadd.f32 %v3692_v18, %v3548_v22  ;;  %v3432_v46 = vunpack.c.l.bf16 %v410_v63 }
 0x4d0   : > { %v5308_v53 = vpop.eup %5307  ;;  %v3251_v36 = vmul.f32 0.6931472, %v5306_v37  ;;  %v3065_v38 = vpop.f32.mrf.mxu1  ;;  %2817 = vmatmul.bf16.gmra.mxu2 %v2541_v33  ;;  %2906 = vmatmul.bf16.gmra.mxu3 %v2541_v33  ;;  %v2977_v39 = vadd.f32 1e-30, %v2976_v10  ;;  %v3549_v21 = vmul.f32 %v3421_v7, %v3241_v0 }
 0x4d1   : > { %v3253_v14 = vmul.f32 0.6931472, %v5308_v53  ;;  %v5310_v41 = vpop.eup %5309  ;;  %5315 = vlog2.f32 %v2885_v20  ;;  %2995 = vmatmul.bf16.gmra.mxu0 %v2541_v33  ;;  %3084 = vmatmul.bf16.gmra.mxu1 %v2541_v33  ;;  %v3556_v48 = vmul.f32 %v3428_v62, %v3255_v27  ;;  %v3066_v9 = vadd.f32 1e-30, %v3065_v38 }
 0x4d2   : > { %v3554_v12 = vmul.f32 %v3426_v23, %v3251_v36  ;;  %3690 = vadd.xlane.f32.xlu2 %v3689_v13  ;;  %3700 = vadd.xlane.f32.xlu1 %v3699_v54  ;;  %5317 = vlog2.f32 %v3063_v61  ;;  %v3257_v26 = vmul.f32 0.6931472, %v5310_v41  ;;  %v5312_v5 = vpop.eup %5311  ;;  %v3694_v23 = vadd.f32 %v3693_v11, %v3549_v21  ;;  %v412_v13 = vld [vmem:[%s5826_s26 + $0x168] sm:$0xff] }
 0x4d3   : > { %v3555_v43 = vmul.f32 %v3427_v57, %v3253_v14  ;;  %3680 = vadd.xlane.f32.xlu0 %v3679_v6  ;;  %v2798_v8 = vpop.f32.mrf.mxu2  ;;  %5319 = vlog2.f32 %v2977_v39  ;;  %v3263_v59 = vmul.f32 0.6931472, %v5312_v5  ;;  %v3433_v53 = vunpack.c.h.bf16 %v410_v63 }
 0x4d4   : > { %v7471_v4 = vpop.xlane.xlu2 %2025  ;;  %v7473_v51 = vpop.xlane.xlu0 %2021  ;;  %v2799_v6 = vadd.f32 1e-30, %v2798_v8  ;;  %v3557_v25 = vmul.f32 %v3429_v31, %v3257_v26  ;;  %v3434_v61 = vunpack.c.l.bf16 %v411_v47  ;;  %v3435_v41 = vunpack.c.h.bf16 %v411_v47  ;;  %v413_v8 = vld [vmem:[%s5826_s26 + $0x170] sm:$0xff] }
 0x4d5   : > { %v7475_v50 = vpop.xlane.xlu1 %2029  ;;  %v3702_v34 = vadd.f32 %v3555_v43, %v3554_v12  ;;  %v5314_v30 = vpop.eup %5313  ;;  %v3560_v36 = vmul.f32 %v3432_v46, %v3263_v59 }
 0x4d6   : > { %v2887_v24 = vpop.f32.mrf.mxu3  ;;  %v3259_v19 = vmul.f32 0.6931472, %v5314_v30  ;;  %5321 = vlog2.f32 %v2799_v6 }
 0x4d7   : > { %v2888_v29 = vadd.f32 1e-30, %v2887_v24  ;;  %v5316_v32 = vpop.eup %5315  ;;  %v3703_v58 = vadd.f32 %v3702_v34, %v3556_v48  ;;  %v2978_v55 = vpop.f32.mrf.mxu0  ;;  %v3436_v48 = vunpack.c.l.bf16 %v412_v13 }
 0x4d8   : > { %v3261_v40 = vmul.f32 0.6931472, %v5316_v32  ;;  %v3067_v52 = vpop.f32.mrf.mxu1  ;;  %v5318_v56 = vpop.eup %5317  ;;  %v3558_v42 = vmul.f32 %v3430_v28, %v3259_v19  ;;  %v2979_v37 = vadd.f32 1e-30, %v2978_v55  ;;  %v3438_v19 = vunpack.c.l.bf16 %v413_v8  ;;  %v414_v55 = vld [vmem:[%s5826_s26 + $0x178] sm:$0xff] }
 0x4d9   : > { %5323 = vlog2.f32 %v2888_v29  ;;  %v3704_v17 = vadd.f32 %v3703_v58, %v3557_v25  ;;  %v3265_v33 = vmul.f32 0.6931472, %v5318_v56  ;;  %v5320_v60 = vpop.eup %5319  ;;  %v3068_v43 = vadd.f32 1e-30, %v3067_v52 }
 0x4da   : > { %v3559_v57 = vmul.f32 %v3431_v35, %v3261_v40  ;;  %5325 = vlog2.f32 %v3066_v9  ;;  %v3271_v5 = vmul.f32 0.6931472, %v5320_v60  ;;  %v3437_v29 = vunpack.c.h.bf16 %v412_v13 }
 0x4db   : > { %3695 = vadd.xlane.f32.xlu0 %v3694_v23  ;;  %3705 = vadd.xlane.f32.xlu2 %v3704_v17  ;;  %v2800_v62 = vpop.f32.mrf.mxu2  ;;  %5327 = vlog2.f32 %v2979_v37  ;;  %v3561_v26 = vmul.f32 %v3433_v53, %v3265_v33  ;;  %v3439_v52 = vunpack.c.h.bf16 %v413_v8 }
 0x4dc   : > { %v7480_v15 = vpop.xlane.xlu2 %2031  ;;  %v7482_v20 = vpop.xlane.xlu0 %2027  ;;  %v3707_v10 = vadd.f32 %v3559_v57, %v3558_v42  ;;  %v2801_v27 = vadd.f32 1e-30, %v2800_v62  ;;  %v3564_v32 = vmul.f32 %v3436_v48, %v3271_v5 }
 0x4dd   : > { %v7484_v54 = vpop.xlane.xlu1 %2035  ;;  %v5322_v38 = vpop.eup %5321 }
 0x4de   : > { %v2889_v14 = vpop.f32.mrf.mxu3  ;;  %v3267_v0 = vmul.f32 0.6931472, %v5322_v38  ;;  %v3708_v45 = vadd.f32 %v3707_v10, %v3560_v36  ;;  %5329 = vlog2.f32 %v2801_v27  ;;  %v3440_v36 = vunpack.c.l.bf16 %v414_v55 }
 0x4df   : > { %v2890_v12 = vadd.f32 1e-30, %v2889_v14  ;;  %v5324_v18 = vpop.eup %5323  ;;  %v2981_v22 = vpop.f32.mrf.mxu0  ;;  %v415_v14 = vld [vmem:[%s5826_s26 + $0x180] sm:$0xff] }
 0x4e0   : > { %v3269_v7 = vmul.f32 0.6931472, %v5324_v18  ;;  %v3070_v39 = vpop.f32.mrf.mxu1  ;;  %v5326_v31 = vpop.eup %5325  ;;  %v3562_v63 = vmul.f32 %v3434_v61, %v3267_v0  ;;  %v3709_v24 = vadd.f32 %v3708_v45, %v3561_v26  ;;  %v2982_v34 = vadd.f32 1e-30, %v2981_v22  ;;  %v416_v45 = vld [vmem:[%s5826_s26 + $0x188] sm:$0xff] }
 0x4e1   : > { %5331 = vlog2.f32 %v2890_v12  ;;  %v3273_v35 = vmul.f32 0.6931472, %v5326_v31  ;;  %v5328_v21 = vpop.eup %5327  ;;  %v3071_v23 = vadd.f32 1e-30, %v3070_v39  ;;  %v3441_v18 = vunpack.c.h.bf16 %v414_v55  ;;  %v417_v55 = vld [vmem:[%s5826_s26 + $0x190] sm:$0xff] }
 0x4e2   : > { %v3563_v28 = vmul.f32 %v3435_v41, %v3269_v7  ;;  %5333 = vlog2.f32 %v3068_v43  ;;  %v3279_v60 = vmul.f32 0.6931472, %v5328_v21  ;;  %v3442_v7 = vunpack.c.l.bf16 %v415_v14 }
 0x4e3   : > { %3710 = vadd.xlane.f32.xlu0 %v3709_v24  ;;  %v2803_v9 = vpop.f32.mrf.mxu2  ;;  %5335 = vlog2.f32 %v2982_v34  ;;  %v3565_v33 = vmul.f32 %v3437_v29, %v3273_v35  ;;  %v3443_v5 = vunpack.c.h.bf16 %v415_v14  ;;  %v3447_v14 = vunpack.c.h.bf16 %v417_v55 }
 0x4e4   : > { %v7488_v11 = vpop.xlane.xlu2 %2037  ;;  %v7490_v30 = vpop.xlane.xlu0 %2033  ;;  %v3712_v46 = vadd.f32 %v3563_v28, %v3562_v63  ;;  %v2804_v25 = vadd.f32 1e-30, %v2803_v9  ;;  %v3568_v43 = vmul.f32 %v3440_v36, %v3279_v60 }
 0x4e5   : > { %v7492_v6 = vpop.xlane.xlu1 %2041  ;;  %v5330_v40 = vpop.eup %5329 }
 0x4e6   : > { %v2892_v58 = vpop.f32.mrf.mxu3  ;;  %v3275_v42 = vmul.f32 0.6931472, %v5330_v40  ;;  %v3713_v57 = vadd.f32 %v3712_v46, %v3564_v32  ;;  %5337 = vlog2.f32 %v2804_v25 }
 0x4e7   : > { %v2893_v56 = vadd.f32 1e-30, %v2892_v58  ;;  %v5332_v59 = vpop.eup %5331  ;;  %v2983_v17 = vpop.f32.mrf.mxu0  ;;  %v3444_v58 = vunpack.c.l.bf16 %v416_v45 }
 0x4e8   : > { %v3277_v47 = vmul.f32 0.6931472, %v5332_v59  ;;  %v3072_v37 = vpop.f32.mrf.mxu1  ;;  %v5334_v53 = vpop.eup %5333  ;;  %v3566_v61 = vmul.f32 %v3438_v19, %v3275_v42  ;;  %v3714_v10 = vadd.f32 %v3713_v57, %v3565_v33  ;;  %v2984_v38 = vadd.f32 1e-30, %v2983_v17 }
 0x4e9   : > { %5339 = vlog2.f32 %v2893_v56  ;;  %v3281_v27 = vmul.f32 0.6931472, %v5334_v53  ;;  %v5336_v0 = vpop.eup %5335  ;;  %v3073_v48 = vadd.f32 1e-30, %v3072_v37  ;;  %v3446_v33 = vunpack.c.l.bf16 %v417_v55 }
 0x4ea   : > { %v3567_v62 = vmul.f32 %v3439_v52, %v3277_v47  ;;  %5341 = vlog2.f32 %v3071_v23  ;;  %3715 = vadd.xlane.f32.xlu1 %v3714_v10  ;;  %v3287_v9 = vmul.f32 0.6931472, %v5336_v0  ;;  %v3445_v47 = vunpack.c.h.bf16 %v416_v45 }
 0x4eb   : > { %v2805_v22 = vpop.f32.mrf.mxu2  ;;  %5343 = vlog2.f32 %v2984_v38  ;;  %v3569_v32 = vmul.f32 %v3441_v18, %v3281_v27 }
 0x4ec   : > { %v7496_v13 = vpop.xlane.xlu2 %2043  ;;  %v7498_v41 = vpop.xlane.xlu0 %2039  ;;  %v3717_v26 = vadd.f32 %v3567_v62, %v3566_v61  ;;  %v2806_v63 = vadd.f32 1e-30, %v2805_v22  ;;  %v3572_v37 = vmul.f32 %v3444_v58, %v3287_v9  ;;  %v418_v62 = vld [vmem:[%s5826_s26 + $0x198] sm:$0xff] }
 0x4ed   : > { %v7500_v12 = vpop.xlane.xlu1 %2047  ;;  %v5338_v31 = vpop.eup %5337 }
 0x4ee   : > { %v2894_v39 = vpop.f32.mrf.mxu3  ;;  %v3283_v24 = vmul.f32 0.6931472, %v5338_v31  ;;  %v3718_v34 = vadd.f32 %v3717_v26, %v3568_v43  ;;  %5345 = vlog2.f32 %v2806_v63  ;;  %v3448_v31 = vunpack.c.l.bf16 %v418_v62  ;;  %v419_v63 = vld [vmem:[%s5826_s26 + $0x1a0] sm:$0xff] }
 0x4ef   : > { %v2895_v28 = vadd.f32 1e-30, %v2894_v39  ;;  %v5340_v8 = vpop.eup %5339  ;;  %v2986_v29 = vpop.f32.mrf.mxu0 }
 0x4f0   : > { %v3285_v35 = vmul.f32 0.6931472, %v5340_v8  ;;  %v3075_v21 = vpop.f32.mrf.mxu1  ;;  %v5342_v19 = vpop.eup %5341  ;;  %v3570_v46 = vmul.f32 %v3442_v7, %v3283_v24  ;;  %v2987_v52 = vadd.f32 1e-30, %v2986_v29  ;;  %v3719_v25 = vadd.f32 %v3718_v34, %v3569_v32 }
 0x4f1   : > { %5347 = vlog2.f32 %v2895_v28  ;;  %v3076_v56 = vadd.f32 1e-30, %v3075_v21  ;;  %v3289_v23 = vmul.f32 0.6931472, %v5342_v19  ;;  %v5344_v17 = vpop.eup %5343  ;;  %v3449_v21 = vunpack.c.h.bf16 %v418_v62 }
 0x4f2   : > { %v3571_v40 = vmul.f32 %v3443_v5, %v3285_v35  ;;  %5349 = vlog2.f32 %v3073_v48  ;;  %3720 = vadd.xlane.f32.xlu2 %v3719_v25  ;;  %v3295_v26 = vmul.f32 0.6931472, %v5344_v17 }
 0x4f3   : > { %v2808_v53 = vpop.f32.mrf.mxu2  ;;  %5351 = vlog2.f32 %v2987_v52  ;;  %v3573_v39 = vmul.f32 %v3445_v47, %v3289_v23  ;;  %v3451_v23 = vunpack.c.h.bf16 %v419_v63 }
 0x4f4   : > { %v7504_v59 = vpop.xlane.xlu2 %2049  ;;  %v7506_v42 = vpop.xlane.xlu0 %2045  ;;  %v3722_v36 = vadd.f32 %v3571_v40, %v3570_v46  ;;  %v2809_v10 = vadd.f32 1e-30, %v2808_v53  ;;  %5353 = vlog2.f32 %v3076_v56  ;;  %v3576_v58 = vmul.f32 %v3448_v31, %v3295_v26  ;;  %v420_v46 = vld [vmem:[%s5826_s26 + $0x1a8] sm:$0xff] }
 0x4f5   : > { %v7508_v57 = vpop.xlane.xlu1 %2053  ;;  %v5346_v61 = vpop.eup %5345  ;;  %v3450_v40 = vunpack.c.l.bf16 %v419_v63 }
 0x4f6   : > { %v2897_v60 = vpop.f32.mrf.mxu3  ;;  %v3291_v18 = vmul.f32 0.6931472, %v5346_v61  ;;  %v3723_v0 = vadd.f32 %v3722_v36, %v3572_v37  ;;  %5355 = vlog2.f32 %v2809_v10  ;;  %v3452_v61 = vunpack.c.l.bf16 %v420_v46 }
 0x4f7   : > { %v2898_v38 = vadd.f32 1e-30, %v2897_v60  ;;  %v5348_v27 = vpop.eup %5347  ;;  %v2988_v45 = vpop.f32.mrf.mxu0 }
 0x4f8   : > { %v5350_v43 = vpop.eup %5349  ;;  %v3293_v7 = vmul.f32 0.6931472, %v5348_v27  ;;  %v3077_v22 = vpop.f32.mrf.mxu1  ;;  %v3574_v5 = vmul.f32 %v3446_v33, %v3291_v18  ;;  %v2989_v28 = vadd.f32 1e-30, %v2988_v45  ;;  %v3724_v8 = vadd.f32 %v3723_v0, %v3573_v39  ;;  %v421_v18 = vld [vmem:[%s5826_s26 + $0x1b0] sm:$0xff] }
 0x4f9   : > { %5357 = vlog2.f32 %v2898_v38  ;;  %v3297_v24 = vmul.f32 0.6931472, %v5350_v43  ;;  %v3078_v34 = vadd.f32 1e-30, %v3077_v22  ;;  %v5352_v32 = vpop.eup %5351  ;;  %v3453_v0 = vunpack.c.h.bf16 %v420_v46 }
 0x4fa   : > { %v3575_v48 = vmul.f32 %v3447_v14, %v3293_v7  ;;  %3725 = vadd.xlane.f32.xlu0 %v3724_v8  ;;  %v5354_v9 = vpop.eup %5353  ;;  %5359 = vlog2.f32 %v2989_v28  ;;  %v3303_v36 = vmul.f32 0.6931472, %v5352_v32  ;;  %v3455_v28 = vunpack.c.h.bf16 %v421_v18 }
 0x4fb   : > { %v2810_v55 = vpop.f32.mrf.mxu2  ;;  %5361 = vlog2.f32 %v3078_v34  ;;  %v3577_v53 = vmul.f32 %v3449_v21, %v3297_v24  ;;  %v3305_v38 = vmul.f32 0.6931472, %v5354_v9 }
 0x4fc   : > { %v7512_v35 = vpop.xlane.xlu2 %2055  ;;  %v7514_v29 = vpop.xlane.xlu0 %2051  ;;  %v3727_v25 = vadd.f32 %v3575_v48, %v3574_v5  ;;  %v2811_v47 = vadd.f32 1e-30, %v2810_v55  ;;  %v3580_v22 = vmul.f32 %v3452_v61, %v3303_v36  ;;  %v422_v5 = vld [vmem:[%s5826_s26 + $0x1b8] sm:$0xff]  ;;  %v3454_v48 = vunpack.c.l.bf16 %v421_v18 }
 0x4fd   : > { %v7516_v19 = vpop.xlane.xlu1 %2059  ;;  %v5356_v56 = vpop.eup %5355  ;;  %v3581_v8 = vmul.f32 %v3453_v0, %v3305_v38  ;;  %v3456_v9 = vunpack.c.l.bf16 %v422_v5  ;;  %v8216_v38 = vld [vmem:[#allocation19_spill] sm:$0xff] }
 0x4fe   : > { %v2899_v52 = vpop.f32.mrf.mxu3  ;;  %v3299_v33 = vmul.f32 0.6931472, %v5356_v56  ;;  %v3728_v60 = vadd.f32 %v3727_v25, %v3576_v58  ;;  %5363 = vlog2.f32 %v2811_v47  ;;  %v3457_v25 = vunpack.c.h.bf16 %v422_v5 }
 0x4ff   : > { %v2900_v17 = vadd.f32 1e-30, %v2899_v52  ;;  %v5358_v37 = vpop.eup %5357  ;;  %vm3795_vm1 = vcmp.eq.s32.totalorder %v8216_v38, 65  ;;  %vm3794_vm3 = vcmp.eq.s32.totalorder %v8216_v38, 64  ;;  %v2077_v5 = vmul.f32 -0.5, %v7458_v16 }
 0x500   : > { %v3301_v62 = vmul.f32 0.6931472, %v5358_v37  ;;  %v3578_v14 = vmul.f32 %v3450_v40, %v3299_v33  ;;  %v3729_v10 = vadd.f32 %v3728_v60, %v3577_v53  ;;  %v5360_v45 = vpop.eup %5359 }
 0x501   : > { %5365 = vlog2.f32 %v2900_v17  ;;  %v5362_v31 = vpop.eup %5361  ;;  %v3311_v32 = vmul.f32 0.6931472, %v5360_v45  ;;  %v8217_v45 = vld [vmem:[#allocation25_spill] sm:$0xff] }
 0x502   : > { %v3579_v27 = vmul.f32 %v3451_v23, %v3301_v62  ;;  %3730 = vadd.xlane.f32.xlu1 %v3729_v10  ;;  %v3313_v55 = vmul.f32 0.6931472, %v5362_v31 }
 0x503   : > { %v3584_v47 = vmul.f32 %v3456_v9, %v3311_v32 }
 0x504   : > { %v7520_v43 = vpop.xlane.xlu2 %2061  ;;  %v7522_v7 = vpop.xlane.xlu0 %2057  ;;  %v3732_v26 = vadd.f32 %v3579_v27, %v3578_v14  ;;  %v3585_v33 = vmul.f32 %v3457_v25, %v3313_v55  ;;  %v2076_v14 = vmul.f32 -0.5, %v7442_v49  ;;  %v2075_v49 = vmul.f32 -0.5, %v7412_v1 }
 0x505   : > { %v7524_v39 = vpop.xlane.xlu1 %2065  ;;  %v5364_v63 = vpop.eup %5363 }
 0x506   : > { %v3733_v24 = vadd.f32 %v3732_v26, %v3580_v22  ;;  %v3307_v21 = vmul.f32 0.6931472, %v5364_v63 }
 0x507   : > { %v5366_v34 = vpop.eup %5365 }
 0x508   : > { %v3309_v58 = vmul.f32 0.6931472, %v5366_v34  ;;  %v3734_v46 = vadd.f32 %v3733_v24, %v3581_v8  ;;  %v3582_v40 = vmul.f32 %v3454_v48, %v3307_v21  ;;  %v2079_v8 = vmul.f32 -0.5, %v7456_v2 }
 0x50a   : > { %v3583_v52 = vmul.f32 %v3455_v28, %v3309_v58  ;;  %3735 = vadd.xlane.f32.xlu2 %v3734_v46  ;;  %v8218_v46 = vld [vmem:[#allocation28_spill] sm:$0xff] }
 0x50c   : > { %v7527_v56 = vpop.xlane.xlu2 %2067  ;;  %v7529_v23 = vpop.xlane.xlu0 %2063  ;;  %v3737_v37 = vadd.f32 %v3583_v52, %v3582_v40  ;;  %v8219_v52 = vld [vmem:[#allocation22_spill] sm:$0xff] }
 0x50d   : > { %v7531_v17 = vpop.xlane.xlu1 %2071 }
 0x50e   : > { %v3738_v53 = vadd.f32 %v3737_v37, %v3584_v47  ;;  %v8220_v47 = vld [vmem:[#allocation34_spill] sm:$0xff] }
 0x510   : > { %v3739_v60 = vadd.f32 %v3738_v53, %v3585_v33 }
 0x512   : > { %3740 = vadd.xlane.f32.xlu0 %v3739_v60  ;;  %v2078_v60 = vmul.f32 -0.5, %v7445_v44 }
 0x514   : > { %v7533_v36 = vpop.xlane.xlu2 %2073  ;;  %v7535_v61 = vpop.xlane.xlu0 %2069 }
 0x515   : > { %v3611_v62 = vpop.xlane.xlu1 %3610 }
 0x516   : > { %v3763_v10 = vsub.f32 0.0, %v3611_v62  ;;  %v2080_v62 = vmul.f32 -0.5, %v7473_v51 }
 0x518   : > { %v3797_v27 = vadd.f32 %v3763_v10, %v2076_v14 }
 0x51a   : > { %v3829_v18 = vsel %vm3795_vm1, %v2076_v14, %v3797_v27 }
 0x51b   : > { %v3861_v0 = vsel %vm3794_vm3, %v3763_v10, %v3829_v18  ;;  %v2082_v18 = vmul.f32 -0.5, %v7471_v4 }
 0x51c   : > { %v3893_v22 = vsel %vm2205_vm2, %v8217_v45, %v3861_v0  ;;  %v3616_v26 = vpop.xlane.xlu2 %3615  ;;  %v3606_v31 = vpop.xlane.xlu0 %3605 }
 0x51d   : > { %3925 = vst [vmem:[%s7551_s3 + $0x8] sm:$0xff] %v3893_v22  ;;  %v3764_v48 = vsub.f32 0.0, %v3616_v26  ;;  %v3626_v63 = vpop.xlane.xlu1 %3625  ;;  %v3762_v28 = vsub.f32 0.0, %v3606_v31 }
 0x51e   : > { %v3766_v24 = vsub.f32 0.0, %v3626_v63 }
 0x51f   : > { %v3798_v34 = vadd.f32 %v3764_v48, %v2077_v5  ;;  %v3796_v21 = vadd.f32 %v3762_v28, %v2075_v49 }
 0x520   : > { %v3800_v32 = vadd.f32 %v3766_v24, %v2079_v8 }
 0x521   : > { %v3830_v1 = vsel %vm3795_vm1, %v2077_v5, %v3798_v34  ;;  %v3828_v16 = vsel %vm3795_vm1, %v2075_v49, %v3796_v21  ;;  %v8221_v5 = vld [vmem:[#allocation37_spill] sm:$0xff] }
 0x522   : > { %v3862_v9 = vsel %vm3794_vm3, %v3764_v48, %v3830_v1  ;;  %v3832_v58 = vsel %vm3795_vm1, %v2079_v8, %v3800_v32  ;;  %v3860_v2 = vsel %vm3794_vm3, %v3762_v28, %v3828_v16  ;;  %v8222_v28 = vld [vmem:[#allocation31_spill] sm:$0xff]  ;;  %v2081_v1 = vmul.f32 -0.5, %v7463_v3 }
 0x523   : > { %v3894_v40 = vsel %vm2205_vm2, %v8218_v46, %v3862_v9  ;;  %v3864_v55 = vsel %vm3794_vm3, %v3766_v24, %v3832_v58  ;;  %v3892_v25 = vsel %vm2205_vm2, %v8219_v52, %v3860_v2  ;;  %v8223_v24 = vld [vmem:[#allocation43_spill] sm:$0xff]  ;;  %v2083_v16 = vmul.f32 -0.5, %v7482_v20 }
 0x524   : > { %3926 = vst [vmem:[%s7551_s3 + $0x10] sm:$0xff] %v3894_v40  ;;  %v3896_v37 = vsel %vm2205_vm2, %v8220_v47, %v3864_v55  ;;  %v3631_v33 = vpop.xlane.xlu2 %3630  ;;  %v3621_v53 = vpop.xlane.xlu0 %3620  ;;  %v2085_v46 = vmul.f32 -0.5, %v7480_v15 }
 0x525   : > { %3928 = vst [vmem:[%s7551_s3 + $0x20] sm:$0xff] %v3896_v37  ;;  %v3767_v14 = vsub.f32 0.0, %v3631_v33  ;;  %v3641_v10 = vpop.xlane.xlu1 %3640  ;;  %v3765_v27 = vsub.f32 0.0, %v3621_v53  ;;  %v8224_v33 = vld [vmem:[#allocation46_spill] sm:$0xff] }
 0x526   : > { %3924 = vst [vmem:[%s7551_s3] sm:$0xff] %v3892_v25  ;;  %v3769_v0 = vsub.f32 0.0, %v3641_v10  ;;  %v8226_v10 = vld [vmem:[#allocation67_spill] sm:$0xff] }
 0x527   : > { %v3801_v45 = vadd.f32 %v3767_v14, %v2080_v62  ;;  %v3799_v22 = vadd.f32 %v3765_v27, %v2078_v60 }
 0x528   : > { %v3803_v26 = vadd.f32 %v3769_v0, %v2082_v18 }
 0x529   : > { %v3833_v31 = vsel %vm3795_vm1, %v2080_v62, %v3801_v45  ;;  %v3831_v44 = vsel %vm3795_vm1, %v2078_v60, %v3799_v22  ;;  %v8225_v62 = vld [vmem:[#allocation40_spill] sm:$0xff]  ;;  %v2088_v45 = vmul.f32 -0.5, %v7488_v11  ;;  %v2086_v22 = vmul.f32 -0.5, %v7490_v30 }
 0x52a   : > { %v3865_v51 = vsel %vm3794_vm3, %v3767_v14, %v3833_v31  ;;  %v3835_v49 = vsel %vm3795_vm1, %v2082_v18, %v3803_v26  ;;  %v3863_v4 = vsel %vm3794_vm3, %v3765_v27, %v3831_v44 }
 0x52b   : > { %v3897_v48 = vsel %vm2205_vm2, %v8221_v5, %v3865_v51  ;;  %v3867_v63 = vsel %vm3794_vm3, %v3769_v0, %v3835_v49  ;;  %v3895_v8 = vsel %vm2205_vm2, %v8222_v28, %v3863_v4  ;;  %v2084_v51 = vmul.f32 -0.5, %v7475_v50 }
 0x52c   : > { %3929 = vst [vmem:[%s7551_s3 + $0x28] sm:$0xff] %v3897_v48  ;;  %v3899_v34 = vsel %vm2205_vm2, %v8223_v24, %v3867_v63  ;;  %v3646_v21 = vpop.xlane.xlu2 %3645  ;;  %v3636_v32 = vpop.xlane.xlu0 %3635 }
 0x52d   : > { %3931 = vst [vmem:[%s7551_s3 + $0x38] sm:$0xff] %v3899_v34  ;;  %v3770_v9 = vsub.f32 0.0, %v3646_v21  ;;  %v3656_v58 = vpop.xlane.xlu1 %3655  ;;  %v3768_v2 = vsub.f32 0.0, %v3636_v32  ;;  %v8228_v34 = vld [vmem:[#allocation76_spill] sm:$0xff] }
 0x52e   : > { %3927 = vst [vmem:[%s7551_s3 + $0x18] sm:$0xff] %v3895_v8  ;;  %v3772_v40 = vsub.f32 0.0, %v3656_v58  ;;  %v8227_v8 = vld [vmem:[#allocation70_spill] sm:$0xff] }
 0x52f   : > { %v3804_v55 = vadd.f32 %v3770_v9, %v2083_v16  ;;  %v3802_v52 = vadd.f32 %v3768_v2, %v2081_v1 }
 0x530   : > { %v3806_v25 = vadd.f32 %v3772_v40, %v2085_v46 }
 0x531   : > { %v3836_v47 = vsel %vm3795_vm1, %v2083_v16, %v3804_v55  ;;  %v3834_v3 = vsel %vm3795_vm1, %v2081_v1, %v3802_v52  ;;  %v8229_v1 = vld [vmem:[#allocation64_spill] sm:$0xff] }
 0x532   : > { %v3868_v20 = vsel %vm3794_vm3, %v3770_v9, %v3836_v47  ;;  %v3838_v37 = vsel %vm3795_vm1, %v2085_v46, %v3806_v25  ;;  %v3866_v15 = vsel %vm3794_vm3, %v3768_v2, %v3834_v3  ;;  %v2091_v2 = vmul.f32 -0.5, %v7496_v13 }
 0x533   : > { %v3900_v53 = vsel %vm2205_vm2, %v8224_v33, %v3868_v20  ;;  %v3870_v60 = vsel %vm3794_vm3, %v3772_v40, %v3838_v37  ;;  %v3898_v14 = vsel %vm2205_vm2, %v8225_v62, %v3866_v15  ;;  %v2089_v46 = vmul.f32 -0.5, %v7498_v41 }
 0x534   : > { %3932 = vst [vmem:[%s7551_s3 + $0x40] sm:$0xff] %v3900_v53  ;;  %v3902_v27 = vsel %vm2205_vm2, %v8226_v10, %v3870_v60  ;;  %v3661_v18 = vpop.xlane.xlu2 %3660  ;;  %v2087_v47 = vmul.f32 -0.5, %v7484_v54 }
 0x535   : > { %3934 = vst [vmem:[%s7551_s3 + $0x50] sm:$0xff] %v3902_v27  ;;  %v3671_v0 = vpop.xlane.xlu1 %3670  ;;  %v3773_v26 = vsub.f32 0.0, %v3661_v18  ;;  %v3651_v44 = vpop.xlane.xlu0 %3650  ;;  %v8230_v18 = vld [vmem:[#allocation79_spill] sm:$0xff] }
 0x536   : > { %3930 = vst [vmem:[%s7551_s3 + $0x30] sm:$0xff] %v3898_v14  ;;  %v3775_v31 = vsub.f32 0.0, %v3671_v0  ;;  %v3771_v49 = vsub.f32 0.0, %v3651_v44  ;;  %v8232_v44 = vld [vmem:[#allocation73_spill] sm:$0xff] }
 0x537   : > { %v3807_v4 = vadd.f32 %v3773_v26, %v2086_v22 }
 0x538   : > { %v3809_v5 = vadd.f32 %v3775_v31, %v2088_v45  ;;  %v3805_v48 = vadd.f32 %v3771_v49, %v2084_v51 }
 0x539   : > { %v3839_v63 = vsel %vm3795_vm1, %v2086_v22, %v3807_v4  ;;  %v2094_v4 = vmul.f32 -0.5, %v7504_v59 }
 0x53a   : > { %v3841_v11 = vsel %vm3795_vm1, %v2088_v45, %v3809_v5  ;;  %v3871_v30 = vsel %vm3794_vm3, %v3773_v26, %v3839_v63  ;;  %v3837_v50 = vsel %vm3795_vm1, %v2084_v51, %v3805_v48  ;;  %v8231_v45 = vld [vmem:[#allocation85_spill] sm:$0xff]  ;;  %v7688_v5 = vld [vmem:[%s5826_s26 + $0x1c8] sm:$0xff] }
 0x53b   : > { %v3873_v28 = vsel %vm3794_vm3, %v3775_v31, %v3841_v11  ;;  %v3903_v24 = vsel %vm2205_vm2, %v8227_v8, %v3871_v30  ;;  %v3869_v32 = vsel %vm3794_vm3, %v3771_v49, %v3837_v50  ;;  %v2092_v30 = vmul.f32 -0.5, %v7506_v42 }
 0x53c   : > { %v3905_v21 = vsel %vm2205_vm2, %v8228_v34, %v3873_v28  ;;  %3935 = vst [vmem:[%s7551_s3 + $0x58] sm:$0xff] %v3903_v24  ;;  %v3901_v16 = vsel %vm2205_vm2, %v8229_v1, %v3869_v32  ;;  %v3676_v9 = vpop.xlane.xlu2 %3675  ;;  %v423_v28 = vld [vmem:[%s5826_s26 + $0x1c0] sm:$0xff] }
 0x53d   : > { %v3686_v58 = vpop.xlane.xlu1 %3685  ;;  %3937 = vst [vmem:[%s7551_s3 + $0x68] sm:$0xff] %v3905_v21  ;;  %v3776_v40 = vsub.f32 0.0, %v3676_v9  ;;  %v3666_v52 = vpop.xlane.xlu0 %3665  ;;  %v2090_v21 = vmul.f32 -0.5, %v7492_v6  ;;  %v3460_v9 = vunpack.c.l.bf16 %v7688_v5  ;;  %v3458_v42 = vunpack.c.l.bf16 %v423_v28 }
 0x53e   : > { %v3778_v55 = vsub.f32 0.0, %v3686_v58  ;;  %v2991_v25 = vpop.f32.mrf.mxu0  ;;  %3933 = vst [vmem:[%s7551_s3 + $0x48] sm:$0xff] %v3901_v16  ;;  %v3774_v3 = vsub.f32 0.0, %v3666_v52  ;;  %v3080_v37 = vpop.f32.mrf.mxu1  ;;  %v2093_v16 = vmul.f32 -0.5, %v7500_v12 }
 0x53f   : > { %v2992_v20 = vadd.f32 1e-30, %v2991_v25  ;;  %v3810_v15 = vadd.f32 %v3776_v40, %v2089_v46  ;;  %v3081_v60 = vadd.f32 1e-30, %v3080_v37 }
 0x540   : > { %v3812_v33 = vadd.f32 %v3778_v55, %v2091_v2  ;;  %v3808_v53 = vadd.f32 %v3774_v3, %v2087_v47 }
 0x541   : > { %5367 = vlog2.f32 %v2992_v20  ;;  %v3842_v13 = vsel %vm3795_vm1, %v2089_v46, %v3810_v15 }
 0x542   : > { %v3844_v41 = vsel %vm3795_vm1, %v2091_v2, %v3812_v33  ;;  %v3874_v54 = vsel %vm3794_vm3, %v3776_v40, %v3842_v13  ;;  %v3840_v14 = vsel %vm3795_vm1, %v2087_v47, %v3808_v53  ;;  %v2813_v10 = vpop.f32.mrf.mxu2  ;;  %v2902_v27 = vpop.f32.mrf.mxu3  ;;  %5369 = vlog2.f32 %v3081_v60 }
 0x543   : > { %v3876_v62 = vsel %vm3794_vm3, %v3778_v55, %v3844_v41  ;;  %v3906_v0 = vsel %vm2205_vm2, %v8230_v18, %v3874_v54  ;;  %v3872_v26 = vsel %vm3794_vm3, %v3774_v3, %v3840_v14  ;;  %v2814_v31 = vadd.f32 1e-30, %v2813_v10  ;;  %v8233_v41 = vld [vmem:[#allocation89_spill] sm:$0xff]  ;;  %v8235_v18 = vld [vmem:[#allocation82_spill] sm:$0xff] }
 0x544   : > { %v3908_v22 = vsel %vm2205_vm2, %v8231_v45, %v3876_v62  ;;  %3938 = vst [vmem:[%s7551_s3 + $0x70] sm:$0xff] %v3906_v0  ;;  %v3904_v51 = vsel %vm2205_vm2, %v8232_v44, %v3872_v26  ;;  %v2903_v49 = vadd.f32 1e-30, %v2902_v27  ;;  %v3459_v40 = vunpack.c.h.bf16 %v423_v28  ;;  %v8234_v62 = vld [vmem:[#allocation99_spill] sm:$0xff]  ;;  %v7719_v45 = vld [vmem:[%s5826_s26 + $0x1d8] sm:$0xff]  ;;  %v425_v44 = vld [vmem:[%s5826_s26 + $0x1d0] sm:$0xff] }
 0x545   : > { %3940 = vst [vmem:[%s7551_s3 + $0x80] sm:$0xff] %v3908_v22  ;;  %5371 = vlog2.f32 %v2814_v31  ;;  %v3691_v48 = vpop.xlane.xlu2 %3690  ;;  %v3701_v63 = vpop.xlane.xlu1 %3700 }
 0x546   : > { %3936 = vst [vmem:[%s7551_s3 + $0x60] sm:$0xff] %v3904_v51  ;;  %5373 = vlog2.f32 %v2903_v49  ;;  %v3779_v50 = vsub.f32 0.0, %v3691_v48  ;;  %v3781_v8 = vsub.f32 0.0, %v3701_v63  ;;  %v3681_v24 = vpop.xlane.xlu0 %3680  ;;  %v2993_v34 = vpop.f32.mrf.mxu0 }
 0x547   : > { %v5368_v11 = vpop.eup %5367  ;;  %v3777_v32 = vsub.f32 0.0, %v3681_v24  ;;  %v2994_v59 = vadd.f32 1e-30, %v2993_v34  ;;  %v3082_v1 = vpop.f32.mrf.mxu1  ;;  %v3464_v24 = vunpack.c.l.bf16 %v7719_v45 }
 0x548   : > { %v3813_v58 = vadd.f32 %v3779_v50, %v2092_v30  ;;  %v3815_v2 = vadd.f32 %v3781_v8, %v2094_v4  ;;  %v3319_v46 = vmul.f32 0.6931472, %v5368_v11  ;;  %v5370_v52 = vpop.eup %5369  ;;  %v3083_v47 = vadd.f32 1e-30, %v3082_v1 }
 0x549   : > { %v3811_v55 = vadd.f32 %v3777_v32, %v2090_v21  ;;  %5375 = vlog2.f32 %v2994_v59  ;;  %v3321_v26 = vmul.f32 0.6931472, %v5370_v52  ;;  %v3462_v59 = vunpack.c.l.bf16 %v425_v44 }
 0x54a   : > { %v3845_v25 = vsel %vm3795_vm1, %v2092_v30, %v3813_v58  ;;  %v3847_v6 = vsel %vm3795_vm1, %v2094_v4, %v3815_v2  ;;  %v2815_v12 = vpop.f32.mrf.mxu2  ;;  %v2904_v3 = vpop.f32.mrf.mxu3  ;;  %v3461_v4 = vunpack.c.h.bf16 %v7688_v5  ;;  %v3463_v2 = vunpack.c.h.bf16 %v425_v44 }
 0x54b   : > { %v5372_v20 = vpop.eup %5371  ;;  %v3877_v37 = vsel %vm3794_vm3, %v3779_v50, %v3845_v25  ;;  %v3879_v15 = vsel %vm3794_vm3, %v3781_v8, %v3847_v6  ;;  %v3843_v33 = vsel %vm3795_vm1, %v2090_v21, %v3811_v55  ;;  %v2816_v53 = vadd.f32 1e-30, %v2815_v12 }
 0x54c   : > { %v5374_v60 = vpop.eup %5373  ;;  %v3315_v13 = vmul.f32 0.6931472, %v5372_v20  ;;  %v3909_v54 = vsel %vm2205_vm2, %v8233_v41, %v3877_v37  ;;  %v3911_v14 = vsel %vm2205_vm2, %v8234_v62, %v3879_v15  ;;  %v3875_v10 = vsel %vm3794_vm3, %v3777_v32, %v3843_v33  ;;  %v8236_v37 = vld [vmem:[#allocation92_spill] sm:$0xff] }
 0x54d   : > { %v3317_v27 = vmul.f32 0.6931472, %v5374_v60  ;;  %3941 = vst [vmem:[%s7551_s3 + $0x88] sm:$0xff] %v3909_v54  ;;  %v3907_v0 = vsel %vm2205_vm2, %v8235_v18, %v3875_v10  ;;  %5377 = vlog2.f32 %v2816_v53  ;;  %v2905_v22 = vadd.f32 1e-30, %v2904_v3  ;;  %v8237_v41 = vld [vmem:[#allocation100_spill] sm:$0xff] }
 0x54e   : > { %v3586_v31 = vmul.f32 %v3458_v42, %v3315_v13  ;;  %3943 = vst [vmem:[%s7551_s3 + $0x98] sm:$0xff] %v3911_v14  ;;  %5379 = vlog2.f32 %v3083_v47  ;;  %v3696_v51 = vpop.xlane.xlu0 %3695  ;;  %v2996_v49 = vpop.f32.mrf.mxu0  ;;  %v2095_v8 = vmul.f32 -0.5, %v7514_v29  ;;  %v3588_v32 = vmul.f32 %v3460_v9, %v3319_v46  ;;  %v428_v10 = vld [vmem:[%s5826_s26 + $0x1e8] sm:$0xff] }
 0x54f   : > { %v3587_v48 = vmul.f32 %v3459_v40, %v3317_v27  ;;  %3939 = vst [vmem:[%s7551_s3 + $0x78] sm:$0xff] %v3907_v0  ;;  %5381 = vlog2.f32 %v2905_v22  ;;  %v3706_v63 = vpop.xlane.xlu2 %3705  ;;  %v3780_v11 = vsub.f32 0.0, %v3696_v51  ;;  %v2997_v30 = vadd.f32 1e-30, %v2996_v49  ;;  %v3085_v28 = vpop.f32.mrf.mxu1  ;;  %v427_v51 = vld [vmem:[%s5826_s26 + $0x1e0] sm:$0xff] }
 0x550   : > { %v5376_v50 = vpop.eup %5375  ;;  %v3782_v34 = vsub.f32 0.0, %v3706_v63  ;;  %v3086_v21 = vadd.f32 1e-30, %v3085_v28  ;;  %v3589_v42 = vmul.f32 %v3461_v4, %v3321_v26  ;;  %v3465_v22 = vunpack.c.h.bf16 %v7719_v45 }
 0x551   : > { %v3814_v1 = vadd.f32 %v3780_v11, %v2093_v16  ;;  %v3742_v58 = vadd.f32 %v3587_v48, %v3586_v31  ;;  %5383 = vlog2.f32 %v2997_v30  ;;  %v3327_v55 = vmul.f32 0.6931472, %v5376_v50 }
 0x552   : > { %v3816_v5 = vadd.f32 %v3782_v34, %v2095_v8  ;;  %5385 = vlog2.f32 %v3086_v21  ;;  %v2096_v31 = vmul.f32 -0.5, %v7508_v57  ;;  %v3466_v50 = vunpack.c.l.bf16 %v427_v51 }
 0x553   : > { %v5378_v40 = vpop.eup %5377  ;;  %v3846_v52 = vsel %vm3795_vm1, %v2093_v16, %v3814_v1  ;;  %v2818_v25 = vpop.f32.mrf.mxu2  ;;  %v3743_v6 = vadd.f32 %v3742_v58, %v3588_v32  ;;  %v3592_v63 = vmul.f32 %v3464_v24, %v3327_v55  ;;  %v8238_v55 = vld [vmem:[#allocation101_spill] sm:$0xff] }
 0x554   : > { %v2907_v29 = vpop.f32.mrf.mxu3  ;;  %v5380_v47 = vpop.eup %5379  ;;  %v3323_v12 = vmul.f32 0.6931472, %v5378_v40  ;;  %v3848_v9 = vsel %vm3795_vm1, %v2095_v8, %v3816_v5  ;;  %v3878_v46 = vsel %vm3794_vm3, %v3780_v11, %v3846_v52  ;;  %v2819_v3 = vadd.f32 1e-30, %v2818_v25 }
 0x555   : > { %v5382_v20 = vpop.eup %5381  ;;  %v3880_v16 = vsel %vm3794_vm3, %v3782_v34, %v3848_v9  ;;  %v3910_v15 = vsel %vm2205_vm2, %v8236_v37, %v3878_v46  ;;  %v2908_v33 = vadd.f32 1e-30, %v2907_v29  ;;  %v3744_v53 = vadd.f32 %v3743_v6, %v3589_v42  ;;  %v429_v46 = vld [vmem:[%s5826_s26 + $0x1f0] sm:$0xff] }
 0x556   : > { %v3590_v60 = vmul.f32 %v3462_v59, %v3323_v12  ;;  %v3325_v13 = vmul.f32 0.6931472, %v5382_v20  ;;  %v3912_v54 = vsel %vm2205_vm2, %v8237_v41, %v3880_v16  ;;  %3942 = vst [vmem:[%s7551_s3 + $0x90] sm:$0xff] %v3910_v15  ;;  %5387 = vlog2.f32 %v2819_v3  ;;  %v2998_v62 = vpop.f32.mrf.mxu0  ;;  %v3711_v27 = vpop.xlane.xlu0 %3710  ;;  %v430_v15 = vld [vmem:[%s5826_s26 + $0x1f8] sm:$0xff] }
 0x557   : > { %v3329_v14 = vmul.f32 0.6931472, %v5380_v47  ;;  %3944 = vst [vmem:[%s7551_s3 + $0xa0] sm:$0xff] %v3912_v54  ;;  %5389 = vlog2.f32 %v2908_v33  ;;  %v2999_v18 = vadd.f32 1e-30, %v2998_v62  ;;  %v3087_v0 = vpop.f32.mrf.mxu1  ;;  %3745 = vadd.xlane.f32.xlu1 %v3744_v53  ;;  %v5384_v26 = vpop.eup %5383  ;;  %v3783_v49 = vsub.f32 0.0, %v3711_v27 }
 0x558   : > { %v3591_v44 = vmul.f32 %v3463_v2, %v3325_v13  ;;  %v5386_v4 = vpop.eup %5385  ;;  %v3088_v48 = vadd.f32 1e-30, %v3087_v0  ;;  %v3468_v11 = vunpack.c.l.bf16 %v428_v10  ;;  %v3467_v8 = vunpack.c.h.bf16 %v427_v51 }
 0x559   : > { %v3817_v30 = vadd.f32 %v3783_v49, %v2096_v31  ;;  %5391 = vlog2.f32 %v2999_v18  ;;  %v3593_v32 = vmul.f32 %v3465_v22, %v3329_v14  ;;  %v3335_v24 = vmul.f32 0.6931472, %v5384_v26 }
 0x55a   : > { %v3747_v28 = vadd.f32 %v3591_v44, %v3590_v60  ;;  %5393 = vlog2.f32 %v3088_v48  ;;  %v2097_v29 = vmul.f32 -0.5, %v7512_v35  ;;  %v3337_v12 = vmul.f32 0.6931472, %v5386_v4 }
 0x55b   : > { %v2820_v34 = vpop.f32.mrf.mxu2  ;;  %v3849_v57 = vsel %vm3795_vm1, %v2096_v31, %v3817_v30  ;;  %v3469_v20 = vunpack.c.h.bf16 %v428_v10  ;;  %v3596_v37 = vmul.f32 %v3468_v11, %v3335_v24  ;;  %v3470_v13 = vunpack.c.l.bf16 %v429_v46  ;;  %v8239_v31 = vld [vmem:[#allocation102_spill] sm:$0xff] }
 0x55c   : > { %v2909_v21 = vpop.f32.mrf.mxu3  ;;  %v5388_v59 = vpop.eup %5387  ;;  %v2821_v45 = vadd.f32 1e-30, %v2820_v34  ;;  %v3748_v58 = vadd.f32 %v3747_v28, %v3592_v63  ;;  %v3881_v42 = vsel %vm3794_vm3, %v3783_v49, %v3849_v57  ;;  %v3471_v35 = vunpack.c.h.bf16 %v429_v46  ;;  %v8240_v57 = vld [vmem:[#allocation103_spill] sm:$0xff] }
 0x55d   : > { %v2910_v1 = vadd.f32 1e-30, %v2909_v21  ;;  %v5390_v2 = vpop.eup %5389  ;;  %v3331_v5 = vmul.f32 0.6931472, %v5388_v59  ;;  %v3913_v52 = vsel %vm2205_vm2, %v8238_v55, %v3881_v42  ;;  %v3716_v47 = vpop.xlane.xlu1 %3715  ;;  %v3597_v62 = vmul.f32 %v3469_v20, %v3337_v12  ;;  %v8241_v55 = vld [vmem:[#allocation104_spill] sm:$0xff] }
 0x55e   : > { %v3333_v40 = vmul.f32 0.6931472, %v5390_v2  ;;  %5395 = vlog2.f32 %v2821_v45  ;;  %v3749_v25 = vadd.f32 %v3748_v58, %v3593_v32  ;;  %3945 = vst [vmem:[%s7551_s3 + $0xa8] sm:$0xff] %v3913_v52  ;;  %v3784_v3 = vsub.f32 0.0, %v3716_v47 }
 0x55f   : > { %v3594_v6 = vmul.f32 %v3466_v50, %v3331_v5  ;;  %5397 = vlog2.f32 %v2910_v1  ;;  %v5392_v16 = vpop.eup %5391  ;;  %v3472_v18 = vunpack.c.l.bf16 %v430_v15  ;;  %v2098_v49 = vmul.f32 -0.5, %v7522_v7 }
 0x560   : > { %v3595_v9 = vmul.f32 %v3467_v8, %v3333_v40  ;;  %3750 = vadd.xlane.f32.xlu2 %v3749_v25  ;;  %v3818_v33 = vadd.f32 %v3784_v3, %v2097_v29  ;;  %v5394_v60 = vpop.eup %5393  ;;  %v3343_v22 = vmul.f32 0.6931472, %v5392_v16  ;;  %v3473_v28 = vunpack.c.h.bf16 %v430_v15 }
 0x561   : > { %v3345_v63 = vmul.f32 0.6931472, %v5394_v60  ;;  %v2099_v2 = vmul.f32 -0.5, %v7516_v19  ;;  %v2101_v20 = vmul.f32 -0.5, %v7529_v23 }
 0x562   : > { %v3752_v53 = vadd.f32 %v3595_v9, %v3594_v6  ;;  %v3850_v54 = vsel %vm3795_vm1, %v2097_v29, %v3818_v33  ;;  %v3600_v50 = vmul.f32 %v3472_v18, %v3343_v22  ;;  %v2100_v29 = vmul.f32 -0.5, %v7520_v43  ;;  %v8242_v9 = vld [vmem:[#allocation105_spill] sm:$0xff]  ;;  %v8243_v33 = vld [vmem:[#allocation106_spill] sm:$0xff] }
 0x563   : > { %v3882_v10 = vsel %vm3794_vm3, %v3784_v3, %v3850_v54  ;;  %v3601_v32 = vmul.f32 %v3473_v28, %v3345_v63  ;;  %v2103_v18 = vmul.f32 -0.5, %v7527_v56  ;;  %v8246_v63 = vld [vmem:[#allocation96_spill] sm:$0xff]  ;;  %v2105_v28 = vmul.f32 -0.5, %v7531_v17 }
 0x564   : > { %v5396_v41 = vpop.eup %5395  ;;  %v3753_v14 = vadd.f32 %v3752_v53, %v3596_v37  ;;  %v3914_v44 = vsel %vm2205_vm2, %v8239_v31, %v3882_v10 }
 0x565   : > { %v5398_v27 = vpop.eup %5397  ;;  %v3339_v0 = vmul.f32 0.6931472, %v5396_v41  ;;  %3946 = vst [vmem:[%s7551_s3 + $0xb0] sm:$0xff] %v3914_v44  ;;  %v3721_v48 = vpop.xlane.xlu2 %3720 }
 0x566   : > { %v3341_v26 = vmul.f32 0.6931472, %v5398_v27  ;;  %v3754_v51 = vadd.f32 %v3753_v14, %v3597_v62  ;;  %v3785_v30 = vsub.f32 0.0, %v3721_v48  ;;  %v8244_v62 = vld [vmem:[#allocation107_spill] sm:$0xff] }
 0x567   : > { %v3598_v4 = vmul.f32 %v3470_v13, %v3339_v0  ;;  %v2102_v13 = vmul.f32 -0.5, %v7524_v39 }
 0x568   : > { %v3599_v11 = vmul.f32 %v3471_v35, %v3341_v26  ;;  %3755 = vadd.xlane.f32.xlu0 %v3754_v51  ;;  %v3819_v8 = vadd.f32 %v3785_v30, %v2098_v49  ;;  %v8245_v26 = vld [vmem:[#allocation108_spill] sm:$0xff]  ;;  %v2104_v51 = vmul.f32 -0.5, %v7535_v61 }
 0x56a   : > { %v3757_v34 = vadd.f32 %v3599_v11, %v3598_v4  ;;  %v3851_v21 = vsel %vm3795_vm1, %v2098_v49, %v3819_v8 }
 0x56b   : > { %v3883_v7 = vsel %vm3794_vm3, %v3785_v30, %v3851_v21  ;;  %v8247_v21 = vld [vmem:[#allocation109_spill] sm:$0xff] }
 0x56c   : > { %v3758_v59 = vadd.f32 %v3757_v34, %v3600_v50  ;;  %v3915_v45 = vsel %vm2205_vm2, %v8240_v57, %v3883_v7 }
 0x56d   : > { %3947 = vst [vmem:[%s7551_s3 + $0xb8] sm:$0xff] %v3915_v45  ;;  %v3726_v58 = vpop.xlane.xlu0 %3725 }
 0x56e   : > { %v3759_v1 = vadd.f32 %v3758_v59, %v3601_v32  ;;  %v3786_v24 = vsub.f32 0.0, %v3726_v58  ;;  %v2106_v59 = vmul.f32 -0.5, %v7533_v36  ;;  %v8248_v58 = vld [vmem:[#allocation111_spill] sm:$0xff] }
 0x570   : > { %3760 = vadd.xlane.f32.xlu1 %v3759_v1  ;;  %v3820_v5 = vadd.f32 %v3786_v24, %v2099_v2 }
 0x572   : > { %v3852_v42 = vsel %vm3795_vm1, %v2099_v2, %v3820_v5 }
 0x573   : > { %v3884_v40 = vsel %vm3794_vm3, %v3786_v24, %v3852_v42 }
 0x574   : > { %v3916_v52 = vsel %vm2205_vm2, %v8241_v55, %v3884_v40 }
 0x575   : > { %v3731_v25 = vpop.xlane.xlu1 %3730  ;;  %3948 = vst [vmem:[%s7551_s3 + $0xc0] sm:$0xff] %v3916_v52 }
 0x576   : > { %v3787_v19 = vsub.f32 0.0, %v3731_v25 }
 0x578   : > { %v3821_v6 = vadd.f32 %v3787_v19, %v2100_v29 }
 0x57a   : > { %v3853_v47 = vsel %vm3795_vm1, %v2100_v29, %v3821_v6 }
 0x57b   : > { %v3885_v12 = vsel %vm3794_vm3, %v3787_v19, %v3853_v47 }
 0x57c   : > { %v3917_v46 = vsel %vm2205_vm2, %v8242_v9, %v3885_v12 }
 0x57d   : > { %v3736_v3 = vpop.xlane.xlu2 %3735  ;;  %3949 = vst [vmem:[%s7551_s3 + $0xc8] sm:$0xff] %v3917_v46 }
 0x57e   : > { %v3788_v16 = vsub.f32 0.0, %v3736_v3 }
 0x580   : > { %v3822_v43 = vadd.f32 %v3788_v16, %v2101_v20 }
 0x582   : > { %v3854_v37 = vsel %vm3795_vm1, %v2101_v20, %v3822_v43 }
 0x583   : > { %v3886_v15 = vsel %vm3794_vm3, %v3788_v16, %v3854_v37 }
 0x584   : > { %v3918_v53 = vsel %vm2205_vm2, %v8243_v33, %v3886_v15 }
 0x585   : > { %3950 = vst [vmem:[%s7551_s3 + $0xd0] sm:$0xff] %v3918_v53  ;;  %v3741_v60 = vpop.xlane.xlu0 %3740 }
 0x586   : > { %v3789_v41 = vsub.f32 0.0, %v3741_v60 }
 0x588   : > { %v3823_v23 = vadd.f32 %v3789_v41, %v2102_v13 }
 0x58a   : > { %v3855_v35 = vsel %vm3795_vm1, %v2102_v13, %v3823_v23 }
 0x58b   : > { %v3887_v54 = vsel %vm3794_vm3, %v3789_v41, %v3855_v35 }
 0x58c   : > { %v3919_v14 = vsel %vm2205_vm2, %v8244_v62, %v3887_v54 }
 0x58d   : > { %3951 = vst [vmem:[%s7551_s3 + $0xd8] sm:$0xff] %v3919_v14 }
 0x5ca   : > { %v3746_v27 = vpop.xlane.xlu1 %3745 }
 0x5cb   : > { %v3790_v0 = vsub.f32 0.0, %v3746_v27 }
 0x5cd   : > { %v3824_v10 = vadd.f32 %v3790_v0, %v2103_v18 }
 0x5cf   : > { %v3856_v39 = vsel %vm3795_vm1, %v2103_v18, %v3824_v10 }
 0x5d0   : > { %v3888_v22 = vsel %vm3794_vm3, %v3790_v0, %v3856_v39 }
 0x5d1   : > { %v3920_v31 = vsel %vm2205_vm2, %v8245_v26, %v3888_v22 }
 0x5d2   : > { %3952 = vst [vmem:[%s7551_s3 + $0xe0] sm:$0xff] %v3920_v31 }
 0x5d3   : > { %v3751_v44 = vpop.xlane.xlu2 %3750 }
 0x5d4   : > { %v3791_v49 = vsub.f32 0.0, %v3751_v44 }
 0x5d6   : > { %v3825_v56 = vadd.f32 %v3791_v49, %v2104_v51 }
 0x5d8   : > { %v3857_v4 = vsel %vm3795_vm1, %v2104_v51, %v3825_v56 }
 0x5d9   : > { %v3889_v48 = vsel %vm3794_vm3, %v3791_v49, %v3857_v4 }
 0x5da   : > { %v3921_v11 = vsel %vm2205_vm2, %v8246_v63, %v3889_v48 }
 0x5db   : > { %3953 = vst [vmem:[%s7551_s3 + $0xe8] sm:$0xff] %v3921_v11  ;;  %v3756_v30 = vpop.xlane.xlu0 %3755 }
 0x5dc   : > { %v3792_v50 = vsub.f32 0.0, %v3756_v30 }
 0x5de   : > { %v3826_v61 = vadd.f32 %v3792_v50, %v2105_v28 }
 0x5e0   : > { %v3858_v8 = vsel %vm3795_vm1, %v2105_v28, %v3826_v61 }
 0x5e1   : > { %v3890_v34 = vsel %vm3794_vm3, %v3792_v50, %v3858_v8 }
 0x5e2   : > { %v3922_v32 = vsel %vm2205_vm2, %v8247_v21, %v3890_v34 }
 0x5e3   : > { %3954 = vst [vmem:[%s7551_s3 + $0xf0] sm:$0xff] %v3922_v32  ;;  %v3761_v17 = vpop.xlane.xlu1 %3760 }
 0x5e4   : > { %v3793_v7 = vsub.f32 0.0, %v3761_v17 }
 0x5e6   : > { %v3827_v57 = vadd.f32 %v3793_v7, %v2106_v59 }
 0x5e8   : > { %v3859_v45 = vsel %vm3795_vm1, %v2106_v59, %v3827_v57 }
 0x5e9   : > { %v3891_v1 = vsel %vm3794_vm3, %v3793_v7, %v3859_v45 }
 0x5ea   : > { %v3923_v2 = vsel %vm2205_vm2, %v8248_v58, %v3891_v1 }
 0x5eb   : > { %3955 = vst [vmem:[%s7551_s3 + $0xf8] sm:$0xff] %v3923_v2 }
 0x5ec   : > { %5576 = shalt.err (!%p5573_p9)
}
 0x5ed   : > { %s5638_s20 = smov 128   ;;  %s5639_s19 = smov 8  }
 0x5ee   : > { %4877 = dma.vmem_to_hbm [thread:$0]  (%p5764_p7), %s3970_s25, 4096, %s3972_s10, %s3957_s16, %s5638_s20, %s5638_s20, %s5639_s19  }
 0x5ef PF: > { %s3986_s18 = sand.u32 1, %s5615_s21   ;;  %p8249_p12 = scmp.ge.s32.totalorder %s5627_s24, 2 }
 0x5f0   : > { %s3987_s30 = scalar_lea.sflag [#allocation4], %s3986_s18 }
 0x5f1   : > { %p4897_p13 = pnand %p8249_p12, %p5710_p6 }
 0x5f3   : > { %p4898_p0 = pneg %p4897_p13 }
 0x5f5   : > { %5610 = dma.done.wait (%p4898_p0), %s3987_s30, 4096  }
 0x5f6   : > { %5612 = vsyncadd (%p4898_p0), %s3987_s30, 4294963200  ;;  %s8250_s27 = sld [smem:[#allocation17_spill]]  ;;  %p23_p3 = scmp.ge.s32.totalorder %s5750_s13, 4  }
 0x5f7   : > { %s8251_s23 = sld [smem:[#allocation18_spill]]  ;;  %s8252_s21 = smov %s5619_s22 }
 0x5f8   : > { %s8254_s24 = smov %s5750_s13  ;;  %25 = sbr.rel (!%p23_p3) target bundleno = 12 (0xc), region = 114 }
 0x5fc   : > { %s8253_s22 = smov %s8250_s27 }
 0x5fd   :  { %3993 = vsyncpa [#allocation3], 1 }
 0x5fe   :  { %3995 = vsyncpa [#allocation3 + $0x1], 1 }
 0x5ff   :  { %3996 = vsyncpa [#allocation6], 1 }
 0x600   :  { %3998 = vsyncpa [#allocation6 + $0x1], 1 }
 0x601   :  { %3999 = vsyncpa [#allocation9], 1 }
 0x602   :  { %4000 = vsyncpa [#allocation4], 1 }
 0x603   :  { %4002 = vsyncpa [#allocation4 + $0x1], 1 }

// kernel: tpu_custom_call.1
= control target key start
LH: loop header
LB: loop body
LE: loop exit
PB: predicated region body
PF: predicated region fallthrough
CT: control target
= control target key end

     0   :  { %s7881_s0 = inlined_call_operand.hbm [shape: bf16[512,512], index: 0, kind: input, shape index: {}]   ;;  %s7882_s1 = inlined_call_operand.hbm [shape: f32[512,128], index: 1, kind: input, shape index: {}]   ;;  %s7883_s2 = inlined_call_operand.hbm [shape: bf16[512,128], index: 2, kind: input, shape index: {}]   ;;  %s7884_s3 = inlined_call_operand.hbm [shape: bf16[128,256], index: 3, kind: input, shape index: {}]   ;;  %s7885_s4 = inlined_call_operand.vmem [shape: f32[1,256], index: 4, kind: input, shape index: {}]   ;;  %s7886_s5 = inlined_call_operand.hbm [shape: bf16[128,512], index: 5, kind: input, shape index: {}]   ;;  %s7887_s6 = inlined_call_operand.hbm [shape: f32[512,128], index: 6, kind: output, shape index: {}]  }
   0x1   :  { %7991 = sst [smem:[#allocation118_spill]] %s7883_s2 }
   0x2   :  { %7992 = sst [smem:[#allocation119_spill]] %s7884_s3 }
   0x3   :  { %7993 = sst [smem:[#allocation120_spill]] %s7886_s5 }
   0x4   :  { %11 = vsyncpa [#allocation3], 0 }
   0x5   :  { %13 = vsyncpa [#allocation3 + $0x1], 0 }
   0x6   :  { %14 = vsyncpa [#allocation6], 0 }
   0x7   :  { %16 = vsyncpa [#allocation6 + $0x1], 0 }
   0x8   :  { %17 = vsyncpa [#allocation9], 0 }
   0x9   :  { %18 = vsyncpa [#allocation4], 0 }
   0xa   :  { %20 = vsyncpa [#allocation4 + $0x1], 0  ;;  %s5675_s21 = smov 0   ;;  %s5677_s22 = smov 0  }
   0xb   :  { %s5679_s23 = smov 0   ;;  %s5681_s24 = smov 0  }
   0xc LB: > { %7994 = sst [smem:[#allocation17_spill]] %s5623_s23  ;;  %s5696_s25 = sadd.s32 4294967295, %s5627_s24   ;;  %s5627_s24 = sphi %s5681_s24, %s8254_s24   ;;  %s5623_s23 = sphi %s5679_s23, %s8251_s23   ;;  %s5619_s22 = sphi %s5677_s22, %s8253_s22   ;;  %s5615_s21 = sphi %s5675_s21, %s8252_s21  }
   0xd   : > { %s4096_s26 = sadd.s32 4294967294, %s5627_s24   ;;  %p46_p0 = scmp.ne.s32.totalorder %s5619_s22, %s5615_s21 }
   0xe   : > { %p47_p1 = scmp.eq.s32.totalorder %s5696_s25, 0  ;;  %p180_p2 = scmp.eq.s32.totalorder %s5696_s25, 1 }
   0xf   : > { %p186_p3 = scmp.eq.s32.totalorder %s4096_s26, 1  ;;  %p4097_p5 = scmp.ge.s32.totalorder %s5627_s24, 1 }
  0x10   : > { %p5705_p4 = por %p47_p1, %p46_p0  ;;  %p193_p7 = scmp.lt.s32.totalorder %s5627_s24, 3 }
  0x11   : > { %p5710_p6 = por %p186_p3, %p46_p0  ;;  %s7997_s2 = sld [smem:[#allocation118_spill]] }
  0x12   : > { %p5718_p8 = pnand %p4097_p5, %p193_p7  ;;  %s5629_s9 = smov [#allocation7]  }
  0x13   : > { %s206_s10 = sshll.u32 %s5629_s9, 4  ;;  %s8000_s3 = sld [smem:[#allocation119_spill]]  ;;  %s207_s10 = int_to_ptr.vmem [resolvable:$true] %s206_s10 }
  0x14   : > { %p4879_p9 = pneg %p5718_p8  ;;  %s5630_s15 = smov 64  }
  0x15   : > { %s5631_s16 = smov 4   ;;  %s5632_s17 = smov [#allocation8]  }
  0x16   : > { %p5726_p10 = pnand %p4879_p9, %p47_p1  ;;  %s220_s18 = sshll.u32 %s5632_s17, 4  ;;  %s221_s18 = int_to_ptr.vmem [resolvable:$true] %s220_s18 }
  0x17   : > { %s204_s7 = sshll.u32 %s7997_s2, 4  ;;  %s7888_s19 = smov 128   ;;  %s205_s7 = int_to_ptr.hbm [resolvable:$true] %s204_s7 }
  0x18   : > { %4882 = dma.hbm_to_vmem [thread:$0]  (!%p5726_p10), %s205_s7, 4096, %s207_s10, [#allocation6], %s5630_s15, %s5630_s15, %s5631_s16  }
  0x19   : > { %s218_s14 = sshll.u32 %s8000_s3, 4  ;;  %s7889_s20 = smov 8   ;;  %s219_s14 = int_to_ptr.hbm [resolvable:$true] %s218_s14 }
  0x1a   : > { %4885 = dma.hbm_to_vmem [thread:$0]  (!%p5726_p10), %s219_s14, 2048, %s221_s18, [#allocation9], %s7888_s19, %s7888_s19, %s7889_s20  }
  0x1b   : > { %s8001_s5 = sld [smem:[#allocation120_spill]]  ;;  %s5635_s7 = smov [#allocation10]  }
  0x1c   : > { %s237_s9 = sshll.u32 %s5635_s7, 4  ;;  %s7890_s10 = smov 256   ;;  %s238_s9 = int_to_ptr.vmem [resolvable:$true] %s237_s9 }
  0x1d   : > { %s7891_s12 = smov 16   ;;  %s5750_s13 = sadd.s32 1, %s5627_s24  }
  0x1e   : > { %s30_s14 = ssub.s32 %s5627_s24, %s5750_s13  ;;  %s33_s15 = sadd.s32 1, %s5623_s23 }
  0x1f   : > { %p31_p12 = scmp.eq.s32.totalorder %s30_s14, 0  ;;  %p40_p13 = scmp.ne.s32.totalorder %s5623_s23, %s5619_s22 }
  0x20   : > { %p41_p0 = scmp.eq.s32.totalorder %s5627_s24, 0  ;;  %p4903_p3 = scmp.lt.s32.totalorder %s5627_s24, 2 }
  0x21   : > { %s235_s30 = sshll.u32 %s8001_s5, 4  ;;  %p5764_p7 = por %p180_p2, %p40_p13  ;;  %s236_s30 = int_to_ptr.hbm [resolvable:$true] %s235_s30 }
  0x22   : > { %4888 = dma.hbm_to_vmem [thread:$0]  (!%p5726_p10), %s236_s30, 4096, %s238_s9, [#allocation9], %s7890_s10, %s7890_s10, %s7891_s12  }
  0x23   : > { %s5760_s16 = scalar_select %p31_p12, %s5623_s23, %s33_s15  }
  0x24   : > { %p42_p5 = por %p41_p0, %p40_p13  ;;  %s5769_s17 = sand.u32 1, %s5623_s23  }
  0x25   : > { %8002 = sst [smem:[#allocation18_spill]] %s5760_s16  ;;  %s4698_s18 = sshll.u32 %s5627_s24, 9 }
  0x26   : > { %s4102_s26 = sshll.u32 %s5769_s17, 9  ;;  %s261_s7 = scalar_lea.hbm %s7881_s0, %s4698_s18 }
  0x27   : > { %s262_s9 = sshll.u32 %s261_s7, 4  ;;  %s255_s14 = scalar_lea.vmem [#allocation2], %s4102_s26  ;;  %s263_s9 = int_to_ptr.hbm [resolvable:$true] %s262_s9 }
  0x28   : > { %s264_s15 = sshll.u32 %s255_s14, 4  ;;  %p5778_p2 = pnand %p4903_p3, %p42_p5  ;;  %s265_s15 = int_to_ptr.vmem [resolvable:$true] %s264_s15 }
  0x29   : > { %s274_s20 = sand.u32 1, %s5627_s24   ;;  %s4106_s10 = sshll.u32 %s5769_s17, 8 }
  0x2a   : > { %s252_s12 = scalar_lea.sflag [#allocation3], %s5769_s17  ;;  %s5489_s2 = sshra.s32 %s263_s9, 4  ;;  %s5490_s2 = int_to_ptr.hbm [resolvable:$true] %s5489_s2 }
  0x2b   : > { %s5491_s3 = scalar_lea.hbm %s5490_s2, 512  ;;  %p5493_p10 = pneg %p5778_p2 }
  0x2c   : > { %p5492_p9 = scmp.ne.s32.totalorder %s5490_s2, %s5491_s3  ;;  %s5496_s29 = scalar_lea.hbm %s7881_s0, 1024 }
  0x2d   : > { %p5497_p0 = scmp.lt.s32.totalorder %s5490_s2, %s7881_s0  ;;  %p5498_p3 = scmp.lt.s32.totalorder %s5496_s29, %s5491_s3 }
  0x2e   : > { %p5494_p12 = pnand %p5493_p10, %p5492_p9 }
  0x2f   : > { %p5499_p5 = por %p5498_p3, %p5497_p0 }
  0x30   : > { %p5495_p13 = pneg %p5494_p12 }
  0x32   : > { %p5500_p11 = pnand %p5499_p5, %p5495_p13 }
  0x34   : > { %5503 = shalt.err (!%p5500_p11)
}
  0x35   : > { %s8005_s17 = smov 16   ;;  %s8006_s14 = smov 256  }
  0x36   : > { %4892 = dma.hbm_to_vmem [thread:$0]  (!%p5778_p2), %s263_s9, 8192, %s265_s15, %s252_s12, %s8006_s14, %s8006_s14, %s8005_s17  }
  0x37   : > { %s4699_s5 = sshll.u32 %s5627_s24, 8  ;;  %s278_s16 = scalar_lea.vmem [#allocation5], %s4106_s10 }
  0x38   : > { %s286_s18 = sshll.u32 %s278_s16, 4  ;;  %s283_s30 = scalar_lea.hbm %s7882_s1, %s4699_s5  ;;  %s287_s18 = int_to_ptr.vmem [resolvable:$true] %s286_s18 }
  0x39   : > { %s284_s2 = sshll.u32 %s283_s30, 4  ;;  %s275_s3 = scalar_lea.sflag [#allocation6], %s274_s20  ;;  %s285_s2 = int_to_ptr.hbm [resolvable:$true] %s284_s2 }
  0x3a   : > { %s5519_s29 = sshra.s32 %s285_s2, 4  ;;  %s5526_s10 = scalar_lea.hbm %s7882_s1, 512  ;;  %s5520_s29 = int_to_ptr.hbm [resolvable:$true] %s5519_s29 }
  0x3b   : > { %s5521_s7 = scalar_lea.hbm %s5520_s29, 256  ;;  %p5527_p13 = scmp.lt.s32.totalorder %s5520_s29, %s7882_s1 }
  0x3c   : > { %p5522_p11 = scmp.ne.s32.totalorder %s5520_s29, %s5521_s7  ;;  %p5528_p0 = scmp.lt.s32.totalorder %s5526_s10, %s5521_s7 }
  0x3e   : > { %p5524_p9 = pnand %p5522_p11, %p5493_p10  ;;  %p5529_p3 = por %p5528_p0, %p5527_p13 }
  0x40   : > { %p5525_p12 = pneg %p5524_p9 }
  0x42   : > { %p5530_p5 = pnand %p5529_p3, %p5525_p12 }
  0x44   : > { %5533 = shalt.err (!%p5530_p5)
}
  0x45   : > { %s8007_s5 = smov 8   ;;  %s8008_s23 = smov 128  }
  0x46   : > { %4895 = dma.hbm_to_vmem [thread:$0]  (!%p5778_p2), %s285_s2, 4096, %s287_s18, %s275_s3, %s8008_s23, %s8008_s23, %s8007_s5  }
  0x47   : > { %298 = sbr.rel (%p5718_p8) target bundleno = 1519 (0x5ef), region = 44 }
  0x4c   : > { %s5822_s20 = sand.u32 1, %s5619_s22  }
  0x4d   : > { %s4110_s17 = sshll.u32 %s5822_s20, 9  ;;  %s301_s14 = scalar_lea.sflag [#allocation3], %s5822_s20 }
  0x4e   : > { %s5826_s26 = scalar_lea.vmem [#allocation2], %s4110_s17 }
  0x4f   : > { %5594 = dma.done.wait (%p5705_p4), %s301_s14, 8192  }
  0x50   : > { %5596 = vsyncadd (%p5705_p4), %s301_s14, 4294959104  ;;  %s310_s8 = sand.u32 1, %s5696_s25   ;;  %s4111_s19 = sshll.u32 %s5822_s20, 8 }
  0x51   : > { %s311_s18 = scalar_lea.sflag [#allocation6], %s310_s8  ;;  %s5836_s30 = scalar_lea.vmem [#allocation5], %s4111_s19 }
  0x52   : > { %5598 = dma.done.wait (%p5705_p4), %s311_s18, 4096  }
  0x53   : > { %5600 = vsyncadd (%p5705_p4), %s311_s18, 4294963200 }
  0x54   : > { %5602 = dma.done.wait (%p47_p1), [#allocation6], 4096  }
  0x55   : > { %5604 = vsyncadd (%p47_p1), [#allocation6], 4294963200 }
  0x56   : > { %5606 = dma.done.wait (%p47_p1), [#allocation9], 6144  }
  0x57   : > { %5608 = vsyncadd (%p47_p1), [#allocation9], 4294961152  ;;  %v4771_v0 = vld [vmem:[#allocation7 + $0x38] sm:$0xff]  ;;  %v4770_v2 = vld [vmem:[#allocation7 + $0x30] sm:$0xff]  ;;  %s7551_s3 = scalar_lea.vmem [#allocation11], %s4111_s19  ;;  %s4844_s29 = sshll.u32 %s5696_s25, 8 }
  0x58   : > { %v4779_v1 = vld [vmem:[#allocation7 + $0x78] sm:$0xff]  ;;  %4845 = vmatpush.bf16.msra.mxu2 %v4771_v0  ;;  %v4778_v3 = vld [vmem:[#allocation7 + $0x70] sm:$0xff]  ;;  %1007 = vmatpush.bf16.msra.mxu0 %v4771_v0  ;;  %v4769_v4 = vld [vmem:[#allocation7 + $0x28] sm:$0xff]  ;;  %s3968_s9 = scalar_lea.hbm %s7887_s6, %s4844_s29  ;;  %s3969_s25 = sshll.u32 %s7551_s3, 4  ;;  %s3970_s25 = int_to_ptr.vmem [resolvable:$true] %s3969_s25 }
  0x59   : > { %4853 = vmatpush.bf16.msra.mxu3 %v4779_v1  ;;  %1096 = vmatpush.bf16.msra.mxu1 %v4779_v1  ;;  %v4777_v5 = vld [vmem:[#allocation7 + $0x68] sm:$0xff]  ;;  %v4768_v6 = vld [vmem:[#allocation7 + $0x20] sm:$0xff]  ;;  %v4767_v8 = vld [vmem:[#allocation7 + $0x18] sm:$0xff]  ;;  %s3971_s10 = sshll.u32 %s3968_s9, 4  ;;  %s3957_s16 = scalar_lea.sflag [#allocation4], %s5822_s20  ;;  %s3972_s10 = int_to_ptr.hbm [resolvable:$true] %s3971_s10 }
  0x5a   : > { %v4776_v7 = vld [vmem:[#allocation7 + $0x60] sm:$0xff]  ;;  %v4775_v9 = vld [vmem:[#allocation7 + $0x58] sm:$0xff]  ;;  %v4766_v10 = vld [vmem:[#allocation7 + $0x10] sm:$0xff]  ;;  %s5563_s15 = sshra.s32 %s3972_s10, 4  ;;  %s5569_s14 = scalar_lea.hbm %s7887_s6, 512  ;;  %s5564_s15 = int_to_ptr.hbm [resolvable:$true] %s5563_s15 }
  0x5b   : > { %v4774_v11 = vld [vmem:[#allocation7 + $0x50] sm:$0xff]  ;;  %v4765_v12 = vld [vmem:[#allocation7 + $0x8] sm:$0xff]  ;;  %v4764_v14 = vld [vmem:[#allocation7] sm:$0xff]  ;;  %s5565_s5 = scalar_lea.hbm %s5564_s15, 256  ;;  %p5570_p2 = scmp.lt.s32.totalorder %s5564_s15, %s7887_s6 }
  0x5c   : > { %4846 = vmatpush.bf16.msra.mxu2 %v4770_v2  ;;  %1008 = vmatpush.bf16.msra.mxu0 %v4770_v2  ;;  %v4773_v13 = vld [vmem:[#allocation7 + $0x48] sm:$0xff]  ;;  %v4772_v15 = vld [vmem:[#allocation7 + $0x40] sm:$0xff]  ;;  %v4734_v17 = vld [vmem:[%s5826_s26 + $0x10c] sm:$0xf0]  ;;  %p5566_p1 = scmp.ne.s32.totalorder %s5564_s15, %s5565_s5  ;;  %p5571_p10 = scmp.lt.s32.totalorder %s5569_s14, %s5565_s5 }
  0x5d   : > { %4854 = vmatpush.bf16.msra.mxu3 %v4778_v3  ;;  %1097 = vmatpush.bf16.msra.mxu1 %v4778_v3  ;;  %v4246_v16 = vld [vmem:[%s5826_s26 + $0x100] sm:$0xf]  ;;  %v4732_v18 = vld [vmem:[%s5826_s26 + $0x104] sm:$0xf]  ;;  %v4248_v19 = vld [vmem:[%s5826_s26 + $0x110] sm:$0xf0] }
  0x5e   : > { %v4787_v20 = vld [vmem:[#allocation7 + $0xb8] sm:$0xff]  ;;  %v4247_v22 = vor.u32 %v4734_v17, %v4246_v16  ;;  %v4251_v23 = vor.u32 %v4732_v18, %v4248_v19  ;;  %v4786_v24 = vld [vmem:[#allocation7 + $0xb0] sm:$0xff]  ;;  %v4785_v26 = vld [vmem:[#allocation7 + $0xa8] sm:$0xff]  ;;  %p5567_p4 = pnand %p5566_p1, %p5764_p7  ;;  %p5572_p11 = por %p5571_p10, %p5570_p2 }
  0x5f   : > { %v4795_v21 = vld [vmem:[#allocation7 + $0xf8] sm:$0xff]  ;;  %v4794_v25 = vld [vmem:[#allocation7 + $0xf0] sm:$0xff]  ;;  %v4793_v27 = vld [vmem:[#allocation7 + $0xe8] sm:$0xff] }
  0x60   : > { %4847 = vmatpush.bf16.msra.mxu2 %v4769_v4  ;;  %1009 = vmatpush.bf16.msra.mxu0 %v4769_v4  ;;  %v4262_v28 = vld [vmem:[%s5826_s26 + $0x120] sm:$0xf]  ;;  %v4738_v29 = vld [vmem:[%s5826_s26 + $0x12c] sm:$0xf0]  ;;  %v4736_v30 = vld [vmem:[%s5826_s26 + $0x124] sm:$0xf]  ;;  %p5568_p8 = pneg %p5567_p4 }
  0x61   : > { %4855 = vmatpush.bf16.msra.mxu3 %v4777_v5  ;;  %1098 = vmatpush.bf16.msra.mxu1 %v4777_v5  ;;  %v4264_v31 = vld [vmem:[%s5826_s26 + $0x130] sm:$0xf0]  ;;  %v4263_v32 = vor.u32 %v4738_v29, %v4262_v28  ;;  %v4784_v34 = vld [vmem:[#allocation7 + $0xa0] sm:$0xff]  ;;  %v4742_v37 = vld [vmem:[%s5826_s26 + $0x14c] sm:$0xf0] }
  0x62   : > { %v4267_v33 = vor.u32 %v4736_v30, %v4264_v31  ;;  %v4792_v35 = vld [vmem:[#allocation7 + $0xe0] sm:$0xff]  ;;  %v4280_v39 = vld [vmem:[%s5826_s26 + $0x150] sm:$0xf0]  ;;  %v4783_v42 = vld [vmem:[#allocation7 + $0x98] sm:$0xff]  ;;  %p5573_p9 = pnand %p5572_p11, %p5568_p8 }
  0x63   : > { %v4278_v36 = vld [vmem:[%s5826_s26 + $0x140] sm:$0xf]  ;;  %v4740_v38 = vld [vmem:[%s5826_s26 + $0x144] sm:$0xf]  ;;  %v4791_v43 = vld [vmem:[#allocation7 + $0xd8] sm:$0xff] }
  0x64   : > { %4848 = vmatpush.bf16.msra.mxu2 %v4768_v6  ;;  %1010 = vmatpush.bf16.msra.mxu0 %v4768_v6  ;;  %v4279_v40 = vor.u32 %v4742_v37, %v4278_v36  ;;  %v4283_v41 = vor.u32 %v4740_v38, %v4280_v39  ;;  %v4294_v44 = vld [vmem:[%s5826_s26 + $0x160] sm:$0xf]  ;;  %v4746_v45 = vld [vmem:[%s5826_s26 + $0x16c] sm:$0xf0]  ;;  %v4744_v46 = vld [vmem:[%s5826_s26 + $0x164] sm:$0xf] }
  0x65   : > { %4856 = vmatpush.bf16.msra.mxu3 %v4776_v7  ;;  %1099 = vmatpush.bf16.msra.mxu1 %v4776_v7  ;;  %v4296_v47 = vld [vmem:[%s5826_s26 + $0x170] sm:$0xf0]  ;;  %v4295_v48 = vor.u32 %v4746_v45, %v4294_v44  ;;  %v4310_v52 = vld [vmem:[%s5826_s26 + $0x180] sm:$0xf]  ;;  %v4750_v53 = vld [vmem:[%s5826_s26 + $0x18c] sm:$0xf0] }
  0x66   : > { %v4299_v49 = vor.u32 %v4744_v46, %v4296_v47  ;;  %v4782_v50 = vld [vmem:[#allocation7 + $0x90] sm:$0xff]  ;;  %v4748_v54 = vld [vmem:[%s5826_s26 + $0x184] sm:$0xf]  ;;  %v4311_v56 = vor.u32 %v4750_v53, %v4310_v52  ;;  %v4781_v58 = vld [vmem:[#allocation7 + $0x88] sm:$0xff] }
  0x67   : > { %v4790_v51 = vld [vmem:[#allocation7 + $0xd0] sm:$0xff]  ;;  %v4789_v59 = vld [vmem:[#allocation7 + $0xc8] sm:$0xff]  ;;  %v4326_v60 = vld [vmem:[%s5826_s26 + $0x1a0] sm:$0xf] }
  0x68   : > { %4849 = vmatpush.bf16.msra.mxu2 %v4767_v8  ;;  %1011 = vmatpush.bf16.msra.mxu0 %v4767_v8  ;;  %v4312_v55 = vld [vmem:[%s5826_s26 + $0x190] sm:$0xf0]  ;;  %v4754_v61 = vld [vmem:[%s5826_s26 + $0x1ac] sm:$0xf0]  ;;  %v4752_v62 = vld [vmem:[%s5826_s26 + $0x1a4] sm:$0xf] }
  0x69   : > { %4857 = vmatpush.bf16.msra.mxu3 %v4775_v9  ;;  %1100 = vmatpush.bf16.msra.mxu1 %v4775_v9  ;;  %v4315_v57 = vor.u32 %v4748_v54, %v4312_v55  ;;  %v4328_v63 = vld [vmem:[%s5826_s26 + $0x1b0] sm:$0xf0]  ;;  %v4327_v0 = vor.u32 %v4754_v61, %v4326_v60  ;;  %v4780_v2 = vld [vmem:[#allocation7 + $0x80] sm:$0xff]  ;;  %v4702_v5 = vld [vmem:[%s5826_s26 + $0xc] sm:$0xf0] }
  0x6a   : > { %v4331_v1 = vor.u32 %v4752_v62, %v4328_v63  ;;  %v4788_v3 = vld [vmem:[#allocation7 + $0xc0] sm:$0xff]  ;;  %v4120_v7 = vld [vmem:[%s5826_s26 + $0x10] sm:$0xf0]  ;;  %v4762_v17 = vld [vmem:[%s5826_s26 + $0x1ec] sm:$0xf0] }
  0x6b   : > { %v4118_v4 = vld [vmem:[%s5826_s26] sm:$0xf]  ;;  %v4700_v6 = vld [vmem:[%s5826_s26 + $0x4] sm:$0xf]  ;;  %v4360_v19 = vld [vmem:[%s5826_s26 + $0x1f0] sm:$0xf0] }
  0x6c   : > { %4850 = vmatpush.bf16.msra.mxu2 %v4766_v10  ;;  %1012 = vmatpush.bf16.msra.mxu0 %v4766_v10  ;;  %v4119_v8 = vor.u32 %v4702_v5, %v4118_v4  ;;  %v4123_v9 = vor.u32 %v4700_v6, %v4120_v7  ;;  %v4342_v10 = vld [vmem:[%s5826_s26 + $0x1c0] sm:$0xf]  ;;  %v4760_v18 = vld [vmem:[%s5826_s26 + $0x1e4] sm:$0xf]  ;;  %v4810_v28 = vld [vmem:[#allocation8 + $0x74] sm:$0xf] }
  0x6d   : > { %4858 = vmatpush.bf16.msra.mxu3 %v4774_v11  ;;  %1101 = vmatpush.bf16.msra.mxu1 %v4774_v11  ;;  %v4758_v11 = vld [vmem:[%s5826_s26 + $0x1cc] sm:$0xf0]  ;;  %v4358_v16 = vld [vmem:[%s5826_s26 + $0x1e0] sm:$0xf]  ;;  %v4560_v29 = vld [vmem:[#allocation8 + $0x78] sm:$0xf0] }
  0x6e   : > { %v4563_v30 = vor.u32 %v4810_v28, %v4560_v29  ;;  %v4126_v31 = vld [vmem:[%s5826_s26 + $0x8] sm:$0xf]  ;;  %v4558_v37 = vld [vmem:[#allocation8 + $0x70] sm:$0xf]  ;;  %v4811_v38 = vld [vmem:[#allocation8 + $0x74] sm:$0xf0] }
  0x6f   : > { %v4559_v39 = vor.u32 %v4811_v38, %v4558_v37  ;;  %v4152_v44 = vld [vmem:[%s5826_s26 + $0x50] sm:$0xf0]  ;;  %v4142_v52 = vld [vmem:[%s5826_s26 + $0x28] sm:$0xf]  ;;  %v4707_v53 = vld [vmem:[%s5826_s26 + $0x34] sm:$0xf0] }
  0x70   : > { %4851 = vmatpush.bf16.msra.mxu2 %v4765_v12  ;;  %1013 = vmatpush.bf16.msra.mxu0 %v4765_v12  ;;  %v4756_v12 = vld [vmem:[%s5826_s26 + $0x1c4] sm:$0xf]  ;;  %v4705_v54 = vld [vmem:[%s5826_s26 + $0x2c] sm:$0xf]  ;;  %v4144_v55 = vld [vmem:[%s5826_s26 + $0x38] sm:$0xf0] }
  0x71   : > { %4859 = vmatpush.bf16.msra.mxu3 %v4773_v13  ;;  %1102 = vmatpush.bf16.msra.mxu1 %v4773_v13  ;;  %v4344_v13 = vld [vmem:[%s5826_s26 + $0x1d0] sm:$0xf0]  ;;  %v4147_v60 = vor.u32 %v4705_v54, %v4144_v55  ;;  %v4550_v61 = vld [vmem:[#allocation8 + $0x60] sm:$0xf]  ;;  %v4809_v62 = vld [vmem:[#allocation8 + $0x64] sm:$0xf0] }
  0x72   : > { %v4551_v63 = vor.u32 %v4809_v62, %v4550_v61  ;;  %v4168_v4 = vld [vmem:[%s5826_s26 + $0x70] sm:$0xf0]  ;;  %v4715_v37 = vld [vmem:[%s5826_s26 + $0x74] sm:$0xf0]  ;;  %v4713_v38 = vld [vmem:[%s5826_s26 + $0x6c] sm:$0xf] }
  0x73   : > { %v4184_v28 = vld [vmem:[%s5826_s26 + $0x90] sm:$0xf0]  ;;  %v4190_v62 = vld [vmem:[%s5826_s26 + $0x88] sm:$0xf] }
  0x74   : > { %4852 = vmatpush.bf16.msra.mxu2 %v4764_v14  ;;  %1014 = vmatpush.bf16.msra.mxu0 %v4764_v14  ;;  %v4343_v14 = vor.u32 %v4758_v11, %v4342_v10  ;;  %v4544_v10 = vld [vmem:[#allocation8 + $0x58] sm:$0xf0] }
  0x75   : > { %4860 = vmatpush.bf16.msra.mxu3 %v4772_v15  ;;  %1103 = vmatpush.bf16.msra.mxu1 %v4772_v15  ;;  %v4347_v15 = vor.u32 %v4756_v12, %v4344_v13  ;;  %v4158_v12 = vld [vmem:[%s5826_s26 + $0x48] sm:$0xf]  ;;  %v4711_v13 = vld [vmem:[%s5826_s26 + $0x54] sm:$0xf0] }
  0x77   : > { %1055 = vmatmul.bf16.vlgmr.msra.gmra.mxu2 %v4247_v22  ;;  %1015 = vmatmul.bf16.vlgmr.msra.gmra.mxu0 %v4119_v8  ;;  %v4704_v22 = vld [vmem:[%s5826_s26 + $0x24] sm:$0xf] }
  0x78   : > { %1185 = vmatpush.bf16.msrb.mxu2 %v4787_v20  ;;  %1144 = vmatmul.bf16.vlgmr.msra.gmra.mxu3 %v4251_v23  ;;  %v4134_v20 = vld [vmem:[%s5826_s26 + $0x20] sm:$0xf] }
  0x79   : > { %1274 = vmatpush.bf16.msrb.mxu3 %v4795_v21  ;;  %1104 = vmatmul.bf16.vlgmr.msra.gmra.mxu1 %v4123_v9  ;;  %v4706_v21 = vld [vmem:[%s5826_s26 + $0x2c] sm:$0xf0]  ;;  %v4806_v9 = vld [vmem:[#allocation8 + $0x54] sm:$0xf] }
  0x7a   : > { %v4135_v23 = vor.u32 %v4706_v21, %v4134_v20  ;;  %1666 = vmatpush.bf16.msrb.mxu1 %v4563_v30  ;;  %1577 = vmatpush.bf16.msrb.mxu0 %v4559_v39  ;;  %v4547_v11 = vor.u32 %v4806_v9, %v4544_v10  ;;  %v4542_v21 = vld [vmem:[#allocation8 + $0x50] sm:$0xf]  ;;  %v4176_v39 = vld [vmem:[%s5826_s26 + $0x78] sm:$0xf0]  ;;  %v4803_v9 = vld [vmem:[#allocation8 + $0x34] sm:$0xf0] }
  0x7c   : > { %1186 = vmatpush.bf16.msrb.mxu2 %v4786_v24  ;;  %v4136_v24 = vld [vmem:[%s5826_s26 + $0x30] sm:$0xf0] }
  0x7d   : > { %1275 = vmatpush.bf16.msrb.mxu3 %v4794_v25  ;;  %v4139_v25 = vor.u32 %v4704_v22, %v4136_v24  ;;  %v4807_v22 = vld [vmem:[#allocation8 + $0x54] sm:$0xf0]  ;;  %v4182_v24 = vld [vmem:[%s5826_s26 + $0x80] sm:$0xf] }
  0x7e   : > { %1578 = vmatpush.bf16.msrb.mxu0 %v4551_v63  ;;  %v4719_v63 = vld [vmem:[%s5826_s26 + $0x94] sm:$0xf0] }
  0x80   : > { %1187 = vmatpush.bf16.msrb.mxu2 %v4785_v26  ;;  %v4359_v26 = vor.u32 %v4762_v17, %v4358_v16 }
  0x81   : > { %1276 = vmatpush.bf16.msrb.mxu3 %v4793_v27  ;;  %v4363_v27 = vor.u32 %v4760_v18, %v4360_v19  ;;  %v4159_v19 = vor.u32 %v4711_v13, %v4158_v12  ;;  %v4726_v12 = vld [vmem:[%s5826_s26 + $0xcc] sm:$0xf0]  ;;  %v4724_v13 = vld [vmem:[%s5826_s26 + $0xc4] sm:$0xf] }
  0x84   : > { %1188 = vmatpush.bf16.msrb.mxu2 %v4784_v34  ;;  %v4128_v34 = vld [vmem:[%s5826_s26 + $0x18] sm:$0xf0] }
  0x85   : > { %1277 = vmatpush.bf16.msrb.mxu3 %v4792_v35 }
  0x87   : > { %1060 = vmatmul.bf16.gmra.mxu2 %v4263_v32  ;;  %1020 = vmatmul.bf16.gmra.mxu0 %v4135_v23  ;;  %v4703_v32 = vld [vmem:[%s5826_s26 + $0x14] sm:$0xf0]  ;;  %v4543_v23 = vor.u32 %v4807_v22, %v4542_v21  ;;  %v4800_v21 = vld [vmem:[#allocation8 + $0x24] sm:$0xf]  ;;  %v4520_v22 = vld [vmem:[#allocation8 + $0x28] sm:$0xf0] }
  0x88   : > { %1149 = vmatmul.bf16.gmra.mxu3 %v4267_v33  ;;  %1189 = vmatpush.bf16.msrb.mxu2 %v4783_v42  ;;  %v4701_v33 = vld [vmem:[%s5826_s26 + $0xc] sm:$0xf]  ;;  %v4127_v35 = vor.u32 %v4703_v32, %v4126_v31  ;;  %v4708_v42 = vld [vmem:[%s5826_s26 + $0x44] sm:$0xf] }
  0x89   : > { %1278 = vmatpush.bf16.msrb.mxu3 %v4791_v43  ;;  %1109 = vmatmul.bf16.gmra.mxu1 %v4139_v25  ;;  %v4131_v36 = vor.u32 %v4701_v33, %v4128_v34  ;;  %v4155_v47 = vor.u32 %v4708_v42, %v4152_v44  ;;  %v4718_v25 = vld [vmem:[%s5826_s26 + $0x8c] sm:$0xf0]  ;;  %v4804_v33 = vld [vmem:[#allocation8 + $0x44] sm:$0xf]  ;;  %v4536_v34 = vld [vmem:[#allocation8 + $0x48] sm:$0xf0]  ;;  %v4179_v44 = vor.u32 %v4713_v38, %v4176_v39 }
  0x8a   : > { %1579 = vmatpush.bf16.msrb.mxu0 %v4543_v23  ;;  %v4523_v23 = vor.u32 %v4800_v21, %v4520_v22  ;;  %v4730_v38 = vld [vmem:[%s5826_s26 + $0xec] sm:$0xf0]  ;;  %v4728_v39 = vld [vmem:[%s5826_s26 + $0xe4] sm:$0xf] }
  0x8c   : > { %1190 = vmatpush.bf16.msrb.mxu2 %v4782_v50  ;;  %v4552_v50 = vld [vmem:[#allocation8 + $0x68] sm:$0xf0] }
  0x8d   : > { %1279 = vmatpush.bf16.msrb.mxu3 %v4790_v51 }
  0x90   : > { %1191 = vmatpush.bf16.msrb.mxu2 %v4781_v58 }
  0x91   : > { %1280 = vmatpush.bf16.msrb.mxu3 %v4789_v59  ;;  %v4143_v59 = vor.u32 %v4707_v53, %v4142_v52  ;;  %v4200_v53 = vld [vmem:[%s5826_s26 + $0xb0] sm:$0xf0] }
  0x94   : > { %1192 = vmatpush.bf16.msrb.mxu2 %v4780_v2  ;;  %v4712_v2 = vld [vmem:[%s5826_s26 + $0x64] sm:$0xf] }
  0x95   : > { %1281 = vmatpush.bf16.msrb.mxu3 %v4788_v3  ;;  %v4171_v7 = vor.u32 %v4712_v2, %v4168_v4 }
  0x97   : > { %1065 = vmatmul.bf16.gmra.mxu2 %v4279_v40  ;;  %v4150_v40 = vld [vmem:[%s5826_s26 + $0x40] sm:$0xf] }
  0x98   : > { %1154 = vmatmul.bf16.gmra.mxu3 %v4283_v41  ;;  %v4710_v41 = vld [vmem:[%s5826_s26 + $0x4c] sm:$0xf0] }
  0x99   : > { %v4151_v43 = vor.u32 %v4710_v41, %v4150_v40  ;;  %1114 = vmatmul.bf16.gmra.mxu1 %v4155_v47 }
  0x9b   : > { %1025 = vmatmul.bf16.gmra.mxu0 %v4151_v43 }
  0xa7   : > { %1070 = vmatmul.bf16.gmra.mxu2 %v4295_v48 }
  0xa8   : > { %1159 = vmatmul.bf16.gmra.mxu3 %v4299_v49  ;;  %v4808_v49 = vld [vmem:[#allocation8 + $0x64] sm:$0xf] }
  0xa9   : > { %v4555_v51 = vor.u32 %v4808_v49, %v4552_v50  ;;  %1119 = vmatmul.bf16.gmra.mxu1 %v4171_v7  ;;  %v4198_v49 = vld [vmem:[%s5826_s26 + $0xa0] sm:$0xf]  ;;  %v4722_v50 = vld [vmem:[%s5826_s26 + $0xac] sm:$0xf0] }
  0xaa   : > { %v4199_v52 = vor.u32 %v4722_v50, %v4198_v49  ;;  %v4526_v7 = vld [vmem:[#allocation8 + $0x30] sm:$0xf]  ;;  %v4512_v49 = vld [vmem:[#allocation8 + $0x18] sm:$0xf0] }
  0xab   : > { %1667 = vmatpush.bf16.msrb.mxu1 %v4555_v51  ;;  %v4720_v51 = vld [vmem:[%s5826_s26 + $0xa4] sm:$0xf]  ;;  %v4527_v10 = vor.u32 %v4803_v9, %v4526_v7  ;;  %v4238_v7 = vld [vmem:[%s5826_s26 + $0xe8] sm:$0xf] }
  0xac   : > { %v4796_v9 = vld [vmem:[#allocation8 + $0x4] sm:$0xf] }
  0xaf   : > { %1668 = vmatpush.bf16.msrb.mxu1 %v4547_v11  ;;  %v4214_v11 = vld [vmem:[%s5826_s26 + $0xc0] sm:$0xf] }
  0xb7   : > { %1075 = vmatmul.bf16.gmra.mxu2 %v4311_v56 }
  0xb8   : > { %1164 = vmatmul.bf16.gmra.mxu3 %v4315_v57 }
  0xc7   : > { %1080 = vmatmul.bf16.gmra.mxu2 %v4327_v0  ;;  %v4166_v0 = vld [vmem:[%s5826_s26 + $0x60] sm:$0xf] }
  0xc8   : > { %1169 = vmatmul.bf16.gmra.mxu3 %v4331_v1  ;;  %v4714_v1 = vld [vmem:[%s5826_s26 + $0x6c] sm:$0xf0] }
  0xc9   : > { %v4167_v3 = vor.u32 %v4714_v1, %v4166_v0  ;;  %v4717_v0 = vld [vmem:[%s5826_s26 + $0x8c] sm:$0xf]  ;;  %v4192_v1 = vld [vmem:[%s5826_s26 + $0x98] sm:$0xf0] }
  0xcb   : > { %1030 = vmatmul.bf16.gmra.mxu0 %v4167_v3 }
  0xd7   : > { %1085 = vmatmul.bf16.gmra.mxu2 %v4343_v14  ;;  %v4709_v14 = vld [vmem:[%s5826_s26 + $0x4c] sm:$0xf] }
  0xd8   : > { %1174 = vmatmul.bf16.gmra.mxu3 %v4347_v15  ;;  %v4160_v15 = vld [vmem:[%s5826_s26 + $0x58] sm:$0xf0] }
  0xd9   : > { %v4163_v20 = vor.u32 %v4709_v14, %v4160_v15  ;;  %v4215_v14 = vor.u32 %v4726_v12, %v4214_v11  ;;  %v4216_v15 = vld [vmem:[%s5826_s26 + $0xd0] sm:$0xf0]  ;;  %v4731_v11 = vld [vmem:[%s5826_s26 + $0xf4] sm:$0xf0]  ;;  %v4729_v12 = vld [vmem:[%s5826_s26 + $0xec] sm:$0xf] }
  0xda   : > { %v4239_v22 = vor.u32 %v4731_v11, %v4238_v7 }
  0xe7   : > { %1090 = vmatmul.bf16.gmra.mxu2 %v4359_v26  ;;  %v4716_v26 = vld [vmem:[%s5826_s26 + $0x84] sm:$0xf] }
  0xe8   : > { %1179 = vmatmul.bf16.gmra.mxu3 %v4363_v27  ;;  %v4183_v27 = vor.u32 %v4718_v25, %v4182_v24  ;;  %v4187_v31 = vor.u32 %v4716_v26, %v4184_v28  ;;  %v4206_v24 = vld [vmem:[%s5826_s26 + $0xa8] sm:$0xf]  ;;  %v4723_v25 = vld [vmem:[%s5826_s26 + $0xb4] sm:$0xf0]  ;;  %v4721_v26 = vld [vmem:[%s5826_s26 + $0xac] sm:$0xf] }
  0xea   : > { %1035 = vmatmul.bf16.gmra.mxu0 %v4183_v27  ;;  %1124 = vmatmul.bf16.gmra.mxu1 %v4187_v31  ;;  %v4208_v27 = vld [vmem:[%s5826_s26 + $0xb8] sm:$0xf0]  ;;  %v4207_v31 = vor.u32 %v4723_v25, %v4206_v24  ;;  %v4502_v24 = vld [vmem:[#allocation8] sm:$0xf]  ;;  %v4797_v25 = vld [vmem:[#allocation8 + $0x4] sm:$0xf0] }
  0xf7   : > { %1193 = vmatmul.bf16.vlgmr.msrb.gmra.mxu2 %v4127_v35  ;;  %v4539_v35 = vor.u32 %v4804_v33, %v4536_v34  ;;  %v4211_v33 = vor.u32 %v4721_v26, %v4208_v27  ;;  %v4518_v34 = vld [vmem:[#allocation8 + $0x20] sm:$0xf]  ;;  %v4503_v26 = vor.u32 %v4797_v25, %v4502_v24  ;;  %v4741_v24 = vld [vmem:[%s5826_s26 + $0x14c] sm:$0xf]  ;;  %v4288_v25 = vld [vmem:[%s5826_s26 + $0x158] sm:$0xf0] }
  0xf8   : > { %1282 = vmatmul.bf16.vlgmr.msrb.gmra.mxu3 %v4131_v36  ;;  %v4174_v36 = vld [vmem:[%s5826_s26 + $0x68] sm:$0xf] }
  0xf9   : > { %1669 = vmatpush.bf16.msrb.mxu1 %v4539_v35  ;;  %v4175_v43 = vor.u32 %v4715_v37, %v4174_v36  ;;  %v4801_v35 = vld [vmem:[#allocation8 + $0x24] sm:$0xf0]  ;;  %v4230_v37 = vld [vmem:[%s5826_s26 + $0xe0] sm:$0xf] }
  0xfa   : > { %v1056_v45 = vpop.f32.mrf.mxu2  ;;  %1040 = vmatmul.bf16.gmra.mxu0 %v4199_v52  ;;  %v4519_v36 = vor.u32 %v4801_v35, %v4518_v34  ;;  %v4727_v52 = vld [vmem:[%s5826_s26 + $0xd4] sm:$0xf0]  ;;  %v4254_v34 = vld [vmem:[%s5826_s26 + $0x108] sm:$0xf] }
  0xfb   : > { %v1145_v46 = vpop.f32.mrf.mxu3  ;;  %v4735_v35 = vld [vmem:[%s5826_s26 + $0x114] sm:$0xf0] }
  0xfc   : > { %v5898_v48 = vadd.f32 %v1145_v46, %v1056_v45  ;;  %v4534_v45 = vld [vmem:[#allocation8 + $0x40] sm:$0xf]  ;;  %v4805_v46 = vld [vmem:[#allocation8 + $0x44] sm:$0xf0] }
  0xfd   : > { %v4535_v47 = vor.u32 %v4805_v46, %v4534_v45 }
  0xff   : > { %1580 = vmatpush.bf16.msrb.mxu0 %v4535_v47  ;;  %v4798_v47 = vld [vmem:[#allocation8 + $0x14] sm:$0xf] }
 0x100   : > { %v4515_v50 = vor.u32 %v4798_v47, %v4512_v49 }
 0x102   : > { %v1058_v56 = vpop.f32.mrf.mxu2 }
 0x103   : > { %v1147_v57 = vpop.f32.mrf.mxu3  ;;  %1581 = vmatpush.bf16.msrb.mxu0 %v4527_v10  ;;  %v4504_v10 = vld [vmem:[#allocation8 + $0x8] sm:$0xf0] }
 0x104   : > { %v5904_v58 = vadd.f32 %v1147_v57, %v1058_v56  ;;  %v4203_v56 = vor.u32 %v4720_v51, %v4200_v53  ;;  %v4222_v51 = vld [vmem:[%s5826_s26 + $0xc8] sm:$0xf]  ;;  %v4725_v53 = vld [vmem:[%s5826_s26 + $0xcc] sm:$0xf] }
 0x106   : > { %1129 = vmatmul.bf16.gmra.mxu1 %v4203_v56 }
 0x107   : > { %1198 = vmatmul.bf16.gmra.mxu2 %v4143_v59  ;;  %v4802_v59 = vld [vmem:[#allocation8 + $0x34] sm:$0xf]  ;;  %1582 = vmatpush.bf16.msrb.mxu0 %v4519_v36  ;;  %v4733_v36 = vld [vmem:[%s5826_s26 + $0x10c] sm:$0xf] }
 0x108   : > { %1287 = vmatmul.bf16.gmra.mxu3 %v4147_v60  ;;  %v4528_v60 = vld [vmem:[#allocation8 + $0x38] sm:$0xf0] }
 0x109   : > { %v4531_v61 = vor.u32 %v4802_v59, %v4528_v60  ;;  %v4223_v60 = vor.u32 %v4727_v52, %v4222_v51 }
 0x10a   : > { %v1061_v5 = vpop.f32.mrf.mxu2  ;;  %1045 = vmatmul.bf16.gmra.mxu0 %v4215_v14  ;;  %v4507_v14 = vor.u32 %v4796_v9, %v4504_v10 }
 0x10b   : > { %v1150_v6 = vpop.f32.mrf.mxu3  ;;  %1670 = vmatpush.bf16.msrb.mxu1 %v4531_v61 }
 0x10c   : > { %v5910_v8 = vadd.f32 %v1150_v6, %v1061_v5  ;;  %v4191_v5 = vor.u32 %v4719_v63, %v4190_v62  ;;  %v4195_v6 = vor.u32 %v4717_v0, %v4192_v1  ;;  %v1016_v62 = vpop.f32.mrf.mxu0  ;;  %v1105_v63 = vpop.f32.mrf.mxu1  ;;  %v4510_v0 = vld [vmem:[#allocation8 + $0x10] sm:$0xf]  ;;  %v4799_v1 = vld [vmem:[#allocation8 + $0x14] sm:$0xf0] }
 0x10d   : > { %v1106_v47 = vadd.f32 %v1105_v63, %v1016_v62 }
 0x10f   : > { %1671 = vmatpush.bf16.msrb.mxu1 %v4523_v23 }
 0x112   : > { %v1063_v16 = vpop.f32.mrf.mxu2 }
 0x113   : > { %v1152_v17 = vpop.f32.mrf.mxu3  ;;  %1672 = vmatpush.bf16.msrb.mxu1 %v4515_v50 }
 0x114   : > { %v5916_v18 = vadd.f32 %v1152_v17, %v1063_v16 }
 0x117   : > { %1203 = vmatmul.bf16.gmra.mxu2 %v4159_v19  ;;  %v4219_v19 = vor.u32 %v4724_v13, %v4216_v15  ;;  %v4240_v13 = vld [vmem:[%s5826_s26 + $0xf8] sm:$0xf0]  ;;  %v1018_v15 = vpop.f32.mrf.mxu0  ;;  %1673 = vmatpush.bf16.msrb.mxu1 %v4507_v14 }
 0x118   : > { %1292 = vmatmul.bf16.gmra.mxu3 %v4163_v20  ;;  %v4243_v23 = vor.u32 %v4729_v12, %v4240_v13 }
 0x119   : > { %1134 = vmatmul.bf16.gmra.mxu1 %v4219_v19 }
 0x11a   : > { %v1066_v29 = vpop.f32.mrf.mxu2 }
 0x11b   : > { %v1155_v30 = vpop.f32.mrf.mxu3 }
 0x11c   : > { %v5922_v32 = vadd.f32 %v1155_v30, %v1066_v29 }
 0x122   : > { %v1068_v40 = vpop.f32.mrf.mxu2 }
 0x123   : > { %v1157_v41 = vpop.f32.mrf.mxu3 }
 0x124   : > { %v5928_v42 = vadd.f32 %v1157_v41, %v1068_v40  ;;  %v4231_v40 = vor.u32 %v4730_v38, %v4230_v37  ;;  %v4232_v41 = vld [vmem:[%s5826_s26 + $0xf0] sm:$0xf0]  ;;  %v4256_v37 = vld [vmem:[%s5826_s26 + $0x118] sm:$0xf0] }
 0x125   : > { %v4235_v45 = vor.u32 %v4728_v39, %v4232_v41  ;;  %v4255_v41 = vor.u32 %v4735_v35, %v4254_v34 }
 0x126   : > { %1050 = vmatmul.bf16.gmra.mxu0 %v4231_v40 }
 0x127   : > { %1208 = vmatmul.bf16.gmra.mxu2 %v4175_v43 }
 0x128   : > { %1297 = vmatmul.bf16.gmra.mxu3 %v4179_v44 }
 0x129   : > { %1139 = vmatmul.bf16.gmra.mxu1 %v4235_v45 }
 0x12a   : > { %v1071_v54 = vpop.f32.mrf.mxu2 }
 0x12b   : > { %v1160_v55 = vpop.f32.mrf.mxu3 }
 0x12c   : > { %v5934_v57 = vadd.f32 %v1160_v55, %v1071_v54  ;;  %v4224_v54 = vld [vmem:[%s5826_s26 + $0xd8] sm:$0xf0] }
 0x12d   : > { %v4227_v61 = vor.u32 %v4725_v53, %v4224_v54  ;;  %v4270_v54 = vld [vmem:[%s5826_s26 + $0x128] sm:$0xf] }
 0x132   : > { %v1073_v2 = vpop.f32.mrf.mxu2 }
 0x133   : > { %v1162_v3 = vpop.f32.mrf.mxu3 }
 0x134   : > { %v5940_v4 = vadd.f32 %v1162_v3, %v1073_v2  ;;  %v4511_v2 = vor.u32 %v4799_v1, %v4510_v0 }
 0x136   : > { %1583 = vmatpush.bf16.msrb.mxu0 %v4511_v2 }
 0x137   : > { %1213 = vmatmul.bf16.gmra.mxu2 %v4191_v5 }
 0x138   : > { %1302 = vmatmul.bf16.gmra.mxu3 %v4195_v6 }
 0x13a   : > { %v1076_v16 = vpop.f32.mrf.mxu2  ;;  %1584 = vmatpush.bf16.msrb.mxu0 %v4503_v26 }
 0x13b   : > { %v1165_v17 = vpop.f32.mrf.mxu3 }
 0x13c   : > { %v5946_v20 = vadd.f32 %v1165_v17, %v1076_v16  ;;  %v1107_v16 = vpop.f32.mrf.mxu1 }
 0x142   : > { %v1078_v28 = vpop.f32.mrf.mxu2 }
 0x143   : > { %v1167_v29 = vpop.f32.mrf.mxu3 }
 0x144   : > { %v5952_v30 = vadd.f32 %v1167_v29, %v1078_v28 }
 0x147   : > { %1218 = vmatmul.bf16.gmra.mxu2 %v4207_v31  ;;  %v1021_v31 = vpop.f32.mrf.mxu0 }
 0x148   : > { %1307 = vmatmul.bf16.gmra.mxu3 %v4211_v33  ;;  %v1110_v33 = vpop.f32.mrf.mxu1 }
 0x149   : > { %v1111_v12 = vadd.f32 %v1110_v33, %v1021_v31  ;;  %v4291_v33 = vor.u32 %v4741_v24, %v4288_v25  ;;  %v4318_v24 = vld [vmem:[%s5826_s26 + $0x188] sm:$0xf] }
 0x14a   : > { %v1081_v43 = vpop.f32.mrf.mxu2 }
 0x14b   : > { %v1170_v44 = vpop.f32.mrf.mxu3 }
 0x14c   : > { %v5958_v46 = vadd.f32 %v1170_v44, %v1081_v43  ;;  %v4259_v43 = vor.u32 %v4733_v36, %v4256_v37 }
 0x14f   : > { %v1023_v44 = vpop.f32.mrf.mxu0 }
 0x150   : > { %v1112_v45 = vpop.f32.mrf.mxu1 }
 0x151   : > { %v1113_v26 = vadd.f32 %v1112_v45, %v1023_v44 }
 0x152   : > { %v1083_v55 = vpop.f32.mrf.mxu2 }
 0x153   : > { %v1172_v56 = vpop.f32.mrf.mxu3 }
 0x154   : > { %v5964_v59 = vadd.f32 %v1172_v56, %v1083_v55  ;;  %v4739_v55 = vld [vmem:[%s5826_s26 + $0x134] sm:$0xf0]  ;;  %v4737_v56 = vld [vmem:[%s5826_s26 + $0x12c] sm:$0xf] }
 0x157   : > { %1223 = vmatmul.bf16.gmra.mxu2 %v4223_v60  ;;  %v1026_v52 = vpop.f32.mrf.mxu0  ;;  %v4272_v60 = vld [vmem:[%s5826_s26 + $0x138] sm:$0xf0] }
 0x158   : > { %1312 = vmatmul.bf16.gmra.mxu3 %v4227_v61  ;;  %v1115_v53 = vpop.f32.mrf.mxu1  ;;  %v1108_v61 = vadd.f32 %v1107_v16, %v1018_v15  ;;  %v4275_v7 = vor.u32 %v4737_v56, %v4272_v60 }
 0x15a   : > { %v1086_v3 = vpop.f32.mrf.mxu2 }
 0x15b   : > { %v1175_v5 = vpop.f32.mrf.mxu3 }
 0x15c   : > { %v5966_v6 = vadd.f32 %v1175_v5, %v1086_v3  ;;  %v4271_v5 = vor.u32 %v4739_v55, %v4270_v54 }
 0x15f   : > { %v1028_v63 = vpop.f32.mrf.mxu0 }
 0x160   : > { %v1117_v11 = vpop.f32.mrf.mxu1 }
 0x161   : > { %v1118_v60 = vadd.f32 %v1117_v11, %v1028_v63 }
 0x162   : > { %v1088_v17 = vpop.f32.mrf.mxu2 }
 0x163   : > { %v1177_v19 = vpop.f32.mrf.mxu3 }
 0x164   : > { %v5972_v21 = vadd.f32 %v1177_v19, %v1088_v17 }
 0x167   : > { %1228 = vmatmul.bf16.gmra.mxu2 %v4239_v22  ;;  %v4286_v22 = vld [vmem:[%s5826_s26 + $0x148] sm:$0xf] }
 0x168   : > { %1317 = vmatmul.bf16.gmra.mxu3 %v4243_v23  ;;  %v4743_v23 = vld [vmem:[%s5826_s26 + $0x154] sm:$0xf0]  ;;  %v1120_v34 = vpop.f32.mrf.mxu1 }
 0x169   : > { %v4287_v31 = vor.u32 %v4743_v23, %v4286_v22 }
 0x16a   : > { %v1091_v27 = vpop.f32.mrf.mxu2 }
 0x16b   : > { %v1180_v28 = vpop.f32.mrf.mxu3 }
 0x16c   : > { %v5974_v29 = vadd.f32 %v1180_v28, %v1091_v27  ;;  %v1031_v28 = vpop.f32.mrf.mxu0 }
 0x170   : > { %v1122_v55 = vpop.f32.mrf.mxu1 }
 0x172   : > { %v1093_v38 = vpop.f32.mrf.mxu2 }
 0x173   : > { %v1182_v39 = vpop.f32.mrf.mxu3 }
 0x174   : > { %v5980_v40 = vadd.f32 %v1182_v39, %v1093_v38  ;;  %v1033_v54 = vpop.f32.mrf.mxu0 }
 0x175   : > { %v1123_v23 = vadd.f32 %v1122_v55, %v1033_v54 }
 0x177   : > { %1233 = vmatmul.bf16.gmra.mxu2 %v4255_v41 }
 0x178   : > { %1322 = vmatmul.bf16.gmra.mxu3 %v4259_v43  ;;  %v1116_v43 = vadd.f32 %v1115_v53, %v1026_v52  ;;  %v4745_v52 = vld [vmem:[%s5826_s26 + $0x16c] sm:$0xf]  ;;  %v4304_v53 = vld [vmem:[%s5826_s26 + $0x178] sm:$0xf0] }
 0x17a   : > { %v1194_v49 = vpop.f32.mrf.mxu2 }
 0x17b   : > { %v1283_v50 = vpop.f32.mrf.mxu3  ;;  %v1195_v51 = vadd.f32 %v1194_v49, %v1106_v47 }
 0x17d   : > { %v1284_v0 = vadd.f32 %v1283_v50, %v1195_v51 }
 0x17f   : > { %v1395_v9 = vmul.f32 0.01, %v1284_v0  ;;  %vm1363_vm0 = vcmp.gt.f32.partialorder %v1284_v0, 0.0 }
 0x181   : > { %v1427_v13 = vsel %vm1363_vm0, %v1284_v0, %v1395_v9  ;;  %v4747_v0 = vld [vmem:[%s5826_s26 + $0x174] sm:$0xf0]  ;;  %v4307_v9 = vor.u32 %v4745_v52, %v4304_v53  ;;  %v4753_v52 = vld [vmem:[%s5826_s26 + $0x1ac] sm:$0xf]  ;;  %v4336_v53 = vld [vmem:[%s5826_s26 + $0x1b8] sm:$0xf0] }
 0x182   : > { %v1196_v1 = vpop.f32.mrf.mxu2 }
 0x183   : > { %v1285_v2 = vpop.f32.mrf.mxu3  ;;  %v1197_v3 = vadd.f32 %v1196_v1, %v1108_v61  ;;  %v4302_v61 = vld [vmem:[%s5826_s26 + $0x168] sm:$0xf] }
 0x185   : > { %v1286_v10 = vadd.f32 %v1285_v2, %v1197_v3 }
 0x187   : > { %vm1364_vm1 = vcmp.gt.f32.partialorder %v1286_v10, 0.0  ;;  %v1396_v62 = vmul.f32 0.01, %v1286_v10  ;;  %1238 = vmatmul.bf16.gmra.mxu2 %v4271_v5 }
 0x188   : > { %1327 = vmatmul.bf16.gmra.mxu3 %v4275_v7  ;;  %v4303_v7 = vor.u32 %v4747_v0, %v4302_v61  ;;  %v4334_v61 = vld [vmem:[%s5826_s26 + $0x1a8] sm:$0xf]  ;;  %v4755_v0 = vld [vmem:[%s5826_s26 + $0x1b4] sm:$0xf0] }
 0x189   : > { %v1428_v14 = vsel %vm1364_vm1, %v1286_v10, %v1396_v62  ;;  %v1036_v62 = vpop.f32.mrf.mxu0 }
 0x18a   : > { %v1199_v15 = vpop.f32.mrf.mxu2  ;;  %v1459_v17 = vpack.c.bf16 %v1428_v14, %v1427_v13  ;;  %v1121_v14 = vadd.f32 %v1120_v34, %v1031_v28  ;;  %v4749_v28 = vld [vmem:[%s5826_s26 + $0x18c] sm:$0xf]  ;;  %v4320_v34 = vld [vmem:[%s5826_s26 + $0x198] sm:$0xf0] }
 0x18b   : > { %v1288_v16 = vpop.f32.mrf.mxu3  ;;  %v1200_v19 = vadd.f32 %v1199_v15, %v1111_v12  ;;  %v1125_v12 = vpop.f32.mrf.mxu1 }
 0x18c   : > { %1585 = vmatmul.bf16.vlgmr.msrb.gmra.mxu0 %v1459_v17  ;;  %1674 = vmatmul.bf16.vlgmr.msrb.gmra.mxu1 %v1459_v17 }
 0x18d   : > { %v1289_v27 = vadd.f32 %v1288_v16, %v1200_v19 }
 0x18f   : > { %v1397_v38 = vmul.f32 0.01, %v1289_v27  ;;  %vm1365_vm2 = vcmp.gt.f32.partialorder %v1289_v27, 0.0 }
 0x191   : > { %v1429_v44 = vsel %vm1365_vm2, %v1289_v27, %v1397_v38  ;;  %v1038_v25 = vpop.f32.mrf.mxu0  ;;  %v4751_v27 = vld [vmem:[%s5826_s26 + $0x194] sm:$0xf0]  ;;  %v4323_v38 = vor.u32 %v4749_v28, %v4320_v34  ;;  %v4757_v28 = vld [vmem:[%s5826_s26 + $0x1cc] sm:$0xf]  ;;  %v4352_v34 = vld [vmem:[%s5826_s26 + $0x1d8] sm:$0xf0] }
 0x192   : > { %v1201_v35 = vpop.f32.mrf.mxu2 }
 0x193   : > { %v1290_v36 = vpop.f32.mrf.mxu3  ;;  %v1202_v37 = vadd.f32 %v1201_v35, %v1113_v26  ;;  %v1127_v26 = vpop.f32.mrf.mxu1 }
 0x195   : > { %v1291_v39 = vadd.f32 %v1290_v36, %v1202_v37 }
 0x197   : > { %v1398_v41 = vmul.f32 0.01, %v1291_v39  ;;  %1243 = vmatmul.bf16.gmra.mxu2 %v4287_v31  ;;  %vm1366_vm3 = vcmp.gt.f32.partialorder %v1291_v39, 0.0 }
 0x198   : > { %1332 = vmatmul.bf16.gmra.mxu3 %v4291_v33  ;;  %v4319_v33 = vor.u32 %v4751_v27, %v4318_v24  ;;  %v4759_v27 = vld [vmem:[%s5826_s26 + $0x1d4] sm:$0xf0] }
 0x199   : > { %v1430_v45 = vsel %vm1366_vm3, %v1291_v39, %v1398_v41 }
 0x19a   : > { %v1204_v47 = vpop.f32.mrf.mxu2  ;;  %v1460_v50 = vpack.c.bf16 %v1430_v45, %v1429_v44 }
 0x19b   : > { %v1293_v49 = vpop.f32.mrf.mxu3  ;;  %v1205_v51 = vadd.f32 %v1204_v47, %v1116_v43  ;;  %v1126_v43 = vadd.f32 %v1125_v12, %v1036_v62  ;;  %v1041_v47 = vpop.f32.mrf.mxu0 }
 0x19c   : > { %1590 = vmatmul.bf16.gmra.mxu0 %v1460_v50  ;;  %1679 = vmatmul.bf16.gmra.mxu1 %v1460_v50 }
 0x19d   : > { %v1294_v56 = vadd.f32 %v1293_v49, %v1205_v51  ;;  %v1130_v49 = vpop.f32.mrf.mxu1 }
 0x19f   : > { %v1399_v3 = vmul.f32 0.01, %v1294_v56  ;;  %vm1367_vm4 = vcmp.gt.f32.partialorder %v1294_v56, 0.0 }
 0x1a1   : > { %v1431_v63 = vsel %vm1367_vm4, %v1294_v56, %v1399_v3 }
 0x1a2   : > { %v1206_v1 = vpop.f32.mrf.mxu2 }
 0x1a3   : > { %v1295_v2 = vpop.f32.mrf.mxu3  ;;  %v1207_v5 = vadd.f32 %v1206_v1, %v1118_v60  ;;  %v1128_v60 = vadd.f32 %v1127_v26, %v1038_v25  ;;  %v4350_v26 = vld [vmem:[%s5826_s26 + $0x1c8] sm:$0xf] }
 0x1a5   : > { %v1296_v10 = vadd.f32 %v1295_v2, %v1207_v5  ;;  %v1132_v62 = vpop.f32.mrf.mxu1 }
 0x1a7   : > { %v1400_v13 = vmul.f32 0.01, %v1296_v10  ;;  %1248 = vmatmul.bf16.gmra.mxu2 %v4303_v7  ;;  %vm1368_vm5 = vcmp.gt.f32.partialorder %v1296_v10, 0.0  ;;  %v4335_v7 = vor.u32 %v4755_v0, %v4334_v61  ;;  %v4366_v61 = vld [vmem:[%s5826_s26 + $0x1e8] sm:$0xf] }
 0x1a8   : > { %1337 = vmatmul.bf16.gmra.mxu3 %v4307_v9  ;;  %v4339_v9 = vor.u32 %v4753_v52, %v4336_v53  ;;  %v4763_v0 = vld [vmem:[%s5826_s26 + $0x1f4] sm:$0xf0]  ;;  %v4761_v52 = vld [vmem:[%s5826_s26 + $0x1ec] sm:$0xf]  ;;  %v4368_v53 = vld [vmem:[%s5826_s26 + $0x1f8] sm:$0xf0] }
 0x1a9   : > { %v1432_v11 = vsel %vm1368_vm5, %v1296_v10, %v1400_v13  ;;  %v1043_v10 = vpop.f32.mrf.mxu0 }
 0x1aa   : > { %v1209_v15 = vpop.f32.mrf.mxu2  ;;  %v1461_v17 = vpack.c.bf16 %v1432_v11, %v1431_v63  ;;  %v1133_v25 = vadd.f32 %v1132_v62, %v1043_v10  ;;  %v4367_v10 = vor.u32 %v4763_v0, %v4366_v61  ;;  %v4371_v62 = vor.u32 %v4761_v52, %v4368_v53 }
 0x1ab   : > { %v1298_v16 = vpop.f32.mrf.mxu3  ;;  %v1210_v19 = vadd.f32 %v1209_v15, %v1121_v14  ;;  %v1131_v14 = vadd.f32 %v1130_v49, %v1041_v47 }
 0x1ac   : > { %1595 = vmatmul.bf16.gmra.mxu0 %v1461_v17  ;;  %1684 = vmatmul.bf16.gmra.mxu1 %v1461_v17 }
 0x1ad   : > { %v1299_v22 = vadd.f32 %v1298_v16, %v1210_v19 }
 0x1af   : > { %v1401_v37 = vmul.f32 0.01, %v1299_v22  ;;  %vm1369_vm6 = vcmp.gt.f32.partialorder %v1299_v22, 0.0 }
 0x1b1   : > { %v1433_v44 = vsel %vm1369_vm6, %v1299_v22, %v1401_v37  ;;  %v1046_v22 = vpop.f32.mrf.mxu0 }
 0x1b2   : > { %v1211_v35 = vpop.f32.mrf.mxu2 }
 0x1b3   : > { %v1300_v36 = vpop.f32.mrf.mxu3  ;;  %v1212_v31 = vadd.f32 %v1211_v35, %v1123_v23  ;;  %v1135_v23 = vpop.f32.mrf.mxu1 }
 0x1b5   : > { %v1301_v39 = vadd.f32 %v1300_v36, %v1212_v31 }
 0x1b7   : > { %v1402_v41 = vmul.f32 0.01, %v1301_v39  ;;  %1253 = vmatmul.bf16.gmra.mxu2 %v4319_v33  ;;  %vm1370_vm7 = vcmp.gt.f32.partialorder %v1301_v39, 0.0  ;;  %v4351_v33 = vor.u32 %v4759_v27, %v4350_v26 }
 0x1b8   : > { %1342 = vmatmul.bf16.gmra.mxu3 %v4323_v38  ;;  %v4355_v38 = vor.u32 %v4757_v28, %v4352_v34 }
 0x1b9   : > { %v1434_v45 = vsel %vm1370_vm7, %v1301_v39, %v1402_v41 }
 0x1ba   : > { %v1214_v50 = vpop.f32.mrf.mxu2  ;;  %v1462_v54 = vpack.c.bf16 %v1434_v45, %v1433_v44  ;;  %v1048_v45 = vpop.f32.mrf.mxu0 }
 0x1bb   : > { %v1303_v51 = vpop.f32.mrf.mxu3  ;;  %v1215_v55 = vadd.f32 %v1214_v50, %v1126_v43  ;;  %v1136_v43 = vadd.f32 %v1135_v23, %v1046_v22  ;;  %v1137_v47 = vpop.f32.mrf.mxu1 }
 0x1bc   : > { %1600 = vmatmul.bf16.gmra.mxu0 %v1462_v54  ;;  %1689 = vmatmul.bf16.gmra.mxu1 %v1462_v54 }
 0x1bd   : > { %v1304_v56 = vadd.f32 %v1303_v51, %v1215_v55 }
 0x1bf   : > { %v1403_v3 = vmul.f32 0.01, %v1304_v56  ;;  %vm1371_vm8 = vcmp.gt.f32.partialorder %v1304_v56, 0.0 }
 0x1c1   : > { %v1435_v63 = vsel %vm1371_vm8, %v1304_v56, %v1403_v3 }
 0x1c2   : > { %v1216_v1 = vpop.f32.mrf.mxu2 }
 0x1c3   : > { %v1305_v2 = vpop.f32.mrf.mxu3  ;;  %v1217_v5 = vadd.f32 %v1216_v1, %v1128_v60  ;;  %v1138_v60 = vadd.f32 %v1137_v47, %v1048_v45  ;;  %v1051_v1 = vpop.f32.mrf.mxu0 }
 0x1c5   : > { %v1306_v12 = vadd.f32 %v1305_v2, %v1217_v5  ;;  %v1140_v2 = vpop.f32.mrf.mxu1 }
 0x1c7   : > { %vm1372_vm9 = vcmp.gt.f32.partialorder %v1306_v12, 0.0  ;;  %v1404_v13 = vmul.f32 0.01, %v1306_v12  ;;  %1258 = vmatmul.bf16.gmra.mxu2 %v4335_v7 }
 0x1c8   : > { %1347 = vmatmul.bf16.gmra.mxu3 %v4339_v9 }
 0x1c9   : > { %v1436_v11 = vsel %vm1372_vm9, %v1306_v12, %v1404_v13 }
 0x1ca   : > { %v1219_v15 = vpop.f32.mrf.mxu2  ;;  %v1463_v17 = vpack.c.bf16 %v1436_v11, %v1435_v63 }
 0x1cb   : > { %v1308_v16 = vpop.f32.mrf.mxu3  ;;  %v1220_v19 = vadd.f32 %v1219_v15, %v1131_v14  ;;  %v1141_v14 = vadd.f32 %v1140_v2, %v1051_v1  ;;  %v1053_v22 = vpop.f32.mrf.mxu0 }
 0x1cc   : > { %1605 = vmatmul.bf16.gmra.mxu0 %v1463_v17  ;;  %1694 = vmatmul.bf16.gmra.mxu1 %v1463_v17 }
 0x1cd   : > { %v1309_v24 = vadd.f32 %v1308_v16, %v1220_v19  ;;  %v1142_v23 = vpop.f32.mrf.mxu1 }
 0x1cf   : > { %v1405_v37 = vmul.f32 0.01, %v1309_v24  ;;  %vm1373_vm10 = vcmp.gt.f32.partialorder %v1309_v24, 0.0 }
 0x1d1   : > { %v1437_v44 = vsel %vm1373_vm10, %v1309_v24, %v1405_v37 }
 0x1d2   : > { %v1221_v35 = vpop.f32.mrf.mxu2 }
 0x1d3   : > { %v1310_v36 = vpop.f32.mrf.mxu3  ;;  %v1222_v31 = vadd.f32 %v1221_v35, %v1133_v25  ;;  %v1143_v25 = vadd.f32 %v1142_v23, %v1053_v22  ;;  %v2107_v22 = vld [vmem:[%s5836_s30] sm:$0xff] }
 0x1d5   : > { %v1311_v39 = vadd.f32 %v1310_v36, %v1222_v31 }
 0x1d7   : > { %vm1374_vm11 = vcmp.gt.f32.partialorder %v1311_v39, 0.0  ;;  %v1406_v41 = vmul.f32 0.01, %v1311_v39  ;;  %1263 = vmatmul.bf16.gmra.mxu2 %v4351_v33 }
 0x1d8   : > { %1352 = vmatmul.bf16.gmra.mxu3 %v4355_v38 }
 0x1d9   : > { %v1438_v49 = vsel %vm1374_vm11, %v1311_v39, %v1406_v41 }
 0x1da   : > { %v1224_v50 = vpop.f32.mrf.mxu2  ;;  %v1464_v54 = vpack.c.bf16 %v1438_v49, %v1437_v44  ;;  %v1491_v49 = vld [vmem:[%s7885_s4] sm:$0x3] }
 0x1db   : > { %v1313_v51 = vpop.f32.mrf.mxu3  ;;  %v1225_v55 = vadd.f32 %v1224_v50, %v1136_v43 }
 0x1dc   : > { %1610 = vmatmul.bf16.gmra.mxu0 %v1464_v54  ;;  %1699 = vmatmul.bf16.gmra.mxu1 %v1464_v54  ;;  %v6015_v54 = vperm.slane %v1491_v49, 0 }
 0x1dd   : > { %v1314_v56 = vadd.f32 %v1313_v51, %v1225_v55  ;;  %v6017_v55 = vperm.slane %v1491_v49, 1 }
 0x1df   : > { %v1407_v7 = vmul.f32 0.01, %v1314_v56  ;;  %vm1375_vm12 = vcmp.gt.f32.partialorder %v1314_v56, 0.0 }
 0x1e1   : > { %v1439_v63 = vsel %vm1375_vm12, %v1314_v56, %v1407_v7  ;;  %v2203_v7 = vlaneseq }
 0x1e2   : > { %v1226_v3 = vpop.f32.mrf.mxu2 }
 0x1e3   : > { %v1315_v5 = vpop.f32.mrf.mxu3  ;;  %v1227_v9 = vadd.f32 %v1226_v3, %v1138_v60 }
 0x1e5   : > { %v1316_v12 = vadd.f32 %v1315_v5, %v1227_v9 }
 0x1e7   : > { %vm1376_vm13 = vcmp.gt.f32.partialorder %v1316_v12, 0.0  ;;  %v1408_v13 = vmul.f32 0.01, %v1316_v12  ;;  %1268 = vmatmul.bf16.gmra.mxu2 %v4367_v10 }
 0x1e8   : > { %1357 = vmatmul.bf16.gmra.mxu3 %v4371_v62 }
 0x1e9   : > { %v1440_v11 = vsel %vm1376_vm13, %v1316_v12, %v1408_v13  ;;  %v6022_v12 = vand.u32 127, %v2203_v7 }
 0x1ea   : > { %v1229_v15 = vpop.f32.mrf.mxu2  ;;  %v1465_v17 = vpack.c.bf16 %v1440_v11, %v1439_v63 }
 0x1eb   : > { %v1318_v16 = vpop.f32.mrf.mxu3  ;;  %v1230_v19 = vadd.f32 %v1229_v15, %v1141_v14  ;;  %8009 = vst [vmem:[#allocation19_spill] sm:$0xff] %v6022_v12  ;;  %vm2205_vm2 = vcmp.lt.s32.totalorder %v6022_v12, 64 }
 0x1ec   : > { %1615 = vmatmul.bf16.gmra.mxu0 %v1465_v17  ;;  %1704 = vmatmul.bf16.gmra.mxu1 %v1465_v17 }
 0x1ed   : > { %v1319_v24 = vadd.f32 %v1318_v16, %v1230_v19 }
 0x1ef   : > { %v1409_v28 = vmul.f32 0.01, %v1319_v24  ;;  %vm1377_vm14 = vcmp.gt.f32.partialorder %v1319_v24, 0.0 }
 0x1f1   : > { %v1441_v37 = vsel %vm1377_vm14, %v1319_v24, %v1409_v28 }
 0x1f2   : > { %v1231_v26 = vpop.f32.mrf.mxu2 }
 0x1f3   : > { %v1320_v27 = vpop.f32.mrf.mxu3  ;;  %v1232_v34 = vadd.f32 %v1231_v26, %v1143_v25 }
 0x1f5   : > { %v1321_v35 = vadd.f32 %v1320_v27, %v1232_v34 }
 0x1f7   : > { %vm1378_vm15 = vcmp.gt.f32.partialorder %v1321_v35, 0.0  ;;  %v1410_v36 = vmul.f32 0.01, %v1321_v35 }
 0x1f9   : > { %v1442_v31 = vsel %vm1378_vm15, %v1321_v35, %v1410_v36 }
 0x1fa   : > { %v1234_v33 = vpop.f32.mrf.mxu2  ;;  %v1466_v39 = vpack.c.bf16 %v1442_v31, %v1441_v37 }
 0x1fb   : > { %v1323_v38 = vpop.f32.mrf.mxu3  ;;  %v1235_v41 = vadd.f32 %v1234_v33, %v5898_v48 }
 0x1fc   : > { %1620 = vmatmul.bf16.gmra.mxu0 %v1466_v39  ;;  %1709 = vmatmul.bf16.gmra.mxu1 %v1466_v39 }
 0x1fd   : > { %v1324_v43 = vadd.f32 %v1323_v38, %v1235_v41 }
 0x1ff   : > { %v1411_v50 = vmul.f32 0.01, %v1324_v43  ;;  %vm1379_vm0 = vcmp.gt.f32.partialorder %v1324_v43, 0.0 }
 0x201   : > { %v1443_v61 = vsel %vm1379_vm0, %v1324_v43, %v1411_v50 }
 0x202   : > { %v1236_v44 = vpop.f32.mrf.mxu2 }
 0x203   : > { %v1325_v45 = vpop.f32.mrf.mxu3  ;;  %v1237_v47 = vadd.f32 %v1236_v44, %v5904_v58 }
 0x205   : > { %v1326_v51 = vadd.f32 %v1325_v45, %v1237_v47 }
 0x207   : > { %vm1380_vm1 = vcmp.gt.f32.partialorder %v1326_v51, 0.0  ;;  %v1412_v56 = vmul.f32 0.01, %v1326_v51 }
 0x209   : > { %v1586_v60 = vpop.f32.mrf.mxu0  ;;  %v1675_v48 = vpop.f32.mrf.mxu1  ;;  %v1444_v0 = vsel %vm1380_vm1, %v1326_v51, %v1412_v56  ;;  %v2108_v56 = vld [vmem:[%s5836_s30 + $0x8] sm:$0xff] }
 0x20a   : > { %v1587_v52 = vadd.f32 %v1586_v60, %v6015_v54  ;;  %v1676_v58 = vadd.f32 %v1675_v48, %v6017_v55  ;;  %v1239_v53 = vpop.f32.mrf.mxu2  ;;  %v1467_v2 = vpack.c.bf16 %v1444_v0, %v1443_v61 }
 0x20b   : > { %v1328_v1 = vpop.f32.mrf.mxu3  ;;  %v1240_v9 = vadd.f32 %v1239_v53, %v5910_v8 }
 0x20c   : > { %v1819_v3 = vmul.f32 %v1587_v52, %v1587_v52  ;;  %v1755_v5 = vmul.f32 1.442695, %v1676_v58  ;;  %1625 = vmatmul.bf16.gmra.mxu0 %v1467_v2  ;;  %1714 = vmatmul.bf16.gmra.mxu1 %v1467_v2  ;;  %v1883_v62 = vmul.f32 2.0, %v1676_v58 }
 0x20d   : > { %v1329_v14 = vadd.f32 %v1328_v1, %v1240_v9 }
 0x20e   : > { %v1851_v10 = vsub.f32 1.0, %v1819_v3  ;;  %4951 = vpow2.f32 %v1755_v5 }
 0x20f   : > { %v1413_v26 = vmul.f32 0.01, %v1329_v14  ;;  %vm1381_vm3 = vcmp.gt.f32.partialorder %v1329_v14, 0.0 }
 0x210   : > { %v6024_v13 = vadd.f32 %v1883_v62, %v1851_v10 }
 0x211   : > { %v1588_v63 = vpop.f32.mrf.mxu0  ;;  %v1677_v11 = vpop.f32.mrf.mxu1  ;;  %v1445_v43 = vsel %vm1381_vm3, %v1329_v14, %v1413_v26 }
 0x212   : > { %8010 = vst [vmem:[#allocation20_spill] sm:$0xff] %v6024_v13  ;;  %v1589_v15 = vadd.f32 %v1588_v63, %v6015_v54  ;;  %v1678_v16 = vadd.f32 %v1677_v11, %v6017_v55  ;;  %v1241_v17 = vpop.f32.mrf.mxu2  ;;  %v4624_v13 = vld [vmem:[#allocation10 + $0x78] sm:$0xf0] }
 0x213   : > { %v1330_v19 = vpop.f32.mrf.mxu3  ;;  %v1242_v23 = vadd.f32 %v1241_v17, %v5916_v18 }
 0x214   : > { %v4952_v8 = vpop.eup %4951  ;;  %v1820_v24 = vmul.f32 %v1589_v15, %v1589_v15  ;;  %v1757_v25 = vmul.f32 1.442695, %v1678_v16  ;;  %v1884_v36 = vmul.f32 2.0, %v1678_v16 }
 0x215   : > { %v1331_v27 = vadd.f32 %v1330_v19, %v1242_v23  ;;  %v2139_v28 = vmul.f32 %v4952_v8, %v2107_v22  ;;  %v6031_v34 = vmul.f32 %v4952_v8, %v4952_v8 }
 0x216   : > { %v1852_v35 = vsub.f32 1.0, %v1820_v24  ;;  %4953 = vpow2.f32 %v1757_v25 }
 0x217   : > { %8011 = vst [vmem:[#allocation21_spill] sm:$0xff] %v6031_v34  ;;  %vm1382_vm4 = vcmp.gt.f32.partialorder %v1331_v27, 0.0  ;;  %v1414_v37 = vmul.f32 0.01, %v1331_v27  ;;  %v6033_v31 = vadd.f32 %v2139_v28, %v1587_v52  ;;  %v4616_v34 = vld [vmem:[#allocation10 + $0x70] sm:$0xf0] }
 0x218   : > { %v6037_v33 = vadd.f32 %v1884_v36, %v1852_v35 }
 0x219   : > { %8012 = vst [vmem:[#allocation22_spill] sm:$0xff] %v6033_v31  ;;  %v1591_v38 = vpop.f32.mrf.mxu0  ;;  %v1680_v39 = vpop.f32.mrf.mxu1  ;;  %v6042_v41 = vsel %vm2205_vm2, %v6033_v31, -1e+30  ;;  %v1446_v44 = vsel %vm1382_vm4, %v1331_v27, %v1414_v37 }
 0x21a   : > { %8013 = vst [vmem:[#allocation23_spill] sm:$0xff] %v6037_v33  ;;  %v1592_v45 = vadd.f32 %v1591_v38, %v6015_v54  ;;  %v1681_v47 = vadd.f32 %v1680_v39, %v6017_v55  ;;  %v1244_v49 = vpop.f32.mrf.mxu2  ;;  %2238 = vmax.xlane.f32.xlu0 %v6042_v41  ;;  %v1468_v51 = vpack.c.bf16 %v1446_v44, %v1445_v43  ;;  %v4824_v33 = vld [vmem:[#allocation10 + $0x64] sm:$0xf] }
 0x21b   : > { %v1333_v50 = vpop.f32.mrf.mxu3  ;;  %v1245_v0 = vadd.f32 %v1244_v49, %v5922_v32 }
 0x21c   : > { %v4954_v60 = vpop.eup %4953  ;;  %v1821_v48 = vmul.f32 %v1592_v45, %v1592_v45  ;;  %v1759_v61 = vmul.f32 1.442695, %v1681_v47  ;;  %1630 = vmatmul.bf16.gmra.mxu0 %v1468_v51  ;;  %1719 = vmatmul.bf16.gmra.mxu1 %v1468_v51  ;;  %v1885_v1 = vmul.f32 2.0, %v1681_v47 }
 0x21d   : > { %v2140_v52 = vmul.f32 %v4954_v60, %v2108_v56  ;;  %v6049_v58 = vmul.f32 %v4954_v60, %v4954_v60  ;;  %v1334_v7 = vadd.f32 %v1333_v50, %v1245_v0  ;;  %v2110_v56 = vld [vmem:[%s5836_s30 + $0x18] sm:$0xff] }
 0x21e   : > { %v1853_v53 = vsub.f32 1.0, %v1821_v48  ;;  %4955 = vpow2.f32 %v1759_v61 }
 0x21f   : > { %8014 = vst [vmem:[#allocation24_spill] sm:$0xff] %v6049_v58  ;;  %v6051_v2 = vadd.f32 %v2140_v52, %v1589_v15  ;;  %v2109_v15 = vld [vmem:[%s5836_s30 + $0x10] sm:$0xff]  ;;  %v1415_v23 = vmul.f32 0.01, %v1334_v7  ;;  %vm1383_vm5 = vcmp.gt.f32.partialorder %v1334_v7, 0.0 }
 0x220   : > { %v6055_v5 = vadd.f32 %v1885_v1, %v1853_v53 }
 0x221   : > { %8015 = vst [vmem:[#allocation25_spill] sm:$0xff] %v6051_v2  ;;  %v1593_v9 = vpop.f32.mrf.mxu0  ;;  %v1682_v10 = vpop.f32.mrf.mxu1  ;;  %v6060_v32 = vsel %vm2205_vm2, %v6051_v2, -1e+30  ;;  %v1447_v43 = vsel %vm1383_vm5, %v1334_v7, %v1415_v23 }
 0x222   : > { %8016 = vst [vmem:[#allocation26_spill] sm:$0xff] %v6055_v5  ;;  %v1594_v62 = vadd.f32 %v1593_v9, %v6015_v54  ;;  %v1683_v14 = vadd.f32 %v1682_v10, %v6017_v55  ;;  %v1246_v63 = vpop.f32.mrf.mxu2  ;;  %2240 = vmax.xlane.f32.xlu0 %v6060_v32  ;;  %v4664_v5 = vld [vmem:[#allocation10 + $0xd0] sm:$0xf0] }
 0x223   : > { %v1335_v11 = vpop.f32.mrf.mxu3  ;;  %v1247_v16 = vadd.f32 %v1246_v63, %v5928_v42 }
 0x224   : > { %v4956_v17 = vpop.eup %4955  ;;  %v1822_v19 = vmul.f32 %v1594_v62, %v1594_v62  ;;  %v1761_v22 = vmul.f32 1.442695, %v1683_v14  ;;  %v1886_v27 = vmul.f32 2.0, %v1683_v14 }
 0x225   : > { %v1336_v8 = vadd.f32 %v1335_v11, %v1247_v16  ;;  %v2141_v24 = vmul.f32 %v4956_v17, %v2109_v15  ;;  %v6067_v25 = vmul.f32 %v4956_v17, %v4956_v17 }
 0x226   : > { %v1854_v26 = vsub.f32 1.0, %v1822_v19  ;;  %4957 = vpow2.f32 %v1761_v22  ;;  %v2111_v22 = vld [vmem:[%s5836_s30 + $0x20] sm:$0xff] }
 0x227   : > { %8017 = vst [vmem:[#allocation27_spill] sm:$0xff] %v6067_v25  ;;  %vm1384_vm6 = vcmp.gt.f32.partialorder %v1336_v8, 0.0  ;;  %v1416_v28 = vmul.f32 0.01, %v1336_v8  ;;  %v6069_v35 = vadd.f32 %v2141_v24, %v1592_v45 }
 0x228   : > { %v6073_v36 = vadd.f32 %v1886_v27, %v1854_v26 }
 0x229   : > { %8018 = vst [vmem:[#allocation28_spill] sm:$0xff] %v6069_v35  ;;  %v1596_v37 = vpop.f32.mrf.mxu0  ;;  %v1685_v38 = vpop.f32.mrf.mxu1  ;;  %v6078_v39 = vsel %vm2205_vm2, %v6069_v35, -1e+30  ;;  %v1448_v44 = vsel %vm1384_vm6, %v1336_v8, %v1416_v28 }
 0x22a   : > { %8019 = vst [vmem:[#allocation29_spill] sm:$0xff] %v6073_v36  ;;  %v1597_v47 = vadd.f32 %v1596_v37, %v6015_v54  ;;  %v1686_v49 = vadd.f32 %v1685_v38, %v6017_v55  ;;  %v1249_v45 = vpop.f32.mrf.mxu2  ;;  %2242 = vmax.xlane.f32.xlu1 %v6078_v39  ;;  %v1469_v51 = vpack.c.bf16 %v1448_v44, %v1447_v43 }
 0x22b   : > { %v1338_v50 = vpop.f32.mrf.mxu3  ;;  %v1250_v52 = vadd.f32 %v1249_v45, %v5934_v57 }
 0x22c   : > { %v4958_v60 = vpop.eup %4957  ;;  %v1823_v48 = vmul.f32 %v1597_v47, %v1597_v47  ;;  %v1763_v61 = vmul.f32 1.442695, %v1686_v49  ;;  %v1887_v0 = vmul.f32 2.0, %v1686_v49  ;;  %1635 = vmatmul.bf16.gmra.mxu0 %v1469_v51  ;;  %1724 = vmatmul.bf16.gmra.mxu1 %v1469_v51 }
 0x22d   : > { %v2142_v53 = vmul.f32 %v4958_v60, %v2110_v56  ;;  %v6085_v1 = vmul.f32 %v4958_v60, %v4958_v60  ;;  %v1339_v63 = vadd.f32 %v1338_v50, %v1250_v52 }
 0x22e   : > { %v1855_v7 = vsub.f32 1.0, %v1823_v48  ;;  %4959 = vpow2.f32 %v1763_v61 }
 0x22f   : > { %8020 = vst [vmem:[#allocation30_spill] sm:$0xff] %v6085_v1  ;;  %v6087_v9 = vadd.f32 %v2142_v53, %v1594_v62  ;;  %v1417_v27 = vmul.f32 0.01, %v1339_v63  ;;  %vm1385_vm7 = vcmp.gt.f32.partialorder %v1339_v63, 0.0 }
 0x230   : > { %v6091_v14 = vadd.f32 %v1887_v0, %v1855_v7 }
 0x231   : > { %8021 = vst [vmem:[#allocation31_spill] sm:$0xff] %v6087_v9  ;;  %v1598_v11 = vpop.f32.mrf.mxu0  ;;  %v1687_v15 = vpop.f32.mrf.mxu1  ;;  %v6096_v57 = vsel %vm2205_vm2, %v6087_v9, -1e+30  ;;  %v1449_v48 = vsel %vm1385_vm7, %v1339_v63, %v1417_v27 }
 0x232   : > { %8022 = vst [vmem:[#allocation32_spill] sm:$0xff] %v6091_v14  ;;  %v1599_v16 = vadd.f32 %v1598_v11, %v6015_v54  ;;  %v1688_v17 = vadd.f32 %v1687_v15, %v6017_v55  ;;  %v1251_v19 = vpop.f32.mrf.mxu2  ;;  %2244 = vmax.xlane.f32.xlu1 %v6096_v57  ;;  %v2112_v11 = vld [vmem:[%s5836_s30 + $0x28] sm:$0xff]  ;;  %v4656_v14 = vld [vmem:[#allocation10 + $0xb8] sm:$0xf0] }
 0x233   : > { %v1340_v62 = vpop.f32.mrf.mxu3  ;;  %v1252_v23 = vadd.f32 %v1251_v19, %v5940_v4 }
 0x234   : > { %v4960_v8 = vpop.eup %4959  ;;  %v1824_v24 = vmul.f32 %v1599_v16, %v1599_v16  ;;  %v1765_v26 = vmul.f32 1.442695, %v1688_v17  ;;  %v1888_v44 = vmul.f32 2.0, %v1688_v17 }
 0x235   : > { %v1341_v28 = vadd.f32 %v1340_v62, %v1252_v23  ;;  %v2143_v37 = vmul.f32 %v4960_v8, %v2111_v22  ;;  %v6103_v38 = vmul.f32 %v4960_v8, %v4960_v8 }
 0x236   : > { %v1856_v43 = vsub.f32 1.0, %v1824_v24  ;;  %4961 = vpow2.f32 %v1765_v26 }
 0x237   : > { %8023 = vst [vmem:[#allocation33_spill] sm:$0xff] %v6103_v38  ;;  %vm1386_vm8 = vcmp.gt.f32.partialorder %v1341_v28, 0.0  ;;  %v1418_v49 = vmul.f32 0.01, %v1341_v28  ;;  %v6105_v45 = vadd.f32 %v2143_v37, %v1597_v47  ;;  %v4835_v38 = vld [vmem:[#allocation10 + $0xb4] sm:$0xf0] }
 0x238   : > { %v6109_v50 = vadd.f32 %v1888_v44, %v1856_v43 }
 0x239   : > { %8024 = vst [vmem:[#allocation34_spill] sm:$0xff] %v6105_v45  ;;  %v1601_v51 = vpop.f32.mrf.mxu0  ;;  %v1690_v56 = vpop.f32.mrf.mxu1  ;;  %v6114_v60 = vsel %vm2205_vm2, %v6105_v45, -1e+30  ;;  %v1450_v61 = vsel %vm1386_vm8, %v1341_v28, %v1418_v49 }
 0x23a   : > { %8025 = vst [vmem:[#allocation35_spill] sm:$0xff] %v6109_v50  ;;  %v1602_v0 = vadd.f32 %v1601_v51, %v6015_v54  ;;  %v1691_v52 = vadd.f32 %v1690_v56, %v6017_v55  ;;  %v1254_v47 = vpop.f32.mrf.mxu2  ;;  %2246 = vmax.xlane.f32.xlu2 %v6114_v60  ;;  %v1470_v7 = vpack.c.bf16 %v1450_v61, %v1449_v48  ;;  %v2113_v56 = vld [vmem:[%s5836_s30 + $0x30] sm:$0xff] }
 0x23b   : > { %v1343_v53 = vpop.f32.mrf.mxu3  ;;  %v1255_v22 = vadd.f32 %v1254_v47, %v5946_v20 }
 0x23c   : > { %v4962_v15 = vpop.eup %4961  ;;  %v1825_v17 = vmul.f32 %v1602_v0, %v1602_v0  ;;  %v1767_v19 = vmul.f32 1.442695, %v1691_v52  ;;  %v1889_v62 = vmul.f32 2.0, %v1691_v52  ;;  %1640 = vmatmul.bf16.gmra.mxu0 %v1470_v7  ;;  %1729 = vmatmul.bf16.gmra.mxu1 %v1470_v7 }
 0x23d   : > { %v2144_v63 = vmul.f32 %v4962_v15, %v2112_v11  ;;  %v6121_v23 = vmul.f32 %v4962_v15, %v4962_v15  ;;  %v1344_v28 = vadd.f32 %v1343_v53, %v1255_v22 }
 0x23e   : > { %v1857_v8 = vsub.f32 1.0, %v1825_v17  ;;  %4963 = vpow2.f32 %v1767_v19 }
 0x23f   : > { %8026 = vst [vmem:[#allocation36_spill] sm:$0xff] %v6121_v23  ;;  %v6123_v24 = vadd.f32 %v2144_v63, %v1599_v16  ;;  %v1419_v53 = vmul.f32 0.01, %v1344_v28  ;;  %vm1387_vm9 = vcmp.gt.f32.partialorder %v1344_v28, 0.0 }
 0x240   : > { %v6127_v27 = vadd.f32 %v1889_v62, %v1857_v8 }
 0x241   : > { %8027 = vst [vmem:[#allocation37_spill] sm:$0xff] %v6123_v24  ;;  %v1603_v37 = vpop.f32.mrf.mxu0  ;;  %v1692_v43 = vpop.f32.mrf.mxu1  ;;  %v6132_v20 = vsel %vm2205_vm2, %v6123_v24, -1e+30 }
 0x242   : > { %8028 = vst [vmem:[#allocation38_spill] sm:$0xff] %v6127_v27  ;;  %v1604_v44 = vadd.f32 %v1603_v37, %v6015_v54  ;;  %v1693_v49 = vadd.f32 %v1692_v43, %v6017_v55  ;;  %v1256_v51 = vpop.f32.mrf.mxu2  ;;  %2248 = vmax.xlane.f32.xlu2 %v6132_v20  ;;  %v4648_v27 = vld [vmem:[#allocation10 + $0xb0] sm:$0xf0] }
 0x243   : > { %v1345_v16 = vpop.f32.mrf.mxu3  ;;  %v1257_v48 = vadd.f32 %v1256_v51, %v5952_v30  ;;  %v1451_v51 = vsel %vm1387_vm9, %v1344_v28, %v1419_v53 }
 0x244   : > { %v4964_v61 = vpop.eup %4963  ;;  %v1826_v52 = vmul.f32 %v1604_v44, %v1604_v44  ;;  %v1769_v47 = vmul.f32 1.442695, %v1693_v49  ;;  %v1890_v19 = vmul.f32 2.0, %v1693_v49 }
 0x245   : > { %v1346_v7 = vadd.f32 %v1345_v16, %v1257_v48  ;;  %v2145_v11 = vmul.f32 %v4964_v61, %v2113_v56  ;;  %v6139_v15 = vmul.f32 %v4964_v61, %v4964_v61 }
 0x246   : > { %v1858_v17 = vsub.f32 1.0, %v1826_v52  ;;  %4965 = vpow2.f32 %v1769_v47  ;;  %v2114_v52 = vld [vmem:[%s5836_s30 + $0x38] sm:$0xff] }
 0x247   : > { %8029 = vst [vmem:[#allocation39_spill] sm:$0xff] %v6139_v15  ;;  %vm1388_vm10 = vcmp.gt.f32.partialorder %v1346_v7, 0.0  ;;  %v1420_v62 = vmul.f32 0.01, %v1346_v7  ;;  %v6141_v22 = vadd.f32 %v2145_v11, %v1602_v0  ;;  %v4839_v15 = vld [vmem:[#allocation10 + $0xd4] sm:$0xf0] }
 0x248   : > { %v6145_v63 = vadd.f32 %v1890_v19, %v1858_v17 }
 0x249   : > { %8030 = vst [vmem:[#allocation40_spill] sm:$0xff] %v6141_v22  ;;  %v1606_v8 = vpop.f32.mrf.mxu0  ;;  %v1695_v37 = vpop.f32.mrf.mxu1  ;;  %v6150_v43 = vsel %vm2205_vm2, %v6141_v22, -1e+30  ;;  %v1452_v16 = vsel %vm1388_vm10, %v1346_v7, %v1420_v62 }
 0x24a   : > { %8031 = vst [vmem:[#allocation41_spill] sm:$0xff] %v6145_v63  ;;  %v1607_v49 = vadd.f32 %v1606_v8, %v6015_v54  ;;  %v1696_v56 = vadd.f32 %v1695_v37, %v6017_v55  ;;  %v1259_v0 = vpop.f32.mrf.mxu2  ;;  %2250 = vmax.xlane.f32.xlu0 %v6150_v43  ;;  %v1471_v61 = vpack.c.bf16 %v1452_v16, %v1451_v51 }
 0x24b   : > { %v1348_v48 = vpop.f32.mrf.mxu3  ;;  %v1260_v26 = vadd.f32 %v1259_v0, %v5958_v46 }
 0x24c   : > { %v4966_v47 = vpop.eup %4965  ;;  %v1827_v11 = vmul.f32 %v1607_v49, %v1607_v49  ;;  %v1771_v17 = vmul.f32 1.442695, %v1696_v56  ;;  %v1891_v19 = vmul.f32 2.0, %v1696_v56  ;;  %1645 = vmatmul.bf16.gmra.mxu0 %v1471_v61  ;;  %1734 = vmatmul.bf16.gmra.mxu1 %v1471_v61 }
 0x24d   : > { %v2146_v28 = vmul.f32 %v4966_v47, %v2114_v52  ;;  %v6157_v53 = vmul.f32 %v4966_v47, %v4966_v47  ;;  %v1349_v51 = vadd.f32 %v1348_v48, %v1260_v26  ;;  %v2115_v47 = vld [vmem:[%s5836_s30 + $0x40] sm:$0xff] }
 0x24e   : > { %v1859_v7 = vsub.f32 1.0, %v1827_v11  ;;  %4967 = vpow2.f32 %v1771_v17 }
 0x24f   : > { %8032 = vst [vmem:[#allocation42_spill] sm:$0xff] %v6157_v53  ;;  %v6159_v62 = vadd.f32 %v2146_v28, %v1604_v44  ;;  %vm1389_vm11 = vcmp.gt.f32.partialorder %v1349_v51, 0.0  ;;  %v4680_v53 = vld [vmem:[#allocation10 + $0xf0] sm:$0xf0] }
 0x250   : > { %v6163_v37 = vadd.f32 %v1891_v19, %v1859_v7  ;;  %v1421_v19 = vmul.f32 0.01, %v1349_v51 }
 0x251   : > { %8033 = vst [vmem:[#allocation43_spill] sm:$0xff] %v6159_v62  ;;  %v1608_v16 = vpop.f32.mrf.mxu0  ;;  %v1697_v56 = vpop.f32.mrf.mxu1  ;;  %v6168_v46 = vsel %vm2205_vm2, %v6159_v62, -1e+30 }
 0x252   : > { %8034 = vst [vmem:[#allocation44_spill] sm:$0xff] %v6163_v37  ;;  %v6171_v0 = vadd.f32 %v1608_v16, %v6015_v54  ;;  %v1698_v61 = vadd.f32 %v1697_v56, %v6017_v55  ;;  %v1261_v44 = vpop.f32.mrf.mxu2  ;;  %2252 = vmax.xlane.f32.xlu1 %v6168_v46 }
 0x253   : > { %v1350_v52 = vpop.f32.mrf.mxu3  ;;  %v1262_v11 = vadd.f32 %v1261_v44, %v5964_v59 }
 0x254   : > { %v4968_v26 = vpop.eup %4967  ;;  %v1828_v48 = vmul.f32 %v6171_v0, %v6171_v0  ;;  %v1773_v17 = vmul.f32 1.442695, %v1698_v61  ;;  %v1892_v56 = vmul.f32 2.0, %v1698_v61 }
 0x255   : > { %v1351_v28 = vadd.f32 %v1350_v52, %v1262_v11  ;;  %v2147_v7 = vmul.f32 %v4968_v26, %v2115_v47  ;;  %v6179_v8 = vmul.f32 %v4968_v26, %v4968_v26  ;;  %v1453_v47 = vsel %vm1389_vm11, %v1349_v51, %v1421_v19 }
 0x256   : > { %v1860_v16 = vsub.f32 1.0, %v1828_v48  ;;  %4969 = vpow2.f32 %v1773_v17 }
 0x257   : > { %8035 = vst [vmem:[#allocation45_spill] sm:$0xff] %v6179_v8  ;;  %vm1390_vm12 = vcmp.gt.f32.partialorder %v1351_v28, 0.0  ;;  %v1422_v42 = vmul.f32 0.01, %v1351_v28  ;;  %v6181_v30 = vadd.f32 %v2147_v7, %v1607_v49 }
 0x258   : > { %v6185_v44 = vadd.f32 %v1892_v56, %v1860_v16 }
 0x259   : > { %8036 = vst [vmem:[#allocation46_spill] sm:$0xff] %v6181_v30  ;;  %v1611_v4 = vpop.f32.mrf.mxu0  ;;  %v1700_v10 = vpop.f32.mrf.mxu1  ;;  %v6190_v52 = vsel %vm2205_vm2, %v6181_v30, -1e+30  ;;  %v1454_v11 = vsel %vm1390_vm12, %v1351_v28, %v1422_v42 }
 0x25a   : > { %8037 = vst [vmem:[#allocation47_spill] sm:$0xff] %v6185_v44  ;;  %v6193_v61 = vadd.f32 %v1611_v4, %v6015_v54  ;;  %v1701_v49 = vadd.f32 %v1700_v10, %v6017_v55  ;;  %v1264_v26 = vpop.f32.mrf.mxu2  ;;  %2254 = vmax.xlane.f32.xlu1 %v6190_v52  ;;  %v1472_v17 = vpack.c.bf16 %v1454_v11, %v1453_v47  ;;  %v4840_v44 = vld [vmem:[#allocation10 + $0xe4] sm:$0xf] }
 0x25b   : > { %v1353_v48 = vpop.f32.mrf.mxu3  ;;  %v1265_v42 = vadd.f32 %v1264_v26, %v5966_v6 }
 0x25c   : > { %v6197_v7 = vpop.eup %4969  ;;  %v1829_v16 = vmul.f32 %v6193_v61, %v6193_v61  ;;  %v1775_v56 = vmul.f32 1.442695, %v1701_v49  ;;  %v1893_v59 = vmul.f32 2.0, %v1701_v49  ;;  %1650 = vmatmul.bf16.gmra.mxu0 %v1472_v17  ;;  %1739 = vmatmul.bf16.gmra.mxu1 %v1472_v17 }
 0x25d   : > { %v6204_v4 = vmul.f32 %v6197_v7, %v6197_v7  ;;  %v1354_v28 = vadd.f32 %v1353_v48, %v1265_v42 }
 0x25e   : > { %v1861_v10 = vsub.f32 1.0, %v1829_v16  ;;  %4971 = vpow2.f32 %v1775_v56 }
 0x25f   : > { %8038 = vst [vmem:[#allocation48_spill] sm:$0xff] %v6204_v4  ;;  %vm1391_vm13 = vcmp.gt.f32.partialorder %v1354_v28, 0.0 }
 0x260   : > { %v6208_v19 = vadd.f32 %v1893_v59, %v1861_v10  ;;  %v1423_v59 = vmul.f32 0.01, %v1354_v28 }
 0x261   : > { %v1613_v47 = vpop.f32.mrf.mxu0  ;;  %v1702_v11 = vpop.f32.mrf.mxu1 }
 0x262   : > { %8039 = vst [vmem:[#allocation49_spill] sm:$0xff] %v6208_v19  ;;  %v6211_v49 = vadd.f32 %v1613_v47, %v6015_v54  ;;  %v1703_v17 = vadd.f32 %v1702_v11, %v6017_v55  ;;  %v1266_v6 = vpop.f32.mrf.mxu2  ;;  %v1455_v30 = vsel %vm1391_vm13, %v1354_v28, %v1423_v59 }
 0x263   : > { %v1355_v26 = vpop.f32.mrf.mxu3  ;;  %v1267_v3 = vadd.f32 %v1266_v6, %v5972_v21 }
 0x264   : > { %v6215_v18 = vpop.eup %4971  ;;  %v1830_v16 = vmul.f32 %v6211_v49, %v6211_v49  ;;  %v1777_v56 = vmul.f32 1.442695, %v1703_v17  ;;  %v1894_v47 = vmul.f32 2.0, %v1703_v17 }
 0x265   : > { %v1356_v10 = vadd.f32 %v1355_v26, %v1267_v3  ;;  %v6221_v48 = vmul.f32 %v6215_v18, %v6215_v18 }
 0x266   : > { %v1862_v42 = vsub.f32 1.0, %v1830_v16  ;;  %4973 = vpow2.f32 %v1777_v56 }
 0x267   : > { %8040 = vst [vmem:[#allocation50_spill] sm:$0xff] %v6221_v48  ;;  %vm1392_vm14 = vcmp.gt.f32.partialorder %v1356_v10, 0.0  ;;  %v1424_v11 = vmul.f32 0.01, %v1356_v10 }
 0x268   : > { %v6225_v6 = vadd.f32 %v1894_v47, %v1862_v42 }
 0x269   : > { %v1616_v51 = vpop.f32.mrf.mxu0  ;;  %v1705_v22 = vpop.f32.mrf.mxu1  ;;  %v1456_v62 = vsel %vm1392_vm14, %v1356_v10, %v1424_v11 }
 0x26a   : > { %8041 = vst [vmem:[#allocation51_spill] sm:$0xff] %v6225_v6  ;;  %v6228_v3 = vadd.f32 %v1616_v51, %v6015_v54  ;;  %v1706_v26 = vadd.f32 %v1705_v22, %v6017_v55  ;;  %v1269_v9 = vpop.f32.mrf.mxu2  ;;  %v1473_v56 = vpack.c.bf16 %v1456_v62, %v1455_v30 }
 0x26b   : > { %v1358_v16 = vpop.f32.mrf.mxu3  ;;  %v1270_v28 = vadd.f32 %v1269_v9, %v5974_v29 }
 0x26c   : > { %v6231_v17 = vpop.eup %4973  ;;  %v1831_v24 = vmul.f32 %v6228_v3, %v6228_v3  ;;  %v1779_v21 = vmul.f32 1.442695, %v1706_v26  ;;  %v1895_v42 = vmul.f32 2.0, %v1706_v26  ;;  %1655 = vmatmul.bf16.gmra.mxu0 %v1473_v56  ;;  %1744 = vmatmul.bf16.gmra.mxu1 %v1473_v56 }
 0x26d   : > { %v6238_v51 = vmul.f32 %v6231_v17, %v6231_v17  ;;  %v1359_v62 = vadd.f32 %v1358_v16, %v1270_v28 }
 0x26e   : > { %v1863_v59 = vsub.f32 1.0, %v1831_v24  ;;  %4975 = vpow2.f32 %v1779_v21 }
 0x26f   : > { %8042 = vst [vmem:[#allocation52_spill] sm:$0xff] %v6238_v51  ;;  %vm1393_vm15 = vcmp.gt.f32.partialorder %v1359_v62, 0.0 }
 0x270   : > { %v6242_v30 = vadd.f32 %v1895_v42, %v1863_v59  ;;  %v1425_v42 = vmul.f32 0.01, %v1359_v62 }
 0x271   : > { %v1618_v10 = vpop.f32.mrf.mxu0  ;;  %v1707_v47 = vpop.f32.mrf.mxu1 }
 0x272   : > { %8043 = vst [vmem:[#allocation53_spill] sm:$0xff] %v6242_v30  ;;  %v6245_v11 = vadd.f32 %v1618_v10, %v6015_v54  ;;  %v1708_v26 = vadd.f32 %v1707_v47, %v6017_v55  ;;  %v1271_v29 = vpop.f32.mrf.mxu2  ;;  %v1457_v35 = vsel %vm1393_vm15, %v1359_v62, %v1425_v42 }
 0x273   : > { %v1360_v9 = vpop.f32.mrf.mxu3  ;;  %v1272_v56 = vadd.f32 %v1271_v29, %v5980_v40 }
 0x274   : > { %v6249_v45 = vpop.eup %4975  ;;  %v1832_v24 = vmul.f32 %v6245_v11, %v6245_v11  ;;  %v1781_v21 = vmul.f32 1.442695, %v1708_v26  ;;  %v1896_v10 = vmul.f32 2.0, %v1708_v26 }
 0x275   : > { %v1361_v59 = vadd.f32 %v1360_v9, %v1272_v56  ;;  %v6255_v16 = vmul.f32 %v6249_v45, %v6249_v45 }
 0x276   : > { %v1864_v28 = vsub.f32 1.0, %v1832_v24  ;;  %4977 = vpow2.f32 %v1781_v21 }
 0x277   : > { %8044 = vst [vmem:[#allocation54_spill] sm:$0xff] %v6255_v16  ;;  %vm1394_vm0 = vcmp.gt.f32.partialorder %v1361_v59, 0.0  ;;  %v1426_v47 = vmul.f32 0.01, %v1361_v59 }
 0x278   : > { %v6259_v29 = vadd.f32 %v1896_v10, %v1864_v28 }
 0x279   : > { %v1621_v22 = vpop.f32.mrf.mxu0  ;;  %v1710_v31 = vpop.f32.mrf.mxu1  ;;  %v1458_v2 = vsel %vm1394_vm0, %v1361_v59, %v1426_v47 }
 0x27a   : > { %8045 = vst [vmem:[#allocation55_spill] sm:$0xff] %v6259_v29  ;;  %v6262_v9 = vadd.f32 %v1621_v22, %v6015_v54  ;;  %v1711_v56 = vadd.f32 %v1710_v31, %v6017_v55  ;;  %v1474_v51 = vpack.c.bf16 %v1458_v2, %v1457_v35 }
 0x27c   : > { %v6265_v24 = vpop.eup %4977  ;;  %v1833_v26 = vmul.f32 %v6262_v9, %v6262_v9  ;;  %v1783_v21 = vmul.f32 1.442695, %v1711_v56  ;;  %v1897_v6 = vmul.f32 2.0, %v1711_v56  ;;  %1660 = vmatmul.bf16.gmra.mxu0 %v1474_v51  ;;  %1749 = vmatmul.bf16.gmra.mxu1 %v1474_v51 }
 0x27d   : > { %v6271_v28 = vmul.f32 %v6265_v24, %v6265_v24 }
 0x27e   : > { %v1865_v62 = vsub.f32 1.0, %v1833_v26  ;;  %4979 = vpow2.f32 %v1783_v21 }
 0x27f   : > { %8046 = vst [vmem:[#allocation56_spill] sm:$0xff] %v6271_v28 }
 0x280   : > { %v6275_v31 = vadd.f32 %v1897_v6, %v1865_v62 }
 0x281   : > { %v1623_v2 = vpop.f32.mrf.mxu0  ;;  %v1712_v35 = vpop.f32.mrf.mxu1 }
 0x282   : > { %8047 = vst [vmem:[#allocation57_spill] sm:$0xff] %v6275_v31  ;;  %v6278_v42 = vadd.f32 %v1623_v2, %v6015_v54  ;;  %v1713_v59 = vadd.f32 %v1712_v35, %v6017_v55 }
 0x284   : > { %v6281_v10 = vpop.eup %4979  ;;  %v1834_v51 = vmul.f32 %v6278_v42, %v6278_v42  ;;  %v1785_v47 = vmul.f32 1.442695, %v1713_v59  ;;  %v1898_v6 = vmul.f32 2.0, %v1713_v59 }
 0x285   : > { %v6287_v56 = vmul.f32 %v6281_v10, %v6281_v10 }
 0x286   : > { %v1866_v26 = vsub.f32 1.0, %v1834_v51  ;;  %4981 = vpow2.f32 %v1785_v47 }
 0x287   : > { %8048 = vst [vmem:[#allocation58_spill] sm:$0xff] %v6287_v56 }
 0x288   : > { %v6291_v62 = vadd.f32 %v1898_v6, %v1866_v26 }
 0x289   : > { %v1626_v2 = vpop.f32.mrf.mxu0  ;;  %v1715_v35 = vpop.f32.mrf.mxu1 }
 0x28a   : > { %8049 = vst [vmem:[#allocation59_spill] sm:$0xff] %v6291_v62  ;;  %v6294_v22 = vadd.f32 %v1626_v2, %v6015_v54  ;;  %v1716_v40 = vadd.f32 %v1715_v35, %v6017_v55 }
 0x28c   : > { %v6297_v28 = vpop.eup %4981  ;;  %v1835_v29 = vmul.f32 %v6294_v22, %v6294_v22  ;;  %v1787_v51 = vmul.f32 1.442695, %v1716_v40  ;;  %v1899_v6 = vmul.f32 2.0, %v1716_v40 }
 0x28d   : > { %v2239_v47 = vpop.xlane.xlu0 %2238  ;;  %v6303_v59 = vmul.f32 %v6297_v28, %v6297_v28 }
 0x28e   : > { %v1867_v26 = vsub.f32 1.0, %v1835_v29  ;;  %4983 = vpow2.f32 %v1787_v51  ;;  %v2302_v2 = vsub.f32 %v6042_v41, %v2239_v47  ;;  %v2116_v47 = vld [vmem:[%s5836_s30 + $0x48] sm:$0xff] }
 0x28f   : > { %8050 = vst [vmem:[#allocation60_spill] sm:$0xff] %v6303_v59  ;;  %v2148_v59 = vmul.f32 %v6197_v7, %v2116_v47 }
 0x290   : > { %v2334_v21 = vmul.f32 1.442695, %v2302_v2  ;;  %v6308_v56 = vadd.f32 %v1899_v6, %v1867_v26 }
 0x291   : > { %v1628_v31 = vpop.f32.mrf.mxu0  ;;  %v1717_v8 = vpop.f32.mrf.mxu1  ;;  %v6341_v7 = vadd.f32 %v2148_v59, %v6171_v0 }
 0x292   : > { %8051 = vst [vmem:[#allocation61_spill] sm:$0xff] %v6308_v56  ;;  %4985 = vpow2.f32 %v2334_v21  ;;  %v6311_v37 = vadd.f32 %v1628_v31, %v6015_v54  ;;  %v1718_v16 = vadd.f32 %v1717_v8, %v6017_v55 }
 0x293   : > { %8054 = vst [vmem:[#allocation64_spill] sm:$0xff] %v6341_v7  ;;  %v6356_v0 = vsel %vm2205_vm2, %v6341_v7, -1e+30 }
 0x294   : > { %v6314_v29 = vpop.eup %4983  ;;  %v1836_v40 = vmul.f32 %v6311_v37, %v6311_v37  ;;  %v1789_v41 = vmul.f32 1.442695, %v1718_v16  ;;  %v1900_v21 = vmul.f32 2.0, %v1718_v16 }
 0x295   : > { %v2241_v51 = vpop.xlane.xlu0 %2240  ;;  %v6321_v26 = vmul.f32 %v6314_v29, %v6314_v29 }
 0x296   : > { %v1868_v6 = vsub.f32 1.0, %v1836_v40  ;;  %4987 = vpow2.f32 %v1789_v41  ;;  %v2303_v31 = vsub.f32 %v6060_v32, %v2241_v51 }
 0x297   : > { %8052 = vst [vmem:[#allocation62_spill] sm:$0xff] %v6321_v26 }
 0x298   : > { %v6326_v2 = vpop.eup %4985  ;;  %v2336_v35 = vmul.f32 1.442695, %v2303_v31  ;;  %v6329_v62 = vadd.f32 %v1900_v21, %v1868_v6  ;;  %v2117_v6 = vld [vmem:[%s5836_s30 + $0x50] sm:$0xff] }
 0x299   : > { %v1631_v30 = vpop.f32.mrf.mxu0  ;;  %v1720_v48 = vpop.f32.mrf.mxu1  ;;  %2398 = vadd.xlane.f32.xlu2 %v6326_v2  ;;  %v2149_v59 = vmul.f32 %v6215_v18, %v2117_v6 }
 0x29a   : > { %8053 = vst [vmem:[#allocation63_spill] sm:$0xff] %v6329_v62  ;;  %4989 = vpow2.f32 %v2336_v35  ;;  %v6333_v16 = vadd.f32 %v1631_v30, %v6015_v54  ;;  %v1721_v32 = vadd.f32 %v1720_v48, %v6017_v55 }
 0x29b   : > { %v6372_v6 = vadd.f32 %v2149_v59, %v6193_v61 }
 0x29c   : > { %v6336_v40 = vpop.eup %4987  ;;  %v1837_v41 = vmul.f32 %v6333_v16, %v6333_v16  ;;  %v1791_v51 = vmul.f32 1.442695, %v1721_v32  ;;  %v1901_v30 = vmul.f32 2.0, %v1721_v32 }
 0x29d   : > { %v2243_v47 = vpop.xlane.xlu1 %2242  ;;  %v6346_v21 = vmul.f32 %v6336_v40, %v6336_v40  ;;  %8057 = vst [vmem:[#allocation67_spill] sm:$0xff] %v6372_v6  ;;  %v6387_v61 = vsel %vm2205_vm2, %v6372_v6, -1e+30 }
 0x29e   : > { %v1869_v35 = vsub.f32 1.0, %v1837_v41  ;;  %4991 = vpow2.f32 %v1791_v51  ;;  %v2304_v48 = vsub.f32 %v6078_v39, %v2243_v47 }
 0x29f   : > { %8055 = vst [vmem:[#allocation65_spill] sm:$0xff] %v6346_v21 }
 0x2a0   : > { %v6351_v8 = vpop.eup %4989  ;;  %v2338_v26 = vmul.f32 1.442695, %v2304_v48  ;;  %v6359_v56 = vadd.f32 %v1901_v30, %v1869_v35  ;;  %v2118_v30 = vld [vmem:[%s5836_s30 + $0x58] sm:$0xff] }
 0x2a1   : > { %v1633_v41 = vpop.f32.mrf.mxu0  ;;  %v1722_v32 = vpop.f32.mrf.mxu1  ;;  %2256 = vmax.xlane.f32.xlu2 %v6356_v0  ;;  %2400 = vadd.xlane.f32.xlu0 %v6351_v8  ;;  %v2150_v59 = vmul.f32 %v6231_v17, %v2118_v30 }
 0x2a2   : > { %8056 = vst [vmem:[#allocation66_spill] sm:$0xff] %v6359_v56  ;;  %4993 = vpow2.f32 %v2338_v26  ;;  %v6364_v39 = vadd.f32 %v1633_v41, %v6015_v54  ;;  %v1723_v51 = vadd.f32 %v1722_v32, %v6017_v55 }
 0x2a3   : > { %v6403_v30 = vadd.f32 %v2150_v59, %v6211_v49 }
 0x2a4   : > { %v6367_v47 = vpop.eup %4991  ;;  %v1838_v48 = vmul.f32 %v6364_v39, %v6364_v39  ;;  %v1793_v18 = vmul.f32 1.442695, %v1723_v51  ;;  %v1902_v41 = vmul.f32 2.0, %v1723_v51 }
 0x2a5   : > { %v2245_v35 = vpop.xlane.xlu1 %2244  ;;  %v6377_v31 = vmul.f32 %v6367_v47, %v6367_v47  ;;  %8060 = vst [vmem:[#allocation70_spill] sm:$0xff] %v6403_v30  ;;  %v6418_v49 = vsel %vm2205_vm2, %v6403_v30, -1e+30 }
 0x2a6   : > { %v1870_v26 = vsub.f32 1.0, %v1838_v48  ;;  %4995 = vpow2.f32 %v1793_v18  ;;  %v2305_v32 = vsub.f32 %v6096_v57, %v2245_v35 }
 0x2a7   : > { %8058 = vst [vmem:[#allocation68_spill] sm:$0xff] %v6377_v31 }
 0x2a8   : > { %v6382_v21 = vpop.eup %4993  ;;  %v2340_v62 = vmul.f32 1.442695, %v2305_v32  ;;  %v6390_v19 = vadd.f32 %v1902_v41, %v1870_v26  ;;  %v2119_v41 = vld [vmem:[%s5836_s30 + $0x60] sm:$0xff] }
 0x2a9   : > { %v1636_v48 = vpop.f32.mrf.mxu0  ;;  %v1725_v51 = vpop.f32.mrf.mxu1  ;;  %2258 = vmax.xlane.f32.xlu2 %v6387_v61  ;;  %2402 = vadd.xlane.f32.xlu0 %v6382_v21  ;;  %v2151_v59 = vmul.f32 %v6249_v45, %v2119_v41 }
 0x2aa   : > { %8059 = vst [vmem:[#allocation69_spill] sm:$0xff] %v6390_v19  ;;  %4997 = vpow2.f32 %v2340_v62  ;;  %v6395_v57 = vadd.f32 %v1636_v48, %v6015_v54  ;;  %v1726_v18 = vadd.f32 %v1725_v51, %v6017_v55 }
 0x2ab   : > { %v6434_v41 = vadd.f32 %v2151_v59, %v6228_v3 }
 0x2ac   : > { %v6398_v35 = vpop.eup %4995  ;;  %v1839_v32 = vmul.f32 %v6395_v57, %v6395_v57  ;;  %v1795_v17 = vmul.f32 1.442695, %v1726_v18  ;;  %v1903_v48 = vmul.f32 2.0, %v1726_v18 }
 0x2ad   : > { %v2247_v26 = vpop.xlane.xlu2 %2246  ;;  %v6408_v7 = vmul.f32 %v6398_v35, %v6398_v35  ;;  %8063 = vst [vmem:[#allocation73_spill] sm:$0xff] %v6434_v41  ;;  %v6449_v3 = vsel %vm2205_vm2, %v6434_v41, -1e+30  ;;  %v4678_v41 = vld [vmem:[#allocation10 + $0xe0] sm:$0xf] }
 0x2ae   : > { %v1871_v62 = vsub.f32 1.0, %v1839_v32  ;;  %4999 = vpow2.f32 %v1795_v17  ;;  %v2306_v51 = vsub.f32 %v6114_v60, %v2247_v26 }
 0x2af   : > { %8061 = vst [vmem:[#allocation71_spill] sm:$0xff] %v6408_v7 }
 0x2b0   : > { %v6413_v31 = vpop.eup %4997  ;;  %v2342_v56 = vmul.f32 1.442695, %v2306_v51  ;;  %v6421_v23 = vadd.f32 %v1903_v48, %v1871_v62  ;;  %v2120_v48 = vld [vmem:[%s5836_s30 + $0x68] sm:$0xff] }
 0x2b1   : > { %v1638_v32 = vpop.f32.mrf.mxu0  ;;  %v1727_v18 = vpop.f32.mrf.mxu1  ;;  %2404 = vadd.xlane.f32.xlu1 %v6413_v31  ;;  %2260 = vmax.xlane.f32.xlu0 %v6418_v49  ;;  %v2152_v59 = vmul.f32 %v6265_v24, %v2120_v48 }
 0x2b2   : > { %8062 = vst [vmem:[#allocation72_spill] sm:$0xff] %v6421_v23  ;;  %5001 = vpow2.f32 %v2342_v56  ;;  %v6426_v60 = vadd.f32 %v1638_v32, %v6015_v54  ;;  %v1728_v17 = vadd.f32 %v1727_v18, %v6017_v55 }
 0x2b3   : > { %v6465_v48 = vadd.f32 %v2152_v59, %v6245_v11  ;;  %v4841_v11 = vld [vmem:[#allocation10 + $0xec] sm:$0xf] }
 0x2b4   : > { %v6429_v26 = vpop.eup %4999  ;;  %v1840_v51 = vmul.f32 %v6426_v60, %v6426_v60  ;;  %v1797_v45 = vmul.f32 1.442695, %v1728_v17  ;;  %v1904_v32 = vmul.f32 2.0, %v1728_v17 }
 0x2b5   : > { %v2249_v62 = vpop.xlane.xlu2 %2248  ;;  %v6439_v6 = vmul.f32 %v6429_v26, %v6429_v26  ;;  %8066 = vst [vmem:[#allocation76_spill] sm:$0xff] %v6465_v48 }
 0x2b6   : > { %v1872_v56 = vsub.f32 1.0, %v1840_v51  ;;  %5003 = vpow2.f32 %v1797_v45  ;;  %v2307_v18 = vsub.f32 %v6132_v20, %v2249_v62 }
 0x2b7   : > { %8064 = vst [vmem:[#allocation74_spill] sm:$0xff] %v6439_v6  ;;  %v4842_v6 = vld [vmem:[#allocation10 + $0xec] sm:$0xf0] }
 0x2b8   : > { %v6444_v7 = vpop.eup %5001  ;;  %v2344_v19 = vmul.f32 1.442695, %v2307_v18  ;;  %v6452_v50 = vadd.f32 %v1904_v32, %v1872_v56  ;;  %v2121_v56 = vld [vmem:[%s5836_s30 + $0x70] sm:$0xff]  ;;  %v4679_v4 = vor.u32 %v4842_v6, %v4678_v41 }
 0x2b9   : > { %v1641_v51 = vpop.f32.mrf.mxu0  ;;  %v1730_v17 = vpop.f32.mrf.mxu1  ;;  %2406 = vadd.xlane.f32.xlu1 %v6444_v7  ;;  %2262 = vmax.xlane.f32.xlu0 %v6449_v3  ;;  %v2153_v23 = vmul.f32 %v6281_v10, %v2121_v56 }
 0x2ba   : > { %8065 = vst [vmem:[#allocation75_spill] sm:$0xff] %v6452_v50  ;;  %5005 = vpow2.f32 %v2344_v19  ;;  %v6457_v20 = vadd.f32 %v1641_v51, %v6015_v54  ;;  %v1731_v45 = vadd.f32 %v1730_v17, %v6017_v55  ;;  %2734 = vmatpush.bf16.msra.mxu2 %v4679_v4 }
 0x2bb   : > { %v6492_v56 = vadd.f32 %v2153_v23, %v6262_v9  ;;  %v4843_v23 = vld [vmem:[#allocation10 + $0xf4] sm:$0xf0] }
 0x2bc   : > { %v6460_v62 = vpop.eup %5003  ;;  %v1841_v18 = vmul.f32 %v6457_v20, %v6457_v20  ;;  %v1799_v24 = vmul.f32 1.442695, %v1731_v45  ;;  %v1905_v51 = vmul.f32 2.0, %v1731_v45  ;;  %v4683_v45 = vor.u32 %v4840_v44, %v4680_v53 }
 0x2bd   : > { %v2251_v32 = vpop.xlane.xlu0 %2250  ;;  %v6470_v30 = vmul.f32 %v6460_v62, %v6460_v62  ;;  %8069 = vst [vmem:[#allocation79_spill] sm:$0xff] %v6492_v56  ;;  %v6507_v9 = vsel %vm2205_vm2, %v6492_v56, -1e+30 }
 0x2be   : > { %v1873_v19 = vsub.f32 1.0, %v1841_v18  ;;  %5007 = vpow2.f32 %v1799_v24  ;;  %v2308_v17 = vsub.f32 %v6150_v43, %v2251_v32  ;;  %v6481_v18 = vsel %vm2205_vm2, %v6465_v48, -1e+30  ;;  %2823 = vmatpush.bf16.msra.mxu3 %v4683_v45  ;;  %v4686_v45 = vld [vmem:[#allocation10 + $0xe8] sm:$0xf] }
 0x2bf   : > { %8067 = vst [vmem:[#allocation77_spill] sm:$0xff] %v6470_v30  ;;  %v4688_v48 = vld [vmem:[#allocation10 + $0xf8] sm:$0xf0] }
 0x2c0   : > { %v6476_v59 = vpop.eup %5005  ;;  %v2346_v63 = vmul.f32 1.442695, %v2308_v17  ;;  %v6483_v43 = vadd.f32 %v1905_v51, %v1873_v19  ;;  %v2122_v51 = vld [vmem:[%s5836_s30 + $0x78] sm:$0xff] }
 0x2c1   : > { %v1643_v24 = vpop.f32.mrf.mxu0  ;;  %v1732_v10 = vpop.f32.mrf.mxu1  ;;  %2264 = vmax.xlane.f32.xlu1 %v6481_v18  ;;  %2408 = vadd.xlane.f32.xlu2 %v6476_v59 }
 0x2c2   : > { %8068 = vst [vmem:[#allocation78_spill] sm:$0xff] %v6483_v43  ;;  %5009 = vpow2.f32 %v2346_v63  ;;  %v6488_v6 = vadd.f32 %v1643_v24, %v6015_v54  ;;  %v1733_v41 = vadd.f32 %v1732_v10, %v6017_v55  ;;  %v4687_v10 = vor.u32 %v4843_v23, %v4686_v45  ;;  %v4836_v43 = vld [vmem:[#allocation10 + $0xc4] sm:$0xf] }
 0x2c4   : > { %v6494_v53 = vpop.eup %5007  ;;  %v1842_v44 = vmul.f32 %v6488_v6, %v6488_v6  ;;  %v1801_v32 = vmul.f32 1.442695, %v1733_v41  ;;  %v1906_v24 = vmul.f32 2.0, %v1733_v41  ;;  %v2154_v41 = vmul.f32 %v6297_v28, %v2122_v51  ;;  %2912 = vmatpush.bf16.msra.mxu0 %v4687_v10 }
 0x2c5   : > { %v2253_v19 = vpop.xlane.xlu1 %2252  ;;  %v6501_v63 = vmul.f32 %v6494_v53, %v6494_v53 }
 0x2c6   : > { %v1874_v17 = vsub.f32 1.0, %v1842_v44  ;;  %5011 = vpow2.f32 %v1801_v32  ;;  %v2309_v4 = vsub.f32 %v6168_v46, %v2253_v19  ;;  %v4691_v32 = vor.u32 %v4841_v11, %v4688_v48 }
 0x2c7   : > { %8070 = vst [vmem:[#allocation80_spill] sm:$0xff] %v6501_v63  ;;  %v6527_v11 = vadd.f32 %v2154_v41, %v6278_v42 }
 0x2c8   : > { %v6511_v50 = vpop.eup %5009  ;;  %v2348_v44 = vmul.f32 1.442695, %v2309_v4  ;;  %v6514_v46 = vadd.f32 %v1906_v24, %v1874_v17  ;;  %3001 = vmatpush.bf16.msra.mxu1 %v4691_v32  ;;  %v2123_v17 = vld [vmem:[%s5836_s30 + $0x80] sm:$0xff] }
 0x2c9   : > { %v1646_v19 = vpop.f32.mrf.mxu0  ;;  %v1735_v25 = vpop.f32.mrf.mxu1  ;;  %2266 = vmax.xlane.f32.xlu1 %v6507_v9  ;;  %2410 = vadd.xlane.f32.xlu2 %v6511_v50  ;;  %8072 = vst [vmem:[#allocation82_spill] sm:$0xff] %v6527_v11  ;;  %v6542_v42 = vsel %vm2205_vm2, %v6527_v11, -1e+30  ;;  %v2155_v41 = vmul.f32 %v6314_v29, %v2123_v17 }
 0x2ca   : > { %8071 = vst [vmem:[#allocation81_spill] sm:$0xff] %v6514_v46  ;;  %5013 = vpow2.f32 %v2348_v44  ;;  %v6519_v45 = vadd.f32 %v1646_v19, %v6015_v54  ;;  %v1736_v23 = vadd.f32 %v1735_v25, %v6017_v55 }
 0x2cb   : > { %v6558_v17 = vadd.f32 %v2155_v41, %v6294_v22 }
 0x2cc   : > { %v6522_v4 = vpop.eup %5011  ;;  %v1843_v28 = vmul.f32 %v6519_v45, %v6519_v45  ;;  %v1803_v48 = vmul.f32 1.442695, %v1736_v23  ;;  %v1907_v25 = vmul.f32 2.0, %v1736_v23 }
 0x2cd   : > { %v2255_v51 = vpop.xlane.xlu1 %2254  ;;  %v6532_v24 = vmul.f32 %v6522_v4, %v6522_v4  ;;  %8075 = vst [vmem:[#allocation85_spill] sm:$0xff] %v6558_v17  ;;  %v6572_v11 = vsel %vm2205_vm2, %v6558_v17, -1e+30 }
 0x2ce   : > { %v1875_v44 = vsub.f32 1.0, %v1843_v28  ;;  %5015 = vpow2.f32 %v1803_v48  ;;  %v2310_v10 = vsub.f32 %v6190_v52, %v2255_v51 }
 0x2cf   : > { %8073 = vst [vmem:[#allocation83_spill] sm:$0xff] %v6532_v24 }
 0x2d0   : > { %v6537_v19 = vpop.eup %5013  ;;  %v2350_v30 = vmul.f32 1.442695, %v2310_v10  ;;  %v6545_v56 = vadd.f32 %v1907_v25, %v1875_v44  ;;  %v2124_v44 = vld [vmem:[%s5836_s30 + $0x88] sm:$0xff] }
 0x2d1   : > { %v1648_v28 = vpop.f32.mrf.mxu0  ;;  %v1737_v23 = vpop.f32.mrf.mxu1  ;;  %2412 = vadd.xlane.f32.xlu0 %v6537_v19  ;;  %2268 = vmax.xlane.f32.xlu2 %v6542_v42  ;;  %v2156_v22 = vmul.f32 %v6336_v40, %v2124_v44 }
 0x2d2   : > { %8074 = vst [vmem:[#allocation84_spill] sm:$0xff] %v6545_v56  ;;  %5017 = vpow2.f32 %v2350_v30  ;;  %v6550_v52 = vadd.f32 %v1648_v28, %v6015_v54  ;;  %v1738_v48 = vadd.f32 %v1737_v23, %v6017_v55  ;;  %v4838_v56 = vld [vmem:[#allocation10 + $0xcc] sm:$0xf0] }
 0x2d3   : > { %v6589_v44 = vadd.f32 %v2156_v22, %v6311_v37 }
 0x2d4   : > { %v6553_v51 = vpop.eup %5015  ;;  %v1844_v10 = vmul.f32 %v6550_v52, %v6550_v52  ;;  %v1805_v29 = vmul.f32 1.442695, %v1738_v48  ;;  %v1908_v28 = vmul.f32 2.0, %v1738_v48 }
 0x2d5   : > { %v6563_v25 = vmul.f32 %v6553_v51, %v6553_v51  ;;  %8079 = vst [vmem:[#allocation89_spill] sm:$0xff] %v6589_v44  ;;  %v6601_v37 = vsel %vm2205_vm2, %v6589_v44, -1e+30  ;;  %v4837_v44 = vld [vmem:[#allocation10 + $0xcc] sm:$0xf] }
 0x2d6   : > { %v1876_v30 = vsub.f32 1.0, %v1844_v10  ;;  %5019 = vpow2.f32 %v1805_v29  ;;  %v2125_v29 = vld [vmem:[%s5836_s30 + $0x90] sm:$0xff] }
 0x2d7   : > { %8076 = vst [vmem:[#allocation86_spill] sm:$0xff] %v6563_v25 }
 0x2d8   : > { %v6567_v32 = vpop.eup %5017  ;;  %v6575_v41 = vadd.f32 %v1908_v28, %v1876_v30  ;;  %v2157_v30 = vmul.f32 %v6367_v47, %v2125_v29  ;;  %v4667_v47 = vor.u32 %v4836_v43, %v4664_v5  ;;  %v4672_v43 = vld [vmem:[#allocation10 + $0xd8] sm:$0xf0] }
 0x2d9   : > { %8077 = vst [vmem:[#allocation87_spill] sm:$0xff] %v6567_v32  ;;  %v1651_v24 = vpop.f32.mrf.mxu0  ;;  %v1740_v46 = vpop.f32.mrf.mxu1  ;;  %2414 = vadd.xlane.f32.xlu0 %v6567_v32  ;;  %2270 = vmax.xlane.f32.xlu2 %v6572_v11  ;;  %v4592_v32 = vld [vmem:[#allocation10 + $0x38] sm:$0xf0] }
 0x2da   : > { %8078 = vst [vmem:[#allocation88_spill] sm:$0xff] %v6575_v41  ;;  %v6580_v48 = vadd.f32 %v1651_v24, %v6015_v54  ;;  %v1741_v10 = vadd.f32 %v1740_v46, %v6017_v55  ;;  %v4662_v46 = vld [vmem:[#allocation10 + $0xc0] sm:$0xf]  ;;  %2824 = vmatpush.bf16.msra.mxu3 %v4667_v47  ;;  %v4832_v41 = vld [vmem:[#allocation10 + $0xa4] sm:$0xf] }
 0x2db   : > { %v4663_v63 = vor.u32 %v4838_v56, %v4662_v46  ;;  %v4670_v46 = vld [vmem:[#allocation10 + $0xc8] sm:$0xf] }
 0x2dc   : > { %v6584_v23 = vpop.eup %5019  ;;  %v1845_v17 = vmul.f32 %v6580_v48, %v6580_v48  ;;  %v1807_v40 = vmul.f32 1.442695, %v1741_v10  ;;  %v1909_v25 = vmul.f32 2.0, %v1741_v10  ;;  %v6607_v10 = vadd.f32 %v2157_v30, %v6333_v16 }
 0x2dd   : > { %v6594_v28 = vmul.f32 %v6584_v23, %v6584_v23  ;;  %2735 = vmatpush.bf16.msra.mxu2 %v4663_v63  ;;  %v4671_v5 = vor.u32 %v4839_v15, %v4670_v46  ;;  %v4675_v16 = vor.u32 %v4837_v44, %v4672_v43  ;;  %v4654_v44 = vld [vmem:[#allocation10 + $0xa8] sm:$0xf] }
 0x2de   : > { %v1877_v24 = vsub.f32 1.0, %v1845_v17  ;;  %5021 = vpow2.f32 %v1807_v40  ;;  %8082 = vst [vmem:[#allocation92_spill] sm:$0xff] %v6607_v10  ;;  %v6620_v63 = vsel %vm2205_vm2, %v6607_v10, -1e+30  ;;  %v4651_v10 = vor.u32 %v4832_v41, %v4648_v27  ;;  %v4830_v27 = vld [vmem:[#allocation10 + $0x8c] sm:$0xf0] }
 0x2df   : > { %8080 = vst [vmem:[#allocation90_spill] sm:$0xff] %v6594_v28  ;;  %2913 = vmatpush.bf16.msra.mxu0 %v4671_v5  ;;  %3002 = vmatpush.bf16.msra.mxu1 %v4675_v16  ;;  %v4833_v5 = vld [vmem:[#allocation10 + $0xac] sm:$0xf]  ;;  %v4828_v41 = vld [vmem:[#allocation10 + $0x84] sm:$0xf] }
 0x2e0   : > { %v6603_v22 = vadd.f32 %v1909_v25, %v1877_v24  ;;  %2825 = vmatpush.bf16.msra.mxu3 %v4651_v10  ;;  %v4638_v43 = vld [vmem:[#allocation10 + $0x88] sm:$0xf]  ;;  %v4640_v10 = vld [vmem:[#allocation10 + $0x98] sm:$0xf0] }
 0x2e1   : > { %v1653_v29 = vpop.f32.mrf.mxu0  ;;  %v1742_v17 = vpop.f32.mrf.mxu1  ;;  %2272 = vmax.xlane.f32.xlu0 %v6601_v37 }
 0x2e2   : > { %8081 = vst [vmem:[#allocation91_spill] sm:$0xff] %v6603_v22  ;;  %v6610_v56 = vadd.f32 %v1653_v29, %v6015_v54  ;;  %v1743_v40 = vadd.f32 %v1742_v17, %v6017_v55  ;;  %v4646_v29 = vld [vmem:[#allocation10 + $0xa0] sm:$0xf]  ;;  %v4834_v17 = vld [vmem:[#allocation10 + $0xac] sm:$0xf0] }
 0x2e3   : > { %v4647_v46 = vor.u32 %v4834_v17, %v4646_v29  ;;  %v4630_v17 = vld [vmem:[#allocation10 + $0x80] sm:$0xf] }
 0x2e4   : > { %v6613_v25 = vpop.eup %5021  ;;  %v1846_v24 = vmul.f32 %v6610_v56, %v6610_v56  ;;  %v1809_v28 = vmul.f32 1.442695, %v1743_v40  ;;  %v1910_v15 = vmul.f32 2.0, %v1743_v40  ;;  %v4659_v40 = vor.u32 %v4833_v5, %v4656_v14 }
 0x2e5   : > { %v6624_v30 = vmul.f32 %v6613_v25, %v6613_v25  ;;  %2736 = vmatpush.bf16.msra.mxu2 %v4647_v46  ;;  %v4829_v46 = vld [vmem:[#allocation10 + $0x8c] sm:$0xf] }
 0x2e6   : > { %v1878_v47 = vsub.f32 1.0, %v1846_v24  ;;  %5023 = vpow2.f32 %v1809_v28  ;;  %v4655_v28 = vor.u32 %v4835_v38, %v4654_v44  ;;  %3003 = vmatpush.bf16.msra.mxu1 %v4659_v40  ;;  %v4643_v40 = vor.u32 %v4829_v46, %v4640_v10 }
 0x2e7   : > { %8083 = vst [vmem:[#allocation93_spill] sm:$0xff] %v6624_v30  ;;  %v4831_v30 = vld [vmem:[#allocation10 + $0x94] sm:$0xf0] }
 0x2e8   : > { %v6628_v1 = vadd.f32 %v1910_v15, %v1878_v47  ;;  %2914 = vmatpush.bf16.msra.mxu0 %v4655_v28  ;;  %v4631_v47 = vor.u32 %v4830_v27, %v4630_v17  ;;  %v4632_v15 = vld [vmem:[#allocation10 + $0x90] sm:$0xf0]  ;;  %v4639_v44 = vor.u32 %v4831_v30, %v4638_v43  ;;  %v4614_v17 = vld [vmem:[#allocation10 + $0x60] sm:$0xf]  ;;  %v4826_v27 = vld [vmem:[#allocation10 + $0x6c] sm:$0xf0]  ;;  %v4619_v43 = vor.u32 %v4824_v33, %v4616_v34 }
 0x2e9   : > { %v1656_v36 = vpop.f32.mrf.mxu0  ;;  %v1745_v24 = vpop.f32.mrf.mxu1  ;;  %2274 = vmax.xlane.f32.xlu0 %v6620_v63  ;;  %v4615_v58 = vor.u32 %v4826_v27, %v4614_v17  ;;  %v4598_v17 = vld [vmem:[#allocation10 + $0x40] sm:$0xf]  ;;  %v4822_v27 = vld [vmem:[#allocation10 + $0x4c] sm:$0xf0]  ;;  %v4600_v33 = vld [vmem:[#allocation10 + $0x50] sm:$0xf0] }
 0x2ea   : > { %8084 = vst [vmem:[#allocation94_spill] sm:$0xff] %v6628_v1  ;;  %v6632_v16 = vadd.f32 %v1656_v36, %v6015_v54  ;;  %v1746_v29 = vadd.f32 %v1745_v24, %v6017_v55  ;;  %v4635_v36 = vor.u32 %v4828_v41, %v4632_v15  ;;  %2737 = vmatpush.bf16.msra.mxu2 %v4631_v47  ;;  %v4622_v41 = vld [vmem:[#allocation10 + $0x68] sm:$0xf]  ;;  %v4827_v47 = vld [vmem:[#allocation10 + $0x74] sm:$0xf0] }
 0x2eb   : > { %3004 = vmatpush.bf16.msra.mxu1 %v4643_v40  ;;  %v4825_v15 = vld [vmem:[#allocation10 + $0x6c] sm:$0xf]  ;;  %v4820_v40 = vld [vmem:[#allocation10 + $0x44] sm:$0xf]  ;;  %v4599_v34 = vor.u32 %v4822_v27, %v4598_v17  ;;  %v4606_v30 = vld [vmem:[#allocation10 + $0x48] sm:$0xf] }
 0x2ec   : > { %v6635_v22 = vpop.eup %5023  ;;  %v1847_v14 = vmul.f32 %v6632_v16, %v6632_v16  ;;  %v1811_v38 = vmul.f32 1.442695, %v1746_v29  ;;  %v1911_v28 = vmul.f32 2.0, %v1746_v29  ;;  %2826 = vmatpush.bf16.msra.mxu3 %v4635_v36  ;;  %2915 = vmatpush.bf16.msra.mxu0 %v4639_v44  ;;  %v4623_v36 = vor.u32 %v4827_v47, %v4622_v41  ;;  %v4821_v47 = vld [vmem:[#allocation10 + $0x4c] sm:$0xf] }
 0x2ed   : > { %v6641_v5 = vmul.f32 %v6635_v22, %v6635_v22  ;;  %v4627_v46 = vor.u32 %v4825_v15, %v4624_v13  ;;  %v4603_v41 = vor.u32 %v4820_v40, %v4600_v33  ;;  %v4582_v27 = vld [vmem:[#allocation10 + $0x20] sm:$0xf]  ;;  %v4590_v40 = vld [vmem:[#allocation10 + $0x28] sm:$0xf]  ;;  %v4819_v33 = vld [vmem:[#allocation10 + $0x34] sm:$0xf0] }
 0x2ee   : > { %v1879_v24 = vsub.f32 1.0, %v1847_v14  ;;  %5025 = vpow2.f32 %v1811_v38  ;;  %2738 = vmatpush.bf16.msra.mxu2 %v4615_v58 }
 0x2ef   : > { %8085 = vst [vmem:[#allocation95_spill] sm:$0xff] %v6641_v5  ;;  %3005 = vmatpush.bf16.msra.mxu1 %v4627_v46  ;;  %v4818_v5 = vld [vmem:[#allocation10 + $0x2c] sm:$0xf0]  ;;  %v4584_v46 = vld [vmem:[#allocation10 + $0x30] sm:$0xf0] }
 0x2f0   : > { %v6645_v14 = vadd.f32 %v1911_v28, %v1879_v24  ;;  %2827 = vmatpush.bf16.msra.mxu3 %v4619_v43  ;;  %2916 = vmatpush.bf16.msra.mxu0 %v4623_v36  ;;  %v4823_v24 = vld [vmem:[#allocation10 + $0x54] sm:$0xf0]  ;;  %v4608_v43 = vld [vmem:[#allocation10 + $0x58] sm:$0xf0]  ;;  %v4583_v1 = vor.u32 %v4818_v5, %v4582_v27  ;;  %v4814_v27 = vld [vmem:[#allocation10 + $0xc] sm:$0xf0] }
 0x2f1   : > { %v1658_v29 = vpop.f32.mrf.mxu0  ;;  %v1747_v38 = vpop.f32.mrf.mxu1  ;;  %v4607_v15 = vor.u32 %v4823_v24, %v4606_v30  ;;  %v4611_v17 = vor.u32 %v4821_v47, %v4608_v43  ;;  %v4817_v24 = vld [vmem:[#allocation10 + $0x2c] sm:$0xf]  ;;  %v4566_v43 = vld [vmem:[#allocation10] sm:$0xf]  ;;  %v4574_v30 = vld [vmem:[#allocation10 + $0x8] sm:$0xf] }
 0x2f2   : > { %v6648_v44 = vadd.f32 %v1658_v29, %v6015_v54  ;;  %v1748_v10 = vadd.f32 %v1747_v38, %v6017_v55  ;;  %2739 = vmatpush.bf16.msra.mxu2 %v4599_v34  ;;  %v4595_v47 = vor.u32 %v4817_v24, %v4592_v32 }
 0x2f3   : > { %3006 = vmatpush.bf16.msra.mxu1 %v4611_v17  ;;  %v4812_v17 = vld [vmem:[#allocation10 + $0x4] sm:$0xf] }
 0x2f4   : > { %8086 = vst [vmem:[#allocation96_spill] sm:$0xff] %v6648_v44  ;;  %v6651_v28 = vpop.eup %5025  ;;  %v1848_v58 = vmul.f32 %v6648_v44, %v6648_v44  ;;  %v1813_v13 = vmul.f32 1.442695, %v1748_v10  ;;  %v1912_v36 = vmul.f32 2.0, %v1748_v10  ;;  %2828 = vmatpush.bf16.msra.mxu3 %v4603_v41  ;;  %2917 = vmatpush.bf16.msra.mxu0 %v4607_v15  ;;  %v4816_v44 = vld [vmem:[#allocation10 + $0x24] sm:$0xf]  ;;  %v4591_v41 = vor.u32 %v4819_v33, %v4590_v40 }
 0x2f5   : > { %v6657_v29 = vmul.f32 %v6651_v28, %v6651_v28  ;;  %v4587_v34 = vor.u32 %v4816_v44, %v4584_v46  ;;  %v4567_v44 = vor.u32 %v4814_v27, %v4566_v43  ;;  %v4568_v46 = vld [vmem:[#allocation10 + $0x10] sm:$0xf0]  ;;  %v4813_v33 = vld [vmem:[#allocation10 + $0xc] sm:$0xf] }
 0x2f6   : > { %v1880_v38 = vsub.f32 1.0, %v1848_v58  ;;  %5027 = vpow2.f32 %v1813_v13  ;;  %2740 = vmatpush.bf16.msra.mxu2 %v4583_v1  ;;  %v4571_v40 = vor.u32 %v4812_v17, %v4568_v46 }
 0x2f7   : > { %3007 = vmatpush.bf16.msra.mxu1 %v4595_v47 }
 0x2f8   : > { %v6661_v58 = vadd.f32 %v1912_v36, %v1880_v38  ;;  %2829 = vmatpush.bf16.msra.mxu3 %v4587_v34  ;;  %2918 = vmatpush.bf16.msra.mxu0 %v4591_v41  ;;  %v4815_v38 = vld [vmem:[#allocation10 + $0x14] sm:$0xf0]  ;;  %v4576_v34 = vld [vmem:[#allocation10 + $0x18] sm:$0xf0] }
 0x2f9   : > { %v1661_v10 = vpop.f32.mrf.mxu0  ;;  %v1750_v13 = vpop.f32.mrf.mxu1  ;;  %v4575_v24 = vor.u32 %v4815_v38, %v4574_v30  ;;  %v4579_v43 = vor.u32 %v4813_v33, %v4576_v34 }
 0x2fa   : > { %8087 = vst [vmem:[#allocation97_spill] sm:$0xff] %v6661_v58  ;;  %v6664_v5 = vadd.f32 %v1661_v10, %v6015_v54  ;;  %v1751_v15 = vadd.f32 %v1750_v13, %v6017_v55  ;;  %2741 = vmatpush.bf16.msra.mxu2 %v4567_v44 }
 0x2fb   : > { %3008 = vmatpush.bf16.msra.mxu1 %v4579_v43 }
 0x2fc   : > { %v6667_v36 = vpop.eup %5027  ;;  %v1849_v1 = vmul.f32 %v6664_v5, %v6664_v5  ;;  %v1815_v32 = vmul.f32 1.442695, %v1751_v15  ;;  %v1913_v41 = vmul.f32 2.0, %v1751_v15  ;;  %2830 = vmatpush.bf16.msra.mxu3 %v4571_v40  ;;  %2919 = vmatpush.bf16.msra.mxu0 %v4575_v24 }
 0x2fd   : > { %v6673_v10 = vmul.f32 %v6667_v36, %v6667_v36 }
 0x2fe   : > { %v1881_v13 = vsub.f32 1.0, %v1849_v1  ;;  %5029 = vpow2.f32 %v1815_v32 }
 0x2ff   : > { %8088 = vst [vmem:[#allocation98_spill] sm:$0xff] %v6673_v10 }
 0x300   : > { %v6677_v47 = vadd.f32 %v1913_v41, %v1881_v13 }
 0x301   : > { %v1663_v17 = vpop.f32.mrf.mxu0  ;;  %v1752_v44 = vpop.f32.mrf.mxu1 }
 0x302   : > { %v6680_v30 = vadd.f32 %v1663_v17, %v6015_v54  ;;  %v1753_v46 = vadd.f32 %v1752_v44, %v6017_v55 }
 0x304   : > { %v6683_v38 = vpop.eup %5029  ;;  %v1850_v15 = vmul.f32 %v6680_v30, %v6680_v30  ;;  %v1817_v1 = vmul.f32 1.442695, %v1753_v46  ;;  %v1914_v33 = vmul.f32 2.0, %v1753_v46 }
 0x305   : > { %v6689_v32 = vmul.f32 %v6683_v38, %v6683_v38 }
 0x306   : > { %v1882_v40 = vsub.f32 1.0, %v1850_v15  ;;  %5031 = vpow2.f32 %v1817_v1 }
 0x308   : > { %v6693_v54 = vadd.f32 %v1914_v33, %v1882_v40 }
 0x30c   : > { %v6695_v34 = vpop.eup %5031  ;;  %v2399_v55 = vpop.xlane.xlu2 %2398 }
 0x30d   : > { %v6699_v13 = vmul.f32 %v6695_v34, %v6695_v34  ;;  %5033 = vrcp.f32 %v2399_v55 }
 0x313   : > { %v5034_v15 = vpop.eup %5033 }
 0x314   : > { %v2257_v43 = vpop.xlane.xlu2 %2256  ;;  %v2401_v17 = vpop.xlane.xlu0 %2400  ;;  %v2494_v40 = vmul.f32 %v5034_v15, %v6326_v2 }
 0x315   : > { %v2311_v44 = vsub.f32 %v6356_v0, %v2257_v43  ;;  %5035 = vrcp.f32 %v2401_v17 }
 0x317   : > { %v2352_v46 = vmul.f32 1.442695, %v2311_v44 }
 0x319   : > { %5037 = vpow2.f32 %v2352_v46 }
 0x31b   : > { %v5036_v1 = vpop.eup %5035 }
 0x31c   : > { %v2495_v33 = vmul.f32 %v5036_v1, %v6351_v8  ;;  %v2259_v27 = vpop.xlane.xlu2 %2258  ;;  %v2403_v24 = vpop.xlane.xlu0 %2402  ;;  %v2126_v8 = vld [vmem:[%s5836_s30 + $0x98] sm:$0xff] }
 0x31d   : > { %v2312_v10 = vsub.f32 %v6387_v61, %v2259_v27 }
 0x31e   : > { %v2526_v41 = vpack.c.bf16 %v2495_v33, %v2494_v40 }
 0x31f   : > { %v6707_v55 = vpop.eup %5037  ;;  %v2354_v58 = vmul.f32 1.442695, %v2312_v10  ;;  %v2158_v10 = vmul.f32 %v6398_v35, %v2126_v8  ;;  %v2128_v8 = vld [vmem:[%s5836_s30 + $0xa8] sm:$0xff] }
 0x320   : > { %2416 = vadd.xlane.f32.xlu1 %v6707_v55  ;;  %2742 = vmatmul.bf16.vlgmr.msra.gmra.mxu2 %v2526_v41 }
 0x321   : > { %5039 = vpow2.f32 %v2354_v58  ;;  %2831 = vmatmul.bf16.vlgmr.msra.gmra.mxu3 %v2526_v41  ;;  %2920 = vmatmul.bf16.vlgmr.msra.gmra.mxu0 %v2526_v41 }
 0x322   : > { %3009 = vmatmul.bf16.vlgmr.msra.gmra.mxu1 %v2526_v41  ;;  %5041 = vrcp.f32 %v2403_v24  ;;  %v6717_v41 = vadd.f32 %v2158_v10, %v6364_v39 }
 0x324   : > { %v2405_v2 = vpop.xlane.xlu1 %2404  ;;  %v2261_v0 = vpop.xlane.xlu0 %2260  ;;  %8089 = vst [vmem:[#allocation99_spill] sm:$0xff] %v6717_v41 }
 0x325   : > { %5043 = vrcp.f32 %v2405_v2  ;;  %v2313_v43 = vsub.f32 %v6418_v49, %v2261_v0  ;;  %v2127_v49 = vld [vmem:[%s5836_s30 + $0xa0] sm:$0xff]  ;;  %v6728_v2 = vsel %vm2205_vm2, %v6717_v41, -1e+30 }
 0x326   : > { %v2159_v39 = vmul.f32 %v6429_v26, %v2127_v49 }
 0x327   : > { %v6712_v61 = vpop.eup %5039  ;;  %v2356_v27 = vmul.f32 1.442695, %v2313_v43 }
 0x328   : > { %2418 = vadd.xlane.f32.xlu1 %v6712_v61  ;;  %v5042_v17 = vpop.eup %5041 }
 0x329   : > { %5045 = vpow2.f32 %v2356_v27  ;;  %v2496_v24 = vmul.f32 %v5042_v17, %v6382_v21  ;;  %v6734_v21 = vadd.f32 %v2159_v39, %v6395_v57  ;;  %v2160_v57 = vmul.f32 %v6460_v62, %v2128_v8 }
 0x32b   : > { %v5044_v58 = vpop.eup %5043  ;;  %8090 = vst [vmem:[#allocation100_spill] sm:$0xff] %v6734_v21  ;;  %v6743_v27 = vsel %vm2205_vm2, %v6734_v21, -1e+30 }
 0x32c   : > { %v2497_v44 = vmul.f32 %v5044_v58, %v6413_v31  ;;  %v2407_v46 = vpop.xlane.xlu1 %2406  ;;  %v2263_v15 = vpop.xlane.xlu0 %2262 }
 0x32d   : > { %v2314_v1 = vsub.f32 %v6449_v3, %v2263_v15  ;;  %v6752_v15 = vadd.f32 %v2160_v57, %v6426_v60 }
 0x32e   : > { %v2527_v40 = vpack.c.bf16 %v2497_v44, %v2496_v24 }
 0x32f   : > { %v6723_v33 = vpop.eup %5045  ;;  %v2358_v35 = vmul.f32 1.442695, %v2314_v1  ;;  %8091 = vst [vmem:[#allocation101_spill] sm:$0xff] %v6752_v15  ;;  %v2129_v1 = vld [vmem:[%s5836_s30 + $0xb0] sm:$0xff] }
 0x330   : > { %2276 = vmax.xlane.f32.xlu1 %v6728_v2  ;;  %2747 = vmatmul.bf16.gmra.mxu2 %v2527_v40  ;;  %v2161_v60 = vmul.f32 %v6494_v53, %v2129_v1 }
 0x331   : > { %5047 = vpow2.f32 %v2358_v35  ;;  %2836 = vmatmul.bf16.gmra.mxu3 %v2527_v40  ;;  %2925 = vmatmul.bf16.gmra.mxu0 %v2527_v40  ;;  %v2130_v35 = vld [vmem:[%s5836_s30 + $0xb8] sm:$0xff] }
 0x332   : > { %3014 = vmatmul.bf16.gmra.mxu1 %v2527_v40  ;;  %2420 = vadd.xlane.f32.xlu2 %v6723_v33  ;;  %5049 = vrcp.f32 %v2407_v46  ;;  %v2162_v8 = vmul.f32 %v6522_v4, %v2130_v35 }
 0x334   : > { %v2265_v31 = vpop.xlane.xlu1 %2264  ;;  %v2409_v3 = vpop.xlane.xlu2 %2408 }
 0x335   : > { %v2315_v0 = vsub.f32 %v6481_v18, %v2265_v31  ;;  %5051 = vrcp.f32 %v2409_v3  ;;  %v6768_v31 = vadd.f32 %v2161_v60, %v6457_v20  ;;  %v6781_v20 = vadd.f32 %v2162_v8, %v6488_v6 }
 0x337   : > { %v6738_v26 = vpop.eup %5047  ;;  %v2360_v43 = vmul.f32 1.442695, %v2315_v0  ;;  %8092 = vst [vmem:[#allocation102_spill] sm:$0xff] %v6768_v31 }
 0x338   : > { %2278 = vmax.xlane.f32.xlu1 %v6743_v27  ;;  %v5050_v10 = vpop.eup %5049  ;;  %8093 = vst [vmem:[#allocation103_spill] sm:$0xff] %v6781_v20 }
 0x339   : > { %5053 = vpow2.f32 %v2360_v43  ;;  %v2498_v17 = vmul.f32 %v5050_v10, %v6444_v7  ;;  %v6761_v7 = vsel %vm2205_vm2, %v6752_v15, -1e+30  ;;  %v6777_v43 = vsel %vm2205_vm2, %v6768_v31, -1e+30 }
 0x33a   : > { %2422 = vadd.xlane.f32.xlu2 %v6738_v26 }
 0x33b   : > { %v5052_v18 = vpop.eup %5051 }
 0x33c   : > { %v2499_v58 = vmul.f32 %v5052_v18, %v6476_v59  ;;  %v2267_v24 = vpop.xlane.xlu1 %2266  ;;  %v2411_v44 = vpop.xlane.xlu2 %2410 }
 0x33d   : > { %v2316_v46 = vsub.f32 %v6507_v9, %v2267_v24 }
 0x33e   : > { %v2528_v49 = vpack.c.bf16 %v2499_v58, %v2498_v17  ;;  %v2131_v17 = vld [vmem:[%s5836_s30 + $0xc0] sm:$0xff] }
 0x33f   : > { %v6755_v40 = vpop.eup %5053  ;;  %v2362_v62 = vmul.f32 1.442695, %v2316_v46  ;;  %v2163_v6 = vmul.f32 %v6553_v51, %v2131_v17 }
 0x340   : > { %2424 = vadd.xlane.f32.xlu0 %v6755_v40  ;;  %2752 = vmatmul.bf16.gmra.mxu2 %v2528_v49 }
 0x341   : > { %5055 = vpow2.f32 %v2362_v62  ;;  %2841 = vmatmul.bf16.gmra.mxu3 %v2528_v49  ;;  %2930 = vmatmul.bf16.gmra.mxu0 %v2528_v49 }
 0x342   : > { %3019 = vmatmul.bf16.gmra.mxu1 %v2528_v49  ;;  %2280 = vmax.xlane.f32.xlu2 %v6761_v7  ;;  %5057 = vrcp.f32 %v2411_v44  ;;  %v6792_v49 = vsel %vm2205_vm2, %v6781_v20, -1e+30 }
 0x344   : > { %v2269_v59 = vpop.xlane.xlu2 %2268  ;;  %v2413_v9 = vpop.xlane.xlu0 %2412 }
 0x345   : > { %v2317_v39 = vsub.f32 %v6542_v42, %v2269_v59  ;;  %5059 = vrcp.f32 %v2413_v9  ;;  %v2133_v9 = vld [vmem:[%s5836_s30 + $0xd0] sm:$0xff] }
 0x346   : > { %v2165_v8 = vmul.f32 %v6613_v25, %v2133_v9 }
 0x347   : > { %v6770_v3 = vpop.eup %5055  ;;  %v2364_v0 = vmul.f32 1.442695, %v2317_v39 }
 0x348   : > { %2426 = vadd.xlane.f32.xlu0 %v6770_v3  ;;  %v5058_v53 = vpop.eup %5057 }
 0x349   : > { %5061 = vpow2.f32 %v2364_v0  ;;  %v2500_v10 = vmul.f32 %v5058_v53, %v6511_v50  ;;  %v6798_v50 = vadd.f32 %v2163_v6, %v6519_v45 }
 0x34a   : > { %2282 = vmax.xlane.f32.xlu2 %v6777_v43 }
 0x34b   : > { %v5060_v42 = vpop.eup %5059  ;;  %8094 = vst [vmem:[#allocation104_spill] sm:$0xff] %v6798_v50  ;;  %v6807_v60 = vsel %vm2205_vm2, %v6798_v50, -1e+30 }
 0x34c   : > { %v2501_v57 = vmul.f32 %v5060_v42, %v6537_v19  ;;  %v2271_v4 = vpop.xlane.xlu2 %2270  ;;  %v2415_v18 = vpop.xlane.xlu0 %2414  ;;  %v2132_v19 = vld [vmem:[%s5836_s30 + $0xc8] sm:$0xff] }
 0x34d   : > { %v2318_v58 = vsub.f32 %v6572_v11, %v2271_v4  ;;  %v2164_v59 = vmul.f32 %v6584_v23, %v2132_v19 }
 0x34e   : > { %v2529_v24 = vpack.c.bf16 %v2501_v57, %v2500_v10  ;;  %v2135_v57 = vld [vmem:[%s5836_s30 + $0xe0] sm:$0xff] }
 0x34f   : > { %v6787_v44 = vpop.eup %5061  ;;  %v2366_v46 = vmul.f32 1.442695, %v2318_v58  ;;  %v6813_v45 = vadd.f32 %v2164_v59, %v6550_v52  ;;  %v6828_v52 = vadd.f32 %v2165_v8, %v6580_v48  ;;  %v2167_v4 = vmul.f32 %v6651_v28, %v2135_v57 }
 0x350   : > { %2284 = vmax.xlane.f32.xlu0 %v6792_v49  ;;  %2428 = vadd.xlane.f32.xlu1 %v6787_v44 }
 0x351   : > { %5063 = vpow2.f32 %v2366_v46  ;;  %2757 = vmatmul.bf16.gmra.mxu2 %v2529_v24  ;;  %2846 = vmatmul.bf16.gmra.mxu3 %v2529_v24  ;;  %8095 = vst [vmem:[#allocation105_spill] sm:$0xff] %v6813_v45  ;;  %v6822_v23 = vsel %vm2205_vm2, %v6813_v45, -1e+30  ;;  %v6836_v42 = vsel %vm2205_vm2, %v6828_v52, -1e+30  ;;  %v6853_v17 = vadd.f32 %v2167_v4, %v6632_v16  ;;  %v8099_v46 = vld [vmem:[#allocation87_spill] sm:$0xff] }
 0x352   : > { %2935 = vmatmul.bf16.gmra.mxu0 %v2529_v24  ;;  %3024 = vmatmul.bf16.gmra.mxu1 %v2529_v24  ;;  %8096 = vst [vmem:[#allocation106_spill] sm:$0xff] %v6828_v52  ;;  %v367_v4 = vld [vmem:[%s5826_s26] sm:$0xff] }
 0x353   : > { %8098 = vst [vmem:[#allocation108_spill] sm:$0xff] %v6853_v17 }
 0x354   : > { %v2273_v11 = vpop.xlane.xlu0 %2272 }
 0x355   : > { %v2319_v1 = vsub.f32 %v6601_v37, %v2273_v11 }
 0x357   : > { %v6802_v62 = vpop.eup %5063  ;;  %v2368_v51 = vmul.f32 1.442695, %v2319_v1 }
 0x358   : > { %2286 = vmax.xlane.f32.xlu0 %v6807_v60  ;;  %2430 = vadd.xlane.f32.xlu1 %v6802_v62 }
 0x359   : > { %5065 = vpow2.f32 %v2368_v51 }
 0x35c   : > { %v2275_v37 = vpop.xlane.xlu0 %2274 }
 0x35d   : > { %v2320_v35 = vsub.f32 %v6620_v63, %v2275_v37  ;;  %v2134_v63 = vld [vmem:[%s5836_s30 + $0xd8] sm:$0xff] }
 0x35e   : > { %v2166_v10 = vmul.f32 %v6635_v22, %v2134_v63  ;;  %v6858_v22 = vsel %vm2205_vm2, %v6853_v17, -1e+30 }
 0x35f   : > { %v6817_v39 = vpop.eup %5065  ;;  %v2370_v0 = vmul.f32 1.442695, %v2320_v35 }
 0x360   : > { %2288 = vmax.xlane.f32.xlu1 %v6822_v23  ;;  %2432 = vadd.xlane.f32.xlu2 %v6817_v39  ;;  %v6842_v25 = vadd.f32 %v2166_v10, %v6610_v56 }
 0x361   : > { %5067 = vpow2.f32 %v2370_v0 }
 0x362   : > { %8097 = vst [vmem:[#allocation107_spill] sm:$0xff] %v6842_v25  ;;  %v6848_v48 = vsel %vm2205_vm2, %v6842_v25, -1e+30  ;;  %5069 = vrcp.f32 %v2415_v18 }
 0x367   : > { %v6831_v53 = vpop.eup %5067 }
 0x368   : > { %2290 = vmax.xlane.f32.xlu1 %v6836_v42  ;;  %2434 = vadd.xlane.f32.xlu2 %v6831_v53  ;;  %v5070_v58 = vpop.eup %5069 }
 0x369   : > { %v2502_v6 = vmul.f32 %v5070_v58, %v8099_v46  ;;  %v3346_v46 = vunpack.c.l.bf16 %v367_v4 }
 0x370   : > { %2292 = vmax.xlane.f32.xlu2 %v6848_v48 }
 0x378   : > { %2294 = vmax.xlane.f32.xlu2 %v6858_v22 }
 0x393   : > { %v2417_v56 = vpop.xlane.xlu1 %2416 }
 0x394   : > { %5071 = vrcp.f32 %v2417_v56 }
 0x39a   : > { %v5072_v24 = vpop.eup %5071 }
 0x39b   : > { %v2503_v28 = vmul.f32 %v5072_v24, %v6707_v55  ;;  %v2419_v11 = vpop.xlane.xlu1 %2418 }
 0x39c   : > { %5073 = vrcp.f32 %v2419_v11 }
 0x39d   : > { %v2530_v19 = vpack.c.bf16 %v2503_v28, %v2502_v6 }
 0x39e   : > { %v2921_v16 = vpop.f32.mrf.mxu0 }
 0x39f   : > { %v3010_v1 = vpop.f32.mrf.mxu1  ;;  %2762 = vmatmul.bf16.gmra.mxu2 %v2530_v19  ;;  %2851 = vmatmul.bf16.gmra.mxu3 %v2530_v19  ;;  %v2922_v51 = vadd.f32 1e-30, %v2921_v16 }
 0x3a0   : > { %2940 = vmatmul.bf16.gmra.mxu0 %v2530_v19  ;;  %3029 = vmatmul.bf16.gmra.mxu1 %v2530_v19  ;;  %v3011_v59 = vadd.f32 1e-30, %v3010_v1  ;;  %v3347_v19 = vunpack.c.h.bf16 %v367_v4 }
 0x3a1   : > { %5075 = vlog2.f32 %v2922_v51 }
 0x3a2   : > { %5077 = vlog2.f32 %v3011_v59  ;;  %v5074_v56 = vpop.eup %5073 }
 0x3a3   : > { %v2277_v18 = vpop.xlane.xlu1 %2276  ;;  %v2743_v37 = vpop.f32.mrf.mxu2  ;;  %v2504_v17 = vmul.f32 %v5074_v56, %v6712_v61 }
 0x3a4   : > { %v2321_v9 = vsub.f32 %v6728_v2, %v2277_v18  ;;  %v2744_v35 = vadd.f32 1e-30, %v2743_v37  ;;  %v2832_v55 = vpop.f32.mrf.mxu3  ;;  %v368_v2 = vld [vmem:[%s5826_s26 + $0x8] sm:$0xff] }
 0x3a5   : > { %v2833_v0 = vadd.f32 1e-30, %v2832_v55  ;;  %v2421_v8 = vpop.xlane.xlu2 %2420 }
 0x3a6   : > { %v2372_v63 = vmul.f32 1.442695, %v2321_v9  ;;  %5079 = vlog2.f32 %v2744_v35  ;;  %v6864_v10 = vpop.f32.mrf.mxu0  ;;  %v3348_v35 = vunpack.c.l.bf16 %v368_v2 }
 0x3a7   : > { %5081 = vlog2.f32 %v2833_v0  ;;  %v6866_v57 = vpop.f32.mrf.mxu1  ;;  %v5076_v58 = vpop.eup %5075 }
 0x3a8   : > { %5083 = vpow2.f32 %v2372_v63  ;;  %v5078_v24 = vpop.eup %5077  ;;  %v3095_v9 = vmul.f32 0.6931472, %v5076_v58 }
 0x3a9   : > { %5085 = vrcp.f32 %v2421_v8 }
 0x3aa   : > { %v3476_v50 = vmul.f32 %v3348_v35, %v3095_v9 }
 0x3ab   : > { %v2279_v6 = vpop.xlane.xlu1 %2278  ;;  %v6870_v28 = vpop.f32.mrf.mxu2 }
 0x3ac   : > { %v5080_v11 = vpop.eup %5079  ;;  %v2322_v16 = vsub.f32 %v6743_v27, %v2279_v6  ;;  %v6873_v1 = vpop.f32.mrf.mxu3  ;;  %v3349_v27 = vunpack.c.h.bf16 %v368_v2  ;;  %v3097_v6 = vmul.f32 0.6931472, %v5078_v24 }
 0x3ad   : > { %v5082_v51 = vpop.eup %5081  ;;  %v3091_v59 = vmul.f32 0.6931472, %v5080_v11  ;;  %v2423_v18 = vpop.xlane.xlu2 %2422 }
 0x3ae   : > { %v6875_v37 = vpop.eup %5083  ;;  %v3093_v55 = vmul.f32 0.6931472, %v5082_v51  ;;  %v2374_v0 = vmul.f32 1.442695, %v2322_v16  ;;  %v2926_v8 = vpop.f32.mrf.mxu0  ;;  %v2136_v51 = vld [vmem:[%s5836_s30 + $0xe8] sm:$0xff]  ;;  %v3477_v2 = vmul.f32 %v3349_v27, %v3097_v6 }
 0x3af   : > { %v5086_v63 = vpop.eup %5085  ;;  %v3474_v25 = vmul.f32 %v3346_v46, %v3091_v59  ;;  %v2927_v4 = vadd.f32 1e-30, %v2926_v8  ;;  %v3015_v52 = vpop.f32.mrf.mxu1  ;;  %2436 = vadd.xlane.f32.xlu0 %v6875_v37  ;;  %v371_v59 = vld [vmem:[%s5826_s26 + $0x20] sm:$0xff] }
 0x3b0   : > { %v3475_v11 = vmul.f32 %v3347_v19, %v3093_v55  ;;  %v2505_v45 = vmul.f32 %v5086_v63, %v6723_v33  ;;  %5087 = vpow2.f32 %v2374_v0  ;;  %v3016_v58 = vadd.f32 1e-30, %v3015_v52  ;;  %v372_v0 = vld [vmem:[%s5826_s26 + $0x28] sm:$0xff] }
 0x3b1   : > { %5089 = vrcp.f32 %v2423_v18  ;;  %v3354_v63 = vunpack.c.l.bf16 %v371_v59 }
 0x3b2   : > { %v2531_v16 = vpack.c.bf16 %v2505_v45, %v2504_v17  ;;  %v3602_v20 = vadd.f32 %v3475_v11, %v3474_v25  ;;  %5091 = vlog2.f32 %v2927_v4  ;;  %v2168_v45 = vmul.f32 %v6667_v36, %v2136_v51  ;;  %v8101_v36 = vld [vmem:[#allocation96_spill] sm:$0xff] }
 0x3b3   : > { %v2748_v31 = vpop.f32.mrf.mxu2  ;;  %v2425_v61 = vpop.xlane.xlu0 %2424  ;;  %v3355_v11 = vunpack.c.h.bf16 %v371_v59 }
 0x3b4   : > { %2767 = vmatmul.bf16.gmra.mxu2 %v2531_v16  ;;  %2856 = vmatmul.bf16.gmra.mxu3 %v2531_v16  ;;  %v2749_v56 = vadd.f32 1e-30, %v2748_v31  ;;  %v2837_v46 = vpop.f32.mrf.mxu3  ;;  %5093 = vrcp.f32 %v2425_v61  ;;  %v3603_v24 = vadd.f32 %v3602_v20, %v3476_v50  ;;  %v6894_v35 = vadd.f32 %v2168_v45, %v8101_v36 }
 0x3b5   : > { %5095 = vlog2.f32 %v3016_v58  ;;  %2945 = vmatmul.bf16.gmra.mxu0 %v2531_v16  ;;  %3034 = vmatmul.bf16.gmra.mxu1 %v2531_v16  ;;  %v2838_v33 = vadd.f32 1e-30, %v2837_v46  ;;  %v2281_v52 = vpop.xlane.xlu2 %2280  ;;  %v3356_v61 = vunpack.c.l.bf16 %v372_v0 }
 0x3b6   : > { %v6882_v25 = vpop.eup %5087  ;;  %5097 = vlog2.f32 %v2749_v56  ;;  %v2323_v17 = vsub.f32 %v6761_v7, %v2281_v52  ;;  %v6885_v31 = vpop.f32.mrf.mxu0  ;;  %v6887_v19 = vadd.f32 %v3603_v24, %v3477_v2  ;;  %8102 = vst [vmem:[#allocation96_spill] sm:$0xff] %v6894_v35  ;;  %v2137_v7 = vld [vmem:[%s5836_s30 + $0xf0] sm:$0xff]  ;;  %v6906_v2 = vsel %vm2205_vm2, %v6894_v35, -1e+30 }
 0x3b7   : > { %5099 = vlog2.f32 %v2838_v33  ;;  %v6889_v20 = vpop.f32.mrf.mxu1  ;;  %2438 = vadd.xlane.f32.xlu0 %v6882_v25  ;;  %v5090_v50 = vpop.eup %5089  ;;  %v2169_v24 = vmul.f32 %v6683_v38, %v2137_v7 }
 0x3b8   : > { %8100 = vst [vmem:[#allocation87_spill] sm:$0xff] %v6887_v19  ;;  %v2376_v18 = vmul.f32 1.442695, %v2323_v17  ;;  %v5092_v9 = vpop.eup %5091  ;;  %v2506_v33 = vmul.f32 %v5090_v50, %v6738_v26 }
 0x3b9   : > { %v3111_v52 = vmul.f32 0.6931472, %v5092_v9 }
 0x3ba   : > { %v5094_v55 = vpop.eup %5093  ;;  %5101 = vpow2.f32 %v2376_v18 }
 0x3bb   : > { %v5096_v8 = vpop.eup %5095  ;;  %v6898_v4 = vpop.f32.mrf.mxu2  ;;  %v2507_v58 = vmul.f32 %v5094_v55, %v6755_v40  ;;  %v3357_v55 = vunpack.c.h.bf16 %v372_v0  ;;  %v3484_v26 = vmul.f32 %v3356_v61, %v3111_v52 }
 0x3bc   : > { %v2427_v27 = vpop.xlane.xlu0 %2426  ;;  %v5098_v6 = vpop.eup %5097  ;;  %v3113_v15 = vmul.f32 0.6931472, %v5096_v8 }
 0x3bd   : > { %v6901_v16 = vpop.f32.mrf.mxu3  ;;  %v5100_v51 = vpop.eup %5099  ;;  %v3107_v56 = vmul.f32 0.6931472, %v5098_v6  ;;  %v2532_v41 = vpack.c.bf16 %v2507_v58, %v2506_v33  ;;  %5103 = vrcp.f32 %v2427_v27  ;;  %v2138_v27 = vld [vmem:[%s5836_s30 + $0xf8] sm:$0xff] }
 0x3be   : > { %v2283_v46 = vpop.xlane.xlu2 %2282  ;;  %v3109_v45 = vmul.f32 0.6931472, %v5100_v51  ;;  %v2931_v40 = vpop.f32.mrf.mxu0 }
 0x3bf   : > { %v2324_v17 = vsub.f32 %v6777_v43, %v2283_v46  ;;  %v3482_v59 = vmul.f32 %v3354_v63, %v3107_v56  ;;  %v2932_v18 = vadd.f32 1e-30, %v2931_v40  ;;  %v3020_v36 = vpop.f32.mrf.mxu1  ;;  %2296 = vmax.xlane.f32.xlu0 %v6906_v2  ;;  %v6916_v43 = vadd.f32 %v2169_v24, %v6664_v5  ;;  %v375_v24 = vld [vmem:[%s5826_s26 + $0x40] sm:$0xff] }
 0x3c0   : > { %v6912_v6 = vpop.eup %5101  ;;  %v3483_v35 = vmul.f32 %v3355_v11, %v3109_v45  ;;  %v3021_v38 = vadd.f32 1e-30, %v3020_v36  ;;  %v3485_v11 = vmul.f32 %v3357_v55, %v3113_v15  ;;  %v3362_v40 = vunpack.c.l.bf16 %v375_v24 }
 0x3c1   : > { %v2378_v21 = vmul.f32 1.442695, %v2324_v17  ;;  %2440 = vadd.xlane.f32.xlu1 %v6912_v6  ;;  %8103 = vst [vmem:[#allocation109_spill] sm:$0xff] %v6916_v43  ;;  %v6925_v51 = vsel %vm2205_vm2, %v6916_v43, -1e+30  ;;  %v376_v17 = vld [vmem:[%s5826_s26 + $0x48] sm:$0xff] }
 0x3c2   : > { %v3612_v50 = vadd.f32 %v3483_v35, %v3482_v59 }
 0x3c3   : > { %5105 = vpow2.f32 %v2378_v21  ;;  %v2429_v9 = vpop.xlane.xlu1 %2428  ;;  %v2753_v0 = vpop.f32.mrf.mxu2 }
 0x3c4   : > { %5107 = vlog2.f32 %v2932_v18  ;;  %2772 = vmatmul.bf16.gmra.mxu2 %v2532_v41  ;;  %2861 = vmatmul.bf16.gmra.mxu3 %v2532_v41  ;;  %v2754_v7 = vadd.f32 1e-30, %v2753_v0  ;;  %v2285_v63 = vpop.xlane.xlu0 %2284  ;;  %v3613_v58 = vadd.f32 %v3612_v50, %v3484_v26  ;;  %v5104_v15 = vpop.eup %5103 }
 0x3c5   : > { %5109 = vrcp.f32 %v2429_v9  ;;  %v2842_v8 = vpop.f32.mrf.mxu3  ;;  %2950 = vmatmul.bf16.gmra.mxu0 %v2532_v41  ;;  %3039 = vmatmul.bf16.gmra.mxu1 %v2532_v41  ;;  %v2325_v5 = vsub.f32 %v6792_v49, %v2285_v63  ;;  %v2170_v41 = vmul.f32 %v6695_v34, %v2138_v27  ;;  %v3364_v27 = vunpack.c.l.bf16 %v376_v17 }
 0x3c6   : > { %5111 = vlog2.f32 %v3021_v38  ;;  %v2843_v21 = vadd.f32 1e-30, %v2842_v8  ;;  %v6920_v35 = vpop.f32.mrf.mxu0  ;;  %v6927_v61 = vadd.f32 %v3613_v58, %v3485_v11  ;;  %v3363_v38 = vunpack.c.h.bf16 %v375_v24 }
 0x3c7   : > { %5113 = vlog2.f32 %v2754_v7  ;;  %v2380_v56 = vmul.f32 1.442695, %v2325_v5  ;;  %v6929_v46 = vpop.f32.mrf.mxu1  ;;  %2298 = vmax.xlane.f32.xlu0 %v6925_v51  ;;  %v6941_v36 = vadd.f32 %v2170_v41, %v6680_v30  ;;  %v2508_v8 = vmul.f32 %v5104_v15, %v6770_v3 }
 0x3c8   : > { %8104 = vst [vmem:[#allocation110_spill] sm:$0xff] %v6927_v61  ;;  %5115 = vlog2.f32 %v2843_v21  ;;  %v3365_v3 = vunpack.c.h.bf16 %v376_v17 }
 0x3c9   : > { %v6933_v49 = vpop.eup %5105  ;;  %5117 = vpow2.f32 %v2380_v56  ;;  %8105 = vst [vmem:[#allocation111_spill] sm:$0xff] %v6941_v36 }
 0x3ca   : > { %v5108_v33 = vpop.eup %5107  ;;  %2442 = vadd.xlane.f32.xlu1 %v6933_v49 }
 0x3cb   : > { %v5110_v52 = vpop.eup %5109  ;;  %v2431_v59 = vpop.xlane.xlu1 %2430  ;;  %v3127_v63 = vmul.f32 0.6931472, %v5108_v33 }
 0x3cc   : > { %v5112_v45 = vpop.eup %5111  ;;  %v6938_v18 = vpop.f32.mrf.mxu2  ;;  %v2509_v34 = vmul.f32 %v5110_v52, %v6787_v44  ;;  %v6953_v44 = vsel %vm2205_vm2, %v6941_v36, -1e+30 }
 0x3cd   : > { %v5114_v55 = vpop.eup %5113  ;;  %v6944_v26 = vpop.f32.mrf.mxu3  ;;  %v3129_v41 = vmul.f32 0.6931472, %v5112_v45  ;;  %v3492_v15 = vmul.f32 %v3364_v27, %v3127_v63  ;;  %v379_v27 = vld [vmem:[%s5826_s26 + $0x60] sm:$0xff] }
 0x3ce   : > { %v2287_v50 = vpop.xlane.xlu0 %2286  ;;  %v5116_v9 = vpop.eup %5115  ;;  %v3123_v0 = vmul.f32 0.6931472, %v5114_v55  ;;  %v2533_v52 = vpack.c.bf16 %v2509_v34, %v2508_v8 }
 0x3cf   : > { %v2326_v7 = vsub.f32 %v6807_v60, %v2287_v50  ;;  %v3125_v11 = vmul.f32 0.6931472, %v5116_v9  ;;  %v6948_v58 = vpop.eup %5117  ;;  %v2936_v5 = vpop.f32.mrf.mxu0  ;;  %v3493_v34 = vmul.f32 %v3365_v3, %v3129_v41  ;;  %v380_v41 = vld [vmem:[%s5826_s26 + $0x68] sm:$0xff] }
 0x3d0   : > { %v3490_v30 = vmul.f32 %v3362_v40, %v3123_v0  ;;  %v3025_v56 = vpop.f32.mrf.mxu1  ;;  %2444 = vadd.xlane.f32.xlu2 %v6948_v58  ;;  %v2937_v60 = vadd.f32 1e-30, %v2936_v5 }
 0x3d1   : > { %v2382_v21 = vmul.f32 1.442695, %v2326_v7  ;;  %v3491_v24 = vmul.f32 %v3363_v38, %v3125_v11  ;;  %v3026_v33 = vadd.f32 1e-30, %v3025_v56 }
 0x3d2   : > { %2300 = vmax.xlane.f32.xlu1 %v6953_v44 }
 0x3d3   : > { %5119 = vpow2.f32 %v2382_v21  ;;  %v3622_v40 = vadd.f32 %v3491_v24, %v3490_v30  ;;  %v2289_v55 = vpop.xlane.xlu1 %2288  ;;  %v2433_v50 = vpop.xlane.xlu2 %2432  ;;  %v3370_v24 = vunpack.c.l.bf16 %v379_v27 }
 0x3d4   : > { %5121 = vrcp.f32 %v2431_v59  ;;  %2777 = vmatmul.bf16.gmra.mxu2 %v2533_v52  ;;  %2866 = vmatmul.bf16.gmra.mxu3 %v2533_v52  ;;  %v2327_v9 = vsub.f32 %v6822_v23, %v2289_v55  ;;  %v2758_v45 = vpop.f32.mrf.mxu2  ;;  %v3371_v55 = vunpack.c.h.bf16 %v379_v27 }
 0x3d5   : > { %v2847_v38 = vpop.f32.mrf.mxu3  ;;  %5123 = vrcp.f32 %v2433_v50  ;;  %v3623_v17 = vadd.f32 %v3622_v40, %v3492_v15  ;;  %2955 = vmatmul.bf16.gmra.mxu0 %v2533_v52  ;;  %3044 = vmatmul.bf16.gmra.mxu1 %v2533_v52  ;;  %v2759_v0 = vadd.f32 1e-30, %v2758_v45 }
 0x3d6   : > { %5125 = vlog2.f32 %v2937_v60  ;;  %v2848_v7 = vadd.f32 1e-30, %v2847_v38  ;;  %v2384_v59 = vmul.f32 1.442695, %v2327_v9  ;;  %v3372_v38 = vunpack.c.l.bf16 %v380_v41 }
 0x3d7   : > { %5127 = vlog2.f32 %v3026_v33  ;;  %v6958_v8 = vadd.f32 %v3623_v17, %v3493_v34 }
 0x3d8   : > { %5129 = vlog2.f32 %v2759_v0 }
 0x3d9   : > { %8106 = vst [vmem:[#allocation112_spill] sm:$0xff] %v6958_v8  ;;  %v6960_v63 = vpop.eup %5119  ;;  %5131 = vpow2.f32 %v2384_v59 }
 0x3da   : > { %2446 = vadd.xlane.f32.xlu2 %v6960_v63  ;;  %v5122_v23 = vpop.eup %5121  ;;  %5133 = vlog2.f32 %v2848_v7 }
 0x3db   : > { %v5124_v11 = vpop.eup %5123  ;;  %v2291_v21 = vpop.xlane.xlu1 %2290  ;;  %v2510_v33 = vmul.f32 %v5122_v23, %v6802_v62 }
 0x3dc   : > { %v5126_v30 = vpop.eup %5125  ;;  %v2435_v5 = vpop.xlane.xlu2 %2434  ;;  %v2511_v52 = vmul.f32 %v5124_v11, %v6817_v39  ;;  %v2328_v3 = vsub.f32 %v6836_v42, %v2291_v21  ;;  %v3373_v42 = vunpack.c.h.bf16 %v380_v41 }
 0x3dd   : > { %v5128_v56 = vpop.eup %5127  ;;  %v3143_v45 = vmul.f32 0.6931472, %v5126_v30 }
 0x3de   : > { %v5130_v60 = vpop.eup %5129  ;;  %v2386_v50 = vmul.f32 1.442695, %v2328_v3  ;;  %v2534_v0 = vpack.c.bf16 %v2511_v52, %v2510_v33  ;;  %v3145_v39 = vmul.f32 0.6931472, %v5128_v56  ;;  %v6984_v33 = vpop.f32.mrf.mxu0 }
 0x3df   : > { %v6967_v15 = vpop.eup %5131  ;;  %v3139_v40 = vmul.f32 0.6931472, %v5130_v60  ;;  %v3500_v11 = vmul.f32 %v3372_v38, %v3143_v45 }
 0x3e0   : > { %v5134_v9 = vpop.eup %5133  ;;  %2448 = vadd.xlane.f32.xlu0 %v6967_v15  ;;  %5135 = vpow2.f32 %v2386_v50  ;;  %v3501_v21 = vmul.f32 %v3373_v42, %v3145_v39  ;;  %v6990_v50 = vpop.f32.mrf.mxu3 }
 0x3e1   : > { %v3498_v34 = vmul.f32 %v3370_v24, %v3139_v40  ;;  %v3141_v17 = vmul.f32 0.6931472, %v5134_v9  ;;  %v6986_v40 = vpop.f32.mrf.mxu1 }
 0x3e3   : > { %v3499_v7 = vmul.f32 %v3371_v55, %v3141_v17  ;;  %v6988_v55 = vpop.f32.mrf.mxu2 }
 0x3e4   : > { %v2293_v59 = vpop.xlane.xlu2 %2292  ;;  %2782 = vmatmul.bf16.gmra.mxu2 %v2534_v0  ;;  %2871 = vmatmul.bf16.gmra.mxu3 %v2534_v0 }
 0x3e5   : > { %v2329_v62 = vsub.f32 %v6848_v48, %v2293_v59  ;;  %v3632_v23 = vadd.f32 %v3499_v7, %v3498_v34  ;;  %2960 = vmatmul.bf16.gmra.mxu0 %v2534_v0  ;;  %3049 = vmatmul.bf16.gmra.mxu1 %v2534_v0 }
 0x3e6   : > { %v6972_v27 = vpop.eup %5135 }
 0x3e7   : > { %v2388_v30 = vmul.f32 1.442695, %v2329_v62  ;;  %v3633_v24 = vadd.f32 %v3632_v23, %v3500_v11  ;;  %2450 = vadd.xlane.f32.xlu1 %v6972_v27 }
 0x3e9   : > { %5137 = vpow2.f32 %v2388_v30  ;;  %v6975_v56 = vadd.f32 %v3633_v24, %v3501_v21 }
 0x3eb   : > { %8107 = vst [vmem:[#allocation113_spill] sm:$0xff] %v6975_v56 }
 0x3ec   : > { %v2295_v41 = vpop.xlane.xlu2 %2294 }
 0x3ed   : > { %v2330_v52 = vsub.f32 %v6858_v22, %v2295_v41 }
 0x3ef   : > { %v6978_v3 = vpop.eup %5137  ;;  %v2390_v60 = vmul.f32 1.442695, %v2330_v52  ;;  %v385_v52 = vld [vmem:[%s5826_s26 + $0x90] sm:$0xff] }
 0x3f0   : > { %2452 = vadd.xlane.f32.xlu2 %v6978_v3 }
 0x3f1   : > { %5139 = vpow2.f32 %v2390_v60 }
 0x3f2   : > { %5141 = vrcp.f32 %v2435_v5 }
 0x3f7   : > { %v6981_v48 = vpop.eup %5139 }
 0x3f8   : > { %8108 = vst [vmem:[#allocation114_spill] sm:$0xff] %v6981_v48  ;;  %2454 = vadd.xlane.f32.xlu0 %v6981_v48  ;;  %v5142_v0 = vpop.eup %5141 }
 0x3f9   : > { %v2512_v62 = vmul.f32 %v5142_v0, %v6831_v53 }
 0x41d   : > { %v6992_v9 = vpop.f32.mrf.mxu0  ;;  %v6994_v22 = vpop.f32.mrf.mxu1 }
 0x422   : > { %v6996_v45 = vpop.f32.mrf.mxu2  ;;  %v6998_v38 = vpop.f32.mrf.mxu3 }
 0x423   : > { %v2437_v34 = vpop.xlane.xlu0 %2436 }
 0x424   : > { %5143 = vrcp.f32 %v2437_v34  ;;  %v3382_v34 = vunpack.c.l.bf16 %v385_v52 }
 0x425   : > { %v2943_v17 = vpop.f32.mrf.mxu0  ;;  %v3032_v7 = vpop.f32.mrf.mxu1 }
 0x426   : > { %v2944_v39 = vadd.f32 1e-30, %v2943_v17  ;;  %v3033_v24 = vadd.f32 1e-30, %v3032_v7  ;;  %v386_v17 = vld [vmem:[%s5826_s26 + $0x98] sm:$0xff] }
 0x427   : > { %v3385_v43 = vunpack.c.h.bf16 %v386_v17 }
 0x428   : > { %5145 = vlog2.f32 %v2944_v39 }
 0x42a   : > { %v5144_v42 = vpop.eup %5143  ;;  %v2765_v59 = vpop.f32.mrf.mxu2 }
 0x42b   : > { %v2854_v11 = vpop.f32.mrf.mxu3  ;;  %v2513_v23 = vmul.f32 %v5144_v42, %v6875_v37  ;;  %v2766_v30 = vadd.f32 1e-30, %v2765_v59  ;;  %v2439_v21 = vpop.xlane.xlu0 %2438  ;;  %v3383_v37 = vunpack.c.h.bf16 %v385_v52 }
 0x42c   : > { %v2855_v5 = vadd.f32 1e-30, %v2854_v11 }
 0x42d   : > { %5147 = vlog2.f32 %v2766_v30  ;;  %v2535_v41 = vpack.c.bf16 %v2513_v23, %v2512_v62  ;;  %v3384_v30 = vunpack.c.l.bf16 %v386_v17 }
 0x42e   : > { %5149 = vlog2.f32 %v2855_v5  ;;  %v5146_v60 = vpop.eup %5145 }
 0x42f   : > { %2787 = vmatmul.bf16.gmra.mxu2 %v2535_v41  ;;  %2876 = vmatmul.bf16.gmra.mxu3 %v2535_v41  ;;  %5151 = vlog2.f32 %v3033_v24  ;;  %v3167_v23 = vmul.f32 0.6931472, %v5146_v60 }
 0x430   : > { %2965 = vmatmul.bf16.gmra.mxu0 %v2535_v41  ;;  %3054 = vmatmul.bf16.gmra.mxu1 %v2535_v41  ;;  %5153 = vrcp.f32 %v2439_v21 }
 0x431   : > { %v3512_v52 = vmul.f32 %v3384_v30, %v3167_v23  ;;  %v8117_v30 = vld [vmem:[#allocation24_spill] sm:$0xff] }
 0x433   : > { %v5148_v53 = vpop.eup %5147  ;;  %v2297_v0 = vpop.xlane.xlu0 %2296 }
 0x434   : > { %v5150_v42 = vpop.eup %5149  ;;  %v3163_v59 = vmul.f32 0.6931472, %v5148_v53  ;;  %v2441_v11 = vpop.xlane.xlu1 %2440  ;;  %v2331_v39 = vsub.f32 %v6906_v2, %v2297_v0 }
 0x435   : > { %v3165_v7 = vmul.f32 0.6931472, %v5150_v42  ;;  %v5152_v62 = vpop.eup %5151  ;;  %5155 = vrcp.f32 %v2441_v11 }
 0x436   : > { %v3510_v5 = vmul.f32 %v3382_v34, %v3163_v59  ;;  %v2392_v24 = vmul.f32 1.442695, %v2331_v39  ;;  %v3169_v41 = vmul.f32 0.6931472, %v5152_v62  ;;  %v5154_v48 = vpop.eup %5153 }
 0x437   : > { %v3511_v36 = vmul.f32 %v3383_v37, %v3165_v7  ;;  %v2514_v60 = vmul.f32 %v5154_v48, %v6882_v25 }
 0x438   : > { %5157 = vpow2.f32 %v2392_v24  ;;  %v3513_v21 = vmul.f32 %v3385_v43, %v3169_v41  ;;  %v8119_v24 = vld [vmem:[#allocation29_spill] sm:$0xff]  ;;  %v8120_v41 = vld [vmem:[#allocation30_spill] sm:$0xff] }
 0x439   : > { %v3647_v12 = vadd.f32 %v3511_v36, %v3510_v5 }
 0x43b   : > { %v2299_v56 = vpop.xlane.xlu0 %2298  ;;  %v3648_v2 = vadd.f32 %v3647_v12, %v3512_v52  ;;  %v5156_v0 = vpop.eup %5155  ;;  %v8121_v52 = vsub.f32 %v8119_v24, %v8120_v41  ;;  %v8137_v24 = vld [vmem:[#allocation35_spill] sm:$0xff]  ;;  %v8138_v41 = vld [vmem:[#allocation36_spill] sm:$0xff] }
 0x43c   : > { %v2332_v19 = vsub.f32 %v6925_v51, %v2299_v56  ;;  %v2515_v34 = vmul.f32 %v5156_v0, %v6912_v6  ;;  %v8113_v56 = vld [vmem:[#allocation21_spill] sm:$0xff] }
 0x43d   : > { %v2443_v53 = vpop.xlane.xlu1 %2442  ;;  %v7011_v17 = vadd.f32 %v3648_v2, %v3513_v21  ;;  %v8123_v2 = vld [vmem:[#allocation33_spill] sm:$0xff]  ;;  %v8125_v21 = vld [vmem:[#allocation38_spill] sm:$0xff] }
 0x43e   : > { %v7006_v42 = vpop.eup %5157  ;;  %v2394_v37 = vmul.f32 1.442695, %v2332_v19  ;;  %v2536_v36 = vpack.c.bf16 %v2515_v34, %v2514_v60  ;;  %v8112_v19 = vld [vmem:[#allocation20_spill] sm:$0xff]  ;;  %v8126_v60 = vld [vmem:[#allocation39_spill] sm:$0xff] }
 0x43f   : > { %8109 = vst [vmem:[#allocation115_spill] sm:$0xff] %v7006_v42  ;;  %2456 = vadd.xlane.f32.xlu1 %v7006_v42  ;;  %v8114_v48 = vsub.f32 %v8112_v19, %v8113_v56  ;;  %v8127_v34 = vsub.f32 %v8125_v21, %v8126_v60  ;;  %v8144_v21 = vld [vmem:[#allocation54_spill] sm:$0xff] }
 0x440   : > { %8110 = vst [vmem:[#allocation116_spill] sm:$0xff] %v7011_v17  ;;  %5159 = vpow2.f32 %v2394_v37  ;;  %2792 = vmatmul.bf16.gmra.mxu2 %v2536_v36  ;;  %2881 = vmatmul.bf16.gmra.mxu3 %v2536_v36  ;;  %v8128_v37 = vld [vmem:[#allocation26_spill] sm:$0xff] }
 0x441   : > { %5161 = vrcp.f32 %v2443_v53  ;;  %2970 = vmatmul.bf16.gmra.mxu0 %v2536_v36  ;;  %3059 = vmatmul.bf16.gmra.mxu1 %v2536_v36  ;;  %v8129_v36 = vld [vmem:[#allocation27_spill] sm:$0xff] }
 0x443   : > { %v2445_v12 = vpop.xlane.xlu2 %2444 }
 0x444   : > { %5163 = vrcp.f32 %v2445_v12  ;;  %v8130_v12 = vsub.f32 %v8128_v37, %v8129_v36  ;;  %v8147_v37 = vld [vmem:[#allocation45_spill] sm:$0xff] }
 0x445   : > { %v2301_v43 = vpop.xlane.xlu1 %2300 }
 0x446   : > { %v2333_v51 = vsub.f32 %v6953_v44, %v2301_v43  ;;  %v7014_v25 = vpop.eup %5159  ;;  %v8116_v44 = vld [vmem:[#allocation23_spill] sm:$0xff] }
 0x447   : > { %8111 = vst [vmem:[#allocation117_spill] sm:$0xff] %v7014_v25  ;;  %2458 = vadd.xlane.f32.xlu2 %v7014_v25  ;;  %2011 = vadd.xlane.f32.xlu1 %v8114_v48  ;;  %v5162_v59 = vpop.eup %5161  ;;  %v8118_v5 = vsub.f32 %v8116_v44, %v8117_v30  ;;  %v7042_v48 = vpop.f32.mrf.mxu0  ;;  %v8135_v44 = vld [vmem:[#allocation48_spill] sm:$0xff] }
 0x448   : > { %v2396_v6 = vmul.f32 1.442695, %v2333_v51  ;;  %v2516_v7 = vmul.f32 %v5162_v59, %v6933_v49  ;;  %v7044_v59 = vpop.f32.mrf.mxu1 }
 0x44a   : > { %5165 = vpow2.f32 %v2396_v6  ;;  %v5164_v11 = vpop.eup %5163 }
 0x44b   : > { %v2517_v39 = vmul.f32 %v5164_v11, %v6948_v58  ;;  %v8122_v58 = vld [vmem:[#allocation32_spill] sm:$0xff]  ;;  %v8131_v11 = vld [vmem:[#allocation41_spill] sm:$0xff] }
 0x44c   : > { %v8124_v0 = vsub.f32 %v8122_v58, %v8123_v2  ;;  %v8141_v58 = vld [vmem:[#allocation50_spill] sm:$0xff] }
 0x44d   : > { %v2537_v62 = vpack.c.bf16 %v2517_v39, %v2516_v7  ;;  %v2447_v53 = vpop.xlane.xlu2 %2446  ;;  %v8132_v39 = vld [vmem:[#allocation42_spill] sm:$0xff] }
 0x44e   : > { %5167 = vrcp.f32 %v2447_v53  ;;  %v8133_v7 = vsub.f32 %v8131_v11, %v8132_v39  ;;  %v7057_v53 = vpop.f32.mrf.mxu3  ;;  %v2746_v39 = vadd.f32 1e-30, %v6870_v28  ;;  %v2751_v28 = vadd.f32 1e-30, %v6898_v4 }
 0x44f   : > { %2013 = vadd.xlane.f32.xlu2 %v8118_v5  ;;  %2017 = vadd.xlane.f32.xlu1 %v8121_v52  ;;  %v8139_v52 = vsub.f32 %v8137_v24, %v8138_v41  ;;  %v8149_v24 = vld [vmem:[#allocation55_spill] sm:$0xff]  ;;  %v8150_v41 = vld [vmem:[#allocation56_spill] sm:$0xff] }
 0x450   : > { %v7022_v23 = vpop.eup %5165  ;;  %2797 = vmatmul.bf16.gmra.mxu2 %v2537_v62  ;;  %2886 = vmatmul.bf16.gmra.mxu3 %v2537_v62 }
 0x451   : > { %8115 = vst [vmem:[#allocation20_spill] sm:$0xff] %v7022_v23  ;;  %2460 = vadd.xlane.f32.xlu0 %v7022_v23  ;;  %2975 = vmatmul.bf16.gmra.mxu0 %v2537_v62  ;;  %v8171_v23 = vld [vmem:[#allocation77_spill] sm:$0xff] }
 0x452   : > { %3064 = vmatmul.bf16.gmra.mxu1 %v2537_v62  ;;  %v8134_v62 = vld [vmem:[#allocation47_spill] sm:$0xff] }
 0x453   : > { %v2449_v49 = vpop.xlane.xlu0 %2448  ;;  %v8136_v30 = vsub.f32 %v8134_v62, %v8135_v44 }
 0x454   : > { %5169 = vrcp.f32 %v2449_v49  ;;  %v5168_v43 = vpop.eup %5167  ;;  %v8140_v49 = vld [vmem:[#allocation49_spill] sm:$0xff] }
 0x455   : > { %v2518_v19 = vmul.f32 %v5168_v43, %v6960_v63  ;;  %v8142_v2 = vsub.f32 %v8140_v49, %v8141_v58  ;;  %v7068_v43 = vpop.f32.mrf.mxu0  ;;  %v2840_v58 = vadd.f32 1e-30, %v6901_v16  ;;  %v2761_v16 = vadd.f32 1e-30, %v6988_v55 }
 0x456   : > { %v7079_v44 = vpop.f32.mrf.mxu3 }
 0x457   : > { %2019 = vadd.xlane.f32.xlu2 %v8124_v0  ;;  %2023 = vadd.xlane.f32.xlu1 %v8127_v34  ;;  %v8143_v0 = vld [vmem:[#allocation53_spill] sm:$0xff]  ;;  %v8146_v34 = vld [vmem:[#allocation44_spill] sm:$0xff] }
 0x458   : > { %v8145_v60 = vsub.f32 %v8143_v0, %v8144_v21  ;;  %v8148_v36 = vsub.f32 %v8146_v34, %v8147_v37  ;;  %v2850_v21 = vadd.f32 1e-30, %v6990_v50  ;;  %v8159_v37 = vld [vmem:[#allocation62_spill] sm:$0xff]  ;;  %v2929_v50 = vadd.f32 1e-30, %v6885_v31 }
 0x459   : > { %2015 = vadd.xlane.f32.xlu0 %v8130_v12 }
 0x45a   : > { %v5170_v51 = vpop.eup %5169  ;;  %v2451_v5 = vpop.xlane.xlu1 %2450 }
 0x45b   : > { %v2519_v6 = vmul.f32 %v5170_v51, %v6967_v15  ;;  %5171 = vrcp.f32 %v2451_v5  ;;  %v7055_v15 = vpop.f32.mrf.mxu2  ;;  %v7070_v51 = vpop.f32.mrf.mxu1  ;;  %v3013_v5 = vadd.f32 1e-30, %v6866_v57  ;;  %v2756_v57 = vadd.f32 1e-30, %v6938_v18 }
 0x45d   : > { %v2538_v56 = vpack.c.bf16 %v2519_v6, %v2518_v19  ;;  %v7095_v0 = vpop.f32.mrf.mxu0 }
 0x45f   : > { %2025 = vadd.xlane.f32.xlu2 %v8133_v7  ;;  %2029 = vadd.xlane.f32.xlu1 %v8136_v30  ;;  %v2835_v7 = vadd.f32 1e-30, %v6873_v1  ;;  %v8156_v1 = vld [vmem:[#allocation52_spill] sm:$0xff] }
 0x460   : > { %2802 = vmatmul.bf16.gmra.mxu2 %v2538_v56  ;;  %2891 = vmatmul.bf16.gmra.mxu3 %v2538_v56 }
 0x461   : > { %2021 = vadd.xlane.f32.xlu0 %v8139_v52  ;;  %2980 = vmatmul.bf16.gmra.mxu0 %v2538_v56  ;;  %v5172_v12 = vpop.eup %5171  ;;  %v8151_v52 = vsub.f32 %v8149_v24, %v8150_v41 }
 0x462   : > { %3069 = vmatmul.bf16.gmra.mxu1 %v2538_v56  ;;  %v2924_v56 = vadd.f32 1e-30, %v6864_v10  ;;  %v2520_v11 = vmul.f32 %v5172_v12, %v6972_v27  ;;  %v8155_v27 = vld [vmem:[#allocation51_spill] sm:$0xff]  ;;  %v8161_v12 = vld [vmem:[#allocation66_spill] sm:$0xff] }
 0x463   : > { %v2453_v63 = vpop.xlane.xlu2 %2452  ;;  %v7077_v62 = vpop.f32.mrf.mxu2  ;;  %v8157_v49 = vsub.f32 %v8155_v27, %v8156_v1  ;;  %v377_v27 = vld [vmem:[%s5826_s26 + $0x50] sm:$0xff] }
 0x464   : > { %5173 = vrcp.f32 %v2453_v63  ;;  %v8153_v63 = vld [vmem:[#allocation60_spill] sm:$0xff]  ;;  %v7097_v4 = vpop.f32.mrf.mxu1 }
 0x465   : > { %5175 = vlog2.f32 %v2924_v56  ;;  %v7109_v56 = vld [vmem:[%s5826_s26 + $0x18] sm:$0xff] }
 0x466   : > { %5177 = vlog2.f32 %v2746_v39  ;;  %v3352_v1 = vunpack.c.l.bf16 %v7109_v56 }
 0x467   : > { %2031 = vadd.xlane.f32.xlu2 %v8142_v2  ;;  %2035 = vadd.xlane.f32.xlu1 %v8145_v60  ;;  %5179 = vlog2.f32 %v2835_v7  ;;  %v2845_v2 = vadd.f32 1e-30, %v6944_v26  ;;  %v369_v60 = vld [vmem:[%s5826_s26 + $0x10] sm:$0xff]  ;;  %v7117_v7 = vpop.f32.mrf.mxu3 }
 0x468   : > { %5181 = vlog2.f32 %v3013_v5  ;;  %v8158_v26 = vld [vmem:[#allocation61_spill] sm:$0xff]  ;;  %v8165_v5 = vld [vmem:[#allocation58_spill] sm:$0xff] }
 0x469   : > { %2027 = vadd.xlane.f32.xlu0 %v8148_v36  ;;  %5183 = vlog2.f32 %v2751_v28  ;;  %v8160_v36 = vsub.f32 %v8158_v26, %v8159_v37  ;;  %v3018_v28 = vadd.f32 1e-30, %v6889_v20  ;;  %v2939_v26 = vadd.f32 1e-30, %v6984_v33  ;;  %v8170_v20 = vld [vmem:[#allocation75_spill] sm:$0xff] }
 0x46a   : > { %v5174_v6 = vpop.eup %5173  ;;  %5185 = vlog2.f32 %v2840_v58  ;;  %v8172_v25 = vsub.f32 %v8170_v20, %v8171_v23 }
 0x46b   : > { %v2521_v19 = vmul.f32 %v5174_v6, %v6978_v3  ;;  %v8152_v3 = vld [vmem:[#allocation59_spill] sm:$0xff]  ;;  %v5176_v18 = vpop.eup %5175  ;;  %5187 = vlog2.f32 %v2756_v57  ;;  %v8162_v6 = vld [vmem:[#allocation68_spill] sm:$0xff]  ;;  %v7115_v39 = vpop.f32.mrf.mxu2 }
 0x46c   : > { %v8154_v10 = vsub.f32 %v8152_v3, %v8153_v63  ;;  %v5178_v34 = vpop.eup %5177  ;;  %5189 = vlog2.f32 %v2845_v2  ;;  %v2934_v3 = vadd.f32 1e-30, %v6920_v35  ;;  %v7124_v63 = vld [vmem:[%s5826_s26 + $0x38] sm:$0xff]  ;;  %v3351_v2 = vunpack.c.h.bf16 %v369_v60 }
 0x46d   : > { %v2539_v30 = vpack.c.bf16 %v2521_v19, %v2520_v11  ;;  %v8163_v19 = vsub.f32 %v8161_v12, %v8162_v6  ;;  %v5180_v55 = vpop.eup %5179  ;;  %v7113_v11 = vld [vmem:[%s5826_s26 + $0x30] sm:$0xff]  ;;  %5191 = vlog2.f32 %v2761_v16  ;;  %v3099_v31 = vmul.f32 0.6931472, %v5178_v34 }
 0x46e   : > { %v5182_v41 = vpop.eup %5181  ;;  %5193 = vlog2.f32 %v2850_v21  ;;  %v3101_v57 = vmul.f32 0.6931472, %v5180_v55  ;;  %v3358_v16 = vunpack.c.l.bf16 %v7113_v11  ;;  %v3359_v21 = vunpack.c.h.bf16 %v7113_v11 }
 0x46f   : > { %2037 = vadd.xlane.f32.xlu2 %v8151_v52  ;;  %2041 = vadd.xlane.f32.xlu1 %v8154_v10  ;;  %v3350_v52 = vunpack.c.l.bf16 %v369_v60  ;;  %v5184_v10 = vpop.eup %5183  ;;  %5195 = vlog2.f32 %v2929_v50  ;;  %v3023_v34 = vadd.f32 1e-30, %v6929_v46  ;;  %v3366_v12 = vunpack.c.l.bf16 %v377_v27  ;;  %v7136_v60 = vpop.f32.mrf.mxu0 }
 0x470   : > { %2807 = vmatmul.bf16.gmra.mxu2 %v2539_v30  ;;  %2896 = vmatmul.bf16.gmra.mxu3 %v2539_v30  ;;  %v5186_v58 = vpop.eup %5185  ;;  %5197 = vlog2.f32 %v2934_v3  ;;  %v2764_v6 = vadd.f32 1e-30, %v6996_v45  ;;  %v3367_v50 = vunpack.c.h.bf16 %v377_v27  ;;  %v2853_v11 = vadd.f32 1e-30, %v6998_v38  ;;  %v8167_v3 = vld [vmem:[#allocation69_spill] sm:$0xff]  ;;  %v8173_v38 = vld [vmem:[#allocation63_spill] sm:$0xff] }
 0x471   : > { %2033 = vadd.xlane.f32.xlu0 %v8157_v49  ;;  %2985 = vmatmul.bf16.gmra.mxu0 %v2539_v30  ;;  %v5188_v35 = vpop.eup %5187  ;;  %v3478_v55 = vmul.f32 %v3350_v52, %v3099_v31  ;;  %5199 = vlog2.f32 %v3018_v28  ;;  %v8168_v49 = vld [vmem:[#allocation71_spill] sm:$0xff]  ;;  %v3117_v52 = vmul.f32 0.6931472, %v5186_v58  ;;  %v8174_v27 = vld [vmem:[#allocation65_spill] sm:$0xff]  ;;  %v7157_v58 = vpop.f32.mrf.mxu3 }
 0x472   : > { %3074 = vmatmul.bf16.gmra.mxu1 %v2539_v30  ;;  %v8164_v30 = vld [vmem:[#allocation57_spill] sm:$0xff]  ;;  %v5190_v37 = vpop.eup %5189  ;;  %5201 = vlog2.f32 %v2939_v26  ;;  %v8169_v45 = vsub.f32 %v8167_v3, %v8168_v49  ;;  %v3131_v31 = vmul.f32 0.6931472, %v5188_v35  ;;  %v7160_v35 = vld [vmem:[%s5826_s26 + $0x58] sm:$0xff] }
 0x473   : > { %v8166_v24 = vsub.f32 %v8164_v30, %v8165_v5  ;;  %v5192_v33 = vpop.eup %5191  ;;  %v381_v30 = vld [vmem:[%s5826_s26 + $0x70] sm:$0xff]  ;;  %v3479_v5 = vmul.f32 %v3351_v2, %v3101_v57  ;;  %5203 = vlog2.f32 %v3023_v34  ;;  %v3133_v28 = vmul.f32 0.6931472, %v5190_v37  ;;  %v7155_v23 = vpop.f32.mrf.mxu2 }
 0x474   : > { %v5194_v46 = vpop.eup %5193  ;;  %v8175_v57 = vsub.f32 %v8173_v38, %v8174_v27  ;;  %5205 = vlog2.f32 %v2764_v6  ;;  %v3147_v26 = vmul.f32 0.6931472, %v5192_v33  ;;  %v3494_v38 = vmul.f32 %v3366_v12, %v3131_v31  ;;  %v8177_v31 = vld [vmem:[#allocation80_spill] sm:$0xff] }
 0x475   : > { %v5196_v2 = vpop.eup %5195  ;;  %v3149_v3 = vmul.f32 0.6931472, %v5194_v46  ;;  %5207 = vlog2.f32 %v2853_v11  ;;  %v3607_v37 = vadd.f32 %v3479_v5, %v3478_v55  ;;  %v3495_v33 = vmul.f32 %v3367_v50, %v3133_v28  ;;  %v383_v5 = vld [vmem:[%s5826_s26 + $0x80] sm:$0xff] }
 0x476   : > { %v5198_v34 = vpop.eup %5197  ;;  %v2942_v46 = vadd.f32 1e-30, %v6992_v9  ;;  %v3119_v27 = vmul.f32 0.6931472, %v5196_v2  ;;  %v3368_v49 = vunpack.c.l.bf16 %v7160_v35  ;;  %v2858_v9 = vadd.f32 1e-30, %v7057_v53 }
 0x477   : > { %2043 = vadd.xlane.f32.xlu2 %v8160_v36  ;;  %2047 = vadd.xlane.f32.xlu1 %v8163_v19  ;;  %v3103_v36 = vmul.f32 0.6931472, %v5176_v18  ;;  %v7138_v19 = vpop.f32.mrf.mxu1  ;;  %v3028_v18 = vadd.f32 1e-30, %v6986_v40  ;;  %v3374_v40 = vunpack.c.l.bf16 %v381_v30  ;;  %v5200_v6 = vpop.eup %5199  ;;  %v8179_v2 = vld [vmem:[#allocation84_spill] sm:$0xff]  ;;  %v8183_v53 = vld [vmem:[#allocation74_spill] sm:$0xff]  ;;  %v3627_v17 = vadd.f32 %v3495_v33, %v3494_v38 }
 0x478   : > { %v5202_v11 = vpop.eup %5201  ;;  %v3121_v50 = vmul.f32 0.6931472, %v5200_v6 }
 0x479   : > { %2039 = vadd.xlane.f32.xlu0 %v8166_v24  ;;  %v3115_v24 = vmul.f32 0.6931472, %v5184_v10  ;;  %v7152_v10 = vmul.f32 0.6931472, %v5182_v41  ;;  %5209 = vlog2.f32 %v3028_v18  ;;  %v3480_v41 = vmul.f32 %v3352_v1, %v3103_v36  ;;  %v7172_v18 = vpop.f32.mrf.mxu0 }
 0x47a   : > { %v3135_v1 = vmul.f32 0.6931472, %v5198_v34  ;;  %v3502_v36 = vmul.f32 %v3374_v40, %v3147_v26  ;;  %5211 = vlog2.f32 %v2942_v46 }
 0x47b   : > { %v3486_v20 = vmul.f32 %v3358_v16, %v3115_v24  ;;  %v3369_v16 = vunpack.c.h.bf16 %v7160_v35  ;;  %v5204_v24 = vpop.eup %5203  ;;  %v8180_v35 = vld [vmem:[#allocation86_spill] sm:$0xff]  ;;  %v3608_v40 = vadd.f32 %v3607_v37, %v3480_v41  ;;  %v3378_v41 = vunpack.c.l.bf16 %v383_v5  ;;  %v7189_v38 = vpop.f32.mrf.mxu2 }
 0x47c   : > { %v5206_v12 = vpop.eup %5205  ;;  %v8181_v34 = vsub.f32 %v8179_v2, %v8180_v35  ;;  %v3137_v61 = vmul.f32 0.6931472, %v5204_v24  ;;  %v3496_v37 = vmul.f32 %v3368_v49, %v3135_v1  ;;  %v3379_v35 = vunpack.c.h.bf16 %v383_v5  ;;  %v384_v1 = vld [vmem:[%s5826_s26 + $0x88] sm:$0xff] }
 0x47d   : > { %v5208_v26 = vpop.eup %5207  ;;  %v3155_v46 = vmul.f32 0.6931472, %v5206_v12 }
 0x47e   : > { %v3157_v2 = vmul.f32 0.6931472, %v5208_v26 }
 0x47f   : > { %2049 = vadd.xlane.f32.xlu2 %v8169_v45  ;;  %2053 = vadd.xlane.f32.xlu1 %v8172_v25  ;;  %v3375_v25 = vunpack.c.h.bf16 %v381_v30  ;;  %v3487_v45 = vmul.f32 %v3359_v21, %v3117_v52  ;;  %v7164_v30 = vld [vmem:[%s5826_s26 + $0x78] sm:$0xff]  ;;  %v2769_v21 = vadd.f32 1e-30, %v7055_v15  ;;  %v7174_v52 = vpop.f32.mrf.mxu1  ;;  %v5210_v8 = vpop.eup %5209 }
 0x480   : > { %v3376_v15 = vunpack.c.l.bf16 %v7164_v30  ;;  %v5212_v24 = vpop.eup %5211 }
 0x481   : > { %2045 = vadd.xlane.f32.xlu0 %v8175_v57  ;;  %v3031_v57 = vadd.f32 1e-30, %v6994_v22  ;;  %v3503_v55 = vmul.f32 %v3375_v25, %v3149_v3  ;;  %v8176_v22 = vld [vmem:[#allocation78_spill] sm:$0xff]  ;;  %v3151_v3 = vmul.f32 0.6931472, %v5202_v11  ;;  %v8182_v25 = vld [vmem:[#allocation72_spill] sm:$0xff]  ;;  %v3617_v42 = vadd.f32 %v3487_v45, %v3486_v20  ;;  %v7191_v20 = vpop.f32.mrf.mxu3 }
 0x482   : > { %v8178_v28 = vsub.f32 %v8176_v22, %v8177_v31  ;;  %v8184_v6 = vsub.f32 %v8182_v25, %v8183_v53  ;;  %v3377_v22 = vunpack.c.h.bf16 %v7164_v30  ;;  %v8185_v31 = vunpack.c.l.bf16 %v7124_v63  ;;  %v8195_v25 = vld [vmem:[#allocation83_spill] sm:$0xff] }
 0x483   : > { %5213 = vlog2.f32 %v3031_v57  ;;  %v3637_v11 = vadd.f32 %v3503_v55, %v3502_v36  ;;  %v3628_v45 = vadd.f32 %v3627_v17, %v3496_v37  ;;  %v3504_v33 = vmul.f32 %v3376_v15, %v3151_v3  ;;  %v8189_v15 = vld [vmem:[#allocation90_spill] sm:$0xff] }
 0x484   : > { %5215 = vlog2.f32 %v2769_v21  ;;  %v2947_v57 = vadd.f32 1e-30, %v7042_v48  ;;  %v3036_v36 = vadd.f32 1e-30, %v7044_v59  ;;  %v3497_v55 = vmul.f32 %v3369_v16, %v3137_v61  ;;  %v8188_v48 = vld [vmem:[#allocation88_spill] sm:$0xff]  ;;  %v387_v16 = vld [vmem:[%s5826_s26 + $0xa0] sm:$0xff] }
 0x485   : > { %5217 = vlog2.f32 %v2858_v9  ;;  %v8187_v21 = vunpack.c.h.bf16 %v7124_v63  ;;  %v3506_v17 = vmul.f32 %v3378_v41, %v3155_v46  ;;  %v3507_v9 = vmul.f32 %v3379_v35, %v3157_v2  ;;  %v7225_v46 = vld [vmem:[%s5826_s26 + $0xa8] sm:$0xff] }
 0x486   : > { %v8190_v26 = vsub.f32 %v8188_v48, %v8189_v15  ;;  %v2860_v63 = vadd.f32 1e-30, %v7079_v44  ;;  %v3159_v41 = vmul.f32 0.6931472, %v5212_v24  ;;  %v3380_v37 = vunpack.c.l.bf16 %v384_v1  ;;  %v7254_v15 = vld [vmem:[%s5826_s26 + $0xd8] sm:$0xff] }
 0x487   : > { %2055 = vadd.xlane.f32.xlu2 %v8178_v28  ;;  %2059 = vadd.xlane.f32.xlu1 %v8181_v34  ;;  %v3488_v28 = vmul.f32 %v8185_v31, %v3119_v27  ;;  %v3153_v34 = vmul.f32 0.6931472, %v5210_v8  ;;  %v8186_v27 = vunpack.c.h.bf16 %v7109_v56  ;;  %v3638_v8 = vadd.f32 %v3637_v11, %v3504_v33  ;;  %v8191_v56 = vld [vmem:[#allocation94_spill] sm:$0xff]  ;;  %v7220_v11 = vpop.f32.mrf.mxu0  ;;  %v7222_v44 = vpop.f32.mrf.mxu1 }
 0x488   : > { %v3489_v12 = vmul.f32 %v8187_v21, %v3121_v50  ;;  %v8194_v50 = vld [vmem:[#allocation81_spill] sm:$0xff]  ;;  %5219 = vlog2.f32 %v2947_v57  ;;  %v3038_v2 = vadd.f32 1e-30, %v7070_v51  ;;  %v3381_v35 = vunpack.c.h.bf16 %v384_v1  ;;  %v7231_v33 = vld [vmem:[%s5826_s26 + $0xb8] sm:$0xff]  ;;  %v7244_v21 = vld [vmem:[%s5826_s26 + $0xc0] sm:$0xff] }
 0x489   : > { %2051 = vadd.xlane.f32.xlu0 %v8184_v6  ;;  %v3618_v30 = vadd.f32 %v3617_v42, %v3488_v28  ;;  %v3481_v49 = vmul.f32 %v8186_v27, %v7152_v10  ;;  %v5214_v5 = vpop.eup %5213  ;;  %v2771_v42 = vadd.f32 1e-30, %v7077_v62  ;;  %v8192_v10 = vld [vmem:[#allocation95_spill] sm:$0xff]  ;;  %v8196_v53 = vsub.f32 %v8194_v50, %v8195_v25 }
 0x48a   : > { %v8193_v3 = vsub.f32 %v8191_v56, %v8192_v10  ;;  %v5216_v61 = vpop.eup %5215  ;;  %v7215_v62 = vadd.f32 %v3628_v45, %v3497_v55  ;;  %v3505_v6 = vmul.f32 %v3377_v22, %v3153_v34  ;;  %5221 = vlog2.f32 %v3036_v36  ;;  %v7238_v36 = vld [vmem:[%s5826_s26 + $0xc8] sm:$0xff] }
 0x48b   : > { %v7208_v59 = vadd.f32 %v3608_v40, %v3481_v49  ;;  %v7217_v31 = vadd.f32 %v3618_v30, %v3489_v12  ;;  %v5218_v28 = vpop.eup %5217  ;;  %v2949_v40 = vadd.f32 1e-30, %v7068_v43  ;;  %v3161_v34 = vmul.f32 0.6931472, %v5214_v5  ;;  %v7234_v30 = vld [vmem:[%s5826_s26 + $0xb0] sm:$0xff]  ;;  %v7246_v12 = vpop.f32.mrf.mxu2 }
 0x48c   : > { %v7228_v22 = vadd.f32 %v3638_v8, %v3505_v6  ;;  %v3386_v45 = vunpack.c.l.bf16 %v387_v16  ;;  %5223 = vlog2.f32 %v2771_v42  ;;  %v3642_v43 = vadd.f32 %v3507_v9, %v3506_v17  ;;  %v7248_v5 = vpop.f32.mrf.mxu3  ;;  %v8200_v6 = vld [vmem:[#allocation93_spill] sm:$0xff] }
 0x48d   : > { %v3171_v57 = vmul.f32 0.6931472, %v5216_v61  ;;  %v3173_v27 = vmul.f32 0.6931472, %v5218_v28  ;;  %v3387_v49 = vunpack.c.h.bf16 %v387_v16  ;;  %5225 = vlog2.f32 %v2860_v63 }
 0x48e   : > { %v3508_v24 = vmul.f32 %v3380_v37, %v3159_v41  ;;  %v3388_v51 = vunpack.c.l.bf16 %v7225_v46  ;;  %5227 = vlog2.f32 %v2949_v40  ;;  %v3389_v1 = vunpack.c.h.bf16 %v7225_v46  ;;  %v5220_v9 = vpop.eup %5219 }
 0x48f   : > { %2061 = vadd.xlane.f32.xlu2 %v8190_v26  ;;  %2065 = vadd.xlane.f32.xlu1 %v8193_v3  ;;  %v3392_v55 = vunpack.c.l.bf16 %v7231_v33  ;;  %5229 = vlog2.f32 %v3038_v2  ;;  %v3390_v8 = vunpack.c.l.bf16 %v7234_v30  ;;  %v3393_v17 = vunpack.c.h.bf16 %v7231_v33 }
 0x490   : > { %v3391_v42 = vunpack.c.h.bf16 %v7234_v30  ;;  %v2952_v48 = vadd.f32 1e-30, %v7095_v0  ;;  %v8197_v26 = vsub.f32 %v6645_v14, %v6657_v29  ;;  %v8198_v56 = vsub.f32 %v6677_v47, %v6689_v32  ;;  %v5222_v61 = vpop.eup %5221  ;;  %v7265_v0 = vld [vmem:[%s5826_s26 + $0xd0] sm:$0xff] }
 0x491   : > { %2057 = vadd.xlane.f32.xlu0 %v8196_v53  ;;  %v3509_v10 = vmul.f32 %v3381_v35, %v3161_v34  ;;  %v3643_v3 = vadd.f32 %v3642_v43, %v3508_v24  ;;  %v3514_v16 = vmul.f32 %v3386_v45, %v3171_v57  ;;  %v3515_v63 = vmul.f32 %v3387_v49, %v3173_v27  ;;  %v8199_v53 = vld [vmem:[#allocation91_spill] sm:$0xff]  ;;  %v7279_v43 = vpop.f32.mrf.mxu0  ;;  %v7281_v57 = vpop.f32.mrf.mxu1 }
 0x492   : > { %v3396_v50 = vunpack.c.l.bf16 %v7238_v36  ;;  %v2774_v25 = vadd.f32 1e-30, %v7115_v39  ;;  %v8201_v28 = vsub.f32 %v8199_v53, %v8200_v6  ;;  %v5224_v14 = vpop.eup %5223  ;;  %v3394_v29 = vunpack.c.l.bf16 %v7244_v21 }
 0x493   : > { %v2863_v47 = vadd.f32 1e-30, %v7117_v7  ;;  %v3395_v32 = vunpack.c.h.bf16 %v7244_v21  ;;  %v3397_v41 = vunpack.c.h.bf16 %v7238_v36  ;;  %v5226_v37 = vpop.eup %5225  ;;  %v3175_v40 = vmul.f32 0.6931472, %v5220_v9  ;;  %v7287_v9 = vld [vmem:[%s5826_s26 + $0xe8] sm:$0xff] }
 0x494   : > { %v3041_v39 = vadd.f32 1e-30, %v7097_v4  ;;  %v3400_v2 = vunpack.c.l.bf16 %v7254_v15  ;;  %v5228_v34 = vpop.eup %5227  ;;  %5231 = vlog2.f32 %v2952_v48  ;;  %v3398_v45 = vunpack.c.l.bf16 %v7265_v0 }
 0x495   : > { %v3399_v7 = vunpack.c.h.bf16 %v7265_v0  ;;  %v7283_v27 = vadd.f32 %v3643_v3, %v3509_v10  ;;  %v5230_v49 = vpop.eup %5229  ;;  %v3177_v24 = vmul.f32 0.6931472, %v5222_v61  ;;  %5233 = vlog2.f32 %v2774_v25  ;;  %v7297_v25 = vld [vmem:[%s5826_s26 + $0xf8] sm:$0xff] }
 0x496   : > { %v2776_v4 = vadd.f32 1e-30, %v7155_v23  ;;  %v3652_v48 = vadd.f32 %v3515_v63, %v3514_v16  ;;  %v3181_v53 = vmul.f32 0.6931472, %v5226_v37  ;;  %5235 = vlog2.f32 %v2863_v47  ;;  %v2872_v63 = vpop.f32.mrf.mxu3  ;;  %v8204_v47 = vld [vmem:[#allocation98_spill] sm:$0xff] }
 0x497   : > { %2067 = vadd.xlane.f32.xlu2 %v8197_v26  ;;  %2071 = vadd.xlane.f32.xlu1 %v8198_v56  ;;  %v7290_v26 = vld [vmem:[%s5826_s26 + $0xe0] sm:$0xff]  ;;  %v3179_v56 = vmul.f32 0.6931472, %v5224_v14  ;;  %v2865_v6 = vadd.f32 1e-30, %v7157_v58  ;;  %5237 = vlog2.f32 %v3041_v39  ;;  %v3404_v61 = vunpack.c.l.bf16 %v7287_v9  ;;  %v8203_v14 = vld [vmem:[#allocation97_spill] sm:$0xff] }
 0x498   : > { %v3183_v35 = vmul.f32 0.6931472, %v5228_v34  ;;  %v2779_v10 = vadd.f32 1e-30, %v7189_v38  ;;  %v3185_v3 = vmul.f32 0.6931472, %v5230_v49  ;;  %v8202_v16 = vsub.f32 %v6693_v54, %v6699_v13  ;;  %v2783_v38 = vpop.f32.mrf.mxu2 }
 0x499   : > { %2063 = vadd.xlane.f32.xlu0 %v8201_v28  ;;  %v3516_v28 = vmul.f32 %v3388_v51, %v3175_v40  ;;  %v2868_v23 = vadd.f32 1e-30, %v7191_v20  ;;  %v3405_v58 = vunpack.c.h.bf16 %v7287_v9  ;;  %5239 = vlog2.f32 %v2776_v4  ;;  %v7314_v34 = vld [vmem:[%s5826_s26 + $0xf0] sm:$0xff] }
 0x49a   : > { %v3402_v51 = vunpack.c.l.bf16 %v7290_v26  ;;  %v8205_v37 = vsub.f32 %v8203_v14, %v8204_v47  ;;  %v3517_v20 = vmul.f32 %v3389_v1, %v3177_v24  ;;  %v5232_v54 = vpop.eup %5231  ;;  %v3518_v13 = vmul.f32 %v3390_v8, %v3179_v56  ;;  %v8206_v47 = vld [vmem:[#allocation110_spill] sm:$0xff] }
 0x49b   : > { %v3653_v40 = vadd.f32 %v3652_v48, %v3516_v28  ;;  %v2954_v39 = vadd.f32 1e-30, %v7136_v60  ;;  %5241 = vlog2.f32 %v2865_v6  ;;  %v5234_v49 = vpop.eup %5233  ;;  %v3043_v4 = vadd.f32 1e-30, %v7138_v19  ;;  %v7329_v28 = vpop.f32.mrf.mxu0 }
 0x49c   : > { %5243 = vlog2.f32 %v2779_v10  ;;  %v3408_v46 = vunpack.c.l.bf16 %v7297_v25  ;;  %v5236_v1 = vpop.eup %5235  ;;  %v3520_v30 = vmul.f32 %v3392_v55, %v3183_v35  ;;  %v2957_v8 = vadd.f32 1e-30, %v7172_v18  ;;  %v7331_v55 = vpop.f32.mrf.mxu1 }
 0x49d   : > { %5245 = vlog2.f32 %v2868_v23  ;;  %v3521_v60 = vmul.f32 %v3393_v17, %v3185_v3  ;;  %v3191_v24 = vmul.f32 0.6931472, %v5232_v54  ;;  %v3406_v48 = vunpack.c.l.bf16 %v7314_v34 }
 0x49e   : > { %v2784_v19 = vadd.f32 1e-30, %v2783_v38  ;;  %v3409_v56 = vunpack.c.h.bf16 %v7297_v25  ;;  %5247 = vlog2.f32 %v2954_v39  ;;  %v2873_v6 = vadd.f32 1e-30, %v2872_v63 }
 0x49f   : > { %2073 = vadd.xlane.f32.xlu2 %v8202_v16  ;;  %3610 = vadd.xlane.f32.xlu1 %v7208_v59  ;;  %v3519_v59 = vmul.f32 %v3391_v42, %v3181_v53  ;;  %v3403_v16 = vunpack.c.h.bf16 %v7290_v26  ;;  %v5238_v42 = vpop.eup %5237  ;;  %v7327_v53 = vld [vmem:[%s5826_s26 + $0x108] sm:$0xff]  ;;  %v7333_v18 = vadd.f32 %v3653_v40, %v3517_v20  ;;  %v3187_v17 = vmul.f32 0.6931472, %v5234_v49 }
 0x4a0   : > { %v5240_v33 = vpop.eup %5239  ;;  %v3189_v10 = vmul.f32 0.6931472, %v5236_v1  ;;  %5249 = vlog2.f32 %v3043_v4  ;;  %v3046_v3 = vadd.f32 1e-30, %v7174_v52  ;;  %v3193_v38 = vmul.f32 0.6931472, %v5238_v42  ;;  %v2874_v42 = vpop.f32.mrf.mxu3 }
 0x4a1   : > { %2069 = vadd.xlane.f32.xlu0 %v8205_v37  ;;  %v3657_v35 = vadd.f32 %v3519_v59, %v3518_v13  ;;  %v5242_v23 = vpop.eup %5241  ;;  %5251 = vlog2.f32 %v2957_v8  ;;  %v2781_v14 = vadd.f32 1e-30, %v7246_v12  ;;  %v3407_v63 = vunpack.c.h.bf16 %v7314_v34  ;;  %v8207_v37 = vld [vmem:[#allocation112_spill] sm:$0xff]  ;;  %v8208_v13 = vld [vmem:[#allocation87_spill] sm:$0xff]  ;;  %v2785_v8 = vpop.f32.mrf.mxu2 }
 0x4a2   : > { %v5244_v20 = vpop.eup %5243  ;;  %v7342_v40 = vmul.f32 %v3396_v50, %v3191_v24  ;;  %v2870_v54 = vadd.f32 1e-30, %v7248_v5  ;;  %v3412_v52 = vunpack.c.l.bf16 %v7327_v53  ;;  %5253 = vlog2.f32 %v2784_v19  ;;  %v7355_v1 = vld [vmem:[%s5826_s26 + $0x100] sm:$0xff] }
 0x4a3   : > { %v5246_v12 = vpop.eup %5245  ;;  %v2959_v59 = vadd.f32 1e-30, %v7220_v11  ;;  %5255 = vlog2.f32 %v2873_v6  ;;  %v3658_v39 = vadd.f32 %v3657_v35, %v3520_v30  ;;  %v3413_v49 = vunpack.c.h.bf16 %v7327_v53 }
 0x4a4   : > { %v3522_v4 = vmul.f32 %v3394_v29, %v3187_v17  ;;  %v3523_v50 = vmul.f32 %v3395_v32, %v3189_v10  ;;  %5257 = vlog2.f32 %v3046_v3  ;;  %v3048_v5 = vadd.f32 1e-30, %v7222_v44  ;;  %v5248_v24 = vpop.eup %5247 }
 0x4a5   : > { %v3195_v19 = vmul.f32 0.6931472, %v5240_v33  ;;  %v3197_v11 = vmul.f32 0.6931472, %v5242_v23  ;;  %5259 = vlog2.f32 %v2781_v14  ;;  %v2962_v30 = vadd.f32 1e-30, %v7279_v43 }
 0x4a6   : > { %v5250_v6 = vpop.eup %5249  ;;  %v3203_v35 = vmul.f32 0.6931472, %v5244_v20  ;;  %v3205_v29 = vmul.f32 0.6931472, %v5246_v12  ;;  %5261 = vlog2.f32 %v2870_v54  ;;  %v3051_v21 = vadd.f32 1e-30, %v7281_v57 }
 0x4a7   : > { %3615 = vadd.xlane.f32.xlu2 %v8206_v47  ;;  %3625 = vadd.xlane.f32.xlu1 %v8207_v37  ;;  %v5252_v32 = vpop.eup %5251  ;;  %5263 = vlog2.f32 %v2959_v59  ;;  %v3410_v44 = vunpack.c.l.bf16 %v7355_v1  ;;  %v7364_v33 = vadd.f32 %v3658_v39, %v3521_v60  ;;  %v7368_v43 = vmul.f32 %v3397_v41, %v3193_v38  ;;  %v7371_v14 = vld [vmem:[%s5826_s26 + $0x118] sm:$0xff]  ;;  %v2455_v47 = vpop.xlane.xlu0 %2454  ;;  %v7388_v59 = vld [vmem:[%s5826_s26 + $0x110] sm:$0xff] }
 0x4a8   : > { %v5254_v3 = vpop.eup %5253  ;;  %v3199_v23 = vmul.f32 0.6931472, %v5248_v24  ;;  %5265 = vlog2.f32 %v3048_v5  ;;  %v2786_v57 = vadd.f32 1e-30, %v2785_v8  ;;  %v3662_v37 = vadd.f32 %v3523_v50, %v3522_v4 }
 0x4a9   : > { %3605 = vadd.xlane.f32.xlu0 %v8208_v13  ;;  %v5256_v20 = vpop.eup %5255  ;;  %v3526_v54 = vmul.f32 %v3398_v45, %v3195_v19  ;;  %v3527_v60 = vmul.f32 %v3399_v7, %v3197_v11  ;;  %5267 = vlog2.f32 %v2962_v30  ;;  %v2875_v36 = vadd.f32 1e-30, %v2874_v42 }
 0x4aa   : > { %v5258_v41 = vpop.eup %5257  ;;  %v3201_v38 = vmul.f32 0.6931472, %v5250_v6  ;;  %v3530_v13 = vmul.f32 %v3402_v51, %v3203_v35  ;;  %v3531_v12 = vmul.f32 %v3403_v16, %v3205_v29  ;;  %5269 = vlog2.f32 %v3051_v21 }
 0x4ab   : > { %v5260_v0 = vpop.eup %5259  ;;  %v3411_v45 = vunpack.c.h.bf16 %v7355_v1  ;;  %v2964_v7 = vadd.f32 1e-30, %v7329_v28  ;;  %5271 = vrcp.f32 %v2455_v47  ;;  %v3207_v39 = vmul.f32 0.6931472, %v5252_v32 }
 0x4ac   : > { %v3219_v4 = vmul.f32 0.6931472, %v5254_v3  ;;  %v3221_v51 = vmul.f32 0.6931472, %v5256_v20  ;;  %5273 = vlog2.f32 %v2786_v57  ;;  %v3667_v1 = vadd.f32 %v3527_v60, %v3526_v54 }
 0x4ad   : > { %v7360_v17 = vpop.f32.mrf.mxu0  ;;  %v7362_v10 = vpop.f32.mrf.mxu1  ;;  %5275 = vlog2.f32 %v2875_v36  ;;  %v3663_v28 = vadd.f32 %v3662_v37, %v7342_v40  ;;  %v3414_v42 = vunpack.c.l.bf16 %v7388_v59  ;;  %v8209_v24 = vunpack.c.h.bf16 %v7254_v15 }
 0x4ae   : > { %v3672_v11 = vadd.f32 %v3531_v12, %v3530_v13  ;;  %v3211_v6 = vmul.f32 0.6931472, %v5260_v0  ;;  %v3053_v29 = vadd.f32 1e-30, %v7331_v55  ;;  %v3532_v32 = vmul.f32 %v3404_v61, %v3207_v39 }
 0x4af   : > { %3630 = vadd.xlane.f32.xlu2 %v7215_v62  ;;  %3640 = vadd.xlane.f32.xlu1 %v7228_v22  ;;  %v3416_v62 = vunpack.c.l.bf16 %v7371_v14  ;;  %v5262_v22 = vpop.eup %5261  ;;  %v3529_v19 = vmul.f32 %v8209_v24, %v3201_v38  ;;  %v3538_v40 = vmul.f32 %v3410_v44, %v3219_v4  ;;  %v3539_v3 = vmul.f32 %v3411_v45, %v3221_v51  ;;  %v8210_v44 = vld [vmem:[#allocation113_spill] sm:$0xff]  ;;  %v8212_v51 = vld [vmem:[#allocation115_spill] sm:$0xff] }
 0x4b0   : > { %v5264_v50 = vpop.eup %5263  ;;  %v3213_v35 = vmul.f32 0.6931472, %v5262_v22  ;;  %v3209_v37 = vmul.f32 0.6931472, %v5258_v41  ;;  %v3415_v15 = vunpack.c.h.bf16 %v7388_v59  ;;  %v7403_v55 = vadd.f32 %v3663_v28, %v7368_v43  ;;  %v8211_v43 = vld [vmem:[#allocation114_spill] sm:$0xff] }
 0x4b1   : > { %3620 = vadd.xlane.f32.xlu0 %v7217_v31  ;;  %v3528_v31 = vmul.f32 %v3400_v2, %v3199_v23  ;;  %v5266_v8 = vpop.eup %5265  ;;  %v3215_v60 = vmul.f32 0.6931472, %v5264_v50  ;;  %v3673_v38 = vadd.f32 %v3672_v11, %v3532_v32  ;;  %v3534_v41 = vmul.f32 %v3406_v48, %v3211_v6 }
 0x4b2   : > { %v2788_v26 = vpop.f32.mrf.mxu2  ;;  %v2877_v16 = vpop.f32.mrf.mxu3  ;;  %v3217_v36 = vmul.f32 0.6931472, %v5266_v8  ;;  %v3682_v39 = vadd.f32 %v3539_v3, %v3538_v40  ;;  %v7429_v3 = vld [vmem:[%s5826_s26 + $0x120] sm:$0xff]  ;;  %v3417_v59 = vunpack.c.h.bf16 %v7371_v14 }
 0x4b3   : > { %v2457_v5 = vpop.xlane.xlu1 %2456  ;;  %v5268_v30 = vpop.eup %5267  ;;  %v2789_v23 = vadd.f32 1e-30, %v2788_v26  ;;  %v3668_v20 = vadd.f32 %v3667_v1, %v3528_v31  ;;  %v2878_v28 = vadd.f32 1e-30, %v2877_v16  ;;  %v405_v16 = vld [vmem:[%s5826_s26 + $0x130] sm:$0xff]  ;;  %v3418_v14 = vunpack.c.l.bf16 %v7429_v3 }
 0x4b4   : > { %5277 = vrcp.f32 %v2457_v5  ;;  %v5270_v21 = vpop.eup %5269  ;;  %v3223_v12 = vmul.f32 0.6931472, %v5268_v30 }
 0x4b5   : > { %5279 = vlog2.f32 %v2964_v7  ;;  %v2968_v2 = vpop.f32.mrf.mxu0  ;;  %v3057_v57 = vpop.f32.mrf.mxu1  ;;  %v3225_v0 = vmul.f32 0.6931472, %v5270_v21  ;;  %v3669_v6 = vadd.f32 %v3668_v20, %v3529_v19  ;;  %v8213_v20 = vld [vmem:[#allocation116_spill] sm:$0xff] }
 0x4b6   : > { %v5272_v47 = vpop.eup %5271  ;;  %v2969_v61 = vadd.f32 1e-30, %v2968_v2  ;;  %5281 = vlog2.f32 %v3053_v29  ;;  %v3058_v50 = vadd.f32 1e-30, %v3057_v57  ;;  %v3540_v8 = vmul.f32 %v3412_v52, %v3223_v12 }
 0x4b7   : > { %3645 = vadd.xlane.f32.xlu2 %v7283_v27  ;;  %3655 = vadd.xlane.f32.xlu1 %v7333_v18  ;;  %v5274_v54 = vpop.eup %5273  ;;  %v3535_v27 = vmul.f32 %v3407_v63, %v3213_v35  ;;  %v2522_v45 = vmul.f32 %v5272_v47, %v8211_v43  ;;  %5283 = vlog2.f32 %v2789_v23  ;;  %v3533_v35 = vmul.f32 %v3405_v58, %v3209_v37  ;;  %v7439_v37 = vld [vmem:[%s5826_s26 + $0x138] sm:$0xff] }
 0x4b8   : > { %v5276_v13 = vpop.eup %5275  ;;  %v3227_v34 = vmul.f32 0.6931472, %v5274_v54  ;;  %5285 = vlog2.f32 %v2969_v61  ;;  %v3536_v2 = vmul.f32 %v3408_v46, %v3215_v60  ;;  %v3683_v21 = vadd.f32 %v3682_v39, %v3540_v8 }
 0x4b9   : > { %3635 = vadd.xlane.f32.xlu0 %v8210_v44  ;;  %v3229_v63 = vmul.f32 0.6931472, %v5276_v13  ;;  %v3677_v11 = vadd.f32 %v3535_v27, %v3534_v41  ;;  %v7423_v52 = vmul.f32 %v3409_v56, %v3217_v36  ;;  %v2967_v58 = vadd.f32 1e-30, %v7360_v17 }
 0x4ba   : > { %v5278_v18 = vpop.eup %5277  ;;  %v2790_v7 = vpop.f32.mrf.mxu2  ;;  %v3542_v19 = vmul.f32 %v3414_v42, %v3227_v34  ;;  %v3674_v25 = vadd.f32 %v3673_v38, %v3533_v35  ;;  %v3541_v56 = vmul.f32 %v3413_v49, %v3225_v0  ;;  %v3056_v47 = vadd.f32 1e-30, %v7362_v10  ;;  %v7451_v34 = vld [vmem:[%s5826_s26 + $0x128] sm:$0xff] }
 0x4bb   : > { %v2879_v22 = vpop.f32.mrf.mxu3  ;;  %v5280_v4 = vpop.eup %5279  ;;  %v2523_v26 = vmul.f32 %v5278_v18, %v8212_v51  ;;  %v2791_v31 = vadd.f32 1e-30, %v2790_v7  ;;  %v3543_v9 = vmul.f32 %v3415_v15, %v3229_v63  ;;  %v3678_v42 = vadd.f32 %v3677_v11, %v3536_v2  ;;  %v407_v11 = vld [vmem:[%s5826_s26 + $0x140] sm:$0xff] }
 0x4bc   : > { %v2880_v5 = vadd.f32 1e-30, %v2879_v22  ;;  %v2459_v48 = vpop.xlane.xlu2 %2458  ;;  %v7412_v1 = vpop.xlane.xlu1 %2011  ;;  %v3231_v30 = vmul.f32 0.6931472, %v5280_v4  ;;  %v3422_v15 = vunpack.c.l.bf16 %v405_v16  ;;  %v3423_v54 = vunpack.c.h.bf16 %v405_v16 }
 0x4bd   : > { %5287 = vlog2.f32 %v2791_v31  ;;  %v2540_v24 = vpack.c.bf16 %v2523_v26, %v2522_v45  ;;  %v5282_v29 = vpop.eup %5281  ;;  %v3684_v36 = vadd.f32 %v3683_v21, %v3541_v56  ;;  %v3687_v10 = vadd.f32 %v3543_v9, %v3542_v19 }
 0x4be   : > { %5289 = vlog2.f32 %v2880_v5  ;;  %v5284_v32 = vpop.eup %5283  ;;  %v2971_v46 = vpop.f32.mrf.mxu0  ;;  %v3544_v17 = vmul.f32 %v3416_v62, %v3231_v30  ;;  %v3233_v57 = vmul.f32 0.6931472, %v5282_v29  ;;  %v3424_v41 = vunpack.c.l.bf16 %v7439_v37 }
 0x4bf   : > { %5291 = vlog2.f32 %v3058_v50  ;;  %2812 = vmatmul.bf16.gmra.mxu2 %v2540_v24  ;;  %2901 = vmatmul.bf16.gmra.mxu3 %v2540_v24  ;;  %v3060_v40 = vpop.f32.mrf.mxu1  ;;  %v5286_v23 = vpop.eup %5285  ;;  %v2972_v53 = vadd.f32 1e-30, %v2971_v46  ;;  %v3419_v22 = vunpack.c.h.bf16 %v7429_v3  ;;  %v3235_v51 = vmul.f32 0.6931472, %v5284_v32 }
 0x4c0   : > { %5293 = vlog2.f32 %v2878_v28  ;;  %2990 = vmatmul.bf16.gmra.mxu0 %v2540_v24  ;;  %3079 = vmatmul.bf16.gmra.mxu1 %v2540_v24  ;;  %v3247_v13 = vmul.f32 0.6931472, %v5286_v23  ;;  %v3061_v4 = vadd.f32 1e-30, %v3060_v40  ;;  %v3425_v5 = vunpack.c.h.bf16 %v7439_v37  ;;  %v8215_v40 = vld [vmem:[#allocation20_spill] sm:$0xff] }
 0x4c1   : > { %3660 = vadd.xlane.f32.xlu2 %v7364_v33  ;;  %3670 = vadd.xlane.f32.xlu1 %v3669_v6  ;;  %5295 = vrcp.f32 %v2459_v48  ;;  %v3545_v30 = vmul.f32 %v3417_v59, %v3233_v57  ;;  %v3679_v6 = vadd.f32 %v3678_v42, %v7423_v52  ;;  %v3688_v21 = vadd.f32 %v3687_v10, %v3544_v17  ;;  %v7466_v42 = vld [vmem:[%s5826_s26 + $0x148] sm:$0xff] }
 0x4c2   : > { %3650 = vadd.xlane.f32.xlu0 %v8213_v20  ;;  %5297 = vlog2.f32 %v2967_v58  ;;  %v3552_v28 = vmul.f32 %v3424_v41, %v3247_v13  ;;  %v3420_v9 = vunpack.c.l.bf16 %v7451_v34  ;;  %v8214_v58 = vld [vmem:[#allocation117_spill] sm:$0xff]  ;;  %v3546_v56 = vmul.f32 %v3418_v14, %v3235_v51 }
 0x4c3   : > { %v5288_v33 = vpop.eup %5287  ;;  %v2793_v12 = vpop.f32.mrf.mxu2  ;;  %v3426_v23 = vunpack.c.l.bf16 %v407_v11  ;;  %v3427_v57 = vunpack.c.h.bf16 %v407_v11  ;;  %v3689_v13 = vadd.f32 %v3688_v21, %v3545_v30 }
 0x4c4   : > { %v7442_v49 = vpop.xlane.xlu2 %2013  ;;  %v2461_v60 = vpop.xlane.xlu0 %2460  ;;  %v3243_v62 = vmul.f32 0.6931472, %v5288_v33  ;;  %v2794_v45 = vadd.f32 1e-30, %v2793_v12 }
 0x4c5   : > { %v5290_v61 = vpop.eup %5289  ;;  %v7445_v44 = vpop.xlane.xlu1 %2017  ;;  %5299 = vrcp.f32 %v2461_v60 }
 0x4c6   : > { %v5292_v38 = vpop.eup %5291  ;;  %v3245_v27 = vmul.f32 0.6931472, %v5290_v61  ;;  %v2882_v18 = vpop.f32.mrf.mxu3  ;;  %5301 = vlog2.f32 %v3056_v47  ;;  %v3550_v43 = vmul.f32 %v3422_v15, %v3243_v62  ;;  %v3428_v62 = vunpack.c.l.bf16 %v7466_v42 }
 0x4c7   : > { %v5294_v0 = vpop.eup %5293  ;;  %v2883_v7 = vadd.f32 1e-30, %v2882_v18  ;;  %5303 = vlog2.f32 %v2972_v53  ;;  %v3249_v26 = vmul.f32 0.6931472, %v5292_v38  ;;  %v2973_v50 = vpop.f32.mrf.mxu0 }
 0x4c8   : > { %v3551_v39 = vmul.f32 %v3423_v54, %v3245_v27  ;;  %5305 = vlog2.f32 %v2794_v45  ;;  %v3062_v31 = vpop.f32.mrf.mxu1  ;;  %v5296_v48 = vpop.eup %5295  ;;  %v3237_v63 = vmul.f32 0.6931472, %v5294_v0  ;;  %v2974_v29 = vadd.f32 1e-30, %v2973_v50  ;;  %v409_v45 = vld [vmem:[%s5826_s26 + $0x150] sm:$0xff] }
 0x4c9   : > { %5307 = vlog2.f32 %v2883_v7  ;;  %3675 = vadd.xlane.f32.xlu2 %v3674_v25  ;;  %3685 = vadd.xlane.f32.xlu1 %v3684_v36  ;;  %v5298_v24 = vpop.eup %5297  ;;  %v2524_v46 = vmul.f32 %v5296_v48, %v8214_v58  ;;  %v3553_v52 = vmul.f32 %v3425_v5, %v3249_v26  ;;  %v3063_v61 = vadd.f32 1e-30, %v3062_v31 }
 0x4ca   : > { %v3697_v8 = vadd.f32 %v3551_v39, %v3550_v43  ;;  %3665 = vadd.xlane.f32.xlu0 %v7403_v55  ;;  %5309 = vlog2.f32 %v3061_v4  ;;  %v3547_v59 = vmul.f32 %v3419_v22, %v3237_v63  ;;  %v3239_v60 = vmul.f32 0.6931472, %v5298_v24  ;;  %v410_v63 = vld [vmem:[%s5826_s26 + $0x158] sm:$0xff] }
 0x4cb   : > { %v5300_v35 = vpop.eup %5299  ;;  %v2795_v47 = vpop.f32.mrf.mxu2  ;;  %5311 = vlog2.f32 %v2974_v29  ;;  %v3421_v7 = vunpack.c.h.bf16 %v7451_v34  ;;  %v3429_v31 = vunpack.c.h.bf16 %v7466_v42 }
 0x4cc   : > { %v7456_v2 = vpop.xlane.xlu2 %2019  ;;  %v7458_v16 = vpop.xlane.xlu0 %2015  ;;  %v3698_v32 = vadd.f32 %v3697_v8, %v3552_v28  ;;  %v2525_v55 = vmul.f32 %v5300_v35, %v8215_v40  ;;  %v2796_v15 = vadd.f32 1e-30, %v2795_v47  ;;  %v3692_v18 = vadd.f32 %v3547_v59, %v3546_v56  ;;  %v411_v47 = vld [vmem:[%s5826_s26 + $0x160] sm:$0xff] }
 0x4cd   : > { %v5302_v19 = vpop.eup %5301  ;;  %v7463_v3 = vpop.xlane.xlu1 %2023  ;;  %v3548_v22 = vmul.f32 %v3420_v9, %v3239_v60  ;;  %v3430_v28 = vunpack.c.l.bf16 %v409_v45  ;;  %v3431_v35 = vunpack.c.h.bf16 %v409_v45 }
 0x4ce   : > { %v5304_v25 = vpop.eup %5303  ;;  %v2884_v17 = vpop.f32.mrf.mxu3  ;;  %v2541_v33 = vpack.c.bf16 %v2525_v55, %v2524_v46  ;;  %v3699_v54 = vadd.f32 %v3698_v32, %v3553_v52  ;;  %5313 = vlog2.f32 %v2796_v15  ;;  %v3241_v0 = vmul.f32 0.6931472, %v5302_v19 }
 0x4cf   : > { %v5306_v37 = vpop.eup %5305  ;;  %v2885_v20 = vadd.f32 1e-30, %v2884_v17  ;;  %v2976_v10 = vpop.f32.mrf.mxu0  ;;  %v3255_v27 = vmul.f32 0.6931472, %v5304_v25  ;;  %v3693_v11 = vadd.f32 %v3692_v18, %v3548_v22  ;;  %v3432_v46 = vunpack.c.l.bf16 %v410_v63 }
 0x4d0   : > { %v5308_v53 = vpop.eup %5307  ;;  %v3251_v36 = vmul.f32 0.6931472, %v5306_v37  ;;  %v3065_v38 = vpop.f32.mrf.mxu1  ;;  %2817 = vmatmul.bf16.gmra.mxu2 %v2541_v33  ;;  %2906 = vmatmul.bf16.gmra.mxu3 %v2541_v33  ;;  %v2977_v39 = vadd.f32 1e-30, %v2976_v10  ;;  %v3549_v21 = vmul.f32 %v3421_v7, %v3241_v0 }
 0x4d1   : > { %v3253_v14 = vmul.f32 0.6931472, %v5308_v53  ;;  %v5310_v41 = vpop.eup %5309  ;;  %5315 = vlog2.f32 %v2885_v20  ;;  %2995 = vmatmul.bf16.gmra.mxu0 %v2541_v33  ;;  %3084 = vmatmul.bf16.gmra.mxu1 %v2541_v33  ;;  %v3556_v48 = vmul.f32 %v3428_v62, %v3255_v27  ;;  %v3066_v9 = vadd.f32 1e-30, %v3065_v38 }
 0x4d2   : > { %v3554_v12 = vmul.f32 %v3426_v23, %v3251_v36  ;;  %3690 = vadd.xlane.f32.xlu2 %v3689_v13  ;;  %3700 = vadd.xlane.f32.xlu1 %v3699_v54  ;;  %5317 = vlog2.f32 %v3063_v61  ;;  %v3257_v26 = vmul.f32 0.6931472, %v5310_v41  ;;  %v5312_v5 = vpop.eup %5311  ;;  %v3694_v23 = vadd.f32 %v3693_v11, %v3549_v21  ;;  %v412_v13 = vld [vmem:[%s5826_s26 + $0x168] sm:$0xff] }
 0x4d3   : > { %v3555_v43 = vmul.f32 %v3427_v57, %v3253_v14  ;;  %3680 = vadd.xlane.f32.xlu0 %v3679_v6  ;;  %v2798_v8 = vpop.f32.mrf.mxu2  ;;  %5319 = vlog2.f32 %v2977_v39  ;;  %v3263_v59 = vmul.f32 0.6931472, %v5312_v5  ;;  %v3433_v53 = vunpack.c.h.bf16 %v410_v63 }
 0x4d4   : > { %v7471_v4 = vpop.xlane.xlu2 %2025  ;;  %v7473_v51 = vpop.xlane.xlu0 %2021  ;;  %v2799_v6 = vadd.f32 1e-30, %v2798_v8  ;;  %v3557_v25 = vmul.f32 %v3429_v31, %v3257_v26  ;;  %v3434_v61 = vunpack.c.l.bf16 %v411_v47  ;;  %v3435_v41 = vunpack.c.h.bf16 %v411_v47  ;;  %v413_v8 = vld [vmem:[%s5826_s26 + $0x170] sm:$0xff] }
 0x4d5   : > { %v7475_v50 = vpop.xlane.xlu1 %2029  ;;  %v3702_v34 = vadd.f32 %v3555_v43, %v3554_v12  ;;  %v5314_v30 = vpop.eup %5313  ;;  %v3560_v36 = vmul.f32 %v3432_v46, %v3263_v59 }
 0x4d6   : > { %v2887_v24 = vpop.f32.mrf.mxu3  ;;  %v3259_v19 = vmul.f32 0.6931472, %v5314_v30  ;;  %5321 = vlog2.f32 %v2799_v6 }
 0x4d7   : > { %v2888_v29 = vadd.f32 1e-30, %v2887_v24  ;;  %v5316_v32 = vpop.eup %5315  ;;  %v3703_v58 = vadd.f32 %v3702_v34, %v3556_v48  ;;  %v2978_v55 = vpop.f32.mrf.mxu0  ;;  %v3436_v48 = vunpack.c.l.bf16 %v412_v13 }
 0x4d8   : > { %v3261_v40 = vmul.f32 0.6931472, %v5316_v32  ;;  %v3067_v52 = vpop.f32.mrf.mxu1  ;;  %v5318_v56 = vpop.eup %5317  ;;  %v3558_v42 = vmul.f32 %v3430_v28, %v3259_v19  ;;  %v2979_v37 = vadd.f32 1e-30, %v2978_v55  ;;  %v3438_v19 = vunpack.c.l.bf16 %v413_v8  ;;  %v414_v55 = vld [vmem:[%s5826_s26 + $0x178] sm:$0xff] }
 0x4d9   : > { %5323 = vlog2.f32 %v2888_v29  ;;  %v3704_v17 = vadd.f32 %v3703_v58, %v3557_v25  ;;  %v3265_v33 = vmul.f32 0.6931472, %v5318_v56  ;;  %v5320_v60 = vpop.eup %5319  ;;  %v3068_v43 = vadd.f32 1e-30, %v3067_v52 }
 0x4da   : > { %v3559_v57 = vmul.f32 %v3431_v35, %v3261_v40  ;;  %5325 = vlog2.f32 %v3066_v9  ;;  %v3271_v5 = vmul.f32 0.6931472, %v5320_v60  ;;  %v3437_v29 = vunpack.c.h.bf16 %v412_v13 }
 0x4db   : > { %3695 = vadd.xlane.f32.xlu0 %v3694_v23  ;;  %3705 = vadd.xlane.f32.xlu2 %v3704_v17  ;;  %v2800_v62 = vpop.f32.mrf.mxu2  ;;  %5327 = vlog2.f32 %v2979_v37  ;;  %v3561_v26 = vmul.f32 %v3433_v53, %v3265_v33  ;;  %v3439_v52 = vunpack.c.h.bf16 %v413_v8 }
 0x4dc   : > { %v7480_v15 = vpop.xlane.xlu2 %2031  ;;  %v7482_v20 = vpop.xlane.xlu0 %2027  ;;  %v3707_v10 = vadd.f32 %v3559_v57, %v3558_v42  ;;  %v2801_v27 = vadd.f32 1e-30, %v2800_v62  ;;  %v3564_v32 = vmul.f32 %v3436_v48, %v3271_v5 }
 0x4dd   : > { %v7484_v54 = vpop.xlane.xlu1 %2035  ;;  %v5322_v38 = vpop.eup %5321 }
 0x4de   : > { %v2889_v14 = vpop.f32.mrf.mxu3  ;;  %v3267_v0 = vmul.f32 0.6931472, %v5322_v38  ;;  %v3708_v45 = vadd.f32 %v3707_v10, %v3560_v36  ;;  %5329 = vlog2.f32 %v2801_v27  ;;  %v3440_v36 = vunpack.c.l.bf16 %v414_v55 }
 0x4df   : > { %v2890_v12 = vadd.f32 1e-30, %v2889_v14  ;;  %v5324_v18 = vpop.eup %5323  ;;  %v2981_v22 = vpop.f32.mrf.mxu0  ;;  %v415_v14 = vld [vmem:[%s5826_s26 + $0x180] sm:$0xff] }
 0x4e0   : > { %v3269_v7 = vmul.f32 0.6931472, %v5324_v18  ;;  %v3070_v39 = vpop.f32.mrf.mxu1  ;;  %v5326_v31 = vpop.eup %5325  ;;  %v3562_v63 = vmul.f32 %v3434_v61, %v3267_v0  ;;  %v3709_v24 = vadd.f32 %v3708_v45, %v3561_v26  ;;  %v2982_v34 = vadd.f32 1e-30, %v2981_v22  ;;  %v416_v45 = vld [vmem:[%s5826_s26 + $0x188] sm:$0xff] }
 0x4e1   : > { %5331 = vlog2.f32 %v2890_v12  ;;  %v3273_v35 = vmul.f32 0.6931472, %v5326_v31  ;;  %v5328_v21 = vpop.eup %5327  ;;  %v3071_v23 = vadd.f32 1e-30, %v3070_v39  ;;  %v3441_v18 = vunpack.c.h.bf16 %v414_v55  ;;  %v417_v55 = vld [vmem:[%s5826_s26 + $0x190] sm:$0xff] }
 0x4e2   : > { %v3563_v28 = vmul.f32 %v3435_v41, %v3269_v7  ;;  %5333 = vlog2.f32 %v3068_v43  ;;  %v3279_v60 = vmul.f32 0.6931472, %v5328_v21  ;;  %v3442_v7 = vunpack.c.l.bf16 %v415_v14 }
 0x4e3   : > { %3710 = vadd.xlane.f32.xlu0 %v3709_v24  ;;  %v2803_v9 = vpop.f32.mrf.mxu2  ;;  %5335 = vlog2.f32 %v2982_v34  ;;  %v3565_v33 = vmul.f32 %v3437_v29, %v3273_v35  ;;  %v3443_v5 = vunpack.c.h.bf16 %v415_v14  ;;  %v3447_v14 = vunpack.c.h.bf16 %v417_v55 }
 0x4e4   : > { %v7488_v11 = vpop.xlane.xlu2 %2037  ;;  %v7490_v30 = vpop.xlane.xlu0 %2033  ;;  %v3712_v46 = vadd.f32 %v3563_v28, %v3562_v63  ;;  %v2804_v25 = vadd.f32 1e-30, %v2803_v9  ;;  %v3568_v43 = vmul.f32 %v3440_v36, %v3279_v60 }
 0x4e5   : > { %v7492_v6 = vpop.xlane.xlu1 %2041  ;;  %v5330_v40 = vpop.eup %5329 }
 0x4e6   : > { %v2892_v58 = vpop.f32.mrf.mxu3  ;;  %v3275_v42 = vmul.f32 0.6931472, %v5330_v40  ;;  %v3713_v57 = vadd.f32 %v3712_v46, %v3564_v32  ;;  %5337 = vlog2.f32 %v2804_v25 }
 0x4e7   : > { %v2893_v56 = vadd.f32 1e-30, %v2892_v58  ;;  %v5332_v59 = vpop.eup %5331  ;;  %v2983_v17 = vpop.f32.mrf.mxu0  ;;  %v3444_v58 = vunpack.c.l.bf16 %v416_v45 }
 0x4e8   : > { %v3277_v47 = vmul.f32 0.6931472, %v5332_v59  ;;  %v3072_v37 = vpop.f32.mrf.mxu1  ;;  %v5334_v53 = vpop.eup %5333  ;;  %v3566_v61 = vmul.f32 %v3438_v19, %v3275_v42  ;;  %v3714_v10 = vadd.f32 %v3713_v57, %v3565_v33  ;;  %v2984_v38 = vadd.f32 1e-30, %v2983_v17 }
 0x4e9   : > { %5339 = vlog2.f32 %v2893_v56  ;;  %v3281_v27 = vmul.f32 0.6931472, %v5334_v53  ;;  %v5336_v0 = vpop.eup %5335  ;;  %v3073_v48 = vadd.f32 1e-30, %v3072_v37  ;;  %v3446_v33 = vunpack.c.l.bf16 %v417_v55 }
 0x4ea   : > { %v3567_v62 = vmul.f32 %v3439_v52, %v3277_v47  ;;  %5341 = vlog2.f32 %v3071_v23  ;;  %3715 = vadd.xlane.f32.xlu1 %v3714_v10  ;;  %v3287_v9 = vmul.f32 0.6931472, %v5336_v0  ;;  %v3445_v47 = vunpack.c.h.bf16 %v416_v45 }
 0x4eb   : > { %v2805_v22 = vpop.f32.mrf.mxu2  ;;  %5343 = vlog2.f32 %v2984_v38  ;;  %v3569_v32 = vmul.f32 %v3441_v18, %v3281_v27 }
 0x4ec   : > { %v7496_v13 = vpop.xlane.xlu2 %2043  ;;  %v7498_v41 = vpop.xlane.xlu0 %2039  ;;  %v3717_v26 = vadd.f32 %v3567_v62, %v3566_v61  ;;  %v2806_v63 = vadd.f32 1e-30, %v2805_v22  ;;  %v3572_v37 = vmul.f32 %v3444_v58, %v3287_v9  ;;  %v418_v62 = vld [vmem:[%s5826_s26 + $0x198] sm:$0xff] }
 0x4ed   : > { %v7500_v12 = vpop.xlane.xlu1 %2047  ;;  %v5338_v31 = vpop.eup %5337 }
 0x4ee   : > { %v2894_v39 = vpop.f32.mrf.mxu3  ;;  %v3283_v24 = vmul.f32 0.6931472, %v5338_v31  ;;  %v3718_v34 = vadd.f32 %v3717_v26, %v3568_v43  ;;  %5345 = vlog2.f32 %v2806_v63  ;;  %v3448_v31 = vunpack.c.l.bf16 %v418_v62  ;;  %v419_v63 = vld [vmem:[%s5826_s26 + $0x1a0] sm:$0xff] }
 0x4ef   : > { %v2895_v28 = vadd.f32 1e-30, %v2894_v39  ;;  %v5340_v8 = vpop.eup %5339  ;;  %v2986_v29 = vpop.f32.mrf.mxu0 }
 0x4f0   : > { %v3285_v35 = vmul.f32 0.6931472, %v5340_v8  ;;  %v3075_v21 = vpop.f32.mrf.mxu1  ;;  %v5342_v19 = vpop.eup %5341  ;;  %v3570_v46 = vmul.f32 %v3442_v7, %v3283_v24  ;;  %v2987_v52 = vadd.f32 1e-30, %v2986_v29  ;;  %v3719_v25 = vadd.f32 %v3718_v34, %v3569_v32 }
 0x4f1   : > { %5347 = vlog2.f32 %v2895_v28  ;;  %v3076_v56 = vadd.f32 1e-30, %v3075_v21  ;;  %v3289_v23 = vmul.f32 0.6931472, %v5342_v19  ;;  %v5344_v17 = vpop.eup %5343  ;;  %v3449_v21 = vunpack.c.h.bf16 %v418_v62 }
 0x4f2   : > { %v3571_v40 = vmul.f32 %v3443_v5, %v3285_v35  ;;  %5349 = vlog2.f32 %v3073_v48  ;;  %3720 = vadd.xlane.f32.xlu2 %v3719_v25  ;;  %v3295_v26 = vmul.f32 0.6931472, %v5344_v17 }
 0x4f3   : > { %v2808_v53 = vpop.f32.mrf.mxu2  ;;  %5351 = vlog2.f32 %v2987_v52  ;;  %v3573_v39 = vmul.f32 %v3445_v47, %v3289_v23  ;;  %v3451_v23 = vunpack.c.h.bf16 %v419_v63 }
 0x4f4   : > { %v7504_v59 = vpop.xlane.xlu2 %2049  ;;  %v7506_v42 = vpop.xlane.xlu0 %2045  ;;  %v3722_v36 = vadd.f32 %v3571_v40, %v3570_v46  ;;  %v2809_v10 = vadd.f32 1e-30, %v2808_v53  ;;  %5353 = vlog2.f32 %v3076_v56  ;;  %v3576_v58 = vmul.f32 %v3448_v31, %v3295_v26  ;;  %v420_v46 = vld [vmem:[%s5826_s26 + $0x1a8] sm:$0xff] }
 0x4f5   : > { %v7508_v57 = vpop.xlane.xlu1 %2053  ;;  %v5346_v61 = vpop.eup %5345  ;;  %v3450_v40 = vunpack.c.l.bf16 %v419_v63 }
 0x4f6   : > { %v2897_v60 = vpop.f32.mrf.mxu3  ;;  %v3291_v18 = vmul.f32 0.6931472, %v5346_v61  ;;  %v3723_v0 = vadd.f32 %v3722_v36, %v3572_v37  ;;  %5355 = vlog2.f32 %v2809_v10  ;;  %v3452_v61 = vunpack.c.l.bf16 %v420_v46 }
 0x4f7   : > { %v2898_v38 = vadd.f32 1e-30, %v2897_v60  ;;  %v5348_v27 = vpop.eup %5347  ;;  %v2988_v45 = vpop.f32.mrf.mxu0 }
 0x4f8   : > { %v5350_v43 = vpop.eup %5349  ;;  %v3293_v7 = vmul.f32 0.6931472, %v5348_v27  ;;  %v3077_v22 = vpop.f32.mrf.mxu1  ;;  %v3574_v5 = vmul.f32 %v3446_v33, %v3291_v18  ;;  %v2989_v28 = vadd.f32 1e-30, %v2988_v45  ;;  %v3724_v8 = vadd.f32 %v3723_v0, %v3573_v39  ;;  %v421_v18 = vld [vmem:[%s5826_s26 + $0x1b0] sm:$0xff] }
 0x4f9   : > { %5357 = vlog2.f32 %v2898_v38  ;;  %v3297_v24 = vmul.f32 0.6931472, %v5350_v43  ;;  %v3078_v34 = vadd.f32 1e-30, %v3077_v22  ;;  %v5352_v32 = vpop.eup %5351  ;;  %v3453_v0 = vunpack.c.h.bf16 %v420_v46 }
 0x4fa   : > { %v3575_v48 = vmul.f32 %v3447_v14, %v3293_v7  ;;  %3725 = vadd.xlane.f32.xlu0 %v3724_v8  ;;  %v5354_v9 = vpop.eup %5353  ;;  %5359 = vlog2.f32 %v2989_v28  ;;  %v3303_v36 = vmul.f32 0.6931472, %v5352_v32  ;;  %v3455_v28 = vunpack.c.h.bf16 %v421_v18 }
 0x4fb   : > { %v2810_v55 = vpop.f32.mrf.mxu2  ;;  %5361 = vlog2.f32 %v3078_v34  ;;  %v3577_v53 = vmul.f32 %v3449_v21, %v3297_v24  ;;  %v3305_v38 = vmul.f32 0.6931472, %v5354_v9 }
 0x4fc   : > { %v7512_v35 = vpop.xlane.xlu2 %2055  ;;  %v7514_v29 = vpop.xlane.xlu0 %2051  ;;  %v3727_v25 = vadd.f32 %v3575_v48, %v3574_v5  ;;  %v2811_v47 = vadd.f32 1e-30, %v2810_v55  ;;  %v3580_v22 = vmul.f32 %v3452_v61, %v3303_v36  ;;  %v422_v5 = vld [vmem:[%s5826_s26 + $0x1b8] sm:$0xff]  ;;  %v3454_v48 = vunpack.c.l.bf16 %v421_v18 }
 0x4fd   : > { %v7516_v19 = vpop.xlane.xlu1 %2059  ;;  %v5356_v56 = vpop.eup %5355  ;;  %v3581_v8 = vmul.f32 %v3453_v0, %v3305_v38  ;;  %v3456_v9 = vunpack.c.l.bf16 %v422_v5  ;;  %v8216_v38 = vld [vmem:[#allocation19_spill] sm:$0xff] }
 0x4fe   : > { %v2899_v52 = vpop.f32.mrf.mxu3  ;;  %v3299_v33 = vmul.f32 0.6931472, %v5356_v56  ;;  %v3728_v60 = vadd.f32 %v3727_v25, %v3576_v58  ;;  %5363 = vlog2.f32 %v2811_v47  ;;  %v3457_v25 = vunpack.c.h.bf16 %v422_v5 }
 0x4ff   : > { %v2900_v17 = vadd.f32 1e-30, %v2899_v52  ;;  %v5358_v37 = vpop.eup %5357  ;;  %vm3795_vm1 = vcmp.eq.s32.totalorder %v8216_v38, 65  ;;  %vm3794_vm3 = vcmp.eq.s32.totalorder %v8216_v38, 64  ;;  %v2077_v5 = vmul.f32 -0.5, %v7458_v16 }
 0x500   : > { %v3301_v62 = vmul.f32 0.6931472, %v5358_v37  ;;  %v3578_v14 = vmul.f32 %v3450_v40, %v3299_v33  ;;  %v3729_v10 = vadd.f32 %v3728_v60, %v3577_v53  ;;  %v5360_v45 = vpop.eup %5359 }
 0x501   : > { %5365 = vlog2.f32 %v2900_v17  ;;  %v5362_v31 = vpop.eup %5361  ;;  %v3311_v32 = vmul.f32 0.6931472, %v5360_v45  ;;  %v8217_v45 = vld [vmem:[#allocation25_spill] sm:$0xff] }
 0x502   : > { %v3579_v27 = vmul.f32 %v3451_v23, %v3301_v62  ;;  %3730 = vadd.xlane.f32.xlu1 %v3729_v10  ;;  %v3313_v55 = vmul.f32 0.6931472, %v5362_v31 }
 0x503   : > { %v3584_v47 = vmul.f32 %v3456_v9, %v3311_v32 }
 0x504   : > { %v7520_v43 = vpop.xlane.xlu2 %2061  ;;  %v7522_v7 = vpop.xlane.xlu0 %2057  ;;  %v3732_v26 = vadd.f32 %v3579_v27, %v3578_v14  ;;  %v3585_v33 = vmul.f32 %v3457_v25, %v3313_v55  ;;  %v2076_v14 = vmul.f32 -0.5, %v7442_v49  ;;  %v2075_v49 = vmul.f32 -0.5, %v7412_v1 }
 0x505   : > { %v7524_v39 = vpop.xlane.xlu1 %2065  ;;  %v5364_v63 = vpop.eup %5363 }
 0x506   : > { %v3733_v24 = vadd.f32 %v3732_v26, %v3580_v22  ;;  %v3307_v21 = vmul.f32 0.6931472, %v5364_v63 }
 0x507   : > { %v5366_v34 = vpop.eup %5365 }
 0x508   : > { %v3309_v58 = vmul.f32 0.6931472, %v5366_v34  ;;  %v3734_v46 = vadd.f32 %v3733_v24, %v3581_v8  ;;  %v3582_v40 = vmul.f32 %v3454_v48, %v3307_v21  ;;  %v2079_v8 = vmul.f32 -0.5, %v7456_v2 }
 0x50a   : > { %v3583_v52 = vmul.f32 %v3455_v28, %v3309_v58  ;;  %3735 = vadd.xlane.f32.xlu2 %v3734_v46  ;;  %v8218_v46 = vld [vmem:[#allocation28_spill] sm:$0xff] }
 0x50c   : > { %v7527_v56 = vpop.xlane.xlu2 %2067  ;;  %v7529_v23 = vpop.xlane.xlu0 %2063  ;;  %v3737_v37 = vadd.f32 %v3583_v52, %v3582_v40  ;;  %v8219_v52 = vld [vmem:[#allocation22_spill] sm:$0xff] }
 0x50d   : > { %v7531_v17 = vpop.xlane.xlu1 %2071 }
 0x50e   : > { %v3738_v53 = vadd.f32 %v3737_v37, %v3584_v47  ;;  %v8220_v47 = vld [vmem:[#allocation34_spill] sm:$0xff] }
 0x510   : > { %v3739_v60 = vadd.f32 %v3738_v53, %v3585_v33 }
 0x512   : > { %3740 = vadd.xlane.f32.xlu0 %v3739_v60  ;;  %v2078_v60 = vmul.f32 -0.5, %v7445_v44 }
 0x514   : > { %v7533_v36 = vpop.xlane.xlu2 %2073  ;;  %v7535_v61 = vpop.xlane.xlu0 %2069 }
 0x515   : > { %v3611_v62 = vpop.xlane.xlu1 %3610 }
 0x516   : > { %v3763_v10 = vsub.f32 0.0, %v3611_v62  ;;  %v2080_v62 = vmul.f32 -0.5, %v7473_v51 }
 0x518   : > { %v3797_v27 = vadd.f32 %v3763_v10, %v2076_v14 }
 0x51a   : > { %v3829_v18 = vsel %vm3795_vm1, %v2076_v14, %v3797_v27 }
 0x51b   : > { %v3861_v0 = vsel %vm3794_vm3, %v3763_v10, %v3829_v18  ;;  %v2082_v18 = vmul.f32 -0.5, %v7471_v4 }
 0x51c   : > { %v3893_v22 = vsel %vm2205_vm2, %v8217_v45, %v3861_v0  ;;  %v3616_v26 = vpop.xlane.xlu2 %3615  ;;  %v3606_v31 = vpop.xlane.xlu0 %3605 }
 0x51d   : > { %3925 = vst [vmem:[%s7551_s3 + $0x8] sm:$0xff] %v3893_v22  ;;  %v3764_v48 = vsub.f32 0.0, %v3616_v26  ;;  %v3626_v63 = vpop.xlane.xlu1 %3625  ;;  %v3762_v28 = vsub.f32 0.0, %v3606_v31 }
 0x51e   : > { %v3766_v24 = vsub.f32 0.0, %v3626_v63 }
 0x51f   : > { %v3798_v34 = vadd.f32 %v3764_v48, %v2077_v5  ;;  %v3796_v21 = vadd.f32 %v3762_v28, %v2075_v49 }
 0x520   : > { %v3800_v32 = vadd.f32 %v3766_v24, %v2079_v8 }
 0x521   : > { %v3830_v1 = vsel %vm3795_vm1, %v2077_v5, %v3798_v34  ;;  %v3828_v16 = vsel %vm3795_vm1, %v2075_v49, %v3796_v21  ;;  %v8221_v5 = vld [vmem:[#allocation37_spill] sm:$0xff] }
 0x522   : > { %v3862_v9 = vsel %vm3794_vm3, %v3764_v48, %v3830_v1  ;;  %v3832_v58 = vsel %vm3795_vm1, %v2079_v8, %v3800_v32  ;;  %v3860_v2 = vsel %vm3794_vm3, %v3762_v28, %v3828_v16  ;;  %v8222_v28 = vld [vmem:[#allocation31_spill] sm:$0xff]  ;;  %v2081_v1 = vmul.f32 -0.5, %v7463_v3 }
 0x523   : > { %v3894_v40 = vsel %vm2205_vm2, %v8218_v46, %v3862_v9  ;;  %v3864_v55 = vsel %vm3794_vm3, %v3766_v24, %v3832_v58  ;;  %v3892_v25 = vsel %vm2205_vm2, %v8219_v52, %v3860_v2  ;;  %v8223_v24 = vld [vmem:[#allocation43_spill] sm:$0xff]  ;;  %v2083_v16 = vmul.f32 -0.5, %v7482_v20 }
 0x524   : > { %3926 = vst [vmem:[%s7551_s3 + $0x10] sm:$0xff] %v3894_v40  ;;  %v3896_v37 = vsel %vm2205_vm2, %v8220_v47, %v3864_v55  ;;  %v3631_v33 = vpop.xlane.xlu2 %3630  ;;  %v3621_v53 = vpop.xlane.xlu0 %3620  ;;  %v2085_v46 = vmul.f32 -0.5, %v7480_v15 }
 0x525   : > { %3928 = vst [vmem:[%s7551_s3 + $0x20] sm:$0xff] %v3896_v37  ;;  %v3767_v14 = vsub.f32 0.0, %v3631_v33  ;;  %v3641_v10 = vpop.xlane.xlu1 %3640  ;;  %v3765_v27 = vsub.f32 0.0, %v3621_v53  ;;  %v8224_v33 = vld [vmem:[#allocation46_spill] sm:$0xff] }
 0x526   : > { %3924 = vst [vmem:[%s7551_s3] sm:$0xff] %v3892_v25  ;;  %v3769_v0 = vsub.f32 0.0, %v3641_v10  ;;  %v8226_v10 = vld [vmem:[#allocation67_spill] sm:$0xff] }
 0x527   : > { %v3801_v45 = vadd.f32 %v3767_v14, %v2080_v62  ;;  %v3799_v22 = vadd.f32 %v3765_v27, %v2078_v60 }
 0x528   : > { %v3803_v26 = vadd.f32 %v3769_v0, %v2082_v18 }
 0x529   : > { %v3833_v31 = vsel %vm3795_vm1, %v2080_v62, %v3801_v45  ;;  %v3831_v44 = vsel %vm3795_vm1, %v2078_v60, %v3799_v22  ;;  %v8225_v62 = vld [vmem:[#allocation40_spill] sm:$0xff]  ;;  %v2088_v45 = vmul.f32 -0.5, %v7488_v11  ;;  %v2086_v22 = vmul.f32 -0.5, %v7490_v30 }
 0x52a   : > { %v3865_v51 = vsel %vm3794_vm3, %v3767_v14, %v3833_v31  ;;  %v3835_v49 = vsel %vm3795_vm1, %v2082_v18, %v3803_v26  ;;  %v3863_v4 = vsel %vm3794_vm3, %v3765_v27, %v3831_v44 }
 0x52b   : > { %v3897_v48 = vsel %vm2205_vm2, %v8221_v5, %v3865_v51  ;;  %v3867_v63 = vsel %vm3794_vm3, %v3769_v0, %v3835_v49  ;;  %v3895_v8 = vsel %vm2205_vm2, %v8222_v28, %v3863_v4  ;;  %v2084_v51 = vmul.f32 -0.5, %v7475_v50 }
 0x52c   : > { %3929 = vst [vmem:[%s7551_s3 + $0x28] sm:$0xff] %v3897_v48  ;;  %v3899_v34 = vsel %vm2205_vm2, %v8223_v24, %v3867_v63  ;;  %v3646_v21 = vpop.xlane.xlu2 %3645  ;;  %v3636_v32 = vpop.xlane.xlu0 %3635 }
 0x52d   : > { %3931 = vst [vmem:[%s7551_s3 + $0x38] sm:$0xff] %v3899_v34  ;;  %v3770_v9 = vsub.f32 0.0, %v3646_v21  ;;  %v3656_v58 = vpop.xlane.xlu1 %3655  ;;  %v3768_v2 = vsub.f32 0.0, %v3636_v32  ;;  %v8228_v34 = vld [vmem:[#allocation76_spill] sm:$0xff] }
 0x52e   : > { %3927 = vst [vmem:[%s7551_s3 + $0x18] sm:$0xff] %v3895_v8  ;;  %v3772_v40 = vsub.f32 0.0, %v3656_v58  ;;  %v8227_v8 = vld [vmem:[#allocation70_spill] sm:$0xff] }
 0x52f   : > { %v3804_v55 = vadd.f32 %v3770_v9, %v2083_v16  ;;  %v3802_v52 = vadd.f32 %v3768_v2, %v2081_v1 }
 0x530   : > { %v3806_v25 = vadd.f32 %v3772_v40, %v2085_v46 }
 0x531   : > { %v3836_v47 = vsel %vm3795_vm1, %v2083_v16, %v3804_v55  ;;  %v3834_v3 = vsel %vm3795_vm1, %v2081_v1, %v3802_v52  ;;  %v8229_v1 = vld [vmem:[#allocation64_spill] sm:$0xff] }
 0x532   : > { %v3868_v20 = vsel %vm3794_vm3, %v3770_v9, %v3836_v47  ;;  %v3838_v37 = vsel %vm3795_vm1, %v2085_v46, %v3806_v25  ;;  %v3866_v15 = vsel %vm3794_vm3, %v3768_v2, %v3834_v3  ;;  %v2091_v2 = vmul.f32 -0.5, %v7496_v13 }
 0x533   : > { %v3900_v53 = vsel %vm2205_vm2, %v8224_v33, %v3868_v20  ;;  %v3870_v60 = vsel %vm3794_vm3, %v3772_v40, %v3838_v37  ;;  %v3898_v14 = vsel %vm2205_vm2, %v8225_v62, %v3866_v15  ;;  %v2089_v46 = vmul.f32 -0.5, %v7498_v41 }
 0x534   : > { %3932 = vst [vmem:[%s7551_s3 + $0x40] sm:$0xff] %v3900_v53  ;;  %v3902_v27 = vsel %vm2205_vm2, %v8226_v10, %v3870_v60  ;;  %v3661_v18 = vpop.xlane.xlu2 %3660  ;;  %v2087_v47 = vmul.f32 -0.5, %v7484_v54 }
 0x535   : > { %3934 = vst [vmem:[%s7551_s3 + $0x50] sm:$0xff] %v3902_v27  ;;  %v3671_v0 = vpop.xlane.xlu1 %3670  ;;  %v3773_v26 = vsub.f32 0.0, %v3661_v18  ;;  %v3651_v44 = vpop.xlane.xlu0 %3650  ;;  %v8230_v18 = vld [vmem:[#allocation79_spill] sm:$0xff] }
 0x536   : > { %3930 = vst [vmem:[%s7551_s3 + $0x30] sm:$0xff] %v3898_v14  ;;  %v3775_v31 = vsub.f32 0.0, %v3671_v0  ;;  %v3771_v49 = vsub.f32 0.0, %v3651_v44  ;;  %v8232_v44 = vld [vmem:[#allocation73_spill] sm:$0xff] }
 0x537   : > { %v3807_v4 = vadd.f32 %v3773_v26, %v2086_v22 }
 0x538   : > { %v3809_v5 = vadd.f32 %v3775_v31, %v2088_v45  ;;  %v3805_v48 = vadd.f32 %v3771_v49, %v2084_v51 }
 0x539   : > { %v3839_v63 = vsel %vm3795_vm1, %v2086_v22, %v3807_v4  ;;  %v2094_v4 = vmul.f32 -0.5, %v7504_v59 }
 0x53a   : > { %v3841_v11 = vsel %vm3795_vm1, %v2088_v45, %v3809_v5  ;;  %v3871_v30 = vsel %vm3794_vm3, %v3773_v26, %v3839_v63  ;;  %v3837_v50 = vsel %vm3795_vm1, %v2084_v51, %v3805_v48  ;;  %v8231_v45 = vld [vmem:[#allocation85_spill] sm:$0xff]  ;;  %v7688_v5 = vld [vmem:[%s5826_s26 + $0x1c8] sm:$0xff] }
 0x53b   : > { %v3873_v28 = vsel %vm3794_vm3, %v3775_v31, %v3841_v11  ;;  %v3903_v24 = vsel %vm2205_vm2, %v8227_v8, %v3871_v30  ;;  %v3869_v32 = vsel %vm3794_vm3, %v3771_v49, %v3837_v50  ;;  %v2092_v30 = vmul.f32 -0.5, %v7506_v42 }
 0x53c   : > { %v3905_v21 = vsel %vm2205_vm2, %v8228_v34, %v3873_v28  ;;  %3935 = vst [vmem:[%s7551_s3 + $0x58] sm:$0xff] %v3903_v24  ;;  %v3901_v16 = vsel %vm2205_vm2, %v8229_v1, %v3869_v32  ;;  %v3676_v9 = vpop.xlane.xlu2 %3675  ;;  %v423_v28 = vld [vmem:[%s5826_s26 + $0x1c0] sm:$0xff] }
 0x53d   : > { %v3686_v58 = vpop.xlane.xlu1 %3685  ;;  %3937 = vst [vmem:[%s7551_s3 + $0x68] sm:$0xff] %v3905_v21  ;;  %v3776_v40 = vsub.f32 0.0, %v3676_v9  ;;  %v3666_v52 = vpop.xlane.xlu0 %3665  ;;  %v2090_v21 = vmul.f32 -0.5, %v7492_v6  ;;  %v3460_v9 = vunpack.c.l.bf16 %v7688_v5  ;;  %v3458_v42 = vunpack.c.l.bf16 %v423_v28 }
 0x53e   : > { %v3778_v55 = vsub.f32 0.0, %v3686_v58  ;;  %v2991_v25 = vpop.f32.mrf.mxu0  ;;  %3933 = vst [vmem:[%s7551_s3 + $0x48] sm:$0xff] %v3901_v16  ;;  %v3774_v3 = vsub.f32 0.0, %v3666_v52  ;;  %v3080_v37 = vpop.f32.mrf.mxu1  ;;  %v2093_v16 = vmul.f32 -0.5, %v7500_v12 }
 0x53f   : > { %v2992_v20 = vadd.f32 1e-30, %v2991_v25  ;;  %v3810_v15 = vadd.f32 %v3776_v40, %v2089_v46  ;;  %v3081_v60 = vadd.f32 1e-30, %v3080_v37 }
 0x540   : > { %v3812_v33 = vadd.f32 %v3778_v55, %v2091_v2  ;;  %v3808_v53 = vadd.f32 %v3774_v3, %v2087_v47 }
 0x541   : > { %5367 = vlog2.f32 %v2992_v20  ;;  %v3842_v13 = vsel %vm3795_vm1, %v2089_v46, %v3810_v15 }
 0x542   : > { %v3844_v41 = vsel %vm3795_vm1, %v2091_v2, %v3812_v33  ;;  %v3874_v54 = vsel %vm3794_vm3, %v3776_v40, %v3842_v13  ;;  %v3840_v14 = vsel %vm3795_vm1, %v2087_v47, %v3808_v53  ;;  %v2813_v10 = vpop.f32.mrf.mxu2  ;;  %v2902_v27 = vpop.f32.mrf.mxu3  ;;  %5369 = vlog2.f32 %v3081_v60 }
 0x543   : > { %v3876_v62 = vsel %vm3794_vm3, %v3778_v55, %v3844_v41  ;;  %v3906_v0 = vsel %vm2205_vm2, %v8230_v18, %v3874_v54  ;;  %v3872_v26 = vsel %vm3794_vm3, %v3774_v3, %v3840_v14  ;;  %v2814_v31 = vadd.f32 1e-30, %v2813_v10  ;;  %v8233_v41 = vld [vmem:[#allocation89_spill] sm:$0xff]  ;;  %v8235_v18 = vld [vmem:[#allocation82_spill] sm:$0xff] }
 0x544   : > { %v3908_v22 = vsel %vm2205_vm2, %v8231_v45, %v3876_v62  ;;  %3938 = vst [vmem:[%s7551_s3 + $0x70] sm:$0xff] %v3906_v0  ;;  %v3904_v51 = vsel %vm2205_vm2, %v8232_v44, %v3872_v26  ;;  %v2903_v49 = vadd.f32 1e-30, %v2902_v27  ;;  %v3459_v40 = vunpack.c.h.bf16 %v423_v28  ;;  %v8234_v62 = vld [vmem:[#allocation99_spill] sm:$0xff]  ;;  %v7719_v45 = vld [vmem:[%s5826_s26 + $0x1d8] sm:$0xff]  ;;  %v425_v44 = vld [vmem:[%s5826_s26 + $0x1d0] sm:$0xff] }
 0x545   : > { %3940 = vst [vmem:[%s7551_s3 + $0x80] sm:$0xff] %v3908_v22  ;;  %5371 = vlog2.f32 %v2814_v31  ;;  %v3691_v48 = vpop.xlane.xlu2 %3690  ;;  %v3701_v63 = vpop.xlane.xlu1 %3700 }
 0x546   : > { %3936 = vst [vmem:[%s7551_s3 + $0x60] sm:$0xff] %v3904_v51  ;;  %5373 = vlog2.f32 %v2903_v49  ;;  %v3779_v50 = vsub.f32 0.0, %v3691_v48  ;;  %v3781_v8 = vsub.f32 0.0, %v3701_v63  ;;  %v3681_v24 = vpop.xlane.xlu0 %3680  ;;  %v2993_v34 = vpop.f32.mrf.mxu0 }
 0x547   : > { %v5368_v11 = vpop.eup %5367  ;;  %v3777_v32 = vsub.f32 0.0, %v3681_v24  ;;  %v2994_v59 = vadd.f32 1e-30, %v2993_v34  ;;  %v3082_v1 = vpop.f32.mrf.mxu1  ;;  %v3464_v24 = vunpack.c.l.bf16 %v7719_v45 }
 0x548   : > { %v3813_v58 = vadd.f32 %v3779_v50, %v2092_v30  ;;  %v3815_v2 = vadd.f32 %v3781_v8, %v2094_v4  ;;  %v3319_v46 = vmul.f32 0.6931472, %v5368_v11  ;;  %v5370_v52 = vpop.eup %5369  ;;  %v3083_v47 = vadd.f32 1e-30, %v3082_v1 }
 0x549   : > { %v3811_v55 = vadd.f32 %v3777_v32, %v2090_v21  ;;  %5375 = vlog2.f32 %v2994_v59  ;;  %v3321_v26 = vmul.f32 0.6931472, %v5370_v52  ;;  %v3462_v59 = vunpack.c.l.bf16 %v425_v44 }
 0x54a   : > { %v3845_v25 = vsel %vm3795_vm1, %v2092_v30, %v3813_v58  ;;  %v3847_v6 = vsel %vm3795_vm1, %v2094_v4, %v3815_v2  ;;  %v2815_v12 = vpop.f32.mrf.mxu2  ;;  %v2904_v3 = vpop.f32.mrf.mxu3  ;;  %v3461_v4 = vunpack.c.h.bf16 %v7688_v5  ;;  %v3463_v2 = vunpack.c.h.bf16 %v425_v44 }
 0x54b   : > { %v5372_v20 = vpop.eup %5371  ;;  %v3877_v37 = vsel %vm3794_vm3, %v3779_v50, %v3845_v25  ;;  %v3879_v15 = vsel %vm3794_vm3, %v3781_v8, %v3847_v6  ;;  %v3843_v33 = vsel %vm3795_vm1, %v2090_v21, %v3811_v55  ;;  %v2816_v53 = vadd.f32 1e-30, %v2815_v12 }
 0x54c   : > { %v5374_v60 = vpop.eup %5373  ;;  %v3315_v13 = vmul.f32 0.6931472, %v5372_v20  ;;  %v3909_v54 = vsel %vm2205_vm2, %v8233_v41, %v3877_v37  ;;  %v3911_v14 = vsel %vm2205_vm2, %v8234_v62, %v3879_v15  ;;  %v3875_v10 = vsel %vm3794_vm3, %v3777_v32, %v3843_v33  ;;  %v8236_v37 = vld [vmem:[#allocation92_spill] sm:$0xff] }
 0x54d   : > { %v3317_v27 = vmul.f32 0.6931472, %v5374_v60  ;;  %3941 = vst [vmem:[%s7551_s3 + $0x88] sm:$0xff] %v3909_v54  ;;  %v3907_v0 = vsel %vm2205_vm2, %v8235_v18, %v3875_v10  ;;  %5377 = vlog2.f32 %v2816_v53  ;;  %v2905_v22 = vadd.f32 1e-30, %v2904_v3  ;;  %v8237_v41 = vld [vmem:[#allocation100_spill] sm:$0xff] }
 0x54e   : > { %v3586_v31 = vmul.f32 %v3458_v42, %v3315_v13  ;;  %3943 = vst [vmem:[%s7551_s3 + $0x98] sm:$0xff] %v3911_v14  ;;  %5379 = vlog2.f32 %v3083_v47  ;;  %v3696_v51 = vpop.xlane.xlu0 %3695  ;;  %v2996_v49 = vpop.f32.mrf.mxu0  ;;  %v2095_v8 = vmul.f32 -0.5, %v7514_v29  ;;  %v3588_v32 = vmul.f32 %v3460_v9, %v3319_v46  ;;  %v428_v10 = vld [vmem:[%s5826_s26 + $0x1e8] sm:$0xff] }
 0x54f   : > { %v3587_v48 = vmul.f32 %v3459_v40, %v3317_v27  ;;  %3939 = vst [vmem:[%s7551_s3 + $0x78] sm:$0xff] %v3907_v0  ;;  %5381 = vlog2.f32 %v2905_v22  ;;  %v3706_v63 = vpop.xlane.xlu2 %3705  ;;  %v3780_v11 = vsub.f32 0.0, %v3696_v51  ;;  %v2997_v30 = vadd.f32 1e-30, %v2996_v49  ;;  %v3085_v28 = vpop.f32.mrf.mxu1  ;;  %v427_v51 = vld [vmem:[%s5826_s26 + $0x1e0] sm:$0xff] }
 0x550   : > { %v5376_v50 = vpop.eup %5375  ;;  %v3782_v34 = vsub.f32 0.0, %v3706_v63  ;;  %v3086_v21 = vadd.f32 1e-30, %v3085_v28  ;;  %v3589_v42 = vmul.f32 %v3461_v4, %v3321_v26  ;;  %v3465_v22 = vunpack.c.h.bf16 %v7719_v45 }
 0x551   : > { %v3814_v1 = vadd.f32 %v3780_v11, %v2093_v16  ;;  %v3742_v58 = vadd.f32 %v3587_v48, %v3586_v31  ;;  %5383 = vlog2.f32 %v2997_v30  ;;  %v3327_v55 = vmul.f32 0.6931472, %v5376_v50 }
 0x552   : > { %v3816_v5 = vadd.f32 %v3782_v34, %v2095_v8  ;;  %5385 = vlog2.f32 %v3086_v21  ;;  %v2096_v31 = vmul.f32 -0.5, %v7508_v57  ;;  %v3466_v50 = vunpack.c.l.bf16 %v427_v51 }
 0x553   : > { %v5378_v40 = vpop.eup %5377  ;;  %v3846_v52 = vsel %vm3795_vm1, %v2093_v16, %v3814_v1  ;;  %v2818_v25 = vpop.f32.mrf.mxu2  ;;  %v3743_v6 = vadd.f32 %v3742_v58, %v3588_v32  ;;  %v3592_v63 = vmul.f32 %v3464_v24, %v3327_v55  ;;  %v8238_v55 = vld [vmem:[#allocation101_spill] sm:$0xff] }
 0x554   : > { %v2907_v29 = vpop.f32.mrf.mxu3  ;;  %v5380_v47 = vpop.eup %5379  ;;  %v3323_v12 = vmul.f32 0.6931472, %v5378_v40  ;;  %v3848_v9 = vsel %vm3795_vm1, %v2095_v8, %v3816_v5  ;;  %v3878_v46 = vsel %vm3794_vm3, %v3780_v11, %v3846_v52  ;;  %v2819_v3 = vadd.f32 1e-30, %v2818_v25 }
 0x555   : > { %v5382_v20 = vpop.eup %5381  ;;  %v3880_v16 = vsel %vm3794_vm3, %v3782_v34, %v3848_v9  ;;  %v3910_v15 = vsel %vm2205_vm2, %v8236_v37, %v3878_v46  ;;  %v2908_v33 = vadd.f32 1e-30, %v2907_v29  ;;  %v3744_v53 = vadd.f32 %v3743_v6, %v3589_v42  ;;  %v429_v46 = vld [vmem:[%s5826_s26 + $0x1f0] sm:$0xff] }
 0x556   : > { %v3590_v60 = vmul.f32 %v3462_v59, %v3323_v12  ;;  %v3325_v13 = vmul.f32 0.6931472, %v5382_v20  ;;  %v3912_v54 = vsel %vm2205_vm2, %v8237_v41, %v3880_v16  ;;  %3942 = vst [vmem:[%s7551_s3 + $0x90] sm:$0xff] %v3910_v15  ;;  %5387 = vlog2.f32 %v2819_v3  ;;  %v2998_v62 = vpop.f32.mrf.mxu0  ;;  %v3711_v27 = vpop.xlane.xlu0 %3710  ;;  %v430_v15 = vld [vmem:[%s5826_s26 + $0x1f8] sm:$0xff] }
 0x557   : > { %v3329_v14 = vmul.f32 0.6931472, %v5380_v47  ;;  %3944 = vst [vmem:[%s7551_s3 + $0xa0] sm:$0xff] %v3912_v54  ;;  %5389 = vlog2.f32 %v2908_v33  ;;  %v2999_v18 = vadd.f32 1e-30, %v2998_v62  ;;  %v3087_v0 = vpop.f32.mrf.mxu1  ;;  %3745 = vadd.xlane.f32.xlu1 %v3744_v53  ;;  %v5384_v26 = vpop.eup %5383  ;;  %v3783_v49 = vsub.f32 0.0, %v3711_v27 }
 0x558   : > { %v3591_v44 = vmul.f32 %v3463_v2, %v3325_v13  ;;  %v5386_v4 = vpop.eup %5385  ;;  %v3088_v48 = vadd.f32 1e-30, %v3087_v0  ;;  %v3468_v11 = vunpack.c.l.bf16 %v428_v10  ;;  %v3467_v8 = vunpack.c.h.bf16 %v427_v51 }
 0x559   : > { %v3817_v30 = vadd.f32 %v3783_v49, %v2096_v31  ;;  %5391 = vlog2.f32 %v2999_v18  ;;  %v3593_v32 = vmul.f32 %v3465_v22, %v3329_v14  ;;  %v3335_v24 = vmul.f32 0.6931472, %v5384_v26 }
 0x55a   : > { %v3747_v28 = vadd.f32 %v3591_v44, %v3590_v60  ;;  %5393 = vlog2.f32 %v3088_v48  ;;  %v2097_v29 = vmul.f32 -0.5, %v7512_v35  ;;  %v3337_v12 = vmul.f32 0.6931472, %v5386_v4 }
 0x55b   : > { %v2820_v34 = vpop.f32.mrf.mxu2  ;;  %v3849_v57 = vsel %vm3795_vm1, %v2096_v31, %v3817_v30  ;;  %v3469_v20 = vunpack.c.h.bf16 %v428_v10  ;;  %v3596_v37 = vmul.f32 %v3468_v11, %v3335_v24  ;;  %v3470_v13 = vunpack.c.l.bf16 %v429_v46  ;;  %v8239_v31 = vld [vmem:[#allocation102_spill] sm:$0xff] }
 0x55c   : > { %v2909_v21 = vpop.f32.mrf.mxu3  ;;  %v5388_v59 = vpop.eup %5387  ;;  %v2821_v45 = vadd.f32 1e-30, %v2820_v34  ;;  %v3748_v58 = vadd.f32 %v3747_v28, %v3592_v63  ;;  %v3881_v42 = vsel %vm3794_vm3, %v3783_v49, %v3849_v57  ;;  %v3471_v35 = vunpack.c.h.bf16 %v429_v46  ;;  %v8240_v57 = vld [vmem:[#allocation103_spill] sm:$0xff] }
 0x55d   : > { %v2910_v1 = vadd.f32 1e-30, %v2909_v21  ;;  %v5390_v2 = vpop.eup %5389  ;;  %v3331_v5 = vmul.f32 0.6931472, %v5388_v59  ;;  %v3913_v52 = vsel %vm2205_vm2, %v8238_v55, %v3881_v42  ;;  %v3716_v47 = vpop.xlane.xlu1 %3715  ;;  %v3597_v62 = vmul.f32 %v3469_v20, %v3337_v12  ;;  %v8241_v55 = vld [vmem:[#allocation104_spill] sm:$0xff] }
 0x55e   : > { %v3333_v40 = vmul.f32 0.6931472, %v5390_v2  ;;  %5395 = vlog2.f32 %v2821_v45  ;;  %v3749_v25 = vadd.f32 %v3748_v58, %v3593_v32  ;;  %3945 = vst [vmem:[%s7551_s3 + $0xa8] sm:$0xff] %v3913_v52  ;;  %v3784_v3 = vsub.f32 0.0, %v3716_v47 }
 0x55f   : > { %v3594_v6 = vmul.f32 %v3466_v50, %v3331_v5  ;;  %5397 = vlog2.f32 %v2910_v1  ;;  %v5392_v16 = vpop.eup %5391  ;;  %v3472_v18 = vunpack.c.l.bf16 %v430_v15  ;;  %v2098_v49 = vmul.f32 -0.5, %v7522_v7 }
 0x560   : > { %v3595_v9 = vmul.f32 %v3467_v8, %v3333_v40  ;;  %3750 = vadd.xlane.f32.xlu2 %v3749_v25  ;;  %v3818_v33 = vadd.f32 %v3784_v3, %v2097_v29  ;;  %v5394_v60 = vpop.eup %5393  ;;  %v3343_v22 = vmul.f32 0.6931472, %v5392_v16  ;;  %v3473_v28 = vunpack.c.h.bf16 %v430_v15 }
 0x561   : > { %v3345_v63 = vmul.f32 0.6931472, %v5394_v60  ;;  %v2099_v2 = vmul.f32 -0.5, %v7516_v19  ;;  %v2101_v20 = vmul.f32 -0.5, %v7529_v23 }
 0x562   : > { %v3752_v53 = vadd.f32 %v3595_v9, %v3594_v6  ;;  %v3850_v54 = vsel %vm3795_vm1, %v2097_v29, %v3818_v33  ;;  %v3600_v50 = vmul.f32 %v3472_v18, %v3343_v22  ;;  %v2100_v29 = vmul.f32 -0.5, %v7520_v43  ;;  %v8242_v9 = vld [vmem:[#allocation105_spill] sm:$0xff]  ;;  %v8243_v33 = vld [vmem:[#allocation106_spill] sm:$0xff] }
 0x563   : > { %v3882_v10 = vsel %vm3794_vm3, %v3784_v3, %v3850_v54  ;;  %v3601_v32 = vmul.f32 %v3473_v28, %v3345_v63  ;;  %v2103_v18 = vmul.f32 -0.5, %v7527_v56  ;;  %v8246_v63 = vld [vmem:[#allocation96_spill] sm:$0xff]  ;;  %v2105_v28 = vmul.f32 -0.5, %v7531_v17 }
 0x564   : > { %v5396_v41 = vpop.eup %5395  ;;  %v3753_v14 = vadd.f32 %v3752_v53, %v3596_v37  ;;  %v3914_v44 = vsel %vm2205_vm2, %v8239_v31, %v3882_v10 }
 0x565   : > { %v5398_v27 = vpop.eup %5397  ;;  %v3339_v0 = vmul.f32 0.6931472, %v5396_v41  ;;  %3946 = vst [vmem:[%s7551_s3 + $0xb0] sm:$0xff] %v3914_v44  ;;  %v3721_v48 = vpop.xlane.xlu2 %3720 }
 0x566   : > { %v3341_v26 = vmul.f32 0.6931472, %v5398_v27  ;;  %v3754_v51 = vadd.f32 %v3753_v14, %v3597_v62  ;;  %v3785_v30 = vsub.f32 0.0, %v3721_v48  ;;  %v8244_v62 = vld [vmem:[#allocation107_spill] sm:$0xff] }
 0x567   : > { %v3598_v4 = vmul.f32 %v3470_v13, %v3339_v0  ;;  %v2102_v13 = vmul.f32 -0.5, %v7524_v39 }
 0x568   : > { %v3599_v11 = vmul.f32 %v3471_v35, %v3341_v26  ;;  %3755 = vadd.xlane.f32.xlu0 %v3754_v51  ;;  %v3819_v8 = vadd.f32 %v3785_v30, %v2098_v49  ;;  %v8245_v26 = vld [vmem:[#allocation108_spill] sm:$0xff]  ;;  %v2104_v51 = vmul.f32 -0.5, %v7535_v61 }
 0x56a   : > { %v3757_v34 = vadd.f32 %v3599_v11, %v3598_v4  ;;  %v3851_v21 = vsel %vm3795_vm1, %v2098_v49, %v3819_v8 }
 0x56b   : > { %v3883_v7 = vsel %vm3794_vm3, %v3785_v30, %v3851_v21  ;;  %v8247_v21 = vld [vmem:[#allocation109_spill] sm:$0xff] }
 0x56c   : > { %v3758_v59 = vadd.f32 %v3757_v34, %v3600_v50  ;;  %v3915_v45 = vsel %vm2205_vm2, %v8240_v57, %v3883_v7 }
 0x56d   : > { %3947 = vst [vmem:[%s7551_s3 + $0xb8] sm:$0xff] %v3915_v45  ;;  %v3726_v58 = vpop.xlane.xlu0 %3725 }
 0x56e   : > { %v3759_v1 = vadd.f32 %v3758_v59, %v3601_v32  ;;  %v3786_v24 = vsub.f32 0.0, %v3726_v58  ;;  %v2106_v59 = vmul.f32 -0.5, %v7533_v36  ;;  %v8248_v58 = vld [vmem:[#allocation111_spill] sm:$0xff] }
 0x570   : > { %3760 = vadd.xlane.f32.xlu1 %v3759_v1  ;;  %v3820_v5 = vadd.f32 %v3786_v24, %v2099_v2 }
 0x572   : > { %v3852_v42 = vsel %vm3795_vm1, %v2099_v2, %v3820_v5 }
 0x573   : > { %v3884_v40 = vsel %vm3794_vm3, %v3786_v24, %v3852_v42 }
 0x574   : > { %v3916_v52 = vsel %vm2205_vm2, %v8241_v55, %v3884_v40 }
 0x575   : > { %v3731_v25 = vpop.xlane.xlu1 %3730  ;;  %3948 = vst [vmem:[%s7551_s3 + $0xc0] sm:$0xff] %v3916_v52 }
 0x576   : > { %v3787_v19 = vsub.f32 0.0, %v3731_v25 }
 0x578   : > { %v3821_v6 = vadd.f32 %v3787_v19, %v2100_v29 }
 0x57a   : > { %v3853_v47 = vsel %vm3795_vm1, %v2100_v29, %v3821_v6 }
 0x57b   : > { %v3885_v12 = vsel %vm3794_vm3, %v3787_v19, %v3853_v47 }
 0x57c   : > { %v3917_v46 = vsel %vm2205_vm2, %v8242_v9, %v3885_v12 }
 0x57d   : > { %v3736_v3 = vpop.xlane.xlu2 %3735  ;;  %3949 = vst [vmem:[%s7551_s3 + $0xc8] sm:$0xff] %v3917_v46 }
 0x57e   : > { %v3788_v16 = vsub.f32 0.0, %v3736_v3 }
 0x580   : > { %v3822_v43 = vadd.f32 %v3788_v16, %v2101_v20 }
 0x582   : > { %v3854_v37 = vsel %vm3795_vm1, %v2101_v20, %v3822_v43 }
 0x583   : > { %v3886_v15 = vsel %vm3794_vm3, %v3788_v16, %v3854_v37 }
 0x584   : > { %v3918_v53 = vsel %vm2205_vm2, %v8243_v33, %v3886_v15 }
 0x585   : > { %3950 = vst [vmem:[%s7551_s3 + $0xd0] sm:$0xff] %v3918_v53  ;;  %v3741_v60 = vpop.xlane.xlu0 %3740 }
 0x586   : > { %v3789_v41 = vsub.f32 0.0, %v3741_v60 }
 0x588   : > { %v3823_v23 = vadd.f32 %v3789_v41, %v2102_v13 }
 0x58a   : > { %v3855_v35 = vsel %vm3795_vm1, %v2102_v13, %v3823_v23 }
 0x58b   : > { %v3887_v54 = vsel %vm3794_vm3, %v3789_v41, %v3855_v35 }
 0x58c   : > { %v3919_v14 = vsel %vm2205_vm2, %v8244_v62, %v3887_v54 }
 0x58d   : > { %3951 = vst [vmem:[%s7551_s3 + $0xd8] sm:$0xff] %v3919_v14 }
 0x5ca   : > { %v3746_v27 = vpop.xlane.xlu1 %3745 }
 0x5cb   : > { %v3790_v0 = vsub.f32 0.0, %v3746_v27 }
 0x5cd   : > { %v3824_v10 = vadd.f32 %v3790_v0, %v2103_v18 }
 0x5cf   : > { %v3856_v39 = vsel %vm3795_vm1, %v2103_v18, %v3824_v10 }
 0x5d0   : > { %v3888_v22 = vsel %vm3794_vm3, %v3790_v0, %v3856_v39 }
 0x5d1   : > { %v3920_v31 = vsel %vm2205_vm2, %v8245_v26, %v3888_v22 }
 0x5d2   : > { %3952 = vst [vmem:[%s7551_s3 + $0xe0] sm:$0xff] %v3920_v31 }
 0x5d3   : > { %v3751_v44 = vpop.xlane.xlu2 %3750 }
 0x5d4   : > { %v3791_v49 = vsub.f32 0.0, %v3751_v44 }
 0x5d6   : > { %v3825_v56 = vadd.f32 %v3791_v49, %v2104_v51 }
 0x5d8   : > { %v3857_v4 = vsel %vm3795_vm1, %v2104_v51, %v3825_v56 }
 0x5d9   : > { %v3889_v48 = vsel %vm3794_vm3, %v3791_v49, %v3857_v4 }
 0x5da   : > { %v3921_v11 = vsel %vm2205_vm2, %v8246_v63, %v3889_v48 }
 0x5db   : > { %3953 = vst [vmem:[%s7551_s3 + $0xe8] sm:$0xff] %v3921_v11  ;;  %v3756_v30 = vpop.xlane.xlu0 %3755 }
 0x5dc   : > { %v3792_v50 = vsub.f32 0.0, %v3756_v30 }
 0x5de   : > { %v3826_v61 = vadd.f32 %v3792_v50, %v2105_v28 }
 0x5e0   : > { %v3858_v8 = vsel %vm3795_vm1, %v2105_v28, %v3826_v61 }
 0x5e1   : > { %v3890_v34 = vsel %vm3794_vm3, %v3792_v50, %v3858_v8 }
 0x5e2   : > { %v3922_v32 = vsel %vm2205_vm2, %v8247_v21, %v3890_v34 }
 0x5e3   : > { %3954 = vst [vmem:[%s7551_s3 + $0xf0] sm:$0xff] %v3922_v32  ;;  %v3761_v17 = vpop.xlane.xlu1 %3760 }
 0x5e4   : > { %v3793_v7 = vsub.f32 0.0, %v3761_v17 }
 0x5e6   : > { %v3827_v57 = vadd.f32 %v3793_v7, %v2106_v59 }
 0x5e8   : > { %v3859_v45 = vsel %vm3795_vm1, %v2106_v59, %v3827_v57 }
 0x5e9   : > { %v3891_v1 = vsel %vm3794_vm3, %v3793_v7, %v3859_v45 }
 0x5ea   : > { %v3923_v2 = vsel %vm2205_vm2, %v8248_v58, %v3891_v1 }
 0x5eb   : > { %3955 = vst [vmem:[%s7551_s3 + $0xf8] sm:$0xff] %v3923_v2 }
 0x5ec   : > { %5576 = shalt.err (!%p5573_p9)
}
 0x5ed   : > { %s5638_s20 = smov 128   ;;  %s5639_s19 = smov 8  }
 0x5ee   : > { %4877 = dma.vmem_to_hbm [thread:$0]  (%p5764_p7), %s3970_s25, 4096, %s3972_s10, %s3957_s16, %s5638_s20, %s5638_s20, %s5639_s19  }
 0x5ef PF: > { %s3986_s18 = sand.u32 1, %s5615_s21   ;;  %p8249_p12 = scmp.ge.s32.totalorder %s5627_s24, 2 }
 0x5f0   : > { %s3987_s30 = scalar_lea.sflag [#allocation4], %s3986_s18 }
 0x5f1   : > { %p4897_p13 = pnand %p8249_p12, %p5710_p6 }
 0x5f3   : > { %p4898_p0 = pneg %p4897_p13 }
 0x5f5   : > { %5610 = dma.done.wait (%p4898_p0), %s3987_s30, 4096  }
 0x5f6   : > { %5612 = vsyncadd (%p4898_p0), %s3987_s30, 4294963200  ;;  %s8250_s27 = sld [smem:[#allocation17_spill]]  ;;  %p23_p3 = scmp.ge.s32.totalorder %s5750_s13, 4  }
 0x5f7   : > { %s8251_s23 = sld [smem:[#allocation18_spill]]  ;;  %s8252_s21 = smov %s5619_s22 }
 0x5f8   : > { %s8254_s24 = smov %s5750_s13  ;;  %25 = sbr.rel (!%p23_p3) target bundleno = 12 (0xc), region = 114 }
 0x5fc   : > { %s8253_s22 = smov %s8250_s27 }
 0x5fd   :  { %3993 = vsyncpa [#allocation3], 1 }
 0x5fe   :  { %3995 = vsyncpa [#allocation3 + $0x1], 1 }
 0x5ff   :  { %3996 = vsyncpa [#allocation6], 1 }
 0x600   :  { %3998 = vsyncpa [#allocation6 + $0x1], 1 }
 0x601   :  { %3999 = vsyncpa [#allocation9], 1 }
 0x602   :  { %4000 = vsyncpa [#allocation4], 1 }
 0x603   :  { %4002 = vsyncpa [#allocation4 + $0x1], 1 }

</bundles_post_ra>
